<compile_context>
chip_gen: v7x
topology: tpu7x:2x2x1
jax: 0.10.0
libtpu: 0.0.40
codegen_flags: <defaults>
</compile_context>

<pallas_src>
import functools

import jax
import jax.numpy as jnp
import numpy as np
from jax.experimental import pallas as pl
from jax.experimental.pallas import tpu as pltpu

LANE = 128    # lane width / MXU alignment (last dim)
SUBLANE = 8   # sublane alignment (second-to-last dim)


def _round_up(x, m):
    return (x + m - 1) // m * m


def _pad2(a, rows, cols, dtype):
    out = jnp.zeros((rows, cols), dtype)
    return out.at[: a.shape[0], : a.shape[1]].set(a.astype(dtype))


def _num_tensorcores():
    """TensorCores per JAX device (2 on v7x / megacore parts, else 1)."""
    try:
        d = jax.devices()[0]
        for attr in ("num_cores", "core_count"):
            v = getattr(d, attr, None)
            if isinstance(v, int) and v > 0:
                return max(1, min(v, 2))
    except Exception:
        pass
    return 1


def mlp_kernel(x_ref, w1_ref, b1_ref, w2_ref, b2_ref, w3_ref, b3_ref, o_ref):
    """Fused 3-layer MLP for one batch tile.

    Matmul inputs run on the MXU in the weights' dtype (bf16 by default);
    accumulation, bias add and ReLU stay in f32 on the VPU (works on v5e too,
    which lacks a bf16 VPU path).
    """
    # hidden1 + ReLU
    h1 = jnp.dot(x_ref[...], w1_ref[...], preferred_element_type=jnp.float32)
    h1 = jnp.maximum(h1 + b1_ref[...], 0.0)
    # hidden2 + ReLU
    h2 = jnp.dot(h1.astype(w2_ref.dtype), w2_ref[...],
                 preferred_element_type=jnp.float32)
    h2 = jnp.maximum(h2 + b2_ref[...], 0.0)
    # output layer (no activation); output block is 128-lane dense
    o = jnp.dot(h2.astype(w3_ref.dtype), w3_ref[...],
                preferred_element_type=jnp.float32)
    o_ref[...] = o + b3_ref[...]


def prepare_params(params, matmul_dtype=jnp.bfloat16):
    """Pad feature dims to multiples of 128 and cast weights to the MXU dtype.

    Call ONCE and reuse the result across inference calls: this hoists ~6 MiB
    of per-call pad/cast HBM traffic (≈2x the kernel's own footprint) out of
    the hot path.  Weights are stored (in, out) so the kernel computes
    y = x @ W + b directly.  Use matmul_dtype=jnp.float32 for full f32 parity
    with the PyTorch reference (≈3x MXU cost).
    """
    F = _round_up(params["w1"].shape[0], LANE)
    H1 = _round_up(params["w1"].shape[1], LANE)
    H2 = _round_up(params["w2"].shape[1], LANE)
    O = _round_up(params["w3"].shape[1], LANE)
    return {
        "w1": _pad2(params["w1"], F, H1, matmul_dtype),
        "b1": _pad2(params["b1"], 1, H1, jnp.float32),
        "w2": _pad2(params["w2"], H1, H2, matmul_dtype),
        "b2": _pad2(params["b2"], 1, H2, jnp.float32),
        "w3": _pad2(params["w3"], H2, O, matmul_dtype),
        "b3": _pad2(params["b3"], 1, O, jnp.float32),
    }


def net2_forward(x, padded, *, n_output, num_batch_tiles=None, max_tile_rows=1024):
    """x: (B, n_feature) f32.  padded: output of prepare_params()."""
    B, n_feature = x.shape
    F, H1 = padded["w1"].shape
    H2 = padded["w2"].shape[1]
    O = padded["w3"].shape[1]
    matmul_dtype = padded["w1"].dtype

    # Grid: exactly one batch tile per TensorCore (1 on v5e/v6e, 2 on v7x),
    # unless the batch is so large that tiles would exceed max_tile_rows.
    if num_batch_tiles is None:
        num_batch_tiles = _num_tensorcores()
    num_batch_tiles = max(1, min(int(num_batch_tiles), pl.cdiv(B, SUBLANE)))

    # Batch tiles only need sublane (8) alignment, not 128: 451 -> 456, not 512.
    tile_b = _round_up(pl.cdiv(B, num_batch_tiles), SUBLANE)
    tile_b = min(tile_b, _round_up(max_tile_rows, SUBLANE))
    Bp = _round_up(B, tile_b)
    grid = (Bp // tile_b,)

    # Only x is padded/cast per call (it changes every call); weights were
    # prepared once in prepare_params().
    xp = _pad2(x, Bp, F, matmul_dtype)

    # x / out are tiled over the batch grid; weights & biases use a constant
    # index_map so they stay resident in VMEM across all grid steps.
    in_specs = [
        pl.BlockSpec((tile_b, F), lambda i: (i, 0)),  # x tile
        pl.BlockSpec((F, H1), lambda i: (0, 0)),      # w1 (resident)
        pl.BlockSpec((1, H1), lambda i: (0, 0)),      # b1 (resident)
        pl.BlockSpec((H1, H2), lambda i: (0, 0)),     # w2 (resident)
        pl.BlockSpec((1, H2), lambda i: (0, 0)),      # b2 (resident)
        pl.BlockSpec((H2, O), lambda i: (0, 0)),      # w3 (resident)
        pl.BlockSpec((1, O), lambda i: (0, 0)),       # b3 (resident)
    ]
    out_specs = pl.BlockSpec((tile_b, O), lambda i: (i, 0))

    bpe = jnp.dtype(matmul_dtype).itemsize
    cost = pl.CostEstimate(
        flops=2 * Bp * (F * H1 + H1 * H2 + H2 * O),
        transcendentals=0,
        bytes_accessed=(Bp * F * bpe
                        + (F * H1 + H1 * H2 + H2 * O) * bpe
                        + (H1 + H2 + O) * 4
                        + Bp * O * 4),
    )

    out = pl.pallas_call(
        mlp_kernel,
        out_shape=jax.ShapeDtypeStruct((Bp, O), jnp.float32),
        grid=grid,
        in_specs=in_specs,
        out_specs=out_specs,
        compiler_params=pltpu.CompilerParams(
            # batch tiles are independent -> megacore-shard on v7x
            dimension_semantics=("parallel",),
            # few-MiB footprint; explicit limit keeps headroom on v7x's 64 MiB
            vmem_limit_bytes=32 * 1024 * 1024,
        ),
        cost_estimate=cost,
    )(xp, padded["w1"], padded["b1"], padded["w2"], padded["b2"],
      padded["w3"], padded["b3"])

    return out[:B, :n_output]


def init_params(key, n_feature, h1, h2, n_output):
    """PyTorch-style init U(-1/sqrt(fan_in), 1/sqrt(fan_in)); weights as (in, out)."""
    def linear(k, fan_in, fan_out):
        kw, kb = jax.random.split(k)
        bound = 1.0 / np.sqrt(fan_in)
        w = jax.random.uniform(kw, (fan_in, fan_out), jnp.float32, -bound, bound)
        b = jax.random.uniform(kb, (1, fan_out), jnp.float32, -bound, bound)
        return w, b

    k1, k2, k3 = jax.random.split(key, 3)
    w1, b1 = linear(k1, n_feature, h1)
    w2, b2 = linear(k2, h1, h2)
    w3, b3 = linear(k3, h2, n_output)
    return {"w1": w1, "b1": b1, "w2": w2, "b2": b2, "w3": w3, "b3": b3}


if __name__ == "__main__":
    # Module-consistent shapes: Net2(n_feature=729) -> 1000 -> 200 -> 2,
    # batch = 451 rows (clean451.csv), exercising the ragged-batch (pad to 456)
    # path.
    B, N_FEATURE, N_H1, N_H2, N_OUTPUT = 451, 729, 1000, 200, 2

    key = jax.random.PRNGKey(0)
    kx, kp = jax.random.split(key)
    x = jax.random.normal(kx, (B, N_FEATURE), jnp.float32)
    params = init_params(kp, N_FEATURE, N_H1, N_H2, N_OUTPUT)

    # Pad + cast weights ONCE, outside the per-call jit path.
    padded = prepare_params(params)

    fwd = jax.jit(functools.partial(net2_forward, n_output=N_OUTPUT))
    out = jax.block_until_ready(fwd(x, padded))
    assert out.shape == (B, N_OUTPUT)

    # Reference 1: same mixed precision (bf16 MXU inputs, f32 accumulation).
    def ref_mixed(x, p, dt=jnp.bfloat16):
        h1 = jnp.maximum(
            jnp.dot(x.astype(dt), p["w1"].astype(dt),
                    preferred_element_type=jnp.float32) + p["b1"], 0.0)
        h2 = jnp.maximum(
            jnp.dot(h1.astype(dt), p["w2"].astype(dt),
                    preferred_element_type=jnp.float32) + p["b2"], 0.0)
        return jnp.dot(h2.astype(dt), p["w3"].astype(dt),
                       preferred_element_type=jnp.float32) + p["b3"]

    # Reference 2: full-f32 forward (the original PyTorch semantics).
    def ref_f32(x, p):
        h1 = jnp.maximum(x @ p["w1"] + p["b1"], 0.0)
        h2 = jnp.maximum(h1 @ p["w2"] + p["b2"], 0.0)
        return h2 @ p["w3"] + p["b3"]

    np.testing.assert_allclose(np.asarray(out), np.asarray(ref_mixed(x, params)),
                               rtol=2e-3, atol=2e-3)
    np.testing.assert_allclose(np.asarray(out), np.asarray(ref_f32(x, params)),
                               rtol=1.5e-1, atol=1.5e-1)
    print("KERNEL_OK")
</pallas_src>

<mosaic_0001>
module attributes {stable_mosaic.version = 11 : i64} {
  func.func @mlp_kernel(%arg0: i32, %arg1: memref<456x768xbf16, #tpu.memory_space<vmem>>, %arg2: memref<768x1024xbf16, #tpu.memory_space<vmem>>, %arg3: memref<1x1024xf32, #tpu.memory_space<vmem>>, %arg4: memref<1024x256xbf16, #tpu.memory_space<vmem>>, %arg5: memref<1x256xf32, #tpu.memory_space<vmem>>, %arg6: memref<256x128xbf16, #tpu.memory_space<vmem>>, %arg7: memref<1x128xf32, #tpu.memory_space<vmem>>, %arg8: memref<456x128xf32, #tpu.memory_space<vmem>>) attributes {dimension_semantics = [#tpu.dimension_semantics<parallel>], iteration_bounds = array<i64: 1>, scalar_prefetch = 0 : i64, scratch_operands = 0 : i64, tpu.core_type = #tpu.core_type<tc>, window_params = [{transform_indices = @transform_0, window_bounds = array<i64: 456, 768>}, {pipeline_mode = #tpu.pipeline_mode<synchronous>, transform_indices = @transform_1, window_bounds = array<i64: 768, 1024>}, {pipeline_mode = #tpu.pipeline_mode<synchronous>, transform_indices = @transform_2, window_bounds = array<i64: 1, 1024>}, {pipeline_mode = #tpu.pipeline_mode<synchronous>, transform_indices = @transform_3, window_bounds = array<i64: 1024, 256>}, {pipeline_mode = #tpu.pipeline_mode<synchronous>, transform_indices = @transform_4, window_bounds = array<i64: 1, 256>}, {pipeline_mode = #tpu.pipeline_mode<synchronous>, transform_indices = @transform_5, window_bounds = array<i64: 256, 128>}, {pipeline_mode = #tpu.pipeline_mode<synchronous>, transform_indices = @transform_6, window_bounds = array<i64: 1, 128>}, {transform_indices = @transform_7, window_bounds = array<i64: 456, 128>}]} {
    %c0 = arith.constant 0 : index
    %c0_0 = arith.constant 0 : index
    %0 = vector.load %arg1[%c0, %c0_0] : memref<456x768xbf16, #tpu.memory_space<vmem>>, vector<456x768xbf16>
    %c0_1 = arith.constant 0 : index
    %c0_2 = arith.constant 0 : index
    %1 = vector.load %arg2[%c0_1, %c0_2] : memref<768x1024xbf16, #tpu.memory_space<vmem>>, vector<768x1024xbf16>
    %cst = arith.constant dense<0.000000e+00> : vector<456x1024xf32>
    %2 = tpu.matmul %0, %1, %cst {dimension_numbers = #tpu.dot_dimension_numbers<[1], [0], [0], [1], [0, 0, 1, 1], [], []>} : vector<456x768xbf16>, vector<768x1024xbf16>, vector<456x1024xf32> -> vector<456x1024xf32>
    %c0_3 = arith.constant 0 : index
    %c0_4 = arith.constant 0 : index
    %3 = vector.load %arg3[%c0_3, %c0_4] : memref<1x1024xf32, #tpu.memory_space<vmem>>, vector<1x1024xf32>
    %4 = vector.broadcast %3 : vector<1x1024xf32> to vector<456x1024xf32>
    %5 = arith.addf %2, %4 : vector<456x1024xf32>
    %cst_5 = arith.constant 0.000000e+00 : f32
    %6 = vector.broadcast %cst_5 : f32 to vector<456x1024xf32>
    %7 = arith.maximumf %5, %6 : vector<456x1024xf32>
    %8 = arith.truncf %7 : vector<456x1024xf32> to vector<456x1024xbf16>
    %c0_6 = arith.constant 0 : index
    %c0_7 = arith.constant 0 : index
    %9 = vector.load %arg4[%c0_6, %c0_7] : memref<1024x256xbf16, #tpu.memory_space<vmem>>, vector<1024x256xbf16>
    %cst_8 = arith.constant dense<0.000000e+00> : vector<456x256xf32>
    %10 = tpu.matmul %8, %9, %cst_8 {dimension_numbers = #tpu.dot_dimension_numbers<[1], [0], [0], [1], [0, 0, 1, 1], [], []>} : vector<456x1024xbf16>, vector<1024x256xbf16>, vector<456x256xf32> -> vector<456x256xf32>
    %c0_9 = arith.constant 0 : index
    %c0_10 = arith.constant 0 : index
    %11 = vector.load %arg5[%c0_9, %c0_10] : memref<1x256xf32, #tpu.memory_space<vmem>>, vector<1x256xf32>
    %12 = vector.broadcast %11 : vector<1x256xf32> to vector<456x256xf32>
    %13 = arith.addf %10, %12 : vector<456x256xf32>
    %cst_11 = arith.constant 0.000000e+00 : f32
    %14 = vector.broadcast %cst_11 : f32 to vector<456x256xf32>
    %15 = arith.maximumf %13, %14 : vector<456x256xf32>
    %16 = arith.truncf %15 : vector<456x256xf32> to vector<456x256xbf16>
    %c0_12 = arith.constant 0 : index
    %c0_13 = arith.constant 0 : index
    %17 = vector.load %arg6[%c0_12, %c0_13] : memref<256x128xbf16, #tpu.memory_space<vmem>>, vector<256x128xbf16>
    %cst_14 = arith.constant dense<0.000000e+00> : vector<456x128xf32>
    %18 = tpu.matmul %16, %17, %cst_14 {dimension_numbers = #tpu.dot_dimension_numbers<[1], [0], [0], [1], [0, 0, 1, 1], [], []>} : vector<456x256xbf16>, vector<256x128xbf16>, vector<456x128xf32> -> vector<456x128xf32>
    %c0_15 = arith.constant 0 : index
    %c0_16 = arith.constant 0 : index
    %19 = vector.load %arg7[%c0_15, %c0_16] : memref<1x128xf32, #tpu.memory_space<vmem>>, vector<1x128xf32>
    %20 = vector.broadcast %19 : vector<1x128xf32> to vector<456x128xf32>
    %21 = arith.addf %18, %20 : vector<456x128xf32>
    %c0_17 = arith.constant 0 : index
    %c0_18 = arith.constant 0 : index
    %22 = vector.load %arg8[%c0_17, %c0_18] : memref<456x128xf32, #tpu.memory_space<vmem>>, vector<456x128xf32>
    tpu.vector_store %arg8[%c0_17, %c0_18], %21 {strides = array<i32>} : memref<456x128xf32, #tpu.memory_space<vmem>>, vector<456x128xf32>,
    return
  }
  func.func @transform_0(%arg0: i32) -> (i32, i32) {
    %c0_i32 = arith.constant 0 : i32
    %c0_i32_0 = arith.constant 0 : i32
    return %arg0, %c0_i32 : i32, i32
  }
  func.func @transform_1(%arg0: i32) -> (i32, i32) {
    %c0_i32 = arith.constant 0 : i32
    %c0_i32_0 = arith.constant 0 : i32
    %c0_i32_1 = arith.constant 0 : i32
    return %c0_i32, %c0_i32_0 : i32, i32
  }
  func.func @transform_2(%arg0: i32) -> (i32, i32) {
    %c0_i32 = arith.constant 0 : i32
    %c0_i32_0 = arith.constant 0 : i32
    %c0_i32_1 = arith.constant 0 : i32
    return %c0_i32, %c0_i32_0 : i32, i32
  }
  func.func @transform_3(%arg0: i32) -> (i32, i32) {
    %c0_i32 = arith.constant 0 : i32
    %c0_i32_0 = arith.constant 0 : i32
    %c0_i32_1 = arith.constant 0 : i32
    return %c0_i32, %c0_i32_0 : i32, i32
  }
  func.func @transform_4(%arg0: i32) -> (i32, i32) {
    %c0_i32 = arith.constant 0 : i32
    %c0_i32_0 = arith.constant 0 : i32
    %c0_i32_1 = arith.constant 0 : i32
    return %c0_i32, %c0_i32_0 : i32, i32
  }
  func.func @transform_5(%arg0: i32) -> (i32, i32) {
    %c0_i32 = arith.constant 0 : i32
    %c0_i32_0 = arith.constant 0 : i32
    %c0_i32_1 = arith.constant 0 : i32
    return %c0_i32, %c0_i32_0 : i32, i32
  }
  func.func @transform_6(%arg0: i32) -> (i32, i32) {
    %c0_i32 = arith.constant 0 : i32
    %c0_i32_0 = arith.constant 0 : i32
    %c0_i32_1 = arith.constant 0 : i32
    return %c0_i32, %c0_i32_0 : i32, i32
  }
  func.func @transform_7(%arg0: i32) -> (i32, i32) {
    %c0_i32 = arith.constant 0 : i32
    %c0_i32_0 = arith.constant 0 : i32
    return %arg0, %c0_i32 : i32, i32
  }
}

</mosaic_0001>

<bundles_post_ra>
// kernel: net2_forward.1
= control target key start
LH: loop header
LB: loop body
LE: loop exit
PB: predicated region body
PF: predicated region fallthrough
CT: control target
= control target key end

     0   :  { %s19059_s1 = inlined_call_operand.vmem [shape: bf16[768,1024], index: 1, kind: input, shape index: {}]   ;;  %s19060_s0 = inlined_call_operand.vmem [shape: bf16[456,768], index: 0, kind: input, shape index: {}]   ;;  %s19061_s2 = inlined_call_operand.vmem [shape: f32[1,1024], index: 2, kind: input, shape index: {}]   ;;  %s19062_s3 = inlined_call_operand.vmem [shape: bf16[1024,256], index: 3, kind: input, shape index: {}]   ;;  %s19063_s5 = inlined_call_operand.vmem [shape: bf16[256,128], index: 5, kind: input, shape index: {}]   ;;  %s19064_s4 = inlined_call_operand.vmem [shape: f32[1,256], index: 4, kind: input, shape index: {}]   ;;  %s19065_s6 = inlined_call_operand.vmem [shape: f32[1,128], index: 6, kind: input, shape index: {}]   ;;  %s19066_s7 = inlined_call_operand.vmem [shape: f32[456,128], index: 7, kind: output, shape index: {}]  }
   0x1   :  { %v198_v0 = vld [vmem:[%s19059_s1] sm:$0xff] }
   0x2   :  { %v202_v1 = vld [vmem:[%s19059_s1 + $0x20] sm:$0xff] }
   0x3   :  { %v326_v2 = vld [vmem:[%s19059_s1 + $0x400] sm:$0xff]  ;;  %v10816_v3 = vcombine.high %v198_v0, %v202_v1  ;;  %v10815_v5 = vcombine.low %v198_v0, %v202_v1 }
   0x4   :  { %v330_v4 = vld [vmem:[%s19059_s1 + $0x420] sm:$0xff] }
   0x5   :  { %v206_v6 = vld [vmem:[%s19059_s1 + $0x40] sm:$0xff]  ;;  %v14084_v8 = vcombine.high %v326_v2, %v330_v4  ;;  %v14086_v9 = vcombine.low %v326_v2, %v330_v4  ;;  %3405 = vmatprep.subr.bf16.mxu1 %v10816_v3 }
   0x6   :  { %v210_v7 = vld [vmem:[%s19059_s1 + $0x60] sm:$0xff]  ;;  %3406 = vmatpush1.bf16.msra.mxu1 %v10815_v5 }
   0x7   :  { %v10824_v10 = vcombine.high %v206_v6, %v210_v7  ;;  %v334_v11 = vld [vmem:[%s19059_s1 + $0x440] sm:$0xff]  ;;  %3726 = vmatprep.subr.bf16.mxu0 %v14084_v8  ;;  %v10823_v18 = vcombine.low %v206_v6, %v210_v7 }
   0x8   :  { %v338_v12 = vld [vmem:[%s19059_s1 + $0x460] sm:$0xff]  ;;  %3727 = vmatpush1.bf16.msra.mxu0 %v14086_v9 }
   0x9   :  { %v214_v13 = vld [vmem:[%s19059_s1 + $0x80] sm:$0xff]  ;;  %v14097_v14 = vcombine.high %v334_v11, %v338_v12  ;;  %3407 = vmatprep.subr.bf16.mxu1 %v10824_v10  ;;  %v14110_v19 = vcombine.low %v334_v11, %v338_v12 }
   0xa   :  { %v218_v15 = vld [vmem:[%s19059_s1 + $0xa0] sm:$0xff]  ;;  %3408 = vmatpush1.bf16.msra.mxu1 %v10823_v18 }
   0xb   :  { %v342_v16 = vld [vmem:[%s19059_s1 + $0x480] sm:$0xff]  ;;  %v10832_v20 = vcombine.high %v214_v13, %v218_v15  ;;  %3728 = vmatprep.subr.bf16.mxu0 %v14097_v14  ;;  %v10831_v26 = vcombine.low %v214_v13, %v218_v15 }
   0xc   :  { %v346_v17 = vld [vmem:[%s19059_s1 + $0x4a0] sm:$0xff]  ;;  %3729 = vmatpush1.bf16.msra.mxu0 %v14110_v19 }
   0xd   :  { %v14113_v21 = vcombine.high %v342_v16, %v346_v17  ;;  %v222_v22 = vld [vmem:[%s19059_s1 + $0xc0] sm:$0xff]  ;;  %3409 = vmatprep.subr.bf16.mxu1 %v10832_v20  ;;  %v14128_v27 = vcombine.low %v342_v16, %v346_v17 }
   0xe   :  { %v226_v23 = vld [vmem:[%s19059_s1 + $0xe0] sm:$0xff]  ;;  %3410 = vmatpush1.bf16.msra.mxu1 %v10831_v26 }
   0xf   :  { %v350_v24 = vld [vmem:[%s19059_s1 + $0x4c0] sm:$0xff]  ;;  %v10840_v28 = vcombine.high %v222_v22, %v226_v23  ;;  %3730 = vmatprep.subr.bf16.mxu0 %v14113_v21  ;;  %v10839_v34 = vcombine.low %v222_v22, %v226_v23 }
  0x10   :  { %v354_v25 = vld [vmem:[%s19059_s1 + $0x4e0] sm:$0xff]  ;;  %3731 = vmatpush1.bf16.msra.mxu0 %v14128_v27 }
  0x11   :  { %v14131_v29 = vcombine.high %v350_v24, %v354_v25  ;;  %v230_v30 = vld [vmem:[%s19059_s1 + $0x100] sm:$0xff]  ;;  %3411 = vmatprep.subr.bf16.mxu1 %v10840_v28  ;;  %v14146_v35 = vcombine.low %v350_v24, %v354_v25 }
  0x12   :  { %v234_v31 = vld [vmem:[%s19059_s1 + $0x120] sm:$0xff]  ;;  %3412 = vmatpush1.bf16.msra.mxu1 %v10839_v34 }
  0x13   :  { %v358_v32 = vld [vmem:[%s19059_s1 + $0x500] sm:$0xff]  ;;  %v10848_v36 = vcombine.high %v230_v30, %v234_v31  ;;  %3732 = vmatprep.subr.bf16.mxu0 %v14131_v29  ;;  %v10847_v42 = vcombine.low %v230_v30, %v234_v31 }
  0x14   :  { %v362_v33 = vld [vmem:[%s19059_s1 + $0x520] sm:$0xff]  ;;  %3733 = vmatpush1.bf16.msra.mxu0 %v14146_v35 }
  0x15   :  { %v14149_v37 = vcombine.high %v358_v32, %v362_v33  ;;  %v238_v38 = vld [vmem:[%s19059_s1 + $0x140] sm:$0xff]  ;;  %3413 = vmatprep.subr.bf16.mxu1 %v10848_v36  ;;  %v14164_v43 = vcombine.low %v358_v32, %v362_v33 }
  0x16   :  { %v242_v39 = vld [vmem:[%s19059_s1 + $0x160] sm:$0xff]  ;;  %3414 = vmatpush1.bf16.msra.mxu1 %v10847_v42 }
  0x17   :  { %v366_v40 = vld [vmem:[%s19059_s1 + $0x540] sm:$0xff]  ;;  %v10856_v44 = vcombine.high %v238_v38, %v242_v39  ;;  %3734 = vmatprep.subr.bf16.mxu0 %v14149_v37  ;;  %v10855_v50 = vcombine.low %v238_v38, %v242_v39 }
  0x18   :  { %v370_v41 = vld [vmem:[%s19059_s1 + $0x560] sm:$0xff]  ;;  %3735 = vmatpush1.bf16.msra.mxu0 %v14164_v43 }
  0x19   :  { %v14167_v45 = vcombine.high %v366_v40, %v370_v41  ;;  %v246_v46 = vld [vmem:[%s19059_s1 + $0x180] sm:$0xff]  ;;  %3415 = vmatprep.subr.bf16.mxu1 %v10856_v44  ;;  %v14185_v52 = vcombine.low %v366_v40, %v370_v41 }
  0x1a   :  { %v250_v47 = vld [vmem:[%s19059_s1 + $0x1a0] sm:$0xff]  ;;  %3416 = vmatpush1.bf16.msra.mxu1 %v10855_v50 }
  0x1b   :  { %v374_v48 = vld [vmem:[%s19059_s1 + $0x580] sm:$0xff]  ;;  %v10864_v53 = vcombine.high %v246_v46, %v250_v47  ;;  %3736 = vmatprep.subr.bf16.mxu0 %v14167_v45  ;;  %v10863_v60 = vcombine.low %v246_v46, %v250_v47 }
  0x1c   :  { %v378_v49 = vld [vmem:[%s19059_s1 + $0x5a0] sm:$0xff]  ;;  %3737 = vmatpush1.bf16.msra.mxu0 %v14185_v52 }
  0x1d   :  { %v254_v51 = vld [vmem:[%s19059_s1 + $0x1c0] sm:$0xff]  ;;  %v14191_v55 = vcombine.high %v374_v48, %v378_v49  ;;  %3417 = vmatprep.subr.bf16.mxu1 %v10864_v53  ;;  %v14206_v61 = vcombine.low %v374_v48, %v378_v49 }
  0x1e   :  { %v258_v54 = vld [vmem:[%s19059_s1 + $0x1e0] sm:$0xff]  ;;  %3418 = vmatpush1.bf16.msra.mxu1 %v10863_v60 }
  0x1f   :  { %v13221_v56 = vld [vmem:[%s19060_s0 + $0x4] ss:$24 sps:$4 sm:$0xff]   ;;  %v10872_v62 = vcombine.high %v254_v51, %v258_v54  ;;  %3738 = vmatprep.subr.bf16.mxu0 %v14191_v55  ;;  %v10871_v4 = vcombine.low %v254_v51, %v258_v54 }
  0x20   :  { %v382_v57 = vld [vmem:[%s19059_s1 + $0x5c0] sm:$0xff]  ;;  %3437 = vmatprep.mubr.bf16.mxu1 %v13221_v56  ;;  %3739 = vmatpush1.bf16.msra.mxu0 %v14206_v61 }
  0x21   :  { %v386_v58 = vld [vmem:[%s19059_s1 + $0x5e0] sm:$0xff]  ;;  %3419 = vmatprep.subr.bf16.mxu1 %v10872_v62 }
  0x22   :  { %v13223_v59 = vld [vmem:[%s19060_s0 + $0xc] ss:$24 sps:$4 sm:$0xff]   ;;  %v14209_v63 = vcombine.high %v382_v57, %v386_v58  ;;  %v14224_v5 = vcombine.low %v382_v57, %v386_v58  ;;  %3420 = vmatpush1.bf16.msra.mxu1 %v10871_v4 }
  0x23   :  { %v262_v0 = vld [vmem:[%s19059_s1 + $0x200] sm:$0xff]  ;;  %3758 = vmatprep.mubr.bf16.mxu0 %v13223_v59 }
  0x24   :  { %v266_v1 = vld [vmem:[%s19059_s1 + $0x220] sm:$0xff]  ;;  %3740 = vmatprep.subr.bf16.mxu0 %v14209_v63 }
  0x25   :  { %v390_v2 = vld [vmem:[%s19059_s1 + $0x600] sm:$0xff]  ;;  %v10880_v6 = vcombine.high %v262_v0, %v266_v1  ;;  %v10879_v15 = vcombine.low %v262_v0, %v266_v1  ;;  %3741 = vmatpush1.bf16.msra.mxu0 %v14224_v5 }
  0x26   :  { %v394_v3 = vld [vmem:[%s19059_s1 + $0x620] sm:$0xff] }
  0x27   :  { %v14227_v7 = vcombine.high %v390_v2, %v394_v3  ;;  %v270_v10 = vld [vmem:[%s19059_s1 + $0x240] sm:$0xff]  ;;  %3421 = vmatprep.subr.bf16.mxu1 %v10880_v6  ;;  %v14242_v16 = vcombine.low %v390_v2, %v394_v3 }
  0x28   :  { %v274_v11 = vld [vmem:[%s19059_s1 + $0x260] sm:$0xff]  ;;  %3422 = vmatpush1.bf16.msra.mxu1 %v10879_v15 }
  0x29   :  { %v398_v12 = vld [vmem:[%s19059_s1 + $0x640] sm:$0xff]  ;;  %v10888_v17 = vcombine.high %v270_v10, %v274_v11  ;;  %3742 = vmatprep.subr.bf16.mxu0 %v14227_v7  ;;  %v10887_v25 = vcombine.low %v270_v10, %v274_v11 }
  0x2a   :  { %v402_v13 = vld [vmem:[%s19059_s1 + $0x660] sm:$0xff]  ;;  %3743 = vmatpush1.bf16.msra.mxu0 %v14242_v16 }
  0x2b   :  { %v14245_v18 = vcombine.high %v398_v12, %v402_v13  ;;  %v278_v20 = vld [vmem:[%s19059_s1 + $0x280] sm:$0xff]  ;;  %3423 = vmatprep.subr.bf16.mxu1 %v10888_v17  ;;  %v14260_v26 = vcombine.low %v398_v12, %v402_v13 }
  0x2c   :  { %v282_v22 = vld [vmem:[%s19059_s1 + $0x2a0] sm:$0xff]  ;;  %3424 = vmatpush1.bf16.msra.mxu1 %v10887_v25 }
  0x2d   :  { %v406_v23 = vld [vmem:[%s19059_s1 + $0x680] sm:$0xff]  ;;  %v10896_v28 = vcombine.high %v278_v20, %v282_v22  ;;  %3744 = vmatprep.subr.bf16.mxu0 %v14245_v18  ;;  %v10895_v36 = vcombine.low %v278_v20, %v282_v22 }
  0x2e   :  { %v410_v24 = vld [vmem:[%s19059_s1 + $0x6a0] sm:$0xff]  ;;  %3745 = vmatpush1.bf16.msra.mxu0 %v14260_v26 }
  0x2f   :  { %v286_v30 = vld [vmem:[%s19059_s1 + $0x2c0] sm:$0xff]  ;;  %v14266_v31 = vcombine.high %v406_v23, %v410_v24  ;;  %3425 = vmatprep.subr.bf16.mxu1 %v10896_v28  ;;  %v14278_v38 = vcombine.low %v406_v23, %v410_v24 }
  0x30   :  { %v290_v32 = vld [vmem:[%s19059_s1 + $0x2e0] sm:$0xff]  ;;  %3426 = vmatpush1.bf16.msra.mxu1 %v10895_v36 }
  0x31   :  { %v414_v33 = vld [vmem:[%s19059_s1 + $0x6c0] sm:$0xff]  ;;  %v10904_v39 = vcombine.high %v286_v30, %v290_v32  ;;  %3746 = vmatprep.subr.bf16.mxu0 %v14266_v31  ;;  %v10903_v47 = vcombine.low %v286_v30, %v290_v32 }
  0x32   :  { %v418_v34 = vld [vmem:[%s19059_s1 + $0x6e0] sm:$0xff]  ;;  %3747 = vmatpush1.bf16.msra.mxu0 %v14278_v38 }
  0x33   :  { %v294_v40 = vld [vmem:[%s19059_s1 + $0x300] sm:$0xff]  ;;  %v14287_v42 = vcombine.high %v414_v33, %v418_v34  ;;  %3427 = vmatprep.subr.bf16.mxu1 %v10904_v39  ;;  %v14296_v48 = vcombine.low %v414_v33, %v418_v34 }
  0x34   :  { %v298_v41 = vld [vmem:[%s19059_s1 + $0x320] sm:$0xff]  ;;  %3428 = vmatpush1.bf16.msra.mxu1 %v10903_v47 }
  0x35   :  { %v422_v44 = vld [vmem:[%s19059_s1 + $0x700] sm:$0xff]  ;;  %v10912_v49 = vcombine.high %v294_v40, %v298_v41  ;;  %3748 = vmatprep.subr.bf16.mxu0 %v14287_v42  ;;  %v10911_v57 = vcombine.low %v294_v40, %v298_v41  ;;  %v13227_v40 = vld [vmem:[%s19060_s0 + $0x34] ss:$24 sps:$4 sm:$0xff]  }
  0x36   :  { %v426_v46 = vld [vmem:[%s19059_s1 + $0x720] sm:$0xff]  ;;  %3749 = vmatpush1.bf16.msra.mxu0 %v14296_v48 }
  0x37   :  { %v302_v50 = vld [vmem:[%s19059_s1 + $0x340] sm:$0xff]  ;;  %v14302_v51 = vcombine.high %v422_v44, %v426_v46  ;;  %3429 = vmatprep.subr.bf16.mxu1 %v10912_v49  ;;  %v14314_v58 = vcombine.low %v422_v44, %v426_v46  ;;  %v13229_v44 = vld [vmem:[%s19060_s0 + $0x3c] ss:$24 sps:$4 sm:$0xff]  }
  0x38   :  { %v306_v53 = vld [vmem:[%s19059_s1 + $0x360] sm:$0xff]  ;;  %3430 = vmatpush1.bf16.msra.mxu1 %v10911_v57 }
  0x39   :  { %v430_v54 = vld [vmem:[%s19059_s1 + $0x740] sm:$0xff]  ;;  %v10920_v59 = vcombine.high %v302_v50, %v306_v53  ;;  %3750 = vmatprep.subr.bf16.mxu0 %v14302_v51  ;;  %v10919_v3 = vcombine.low %v302_v50, %v306_v53 }
  0x3a   :  { %v434_v56 = vld [vmem:[%s19059_s1 + $0x760] sm:$0xff]  ;;  %3751 = vmatpush1.bf16.msra.mxu0 %v14314_v58 }
  0x3b   :  { %v14317_v60 = vcombine.high %v430_v54, %v434_v56  ;;  %v310_v62 = vld [vmem:[%s19059_s1 + $0x380] sm:$0xff]  ;;  %3431 = vmatprep.subr.bf16.mxu1 %v10920_v59  ;;  %v14332_v4 = vcombine.low %v430_v54, %v434_v56  ;;  %v13232_v54 = vld [vmem:[%s19060_s0 + $0x38] ss:$24 sps:$4 sm:$0xff]  }
  0x3c   :  { %v314_v0 = vld [vmem:[%s19059_s1 + $0x3a0] sm:$0xff]  ;;  %3432 = vmatpush1.bf16.msra.mxu1 %v10919_v3 }
  0x3d   :  { %v438_v1 = vld [vmem:[%s19059_s1 + $0x780] sm:$0xff]  ;;  %v10928_v6 = vcombine.high %v310_v62, %v314_v0  ;;  %3752 = vmatprep.subr.bf16.mxu0 %v14317_v60  ;;  %v10927_v17 = vcombine.low %v310_v62, %v314_v0 }
  0x3e   :  { %v442_v2 = vld [vmem:[%s19059_s1 + $0x7a0] sm:$0xff]  ;;  %3753 = vmatpush1.bf16.msra.mxu0 %v14332_v4 }
  0x3f   :  { %v14335_v10 = vcombine.high %v438_v1, %v442_v2  ;;  %v318_v11 = vld [vmem:[%s19059_s1 + $0x3c0] sm:$0xff]  ;;  %3433 = vmatprep.subr.bf16.mxu1 %v10928_v6  ;;  %v14350_v20 = vcombine.low %v438_v1, %v442_v2 }
  0x40   :  { %v322_v12 = vld [vmem:[%s19059_s1 + $0x3e0] sm:$0xff]  ;;  %3434 = vmatpush1.bf16.msra.mxu1 %v10927_v17 }
  0x41   :  { %v446_v13 = vld [vmem:[%s19059_s1 + $0x7c0] sm:$0xff]  ;;  %v10936_v22 = vcombine.high %v318_v11, %v322_v12  ;;  %3754 = vmatprep.subr.bf16.mxu0 %v14335_v10  ;;  %v10935_v28 = vcombine.low %v318_v11, %v322_v12  ;;  %v13239_v12 = vld [vmem:[%s19060_s0 + $0x94] ss:$24 sps:$4 sm:$0xff]  }
  0x42   :  { %v450_v15 = vld [vmem:[%s19059_s1 + $0x7e0] sm:$0xff]  ;;  %3755 = vmatpush1.bf16.msra.mxu0 %v14350_v20 }
  0x43   :  { %v14353_v23 = vcombine.high %v446_v13, %v450_v15  ;;  %v454_v24 = vld [vmem:[%s19059_s1 + $0x800] sm:$0xff]  ;;  %3435 = vmatprep.subr.bf16.mxu1 %v10936_v22  ;;  %v14362_v30 = vcombine.low %v446_v13, %v450_v15  ;;  %v13241_v13 = vld [vmem:[%s19060_s0 + $0x9c] ss:$24 sps:$4 sm:$0xff]   ;;  %v13243_v22 = vld [vmem:[%s19060_s0 + $0x90] ss:$24 sps:$4 sm:$0xff]  }
  0x44   :  { %v458_v25 = vld [vmem:[%s19059_s1 + $0x820] sm:$0xff]  ;;  %3436 = vmatpush1.bf16.msra.mxu1 %v10935_v28 }
  0x45   :  { %v13225_v32 = vld [vmem:[%s19060_s0] ss:$24 sps:$4 sm:$0xff]   ;;  %3756 = vmatprep.subr.bf16.mxu0 %v14353_v23  ;;  %v11072_v33 = vcombine.high %v454_v24, %v458_v25  ;;  %v11071_v41 = vcombine.low %v454_v24, %v458_v25  ;;  %11344 = vmatprep.subr.bf16.mxu1 %v14084_v8  ;;  %v13231_v8 = vld [vmem:[%s19060_s0 + $0x30] ss:$24 sps:$4 sm:$0xff]   ;;  %v13233_v59 = vld [vmem:[%s19060_s0 + $0x64] ss:$24 sps:$4 sm:$0xff]  }
  0x46   :  { %v462_v34 = vld [vmem:[%s19059_s1 + $0x840] sm:$0xff]  ;;  %3757 = vmatpush1.bf16.msra.mxu0 %v14362_v30  ;;  %v13244_v24 = vld [vmem:[%s19060_s0 + $0x98] ss:$24 sps:$4 sm:$0xff]  }
  0x47   :  { %v466_v36 = vld [vmem:[%s19059_s1 + $0x860] sm:$0xff]  ;;  %4047 = vmatprep.subr.bf16.mxu0 %v11072_v33  ;;  %3438 = vmatmul.mubr.bf16.vlgmr.msra.gmra.mrb[0].mxu1 %v13225_v32 }
  0x48   :  { %v13226_v39 = vld [vmem:[%s19060_s0 + $0x8] ss:$24 sps:$4 sm:$0xff]   ;;  %v11080_v46 = vcombine.high %v462_v34, %v466_v36  ;;  %3447 = vmatprep.mubr.bf16.mxu1 %v13227_v40  ;;  %v11079_v50 = vcombine.low %v462_v34, %v466_v36  ;;  %11360 = vmatpush1.bf16.msra.mxu1 %v14086_v9  ;;  %v13235_v9 = vld [vmem:[%s19060_s0 + $0x6c] ss:$24 sps:$4 sm:$0xff]  }
  0x49   :  { %v470_v47 = vld [vmem:[%s19059_s1 + $0x880] sm:$0xff]  ;;  %3759 = vmatmul.mubr.bf16.vlgmr.msra.gmra.mrb[0].mxu0 %v13226_v39  ;;  %11345 = vmatprep.subr.bf16.mxu1 %v14097_v14 }
  0x4a   :  { %v474_v49 = vld [vmem:[%s19059_s1 + $0x8a0] sm:$0xff]  ;;  %4048 = vmatpush1.bf16.msra.mxu0 %v11071_v41  ;;  %3768 = vmatprep.mubr.bf16.mxu0 %v13229_v44  ;;  %v13251_v44 = vld [vmem:[%s19060_s0 + $0xf4] ss:$24 sps:$4 sm:$0xff]  }
  0x4b   :  { %4049 = vmatprep.subr.bf16.mxu0 %v11080_v46  ;;  %v11088_v53 = vcombine.high %v470_v47, %v474_v49  ;;  %v478_v56 = vld [vmem:[%s19059_s1 + $0x8c0] sm:$0xff]  ;;  %v11087_v62 = vcombine.low %v470_v47, %v474_v49  ;;  %v13253_v47 = vld [vmem:[%s19060_s0 + $0xfc] ss:$24 sps:$4 sm:$0xff]  }
  0x4c   :  { %v482_v57 = vld [vmem:[%s19059_s1 + $0x8e0] sm:$0xff]  ;;  %11361 = vmatpush1.bf16.msra.mxu1 %v14110_v19 }
  0x4d   :  { %v11096_v0 = vcombine.high %v478_v56, %v482_v57  ;;  %v486_v1 = vld [vmem:[%s19059_s1 + $0x900] sm:$0xff]  ;;  %11346 = vmatprep.subr.bf16.mxu1 %v14113_v21  ;;  %v11095_v3 = vcombine.low %v478_v56, %v482_v57 }
  0x4e   :  { %4050 = vmatpush1.bf16.msra.mxu0 %v11079_v50  ;;  %v490_v14 = vld [vmem:[%s19059_s1 + $0x920] sm:$0xff] }
  0x4f   :  { %4051 = vmatprep.subr.bf16.mxu0 %v11088_v53  ;;  %3448 = vmatmul.mubr.bf16.gmra.mrb[4].mxu1 %v13231_v8  ;;  %v13237_v2 = vld [vmem:[%s19060_s0 + $0x60] ss:$24 sps:$4 sm:$0xff]   ;;  %v11104_v6 = vcombine.high %v486_v1, %v490_v14  ;;  %v13245_v25 = vld [vmem:[%s19060_s0 + $0xc4] ss:$24 sps:$4 sm:$0xff]  }
  0x50   :  { %3457 = vmatprep.mubr.bf16.mxu1 %v13233_v59  ;;  %v494_v19 = vld [vmem:[%s19059_s1 + $0x940] sm:$0xff]  ;;  %11362 = vmatpush1.bf16.msra.mxu1 %v14128_v27  ;;  %v11103_v27 = vcombine.low %v486_v1, %v490_v14 }
  0x51   :  { %3769 = vmatmul.mubr.bf16.gmra.mrb[4].mxu0 %v13232_v54  ;;  %v498_v21 = vld [vmem:[%s19059_s1 + $0x960] sm:$0xff]  ;;  %11347 = vmatprep.subr.bf16.mxu1 %v14131_v29 }
  0x52   :  { %3778 = vmatprep.mubr.bf16.mxu0 %v13235_v9  ;;  %4052 = vmatpush1.bf16.msra.mxu0 %v11087_v62  ;;  %v13238_v11 = vld [vmem:[%s19060_s0 + $0x68] ss:$24 sps:$4 sm:$0xff]   ;;  %v11112_v15 = vcombine.high %v494_v19, %v498_v21  ;;  %v13247_v33 = vld [vmem:[%s19060_s0 + $0xcc] ss:$24 sps:$4 sm:$0xff]  }
  0x53   :  { %4053 = vmatprep.subr.bf16.mxu0 %v11096_v0  ;;  %v502_v29 = vld [vmem:[%s19059_s1 + $0x980] sm:$0xff] }
  0x54   :  { %11363 = vmatpush1.bf16.msra.mxu1 %v14146_v35  ;;  %v506_v17 = vld [vmem:[%s19059_s1 + $0x9a0] sm:$0xff]  ;;  %v11111_v35 = vcombine.low %v494_v19, %v498_v21 }
  0x55   :  { %11348 = vmatprep.subr.bf16.mxu1 %v14149_v37  ;;  %v11120_v28 = vcombine.high %v502_v29, %v506_v17  ;;  %v510_v37 = vld [vmem:[%s19059_s1 + $0x9c0] sm:$0xff]  ;;  %v11119_v34 = vcombine.low %v502_v29, %v506_v17 }
  0x56   :  { %4054 = vmatpush1.bf16.msra.mxu0 %v11095_v3  ;;  %v514_v32 = vld [vmem:[%s19059_s1 + $0x9e0] sm:$0xff] }
  0x57   :  { %4055 = vmatprep.subr.bf16.mxu0 %v11104_v6  ;;  %3458 = vmatmul.mubr.bf16.gmra.mrb[8].mxu1 %v13237_v2  ;;  %v518_v36 = vld [vmem:[%s19059_s1 + $0xa00] sm:$0xff]  ;;  %v11128_v39 = vcombine.high %v510_v37, %v514_v32  ;;  %v13263_v2 = vld [vmem:[%s19060_s0 + $0x154] ss:$24 sps:$4 sm:$0xff]  }
  0x58   :  { %3467 = vmatprep.mubr.bf16.mxu1 %v13239_v12  ;;  %11364 = vmatpush1.bf16.msra.mxu1 %v14164_v43  ;;  %v522_v40 = vld [vmem:[%s19059_s1 + $0xa20] sm:$0xff]  ;;  %v13265_v6 = vld [vmem:[%s19060_s0 + $0x15c] ss:$24 sps:$4 sm:$0xff]  }
  0x59   :  { %3779 = vmatmul.mubr.bf16.gmra.mrb[8].mxu0 %v13238_v11  ;;  %11349 = vmatprep.subr.bf16.mxu1 %v14167_v45  ;;  %v13249_v43 = vld [vmem:[%s19060_s0 + $0xc0] ss:$24 sps:$4 sm:$0xff]   ;;  %v11127_v45 = vcombine.low %v510_v37, %v514_v32  ;;  %v11136_v46 = vcombine.high %v518_v36, %v522_v40  ;;  %v11135_v49 = vcombine.low %v518_v36, %v522_v40  ;;  %v13257_v56 = vld [vmem:[%s19060_s0 + $0x124] ss:$24 sps:$4 sm:$0xff]  }
  0x5a   :  { %3788 = vmatprep.mubr.bf16.mxu0 %v13241_v13  ;;  %4056 = vmatpush1.bf16.msra.mxu0 %v11103_v27  ;;  %v526_v41 = vld [vmem:[%s19059_s1 + $0xa40] sm:$0xff]  ;;  %v13289_v36 = vld [vmem:[%s19060_s0 + $0x21c] ss:$24 sps:$4 sm:$0xff]   ;;  %v13292_v40 = vld [vmem:[%s19060_s0 + $0x218] ss:$24 sps:$4 sm:$0xff]  }
  0x5b   :  { %4057 = vmatprep.subr.bf16.mxu0 %v11112_v15  ;;  %v534_v50 = vld [vmem:[%s19059_s1 + $0xa80] sm:$0xff] }
  0x5c   :  { %11365 = vmatpush1.bf16.msra.mxu1 %v14185_v52  ;;  %v530_v52 = vld [vmem:[%s19059_s1 + $0xa60] sm:$0xff] }
  0x5d   :  { %11350 = vmatprep.subr.bf16.mxu1 %v14191_v55  ;;  %v13250_v55 = vld [vmem:[%s19060_s0 + $0xc8] ss:$24 sps:$4 sm:$0xff]   ;;  %v11144_v8 = vcombine.high %v526_v41, %v530_v52  ;;  %v13259_v59 = vld [vmem:[%s19060_s0 + $0x12c] ss:$24 sps:$4 sm:$0xff]  }
  0x5e   :  { %4058 = vmatpush1.bf16.msra.mxu0 %v11111_v35  ;;  %v538_v53 = vld [vmem:[%s19059_s1 + $0xaa0] sm:$0xff]  ;;  %v14583_v35 = vld [vmem:[%s19059_s1 + $0x10] sm:$0xff] }
  0x5f   :  { %4059 = vmatprep.subr.bf16.mxu0 %v11120_v28  ;;  %3468 = vmatmul.mubr.bf16.gmra.mrb[12].mxu1 %v13243_v22  ;;  %v542_v54 = vld [vmem:[%s19059_s1 + $0xac0] sm:$0xff]  ;;  %v11152_v57 = vcombine.high %v534_v50, %v538_v53  ;;  %v11151_v9 = vcombine.low %v534_v50, %v538_v53  ;;  %v13277_v28 = vld [vmem:[%s19060_s0 + $0x1bc] ss:$24 sps:$4 sm:$0xff]  }
  0x60   :  { %3477 = vmatprep.mubr.bf16.mxu1 %v13245_v25  ;;  %11366 = vmatpush1.bf16.msra.mxu1 %v14206_v61  ;;  %v13255_v61 = vld [vmem:[%s19060_s0 + $0xf0] ss:$24 sps:$4 sm:$0xff]   ;;  %v550_v62 = vld [vmem:[%s19059_s1 + $0xb00] sm:$0xff]  ;;  %v13275_v25 = vld [vmem:[%s19060_s0 + $0x1b4] ss:$24 sps:$4 sm:$0xff]  }
  0x61   :  { %3789 = vmatmul.mubr.bf16.gmra.mrb[12].mxu0 %v13244_v24  ;;  %11351 = vmatprep.subr.bf16.mxu1 %v14209_v63  ;;  %v11143_v63 = vcombine.low %v526_v41, %v530_v52  ;;  %v554_v1 = vld [vmem:[%s19059_s1 + $0xb20] sm:$0xff] }
  0x62   :  { %3798 = vmatprep.mubr.bf16.mxu0 %v13247_v33  ;;  %4060 = vmatpush1.bf16.msra.mxu0 %v11119_v34  ;;  %v558_v14 = vld [vmem:[%s19059_s1 + $0xb40] sm:$0xff]  ;;  %v11168_v3 = vcombine.high %v550_v62, %v554_v1  ;;  %v11167_v19 = vcombine.low %v550_v62, %v554_v1  ;;  %v13287_v34 = vld [vmem:[%s19060_s0 + $0x214] ss:$24 sps:$4 sm:$0xff]  }
  0x63   :  { %4061 = vmatprep.subr.bf16.mxu0 %v11128_v39  ;;  %v566_v21 = vld [vmem:[%s19059_s1 + $0xb80] sm:$0xff]  ;;  %v13291_v39 = vld [vmem:[%s19060_s0 + $0x210] ss:$24 sps:$4 sm:$0xff]  }
  0x64   :  { %11367 = vmatpush1.bf16.msra.mxu1 %v14224_v5  ;;  %v546_v5 = vld [vmem:[%s19059_s1 + $0xae0] sm:$0xff]  ;;  %v220_v1 = vld [vmem:[%s19059_s1 + $0xb0] sm:$0xff] }
  0x65   :  { %11352 = vmatprep.subr.bf16.mxu1 %v14227_v7  ;;  %v13256_v7 = vld [vmem:[%s19060_s0 + $0xf8] ss:$24 sps:$4 sm:$0xff]   ;;  %v11160_v0 = vcombine.high %v542_v54, %v546_v5  ;;  %v570_v12 = vld [vmem:[%s19059_s1 + $0xba0] sm:$0xff] }
  0x66   :  { %4062 = vmatpush1.bf16.msra.mxu0 %v11127_v45  ;;  %v574_v13 = vld [vmem:[%s19059_s1 + $0xbc0] sm:$0xff]  ;;  %v11184_v15 = vcombine.high %v566_v21, %v570_v12  ;;  %v11183_v17 = vcombine.low %v566_v21, %v570_v12  ;;  %v13325_v12 = vld [vmem:[%s19060_s0 + $0x74] ss:$24 sps:$4 sm:$0xff]  }
  0x67   :  { %4063 = vmatprep.subr.bf16.mxu0 %v11136_v46  ;;  %3478 = vmatmul.mubr.bf16.gmra.mrb[16].mxu1 %v13249_v43  ;;  %v13269_v27 = vld [vmem:[%s19060_s0 + $0x184] ss:$24 sps:$4 sm:$0xff]   ;;  %v13273_v24 = vld [vmem:[%s19060_s0 + $0x180] ss:$24 sps:$4 sm:$0xff]   ;;  %v13303_v46 = vld [vmem:[%s19060_s0 + $0x270] ss:$24 sps:$4 sm:$0xff]  }
  0x68   :  { %3487 = vmatprep.mubr.bf16.mxu1 %v13251_v44  ;;  %11368 = vmatpush1.bf16.msra.mxu1 %v14242_v16  ;;  %v13261_v16 = vld [vmem:[%s19060_s0 + $0x120] ss:$24 sps:$4 sm:$0xff]   ;;  %v13271_v29 = vld [vmem:[%s19060_s0 + $0x18c] ss:$24 sps:$4 sm:$0xff]   ;;  %v13301_v44 = vld [vmem:[%s19060_s0 + $0x27c] ss:$24 sps:$4 sm:$0xff]  }
  0x69   :  { %3799 = vmatmul.mubr.bf16.gmra.mrb[16].mxu0 %v13250_v55  ;;  %11353 = vmatprep.subr.bf16.mxu1 %v14245_v18  ;;  %v11159_v18 = vcombine.low %v542_v54, %v546_v5  ;;  %v13281_v37 = vld [vmem:[%s19060_s0 + $0x1e4] ss:$24 sps:$4 sm:$0xff]   ;;  %v13285_v32 = vld [vmem:[%s19060_s0 + $0x1e0] ss:$24 sps:$4 sm:$0xff]   ;;  %v13299_v55 = vld [vmem:[%s19060_s0 + $0x274] ss:$24 sps:$4 sm:$0xff]  }
  0x6a   :  { %3808 = vmatprep.mubr.bf16.mxu0 %v13253_v47  ;;  %4064 = vmatpush1.bf16.msra.mxu0 %v11135_v49  ;;  %v13286_v33 = vld [vmem:[%s19060_s0 + $0x1e8] ss:$24 sps:$4 sm:$0xff]   ;;  %v13293_v43 = vld [vmem:[%s19060_s0 + $0x244] ss:$24 sps:$4 sm:$0xff]   ;;  %v13304_v47 = vld [vmem:[%s19060_s0 + $0x278] ss:$24 sps:$4 sm:$0xff]  }
  0x6b   :  { %4065 = vmatprep.subr.bf16.mxu0 %v11144_v8  ;;  %v13295_v45 = vld [vmem:[%s19060_s0 + $0x24c] ss:$24 sps:$4 sm:$0xff]   ;;  %v13297_v41 = vld [vmem:[%s19060_s0 + $0x240] ss:$24 sps:$4 sm:$0xff]   ;;  %v13316_v54 = vld [vmem:[%s19060_s0 + $0x2d0] ss:$24 sps:$4 sm:$0xff]  }
  0x6c   :  { %11369 = vmatpush1.bf16.msra.mxu1 %v14260_v26  ;;  %v562_v26 = vld [vmem:[%s19059_s1 + $0xb60] sm:$0xff]  ;;  %v208_v5 = vld [vmem:[%s19059_s1 + $0x50] sm:$0xff] }
  0x6d   :  { %11354 = vmatprep.subr.bf16.mxu1 %v14266_v31  ;;  %v13262_v31 = vld [vmem:[%s19060_s0 + $0x128] ss:$24 sps:$4 sm:$0xff]   ;;  %v11176_v11 = vcombine.high %v558_v14, %v562_v26  ;;  %v13305_v49 = vld [vmem:[%s19060_s0 + $0x2a4] ss:$24 sps:$4 sm:$0xff]  }
  0x6e   :  { %4066 = vmatpush1.bf16.msra.mxu0 %v11143_v63  ;;  %v13298_v52 = vld [vmem:[%s19060_s0 + $0x248] ss:$24 sps:$4 sm:$0xff]   ;;  %v13307_v50 = vld [vmem:[%s19060_s0 + $0x2ac] ss:$24 sps:$4 sm:$0xff]  }
  0x6f   :  { %4067 = vmatprep.subr.bf16.mxu0 %v11152_v57  ;;  %3488 = vmatmul.mubr.bf16.gmra.mrb[20].mxu1 %v13255_v61  ;;  %v13309_v8 = vld [vmem:[%s19060_s0 + $0x2a0] ss:$24 sps:$4 sm:$0xff]   ;;  %v13311_v61 = vld [vmem:[%s19060_s0 + $0x2d4] ss:$24 sps:$4 sm:$0xff]   ;;  %v13317_v57 = vld [vmem:[%s19060_s0 + $0x304] ss:$24 sps:$4 sm:$0xff]  }
  0x70   :  { %3497 = vmatprep.mubr.bf16.mxu1 %v13257_v56  ;;  %11370 = vmatpush1.bf16.msra.mxu1 %v14278_v38  ;;  %v13267_v38 = vld [vmem:[%s19060_s0 + $0x150] ss:$24 sps:$4 sm:$0xff]   ;;  %v13315_v63 = vld [vmem:[%s19060_s0 + $0x14] ss:$24 sps:$4 sm:$0xff]   ;;  %v13322_v21 = vld [vmem:[%s19060_s0 + $0x40] ss:$24 sps:$4 sm:$0xff]  }
  0x71   :  { %3809 = vmatmul.mubr.bf16.gmra.mrb[20].mxu0 %v13256_v7  ;;  %11355 = vmatprep.subr.bf16.mxu1 %v14287_v42  ;;  %v11175_v42 = vcombine.low %v558_v14, %v562_v26  ;;  %v13310_v53 = vld [vmem:[%s19060_s0 + $0x2a8] ss:$24 sps:$4 sm:$0xff]   ;;  %v212_v7 = vld [vmem:[%s19059_s1 + $0x70] sm:$0xff] }
  0x72   :  { %3818 = vmatprep.mubr.bf16.mxu0 %v13259_v59  ;;  %4068 = vmatpush1.bf16.msra.mxu0 %v11151_v9  ;;  %v13313_v56 = vld [vmem:[%s19060_s0 + $0x10] ss:$24 sps:$4 sm:$0xff]   ;;  %v13319_v9 = vld [vmem:[%s19060_s0 + $0x44] ss:$24 sps:$4 sm:$0xff]   ;;  %v10828_v62 = vcombine.high %v208_v5, %v212_v7  ;;  %v10827_v14 = vcombine.low %v208_v5, %v212_v7 }
  0x73   :  { %4069 = vmatprep.subr.bf16.mxu0 %v11160_v0  ;;  %v216_v0 = vld [vmem:[%s19059_s1 + $0x90] sm:$0xff] }
  0x74   :  { %11371 = vmatpush1.bf16.msra.mxu1 %v14296_v48  ;;  %v578_v48 = vld [vmem:[%s19059_s1 + $0xbe0] sm:$0xff]  ;;  %v288_v5 = vld [vmem:[%s19059_s1 + $0x2d0] sm:$0xff] }
  0x75   :  { %11356 = vmatprep.subr.bf16.mxu1 %v14302_v51  ;;  %v13268_v51 = vld [vmem:[%s19060_s0 + $0x158] ss:$24 sps:$4 sm:$0xff]   ;;  %v11192_v22 = vcombine.high %v574_v13, %v578_v48 }
  0x76   :  { %4070 = vmatpush1.bf16.msra.mxu0 %v11159_v18  ;;  %v14714_v18 = vld [vmem:[%s19059_s1 + $0x28] sm:$0xff]  ;;  %v292_v7 = vld [vmem:[%s19059_s1 + $0x2f0] sm:$0xff] }
  0x77   :  { %4071 = vmatprep.subr.bf16.mxu0 %v11168_v3  ;;  %3498 = vmatmul.mubr.bf16.gmra.mrb[24].mxu1 %v13261_v16  ;;  %v14709_v16 = vld [vmem:[%s19059_s1 + $0x8] sm:$0xff]  ;;  %v13321_v3 = vld [vmem:[%s19060_s0 + $0x300] ss:$24 sps:$4 sm:$0xff]  }
  0x78   :  { %3507 = vmatprep.mubr.bf16.mxu1 %v13263_v2  ;;  %11372 = vmatpush1.bf16.msra.mxu1 %v14314_v58  ;;  %v14588_v58 = vld [vmem:[%s19059_s1 + $0x30] sm:$0xff]  ;;  %v10817_v26 = vcombine.low %v14709_v16, %v14714_v18  ;;  %v10836_v2 = vcombine.high %v216_v0, %v220_v1 }
  0x79   :  { %3819 = vmatmul.mubr.bf16.gmra.mrb[24].mxu0 %v13262_v31  ;;  %11357 = vmatprep.subr.bf16.mxu1 %v14317_v60  ;;  %v11191_v60 = vcombine.low %v574_v13, %v578_v48  ;;  %v10819_v59 = vcombine.low %v14583_v35, %v14588_v58  ;;  %v10818_v31 = vcombine.high %v14709_v16, %v14714_v18  ;;  %v232_v13 = vld [vmem:[%s19059_s1 + $0x110] sm:$0xff]  ;;  %v227_v16 = vld [vmem:[%s19059_s1 + $0xe8] sm:$0xff]  ;;  %v13405_v18 = vld [vmem:[%s19060_s0 + $0x2e0] ss:$24 sps:$4 sm:$0xff]  }
  0x7a   :  { %3828 = vmatprep.mubr.bf16.mxu0 %v13265_v6  ;;  %4072 = vmatpush1.bf16.msra.mxu0 %v11167_v19  ;;  %v224_v6 = vld [vmem:[%s19059_s1 + $0xd0] sm:$0xff] }
  0x7b   :  { %4073 = vmatprep.subr.bf16.mxu0 %v11176_v11  ;;  %v228_v19 = vld [vmem:[%s19059_s1 + $0xf0] sm:$0xff] }
  0x7c   :  { %11373 = vmatpush1.bf16.msra.mxu1 %v14332_v4  ;;  %v10820_v4 = vcombine.high %v14583_v35, %v14588_v58  ;;  %v13323_v11 = vld [vmem:[%s19060_s0 + $0x334] ss:$24 sps:$4 sm:$0xff]   ;;  %v13329_v35 = vld [vmem:[%s19060_s0 + $0x364] ss:$24 sps:$4 sm:$0xff]  }
  0x7d   :  { %11358 = vmatprep.subr.bf16.mxu1 %v14335_v10  ;;  %v13274_v10 = vld [vmem:[%s19060_s0 + $0x188] ss:$24 sps:$4 sm:$0xff]   ;;  %v236_v48 = vld [vmem:[%s19059_s1 + $0x130] sm:$0xff]  ;;  %v13331_v58 = vld [vmem:[%s19060_s0 + $0xa4] ss:$24 sps:$4 sm:$0xff]  }
  0x7e   :  { %4074 = vmatpush1.bf16.msra.mxu0 %v11175_v42  ;;  %v10844_v42 = vcombine.high %v224_v6, %v228_v19 }
  0x7f   :  { %4075 = vmatprep.subr.bf16.mxu0 %v11184_v15  ;;  %3508 = vmatmul.mubr.bf16.gmra.mrb[28].mxu1 %v13267_v38  ;;  %v10835_v38 = vcombine.low %v216_v0, %v220_v1  ;;  %v13327_v15 = vld [vmem:[%s19060_s0 + $0x330] ss:$24 sps:$4 sm:$0xff]   ;;  %v10907_v1 = vcombine.low %v288_v5, %v292_v7 }
  0x80   :  { %3517 = vmatprep.mubr.bf16.mxu1 %v13269_v27  ;;  %11374 = vmatpush1.bf16.msra.mxu1 %v14350_v20  ;;  %v13279_v20 = vld [vmem:[%s19060_s0 + $0x1b0] ss:$24 sps:$4 sm:$0xff]   ;;  %v10852_v27 = vcombine.high %v232_v13, %v236_v48 }
  0x81   :  { %3829 = vmatmul.mubr.bf16.gmra.mrb[28].mxu0 %v13268_v51  ;;  %11359 = vmatprep.subr.bf16.mxu1 %v14353_v23  ;;  %v13280_v23 = vld [vmem:[%s19060_s0 + $0x1b8] ss:$24 sps:$4 sm:$0xff]   ;;  %v10843_v51 = vcombine.low %v224_v6, %v228_v19  ;;  %v13353_v6 = vld [vmem:[%s19060_s0 + $0x424] ss:$24 sps:$4 sm:$0xff]  }
  0x82   :  { %3838 = vmatprep.mubr.bf16.mxu0 %v13271_v29  ;;  %4076 = vmatpush1.bf16.msra.mxu0 %v11183_v17  ;;  %v240_v29 = vld [vmem:[%s19059_s1 + $0x150] sm:$0xff]  ;;  %v13355_v19 = vld [vmem:[%s19060_s0 + $0x164] ss:$24 sps:$4 sm:$0xff]  }
  0x83   :  { %4077 = vmatprep.subr.bf16.mxu0 %v11192_v22  ;;  %v244_v17 = vld [vmem:[%s19059_s1 + $0x170] sm:$0xff] }
  0x84   :  { %11375 = vmatpush1.bf16.msra.mxu1 %v14362_v30  ;;  %v13283_v30 = vld [vmem:[%s19060_s0 + $0x1ec] ss:$24 sps:$4 sm:$0xff]   ;;  %v13328_v22 = vld [vmem:[%s19060_s0 + $0x70] ss:$24 sps:$4 sm:$0xff]  }
  0x85   :  { %4368 = vmatprep.subr.bf16.mxu1 %v10818_v31  ;;  %v296_v0 = vld [vmem:[%s19059_s1 + $0x310] sm:$0xff] }
  0x86   :  { %4078 = vmatpush1.bf16.msra.mxu0 %v11191_v60  ;;  %v10851_v60 = vcombine.low %v232_v13, %v236_v48  ;;  %v304_v13 = vld [vmem:[%s19059_s1 + $0x350] sm:$0xff] }
  0x87   :  { %5331 = vmatprep.subr.bf16.mxu0 %v10820_v4  ;;  %3518 = vmatmul.mubr.bf16.gmra.mrb[32].mxu1 %v13273_v24  ;;  %v10860_v4 = vcombine.high %v240_v29, %v244_v17  ;;  %v248_v24 = vld [vmem:[%s19059_s1 + $0x190] sm:$0xff] }
  0x88   :  { %3527 = vmatprep.mubr.bf16.mxu1 %v13275_v25  ;;  %v10859_v25 = vcombine.low %v240_v29, %v244_v17  ;;  %v308_v48 = vld [vmem:[%s19059_s1 + $0x370] sm:$0xff]  ;;  %v13365_v17 = vld [vmem:[%s19060_s0 + $0x484] ss:$24 sps:$4 sm:$0xff]  }
  0x89   :  { %3839 = vmatmul.mubr.bf16.gmra.mrb[32].mxu0 %v13274_v10  ;;  %v252_v10 = vld [vmem:[%s19059_s1 + $0x1b0] sm:$0xff] }
  0x8a   :  { %3848 = vmatprep.mubr.bf16.mxu0 %v13277_v28  ;;  %v10868_v28 = vcombine.high %v248_v24, %v252_v10  ;;  %v13364_v29 = vld [vmem:[%s19060_s0 + $0x190] ss:$24 sps:$4 sm:$0xff]  }
  0x8f   :  { %3528 = vmatmul.mubr.bf16.gmra.mrb[36].mxu1 %v13279_v20  ;;  %v13333_v20 = vld [vmem:[%s19060_s0 + $0x360] ss:$24 sps:$4 sm:$0xff]  }
  0x90   :  { %3537 = vmatprep.mubr.bf16.mxu1 %v13281_v37  ;;  %v260_v37 = vld [vmem:[%s19059_s1 + $0x1f0] sm:$0xff] }
  0x91   :  { %3849 = vmatmul.mubr.bf16.gmra.mrb[36].mxu0 %v13280_v23  ;;  %v256_v23 = vld [vmem:[%s19059_s1 + $0x1d0] sm:$0xff] }
  0x92   :  { %3858 = vmatprep.mubr.bf16.mxu0 %v13283_v30  ;;  %v13334_v30 = vld [vmem:[%s19060_s0 + $0xa0] ss:$24 sps:$4 sm:$0xff]  }
  0x97   :  { %3538 = vmatmul.mubr.bf16.gmra.mrb[40].mxu1 %v13285_v32  ;;  %v13335_v32 = vld [vmem:[%s19060_s0 + $0x394] ss:$24 sps:$4 sm:$0xff]  }
  0x98   :  { %3547 = vmatprep.mubr.bf16.mxu1 %v13287_v34  ;;  %v10867_v34 = vcombine.low %v248_v24, %v252_v10  ;;  %v312_v24 = vld [vmem:[%s19059_s1 + $0x390] sm:$0xff] }
  0x99   :  { %3859 = vmatmul.mubr.bf16.gmra.mrb[40].mxu0 %v13286_v33  ;;  %v13337_v33 = vld [vmem:[%s19060_s0 + $0xd4] ss:$24 sps:$4 sm:$0xff]  }
  0x9a   :  { %3868 = vmatprep.mubr.bf16.mxu0 %v13289_v36  ;;  %v10876_v36 = vcombine.high %v256_v23, %v260_v37  ;;  %v316_v10 = vld [vmem:[%s19059_s1 + $0x3b0] sm:$0xff] }
  0x9f   :  { %3548 = vmatmul.mubr.bf16.gmra.mrb[44].mxu1 %v13291_v39  ;;  %v264_v39 = vld [vmem:[%s19059_s1 + $0x210] sm:$0xff] }
  0xa0   :  { %3557 = vmatprep.mubr.bf16.mxu1 %v13293_v43  ;;  %v10875_v43 = vcombine.low %v256_v23, %v260_v37  ;;  %v13376_v23 = vld [vmem:[%s19060_s0 + $0x1f0] ss:$24 sps:$4 sm:$0xff]   ;;  %v13377_v37 = vld [vmem:[%s19060_s0 + $0x4e4] ss:$24 sps:$4 sm:$0xff]  }
  0xa1   :  { %3869 = vmatmul.mubr.bf16.gmra.mrb[44].mxu0 %v13292_v40  ;;  %v268_v40 = vld [vmem:[%s19059_s1 + $0x230] sm:$0xff] }
  0xa2   :  { %3878 = vmatprep.mubr.bf16.mxu0 %v13295_v45  ;;  %v10884_v45 = vcombine.high %v264_v39, %v268_v40 }
  0xa7   :  { %3558 = vmatmul.mubr.bf16.gmra.mrb[48].mxu1 %v13297_v41  ;;  %v13339_v41 = vld [vmem:[%s19060_s0 + $0x390] ss:$24 sps:$4 sm:$0xff]  }
  0xa8   :  { %3567 = vmatprep.mubr.bf16.mxu1 %v13299_v55  ;;  %v276_v55 = vld [vmem:[%s19059_s1 + $0x270] sm:$0xff] }
  0xa9   :  { %3879 = vmatmul.mubr.bf16.gmra.mrb[48].mxu0 %v13298_v52  ;;  %v272_v52 = vld [vmem:[%s19059_s1 + $0x250] sm:$0xff] }
  0xaa   :  { %3888 = vmatprep.mubr.bf16.mxu0 %v13301_v44  ;;  %v13340_v44 = vld [vmem:[%s19060_s0 + $0xd0] ss:$24 sps:$4 sm:$0xff]  }
  0xaf   :  { %3568 = vmatmul.mubr.bf16.gmra.mrb[52].mxu1 %v13303_v46  ;;  %v13341_v46 = vld [vmem:[%s19060_s0 + $0x3c4] ss:$24 sps:$4 sm:$0xff]  }
  0xb0   :  { %3577 = vmatprep.mubr.bf16.mxu1 %v13305_v49  ;;  %v10883_v49 = vcombine.low %v264_v39, %v268_v40  ;;  %v320_v39 = vld [vmem:[%s19059_s1 + $0x3d0] sm:$0xff] }
  0xb1   :  { %3889 = vmatmul.mubr.bf16.gmra.mrb[52].mxu0 %v13304_v47  ;;  %v13343_v47 = vld [vmem:[%s19060_s0 + $0x104] ss:$24 sps:$4 sm:$0xff]   ;;  %v324_v40 = vld [vmem:[%s19059_s1 + $0x3f0] sm:$0xff] }
  0xb2   :  { %3898 = vmatprep.mubr.bf16.mxu0 %v13307_v50  ;;  %v10892_v50 = vcombine.high %v272_v52, %v276_v55 }
  0xb7   :  { %3578 = vmatmul.mubr.bf16.gmra.mrb[56].mxu1 %v13309_v8  ;;  %v280_v8 = vld [vmem:[%s19059_s1 + $0x290] sm:$0xff] }
  0xb8   :  { %3587 = vmatprep.mubr.bf16.mxu1 %v13311_v61  ;;  %v10891_v61 = vcombine.low %v272_v52, %v276_v55  ;;  %v13387_v55 = vld [vmem:[%s19060_s0 + $0x510] ss:$24 sps:$4 sm:$0xff]  }
  0xb9   :  { %3899 = vmatmul.mubr.bf16.gmra.mrb[56].mxu0 %v13310_v53  ;;  %v284_v53 = vld [vmem:[%s19059_s1 + $0x2b0] sm:$0xff] }
  0xba   :  { %4079 = vmatprep.mubr.bf16.mxu0 %v13315_v63  ;;  %v10900_v63 = vcombine.high %v280_v8, %v284_v53 }
  0xbf   :  { %3588 = vmatmul.mubr.bf16.gmra.mrb[60].mxu1 %v13316_v54  ;;  %v13345_v54 = vld [vmem:[%s19060_s0 + $0x3c0] ss:$24 sps:$4 sm:$0xff]  }
  0xc0   :  { %3597 = vmatprep.mubr.bf16.mxu1 %v13317_v57  ;;  %v13347_v57 = vld [vmem:[%s19060_s0 + $0x3f4] ss:$24 sps:$4 sm:$0xff]  }
  0xc1   :  { %4080 = vmatmul.mubr.bf16.vlgmr.msra.gmra.mrb[0].mxu0 %v13313_v56  ;;  %v13346_v56 = vld [vmem:[%s19060_s0 + $0x100] ss:$24 sps:$4 sm:$0xff]  }
  0xc2   :  { %5332 = vmatpush1.bf16.msra.mxu0 %v10819_v59  ;;  %4089 = vmatprep.mubr.bf16.mxu0 %v13319_v9  ;;  %v13349_v59 = vld [vmem:[%s19060_s0 + $0x134] ss:$24 sps:$4 sm:$0xff]   ;;  %v10899_v9 = vcombine.low %v280_v8, %v284_v53 }
  0xc3   :  { %5333 = vmatprep.subr.bf16.mxu0 %v10828_v62  ;;  %v10908_v62 = vcombine.high %v288_v5, %v292_v7  ;;  %v13396_v5 = vld [vmem:[%s19060_s0 + $0x2dc] ss:$24 sps:$4 sm:$0xff]  }
  0xc6   :  { %5334 = vmatpush1.bf16.msra.mxu0 %v10827_v14  ;;  %v300_v14 = vld [vmem:[%s19059_s1 + $0x330] sm:$0xff] }
  0xc7   :  { %5335 = vmatprep.subr.bf16.mxu0 %v10836_v2  ;;  %3598 = vmatmul.mubr.bf16.gmra.mrb[64].mxu1 %v13321_v3  ;;  %v10916_v31 = vcombine.high %v296_v0, %v300_v14  ;;  %v13351_v2 = vld [vmem:[%s19060_s0 + $0x3f0] ss:$24 sps:$4 sm:$0xff]  }
  0xc8   :  { %3607 = vmatprep.mubr.bf16.mxu1 %v13323_v11  ;;  %v13352_v3 = vld [vmem:[%s19060_s0 + $0x130] ss:$24 sps:$4 sm:$0xff]   ;;  %v13357_v11 = vld [vmem:[%s19060_s0 + $0x420] ss:$24 sps:$4 sm:$0xff]  }
  0xc9   :  { %4090 = vmatmul.mubr.bf16.gmra.mrb[4].mxu0 %v13322_v21  ;;  %v10915_v21 = vcombine.low %v296_v0, %v300_v14  ;;  %v13394_v14 = vld [vmem:[%s19060_s0 + $0x2d8] ss:$24 sps:$4 sm:$0xff]  }
  0xca   :  { %4099 = vmatprep.mubr.bf16.mxu0 %v13325_v12  ;;  %5336 = vmatpush1.bf16.msra.mxu0 %v10835_v38  ;;  %v13358_v12 = vld [vmem:[%s19060_s0 + $0x160] ss:$24 sps:$4 sm:$0xff]   ;;  %v13359_v38 = vld [vmem:[%s19060_s0 + $0x454] ss:$24 sps:$4 sm:$0xff]  }
  0xcb   :  { %5337 = vmatprep.subr.bf16.mxu0 %v10844_v42  ;;  %v13361_v42 = vld [vmem:[%s19060_s0 + $0x194] ss:$24 sps:$4 sm:$0xff]  }
  0xce   :  { %5338 = vmatpush1.bf16.msra.mxu0 %v10843_v51  ;;  %v10923_v51 = vcombine.low %v304_v13, %v308_v48 }
  0xcf   :  { %5339 = vmatprep.subr.bf16.mxu0 %v10852_v27  ;;  %3608 = vmatmul.mubr.bf16.gmra.mrb[68].mxu1 %v13327_v15  ;;  %v10924_v27 = vcombine.high %v304_v13, %v308_v48  ;;  %v13363_v15 = vld [vmem:[%s19060_s0 + $0x450] ss:$24 sps:$4 sm:$0xff]  }
  0xd0   :  { %3617 = vmatprep.mubr.bf16.mxu1 %v13329_v35  ;;  %v13369_v35 = vld [vmem:[%s19060_s0 + $0x480] ss:$24 sps:$4 sm:$0xff]   ;;  %v219_v13 = vld [vmem:[%s19059_s1 + $0xa8] sm:$0xff] }
  0xd1   :  { %4100 = vmatmul.mubr.bf16.gmra.mrb[8].mxu0 %v13328_v22  ;;  %v13367_v22 = vld [vmem:[%s19060_s0 + $0x1c4] ss:$24 sps:$4 sm:$0xff]  }
  0xd2   :  { %4109 = vmatprep.mubr.bf16.mxu0 %v13331_v58  ;;  %5340 = vmatpush1.bf16.msra.mxu0 %v10851_v60  ;;  %v13370_v58 = vld [vmem:[%s19060_s0 + $0x1c0] ss:$24 sps:$4 sm:$0xff]   ;;  %v13371_v60 = vld [vmem:[%s19060_s0 + $0x4b4] ss:$24 sps:$4 sm:$0xff]  }
  0xd3   :  { %5341 = vmatprep.subr.bf16.mxu0 %v10860_v4  ;;  %v13373_v4 = vld [vmem:[%s19060_s0 + $0x1f4] ss:$24 sps:$4 sm:$0xff]  }
  0xd6   :  { %5342 = vmatpush1.bf16.msra.mxu0 %v10859_v25  ;;  %v10931_v25 = vcombine.low %v312_v24, %v316_v10 }
  0xd7   :  { %5343 = vmatprep.subr.bf16.mxu0 %v10868_v28  ;;  %3618 = vmatmul.mubr.bf16.gmra.mrb[72].mxu1 %v13333_v20  ;;  %v10932_v28 = vcombine.high %v312_v24, %v316_v10  ;;  %v13375_v20 = vld [vmem:[%s19060_s0 + $0x4b0] ss:$24 sps:$4 sm:$0xff]  }
  0xd8   :  { %3627 = vmatprep.mubr.bf16.mxu1 %v13335_v32  ;;  %v13381_v32 = vld [vmem:[%s19060_s0 + $0x4e0] ss:$24 sps:$4 sm:$0xff]   ;;  %v231_v24 = vld [vmem:[%s19059_s1 + $0x108] sm:$0xff] }
  0xd9   :  { %4110 = vmatmul.mubr.bf16.gmra.mrb[12].mxu0 %v13334_v30  ;;  %v13379_v30 = vld [vmem:[%s19060_s0 + $0x224] ss:$24 sps:$4 sm:$0xff]   ;;  %v235_v10 = vld [vmem:[%s19059_s1 + $0x128] sm:$0xff] }
  0xda   :  { %4119 = vmatprep.mubr.bf16.mxu0 %v13337_v33  ;;  %5344 = vmatpush1.bf16.msra.mxu0 %v10867_v34  ;;  %v13382_v33 = vld [vmem:[%s19060_s0 + $0x220] ss:$24 sps:$4 sm:$0xff]   ;;  %v13383_v34 = vld [vmem:[%s19060_s0 + $0x514] ss:$24 sps:$4 sm:$0xff]  }
  0xdb   :  { %5345 = vmatprep.subr.bf16.mxu0 %v10876_v36  ;;  %v13385_v36 = vld [vmem:[%s19060_s0 + $0x254] ss:$24 sps:$4 sm:$0xff]  }
  0xde   :  { %5346 = vmatpush1.bf16.msra.mxu0 %v10875_v43  ;;  %v195_v43 = vld [vmem:[%s19060_s0 + $0x540] sm:$0xff] }
  0xdf   :  { %5347 = vmatprep.subr.bf16.mxu0 %v10884_v45  ;;  %3628 = vmatmul.mubr.bf16.gmra.mrb[76].mxu1 %v13339_v41  ;;  %v10939_v45 = vcombine.low %v320_v39, %v324_v40  ;;  %v10940_v41 = vcombine.high %v320_v39, %v324_v40  ;;  %v13414_v39 = vld [vmem:[%s19060_s0 + $0x344] ss:$24 sps:$4 sm:$0xff]  }
  0xe0   :  { %3637 = vmatprep.mubr.bf16.mxu1 %v13341_v46  ;;  %v13388_v46 = vld [vmem:[%s19060_s0 + $0x250] ss:$24 sps:$4 sm:$0xff]  }
  0xe1   :  { %4120 = vmatmul.mubr.bf16.gmra.mrb[16].mxu0 %v13340_v44 }
  0xe2   :  { %4129 = vmatprep.mubr.bf16.mxu0 %v13343_v47  ;;  %5348 = vmatpush1.bf16.msra.mxu0 %v10883_v49  ;;  %v14943_v47 = vcombine.high %v195_v43, %v195_v43 }
  0xe3   :  { %5349 = vmatprep.subr.bf16.mxu0 %v10892_v50  ;;  %v13390_v50 = vld [vmem:[%s19060_s0 + $0x284] ss:$24 sps:$4 sm:$0xff]  }
  0xe4   :  { %19085 = vst [vmem:[#allocation2_spill] sm:$0xff] %v14943_v47 }
  0xe6   :  { %5350 = vmatpush1.bf16.msra.mxu0 %v10891_v61  ;;  %v14955_v61 = vcombine.low %v195_v43, %v195_v43  ;;  %v10849_v43 = vcombine.low %v231_v24, %v235_v10 }
  0xe7   :  { %5351 = vmatprep.subr.bf16.mxu0 %v10900_v63  ;;  %3638 = vmatmul.mubr.bf16.gmra.mrb[80].mxu1 %v13345_v54  ;;  %v13393_v54 = vld [vmem:[%s19060_s0 + $0x280] ss:$24 sps:$4 sm:$0xff]  }
  0xe8   :  { %3647 = vmatprep.mubr.bf16.mxu1 %v13347_v57  ;;  %19086 = vst [vmem:[#allocation3_spill] sm:$0xff] %v14955_v61 }
  0xe9   :  { %4130 = vmatmul.mubr.bf16.gmra.mrb[20].mxu0 %v13346_v56  ;;  %v13397_v56 = vld [vmem:[%s19060_s0 + $0x2b4] ss:$24 sps:$4 sm:$0xff]  }
  0xea   :  { %4139 = vmatprep.mubr.bf16.mxu0 %v13349_v59  ;;  %5352 = vmatpush1.bf16.msra.mxu0 %v10899_v9  ;;  %v14976_v59 = vld [vmem:[%s19059_s1 + $0x410] sm:$0xff] }
  0xeb   :  { %5353 = vmatprep.subr.bf16.mxu0 %v10908_v62  ;;  %v14981_v9 = vld [vmem:[%s19059_s1 + $0x430] sm:$0xff] }
  0xec   :  { %v10948_v0 = vcombine.high %v14976_v59, %v14981_v9 }
  0xee   :  { %5354 = vmatpush1.bf16.msra.mxu0 %v10907_v1 }
  0xef   :  { %5355 = vmatprep.subr.bf16.mxu0 %v10916_v31  ;;  %3648 = vmatmul.mubr.bf16.gmra.mrb[84].mxu1 %v13351_v2  ;;  %v207_v2 = vld [vmem:[%s19059_s1 + $0x48] sm:$0xff] }
  0xf0   :  { %3657 = vmatprep.mubr.bf16.mxu1 %v13353_v6  ;;  %v13399_v6 = vld [vmem:[%s19060_s0 + $0x2b0] ss:$24 sps:$4 sm:$0xff]  }
  0xf1   :  { %4140 = vmatmul.mubr.bf16.gmra.mrb[24].mxu0 %v13352_v3  ;;  %v211_v3 = vld [vmem:[%s19059_s1 + $0x68] sm:$0xff] }
  0xf2   :  { %4149 = vmatprep.mubr.bf16.mxu0 %v13355_v19  ;;  %5356 = vmatpush1.bf16.msra.mxu0 %v10915_v21  ;;  %v13400_v19 = vld [vmem:[%s19060_s0 + $0x30c] ss:$24 sps:$4 sm:$0xff]   ;;  %v10825_v48 = vcombine.low %v207_v2, %v211_v3 }
  0xf3   :  { %5357 = vmatprep.subr.bf16.mxu0 %v10924_v27 }
  0xf6   :  { %5358 = vmatpush1.bf16.msra.mxu0 %v10923_v51 }
  0xf7   :  { %3658 = vmatmul.mubr.bf16.gmra.mrb[88].mxu1 %v13357_v11  ;;  %5359 = vmatprep.subr.bf16.mxu0 %v10932_v28  ;;  %v13402_v11 = vld [vmem:[%s19060_s0 + $0x2e4] ss:$24 sps:$4 sm:$0xff]  }
  0xf8   :  { %3667 = vmatprep.mubr.bf16.mxu1 %v13359_v38  ;;  %v10826_v38 = vcombine.high %v207_v2, %v211_v3  ;;  %v13417_v2 = vld [vmem:[%s19060_s0 + $0x340] ss:$24 sps:$4 sm:$0xff]   ;;  %v13418_v3 = vld [vmem:[%s19060_s0 + $0x39c] ss:$24 sps:$4 sm:$0xff]  }
  0xf9   :  { %4150 = vmatmul.mubr.bf16.gmra.mrb[28].mxu0 %v13358_v12 }
  0xfa   :  { %4159 = vmatprep.mubr.bf16.mxu0 %v13361_v42  ;;  %5360 = vmatpush1.bf16.msra.mxu0 %v10931_v25  ;;  %v215_v42 = vld [vmem:[%s19059_s1 + $0x88] sm:$0xff] }
  0xfb   :  { %5361 = vmatprep.subr.bf16.mxu0 %v10940_v41  ;;  %v10834_v27 = vcombine.high %v215_v42, %v219_v13  ;;  %v247_v41 = vld [vmem:[%s19059_s1 + $0x188] sm:$0xff] }
  0xfe   :  { %5362 = vmatpush1.bf16.msra.mxu0 %v10939_v45 }
  0xff   :  { %3668 = vmatmul.mubr.bf16.gmra.mrb[92].mxu1 %v13363_v15  ;;  %5652 = vmatprep.subr.bf16.mxu0 %v10948_v0  ;;  %v13404_v15 = vld [vmem:[%s19060_s0 + $0x308] ss:$24 sps:$4 sm:$0xff]  }
 0x100   :  { %3677 = vmatprep.mubr.bf16.mxu1 %v13365_v17  ;;  %v223_v17 = vld [vmem:[%s19059_s1 + $0xc8] sm:$0xff] }
 0x101   :  { %4160 = vmatmul.mubr.bf16.gmra.mrb[32].mxu0 %v13364_v29  ;;  %v10841_v25 = vcombine.low %v223_v17, %v227_v16  ;;  %v255_v0 = vld [vmem:[%s19059_s1 + $0x1c8] sm:$0xff] }
 0x102   :  { %4169 = vmatprep.mubr.bf16.mxu0 %v13367_v22 }
 0x107   :  { %3678 = vmatmul.mubr.bf16.gmra.mrb[96].mxu1 %v13369_v35  ;;  %v13408_v35 = vld [vmem:[%s19060_s0 + $0x314] ss:$24 sps:$4 sm:$0xff]  }
 0x108   :  { %3687 = vmatprep.mubr.bf16.mxu1 %v13371_v60  ;;  %v10833_v60 = vcombine.low %v215_v42, %v219_v13  ;;  %v263_v13 = vld [vmem:[%s19059_s1 + $0x208] sm:$0xff] }
 0x109   :  { %4170 = vmatmul.mubr.bf16.gmra.mrb[36].mxu0 %v13370_v58 }
 0x10a   :  { %4179 = vmatprep.mubr.bf16.mxu0 %v13373_v4  ;;  %v10842_v4 = vcombine.high %v223_v17, %v227_v16  ;;  %v13422_v16 = vld [vmem:[%s19060_s0 + $0x398] ss:$24 sps:$4 sm:$0xff]  }
 0x10f   :  { %3688 = vmatmul.mubr.bf16.gmra.mrb[100].mxu1 %v13375_v20  ;;  %v10850_v20 = vcombine.high %v231_v24, %v235_v10  ;;  %v13426_v10 = vld [vmem:[%s19060_s0 + $0x3a4] ss:$24 sps:$4 sm:$0xff]  }
 0x110   :  { %3697 = vmatprep.mubr.bf16.mxu1 %v13377_v37 }
 0x111   :  { %4180 = vmatmul.mubr.bf16.gmra.mrb[40].mxu0 %v13376_v23  ;;  %v13410_v23 = vld [vmem:[%s19060_s0 + $0x338] ss:$24 sps:$4 sm:$0xff]  }
 0x112   :  { %4189 = vmatprep.mubr.bf16.mxu0 %v13379_v30  ;;  %v239_v30 = vld [vmem:[%s19059_s1 + $0x148] sm:$0xff] }
 0x117   :  { %3698 = vmatmul.mubr.bf16.gmra.mrb[104].mxu1 %v13381_v32  ;;  %v243_v32 = vld [vmem:[%s19059_s1 + $0x168] sm:$0xff] }
 0x118   :  { %3707 = vmatprep.mubr.bf16.mxu1 %v13383_v34  ;;  %v13412_v34 = vld [vmem:[%s19060_s0 + $0x36c] ss:$24 sps:$4 sm:$0xff]   ;;  %v10858_v45 = vcombine.high %v239_v30, %v243_v32 }
 0x119   :  { %4190 = vmatmul.mubr.bf16.gmra.mrb[44].mxu0 %v13382_v33  ;;  %v13411_v33 = vld [vmem:[%s19060_s0 + $0x310] ss:$24 sps:$4 sm:$0xff]  }
 0x11a   :  { %4199 = vmatprep.mubr.bf16.mxu0 %v13385_v36  ;;  %v14933_v52 = vpop.f32.mrb[0].mxu1 }
 0x11b   :  { %v14938_v44 = vpop.f32.mrb[1].mxu1 }
 0x11c   :  { %v14945_v49 = vpop.f32.mrb[2].mxu1 }
 0x11d   :  { %v14950_v8 = vpop.f32.mrb[3].mxu1 }
 0x11f   :  { %3708 = vmatmul.mubr.bf16.gmra.mrb[108].mxu1 %v13387_v55  ;;  %v251_v55 = vld [vmem:[%s19059_s1 + $0x1a8] sm:$0xff] }
 0x120   :  { %3717 = vmatprep.mubr.bf16.mxu1 %v14943_v47 }
 0x121   :  { %4200 = vmatmul.mubr.bf16.gmra.mrb[48].mxu0 %v13388_v46  ;;  %v10857_v46 = vcombine.low %v239_v30, %v243_v32  ;;  %v279_v30 = vld [vmem:[%s19059_s1 + $0x288] sm:$0xff] }
 0x122   :  { %4209 = vmatprep.mubr.bf16.mxu0 %v13390_v50  ;;  %v14953_v53 = vpop.f32.mrb[4].mxu1  ;;  %v283_v32 = vld [vmem:[%s19059_s1 + $0x2a8] sm:$0xff] }
 0x123   :  { %v14957_v63 = vpop.f32.mrb[5].mxu1 }
 0x124   :  { %v14965_v7 = vpop.f32.mrb[6].mxu1 }
 0x125   :  { %v14970_v57 = vpop.f32.mrb[7].mxu1 }
 0x127   :  { %3718 = vmatmul.mubr.bf16.gmra.mrb[112].mxu1 %v14955_v61  ;;  %v13464_v61 = vld [vmem:[%s19060_s0 + $0x4e8] ss:$24 sps:$4 sm:$0xff]  }
 0x128   :  { %3908 = vmatprep.mubr.bf16.mxu1 %v13396_v5  ;;  %v13416_v5 = vld [vmem:[%s19060_s0 + $0x368] ss:$24 sps:$4 sm:$0xff]  }
 0x129   :  { %4210 = vmatmul.mubr.bf16.gmra.mrb[52].mxu0 %v13393_v54  ;;  %v10866_v54 = vcombine.high %v247_v41, %v251_v55 }
 0x12a   :  { %4219 = vmatprep.mubr.bf16.mxu0 %v13397_v56  ;;  %v14987_v1 = vpop.f32.mrb[8].mxu1 }
 0x12b   :  { %v14992_v31 = vpop.f32.mrb[9].mxu1 }
 0x12c   :  { %v15006_v21 = vpop.f32.mrb[10].mxu1 }
 0x12d   :  { %v15011_v12 = vpop.f32.mrb[11].mxu1 }
 0x12f   :  { %3909 = vmatmul.mubr.bf16.vlgmr.msra.gmra.mrb[60].mxu1 %v13394_v14  ;;  %v259_v14 = vld [vmem:[%s19059_s1 + $0x1e8] sm:$0xff] }
 0x130   :  { %3918 = vmatprep.mubr.bf16.mxu1 %v13400_v19  ;;  %4369 = vmatpush1.bf16.msra.mxu1 %v10817_v26  ;;  %v13406_v26 = vld [vmem:[%s19060_s0 + $0x33c] ss:$24 sps:$4 sm:$0xff]   ;;  %v10874_v42 = vcombine.high %v255_v0, %v259_v14 }
 0x131   :  { %4220 = vmatmul.mubr.bf16.gmra.mrb[56].mxu0 %v13399_v6  ;;  %4370 = vmatprep.subr.bf16.mxu1 %v10826_v38  ;;  %v13420_v19 = vld [vmem:[%s19060_s0 + $0x374] ss:$24 sps:$4 sm:$0xff]   ;;  %v10865_v38 = vcombine.low %v247_v41, %v251_v55 }
 0x132   :  { %4229 = vmatprep.mubr.bf16.mxu0 %v13402_v11  ;;  %v15022_v51 = vpop.f32.mrb[12].mxu1  ;;  %v287_v41 = vld [vmem:[%s19059_s1 + $0x2c8] sm:$0xff] }
 0x133   :  { %v15027_v29 = vpop.f32.mrb[13].mxu1  ;;  %v291_v55 = vld [vmem:[%s19059_s1 + $0x2e8] sm:$0xff] }
 0x134   :  { %v15041_v22 = vpop.f32.mrb[14].mxu1  ;;  %4371 = vmatpush1.bf16.msra.mxu1 %v10825_v48  ;;  %v267_v48 = vld [vmem:[%s19059_s1 + $0x228] sm:$0xff] }
 0x135   :  { %v15046_v58 = vpop.f32.mrb[15].mxu1  ;;  %4372 = vmatprep.subr.bf16.mxu1 %v10834_v27  ;;  %v10873_v27 = vcombine.low %v255_v0, %v259_v14  ;;  %v10882_v17 = vcombine.high %v263_v13, %v267_v48  ;;  %v13432_v0 = vld [vmem:[%s19060_s0 + $0x3d4] ss:$24 sps:$4 sm:$0xff]  }
 0x137   :  { %3919 = vmatmul.mubr.bf16.gmra.mrb[64].mxu1 %v13404_v15 }
 0x138   :  { %3928 = vmatprep.mubr.bf16.mxu1 %v13406_v26  ;;  %4373 = vmatpush1.bf16.msra.mxu1 %v10833_v60  ;;  %v271_v26 = vld [vmem:[%s19059_s1 + $0x248] sm:$0xff] }
 0x139   :  { %4230 = vmatmul.mubr.bf16.gmra.mrb[60].mxu0 %v13405_v18  ;;  %4374 = vmatprep.subr.bf16.mxu1 %v10842_v4  ;;  %v13423_v60 = vld [vmem:[%s19060_s0 + $0x370] ss:$24 sps:$4 sm:$0xff]   ;;  %v13424_v4 = vld [vmem:[%s19060_s0 + $0x3cc] ss:$24 sps:$4 sm:$0xff]  }
 0x13a   :  { %4239 = vmatprep.mubr.bf16.mxu0 %v13408_v35  ;;  %v15054_v28 = vpop.f32.mrb[16].mxu1  ;;  %v275_v35 = vld [vmem:[%s19059_s1 + $0x268] sm:$0xff] }
 0x13b   :  { %v15059_v37 = vpop.f32.mrb[17].mxu1 }
 0x13c   :  { %v15073_v36 = vpop.f32.mrb[18].mxu1  ;;  %4375 = vmatpush1.bf16.msra.mxu1 %v10841_v25 }
 0x13d   :  { %v15078_v40 = vpop.f32.mrb[19].mxu1  ;;  %4376 = vmatprep.subr.bf16.mxu1 %v10850_v20  ;;  %v10881_v20 = vcombine.low %v263_v13, %v267_v48 }
 0x13f   :  { %3929 = vmatmul.mubr.bf16.gmra.mrb[68].mxu1 %v13410_v23  ;;  %v10890_v23 = vcombine.high %v271_v26, %v275_v35 }
 0x140   :  { %3938 = vmatprep.mubr.bf16.mxu1 %v13412_v34  ;;  %4377 = vmatpush1.bf16.msra.mxu1 %v10849_v43  ;;  %v13428_v43 = vld [vmem:[%s19060_s0 + $0x3c8] ss:$24 sps:$4 sm:$0xff]  }
 0x141   :  { %4240 = vmatmul.mubr.bf16.gmra.mrb[64].mxu0 %v13411_v33  ;;  %4378 = vmatprep.subr.bf16.mxu1 %v10858_v45  ;;  %v10889_v33 = vcombine.low %v271_v26, %v275_v35  ;;  %v307_v26 = vld [vmem:[%s19059_s1 + $0x368] sm:$0xff] }
 0x142   :  { %4249 = vmatprep.mubr.bf16.mxu0 %v13414_v39  ;;  %v15086_v50 = vpop.f32.mrb[20].mxu1  ;;  %v10898_v39 = vcombine.high %v279_v30, %v283_v32  ;;  %v13435_v35 = vld [vmem:[%s19060_s0 + $0x3d0] ss:$24 sps:$4 sm:$0xff]  }
 0x143   :  { %v15091_v56 = vpop.f32.mrb[21].mxu1 }
 0x144   :  { %v15105_v6 = vpop.f32.mrb[22].mxu1  ;;  %4379 = vmatpush1.bf16.msra.mxu1 %v10857_v46  ;;  %v13429_v46 = vld [vmem:[%s19060_s0 + $0x3a0] ss:$24 sps:$4 sm:$0xff]  }
 0x145   :  { %v15110_v11 = vpop.f32.mrb[23].mxu1  ;;  %4380 = vmatprep.subr.bf16.mxu1 %v10866_v54  ;;  %v13430_v54 = vld [vmem:[%s19060_s0 + $0x3fc] ss:$24 sps:$4 sm:$0xff]  }
 0x147   :  { %3939 = vmatmul.mubr.bf16.gmra.mrb[72].mxu1 %v13416_v5 }
 0x148   :  { %3948 = vmatprep.mubr.bf16.mxu1 %v13418_v3  ;;  %4381 = vmatpush1.bf16.msra.mxu1 %v10865_v38  ;;  %v10906_v3 = vcombine.high %v287_v41, %v291_v55  ;;  %v299_v38 = vld [vmem:[%s19059_s1 + $0x328] sm:$0xff] }
 0x149   :  { %4250 = vmatmul.mubr.bf16.gmra.mrb[68].mxu0 %v13417_v2  ;;  %4382 = vmatprep.subr.bf16.mxu1 %v10874_v42  ;;  %v10897_v2 = vcombine.low %v279_v30, %v283_v32  ;;  %v10905_v42 = vcombine.low %v287_v41, %v291_v55  ;;  %v311_v32 = vld [vmem:[%s19059_s1 + $0x388] sm:$0xff] }
 0x14a   :  { %4259 = vmatprep.mubr.bf16.mxu0 %v13420_v19  ;;  %v15118_v15 = vpop.f32.mrb[24].mxu1  ;;  %v295_v19 = vld [vmem:[%s19059_s1 + $0x308] sm:$0xff] }
 0x14b   :  { %v15123_v18 = vpop.f32.mrb[25].mxu1  ;;  %v10914_v48 = vcombine.high %v295_v19, %v299_v38  ;;  %v13440_v55 = vld [vmem:[%s19060_s0 + $0x428] ss:$24 sps:$4 sm:$0xff]  }
 0x14c   :  { %v15137_v24 = vpop.f32.mrb[26].mxu1  ;;  %4383 = vmatpush1.bf16.msra.mxu1 %v10873_v27  ;;  %v13434_v27 = vld [vmem:[%s19060_s0 + $0x3f8] ss:$24 sps:$4 sm:$0xff]  }
 0x14d   :  { %v15142_v25 = vpop.f32.mrb[27].mxu1  ;;  %4384 = vmatprep.subr.bf16.mxu1 %v10882_v17 }
 0x14f   :  { %3949 = vmatmul.mubr.bf16.gmra.mrb[76].mxu1 %v13422_v16  ;;  %v303_v16 = vld [vmem:[%s19059_s1 + $0x348] sm:$0xff] }
 0x150   :  { %3958 = vmatprep.mubr.bf16.mxu1 %v13424_v4  ;;  %4385 = vmatpush1.bf16.msra.mxu1 %v10881_v20  ;;  %v10922_v30 = vcombine.high %v303_v16, %v307_v26 }
 0x151   :  { %4260 = vmatmul.mubr.bf16.gmra.mrb[72].mxu0 %v13423_v60  ;;  %4386 = vmatprep.subr.bf16.mxu1 %v10890_v23  ;;  %v13436_v60 = vld [vmem:[%s19060_s0 + $0x42c] ss:$24 sps:$4 sm:$0xff]   ;;  %v10913_v23 = vcombine.low %v295_v19, %v299_v38 }
 0x152   :  { %4269 = vmatprep.mubr.bf16.mxu0 %v13426_v10  ;;  %v15150_v34 = vpop.f32.mrb[28].mxu1  ;;  %v13438_v10 = vld [vmem:[%s19060_s0 + $0x404] ss:$24 sps:$4 sm:$0xff]   ;;  %v13444_v38 = vld [vmem:[%s19060_s0 + $0x434] ss:$24 sps:$4 sm:$0xff]  }
 0x153   :  { %v15155_v45 = vpop.f32.mrb[29].mxu1 }
 0x154   :  { %v15169_v5 = vpop.f32.mrb[30].mxu1  ;;  %4387 = vmatpush1.bf16.msra.mxu1 %v10889_v33  ;;  %v315_v33 = vld [vmem:[%s19059_s1 + $0x3a8] sm:$0xff] }
 0x155   :  { %v15174_v14 = vpop.f32.mrb[31].mxu1  ;;  %4388 = vmatprep.subr.bf16.mxu1 %v10898_v39  ;;  %v10921_v39 = vcombine.low %v303_v16, %v307_v26  ;;  %v10930_v41 = vcombine.high %v311_v32, %v315_v33  ;;  %v15243_v16 = vld [vmem:[%s19059_s1 + $0x408] sm:$0xff] }
 0x156   :  { %v15248_v26 = vld [vmem:[%s19059_s1 + $0x428] sm:$0xff] }
 0x157   :  { %3959 = vmatmul.mubr.bf16.gmra.mrb[80].mxu1 %v13428_v43 }
 0x158   :  { %3968 = vmatprep.mubr.bf16.mxu1 %v13430_v54  ;;  %4389 = vmatpush1.bf16.msra.mxu1 %v10897_v2  ;;  %v319_v54 = vld [vmem:[%s19059_s1 + $0x3c8] sm:$0xff]  ;;  %v13441_v2 = vld [vmem:[%s19060_s0 + $0x400] ss:$24 sps:$4 sm:$0xff]  }
 0x159   :  { %4270 = vmatmul.mubr.bf16.gmra.mrb[76].mxu0 %v13429_v46  ;;  %4390 = vmatprep.subr.bf16.mxu1 %v10906_v3  ;;  %v13442_v3 = vld [vmem:[%s19060_s0 + $0x45c] ss:$24 sps:$4 sm:$0xff]  }
 0x15a   :  { %4279 = vmatprep.mubr.bf16.mxu0 %v13432_v0  ;;  %v15182_v13 = vpop.f32.mrb[32].mxu1  ;;  %v323_v0 = vld [vmem:[%s19059_s1 + $0x3e8] sm:$0xff] }
 0x15b   :  { %v15187_v17 = vpop.f32.mrb[33].mxu1 }
 0x15c   :  { %v15201_v4 = vpop.f32.mrb[34].mxu1  ;;  %4391 = vmatpush1.bf16.msra.mxu1 %v10905_v42 }
 0x15d   :  { %v15206_v20 = vpop.f32.mrb[35].mxu1  ;;  %4392 = vmatprep.subr.bf16.mxu1 %v10914_v48  ;;  %v10929_v48 = vcombine.low %v311_v32, %v315_v33  ;;  %v13447_v32 = vld [vmem:[%s19060_s0 + $0x430] ss:$24 sps:$4 sm:$0xff]   ;;  %v13448_v33 = vld [vmem:[%s19060_s0 + $0x48c] ss:$24 sps:$4 sm:$0xff]  }
 0x15f   :  { %3969 = vmatmul.mubr.bf16.gmra.mrb[84].mxu1 %v13434_v27  ;;  %v10938_v27 = vcombine.high %v319_v54, %v323_v0 }
 0x160   :  { %3978 = vmatprep.mubr.bf16.mxu1 %v13436_v60  ;;  %4393 = vmatpush1.bf16.msra.mxu1 %v10913_v23  ;;  %v13446_v23 = vld [vmem:[%s19060_s0 + $0x458] ss:$24 sps:$4 sm:$0xff]  }
 0x161   :  { %4280 = vmatmul.mubr.bf16.gmra.mrb[80].mxu0 %v13435_v35  ;;  %4394 = vmatprep.subr.bf16.mxu1 %v10922_v30  ;;  %v10937_v35 = vcombine.low %v319_v54, %v323_v0  ;;  %v13452_v0 = vld [vmem:[%s19060_s0 + $0x488] ss:$24 sps:$4 sm:$0xff]  }
 0x162   :  { %4289 = vmatprep.mubr.bf16.mxu0 %v13438_v10  ;;  %v15214_v43 = vpop.f32.mrb[36].mxu1  ;;  %v10946_v10 = vcombine.high %v15243_v16, %v15248_v26 }
 0x163   :  { %v15219_v46 = vpop.f32.mrb[37].mxu1 }
 0x164   :  { %v15233_v19 = vpop.f32.mrb[38].mxu1  ;;  %4395 = vmatpush1.bf16.msra.mxu1 %v10921_v39 }
 0x165   :  { %v15238_v42 = vpop.f32.mrb[39].mxu1  ;;  %4396 = vmatprep.subr.bf16.mxu1 %v10930_v41  ;;  %v13450_v41 = vld [vmem:[%s19060_s0 + $0x464] ss:$24 sps:$4 sm:$0xff]  }
 0x167   :  { %3979 = vmatmul.mubr.bf16.gmra.mrb[88].mxu1 %v13440_v55 }
 0x168   :  { %3988 = vmatprep.mubr.bf16.mxu1 %v13442_v3  ;;  %4397 = vmatpush1.bf16.msra.mxu1 %v10929_v48  ;;  %v13453_v3 = vld [vmem:[%s19060_s0 + $0x460] ss:$24 sps:$4 sm:$0xff]  }
 0x169   :  { %4290 = vmatmul.mubr.bf16.gmra.mrb[84].mxu0 %v13441_v2  ;;  %4398 = vmatprep.subr.bf16.mxu1 %v10938_v27  ;;  %v13456_v27 = vld [vmem:[%s19060_s0 + $0x494] ss:$24 sps:$4 sm:$0xff]  }
 0x16a   :  { %4299 = vmatprep.mubr.bf16.mxu0 %v13444_v38  ;;  %v15250_v60 = vpop.f32.mrb[40].mxu1  ;;  %v13454_v38 = vld [vmem:[%s19060_s0 + $0x4bc] ss:$24 sps:$4 sm:$0xff]  }
 0x16b   :  { %v15257_v30 = vpop.f32.mrb[41].mxu1 }
 0x16c   :  { %19087 = vst [vmem:[#allocation4_spill] sm:$0xff] %v15257_v30  ;;  %v15265_v39 = vpop.f32.mrb[42].mxu1  ;;  %4399 = vmatpush1.bf16.msra.mxu1 %v10937_v35 }
 0x16d   :  { %19088 = vst [vmem:[#allocation5_spill] sm:$0xff] %v15265_v39  ;;  %v15270_v55 = vpop.f32.mrb[43].mxu1  ;;  %4689 = vmatprep.subr.bf16.mxu1 %v10946_v10 }
 0x16e   :  { %19089 = vst [vmem:[#allocation6_spill] sm:$0xff] %v15270_v55 }
 0x16f   :  { %3989 = vmatmul.mubr.bf16.gmra.mrb[92].mxu1 %v13446_v23  ;;  %v13458_v23 = vld [vmem:[%s19060_s0 + $0x4b8] ss:$24 sps:$4 sm:$0xff]  }
 0x170   :  { %3998 = vmatprep.mubr.bf16.mxu1 %v13448_v33  ;;  %v13459_v33 = vld [vmem:[%s19060_s0 + $0x490] ss:$24 sps:$4 sm:$0xff]  }
 0x171   :  { %4300 = vmatmul.mubr.bf16.gmra.mrb[88].mxu0 %v13447_v32 }
 0x172   :  { %4309 = vmatprep.mubr.bf16.mxu0 %v13450_v41  ;;  %v15272_v54 = vpop.f32.mrb[44].mxu1  ;;  %v13460_v41 = vld [vmem:[%s19060_s0 + $0x4ec] ss:$24 sps:$4 sm:$0xff]  }
 0x173   :  { %19090 = vst [vmem:[#allocation7_spill] sm:$0xff] %v15272_v54  ;;  %v15277_v2 = vpop.f32.mrb[45].mxu1 }
 0x174   :  { %19091 = vst [vmem:[#allocation8_spill] sm:$0xff] %v15277_v2  ;;  %v15285_v48 = vpop.f32.mrb[46].mxu1 }
 0x175   :  { %19092 = vst [vmem:[#allocation9_spill] sm:$0xff] %v15285_v48  ;;  %v15290_v35 = vpop.f32.mrb[47].mxu1 }
 0x176   :  { %19093 = vst [vmem:[#allocation10_spill] sm:$0xff] %v15290_v35 }
 0x177   :  { %3999 = vmatmul.mubr.bf16.gmra.mrb[96].mxu1 %v13452_v0 }
 0x178   :  { %4008 = vmatprep.mubr.bf16.mxu1 %v13454_v38 }
 0x179   :  { %4310 = vmatmul.mubr.bf16.gmra.mrb[92].mxu0 %v13453_v3  ;;  %v13462_v3 = vld [vmem:[%s19060_s0 + $0x4c4] ss:$24 sps:$4 sm:$0xff]  }
 0x17a   :  { %4319 = vmatprep.mubr.bf16.mxu0 %v13456_v27  ;;  %v15292_v10 = vpop.f32.mrb[48].mxu1  ;;  %v584_v27 = vlaneseq }
 0x17b   :  { %19094 = vst [vmem:[#allocation11_spill] sm:$0xff] %v15292_v10  ;;  %v15297_v32 = vpop.f32.mrb[49].mxu1 }
 0x17c   :  { %19095 = vst [vmem:[#allocation12_spill] sm:$0xff] %v15297_v32  ;;  %v15305_v0 = vpop.f32.mrb[50].mxu1 }
 0x17d   :  { %19096 = vst [vmem:[#allocation13_spill] sm:$0xff] %v15305_v0  ;;  %v15310_v38 = vpop.f32.mrb[51].mxu1  ;;  %v13465_v0 = vld [vmem:[%s19060_s0 + $0x4c0] ss:$24 sps:$4 sm:$0xff]  }
 0x17e   :  { %19097 = vst [vmem:[#allocation14_spill] sm:$0xff] %v15310_v38 }
 0x17f   :  { %4009 = vmatmul.mubr.bf16.gmra.mrb[100].mxu1 %v13458_v23  ;;  %v13466_v23 = vld [vmem:[%s19060_s0 + $0x51c] ss:$24 sps:$4 sm:$0xff]  }
 0x180   :  { %4018 = vmatprep.mubr.bf16.mxu1 %v13460_v41  ;;  %v13468_v41 = vld [vmem:[%s19060_s0 + $0x4f4] ss:$24 sps:$4 sm:$0xff]  }
 0x181   :  { %4320 = vmatmul.mubr.bf16.gmra.mrb[96].mxu0 %v13459_v33 }
 0x182   :  { %4329 = vmatprep.mubr.bf16.mxu0 %v13462_v3  ;;  %v15312_v62 = vpop.f32.mrb[52].mxu1 }
 0x183   :  { %19098 = vst [vmem:[#allocation15_spill] sm:$0xff] %v15312_v62  ;;  %v15317_v47 = vpop.f32.mrb[53].mxu1  ;;  %v15332_v62 = vshrl.u32 %v584_v27, 7  ;;  %v13470_v27 = vld [vmem:[%s19060_s0 + $0x518] ss:$24 sps:$4 sm:$0xff]  }
 0x184   :  { %19099 = vst [vmem:[#allocation16_spill] sm:$0xff] %v15317_v47  ;;  %v15325_v33 = vpop.f32.mrb[54].mxu1  ;;  %v196_v47 = vld [vmem:[%s19060_s0 + $0x548] sm:$0xff] }
 0x185   :  { %19100 = vst [vmem:[#allocation17_spill] sm:$0xff] %v15325_v33  ;;  %v15330_v3 = vpop.f32.mrb[55].mxu1  ;;  %19102 = vst [vmem:[#allocation19_spill] sm:$0xff] %v15332_v62  ;;  %v582_v33 = vld [vmem:[%s19061_s2] sm:$0xff]  ;;  %v19108_v10 = vsub.s32 0, %v15332_v62  ;;  %v15375_v2 = vcombine.low %v196_v47, %v196_v47 }
 0x186   :  { %19101 = vst [vmem:[#allocation18_spill] sm:$0xff] %v15330_v3 }
 0x187   :  { %4019 = vmatmul.mubr.bf16.gmra.mrb[104].mxu1 %v13464_v61  ;;  %v15363_v35 = vrot.slane %v582_v33, %v19108_v10  ;;  %19109 = vst [vmem:[#allocation25_spill] sm:$0xff] %v15375_v2 }
 0x188   :  { %4028 = vmatprep.mubr.bf16.mxu1 %v13466_v23  ;;  %v13471_v23 = vld [vmem:[%s19060_s0 + $0x4f0] ss:$24 sps:$4 sm:$0xff]  }
 0x189   :  { %4330 = vmatmul.mubr.bf16.gmra.mrb[100].mxu0 %v13465_v0  ;;  %v19071_v0 = vsub.s32 1, %v15332_v62 }
 0x18a   :  { %4339 = vmatprep.mubr.bf16.mxu0 %v13468_v41  ;;  %v15338_v32 = vpop.f32.mrb[56].mxu1  ;;  %v15352_v41 = vcombine.high %v196_v47, %v196_v47 }
 0x18b   :  { %19103 = vst [vmem:[#allocation20_spill] sm:$0xff] %v15338_v32  ;;  %v15346_v61 = vpop.f32.mrb[57].mxu1  ;;  %v13473_v32 = vld [vmem:[%s19060_s0 + $0x524] ss:$24 sps:$4 sm:$0xff]  }
 0x18c   :  { %19104 = vst [vmem:[#allocation21_spill] sm:$0xff] %v15346_v61  ;;  %19105 = vst [vmem:[#allocation22_spill] sm:$0xff] %v15352_v41  ;;  %v15354_v38 = vpop.f32.mrb[58].mxu1  ;;  %v15367_v61 = vrot.slane %v582_v33, %v19071_v0  ;;  %v3444_v33 = vadd.f32 %v14945_v49, %v15363_v35 }
 0x18d   :  { %19106 = vst [vmem:[#allocation23_spill] sm:$0xff] %v15354_v38  ;;  %v15359_v3 = vpop.f32.mrb[59].mxu1  ;;  %v3440_v38 = vadd.f32 %v14933_v52, %v15363_v35 }
 0x18e   :  { %19107 = vst [vmem:[#allocation24_spill] sm:$0xff] %v15359_v3  ;;  %v197_v3 = vld [vmem:[%s19060_s0 + $0x550] sm:$0xff]  ;;  %v3442_v10 = vadd.f32 %v14938_v44, %v15367_v61  ;;  %v3446_v62 = vadd.f32 %v14950_v8, %v15367_v61  ;;  %v3450_v8 = vadd.f32 %v14953_v53, %v15363_v35  ;;  %v3454_v53 = vadd.f32 %v14965_v7, %v15363_v35  ;;  %v343_v7 = vld [vmem:[%s19059_s1 + $0x488] sm:$0xff] }
 0x18f   :  { %4029 = vmatmul.mubr.bf16.gmra.mrb[108].mxu1 %v13470_v27  ;;  %v15384_v0 = vcombine.high %v197_v3, %v197_v3 }
 0x190   :  { %4038 = vmatprep.mubr.bf16.mxu1 %v15352_v41 }
 0x191   :  { %4340 = vmatmul.mubr.bf16.gmra.mrb[104].mxu0 %v13471_v23  ;;  %19110 = vst [vmem:[#allocation26_spill] sm:$0xff] %v15384_v0 }
 0x192   :  { %4349 = vmatprep.mubr.bf16.mxu0 %v13473_v32  ;;  %v13476_v32 = vld [vmem:[%s19060_s0 + $0x520] ss:$24 sps:$4 sm:$0xff]  }
 0x194   :  { %v4081_v48 = vpop.f32.mrb[0].mxu0 }
 0x195   :  { %v11377_v27 = vadd.f32 %v4081_v48, %v3440_v38  ;;  %v4083_v23 = vpop.f32.mrb[1].mxu0  ;;  %v13687_v48 = vld [vmem:[%s19060_s0 + $0x4] ss:$24 sps:$4 sm:$0xff]  }
 0x196   :  { %v4085_v52 = vpop.f32.mrb[2].mxu0  ;;  %v11379_v47 = vadd.f32 %v4083_v23, %v3442_v10 }
 0x197   :  { %v11381_v41 = vadd.f32 %v4085_v52, %v3444_v33  ;;  %v4087_v54 = vpop.f32.mrb[3].mxu0  ;;  %4039 = vmatmul.mubr.bf16.gmra.mrb[112].mxu1 %v15375_v2  ;;  %v7257_v55 = vmax.f32 %v11377_v27, 0.0  ;;  %v3452_v33 = vadd.f32 %v14957_v63, %v15367_v61  ;;  %v10945_v52 = vcombine.low %v15243_v16, %v15248_v26  ;;  %v13688_v63 = vld [vmem:[%s19060_s0] ss:$24 sps:$4 sm:$0xff]   ;;  %v347_v16 = vld [vmem:[%s19059_s1 + $0x4a8] sm:$0xff] }
 0x198   :  { %v11383_v44 = vadd.f32 %v4087_v54, %v3446_v62  ;;  %4400 = vmatprep.mubr.bf16.mxu1 %v13687_v48  ;;  %v7258_v38 = vmax.f32 %v11379_v47, 0.0  ;;  %v335_v62 = vld [vmem:[%s19059_s1 + $0x448] sm:$0xff]  ;;  %v3456_v47 = vadd.f32 %v14970_v57, %v15367_v61 }
 0x199   :  { %v7265_v49 = vmax.f32 %v11381_v41, 0.0  ;;  %4350 = vmatmul.mubr.bf16.gmra.mrb[108].mxu0 %v13476_v32  ;;  %v339_v54 = vld [vmem:[%s19059_s1 + $0x468] sm:$0xff] }
 0x19a   :  { %4359 = vmatprep.mubr.bf16.mxu0 %v15384_v0  ;;  %v7266_v39 = vmax.f32 %v11383_v44, 0.0  ;;  %v13689_v57 = vld [vmem:[%s19060_s0 + $0x34] ss:$24 sps:$4 sm:$0xff]  }
 0x19b   :  { %v15393_v30 = vpack.c.bf16 %v7265_v49, %v7257_v55  ;;  %v15407_v55 = vcombine.low %v197_v3, %v197_v3  ;;  %v10954_v49 = vcombine.high %v335_v62, %v339_v54 }
 0x19c   :  { %v4091_v10 = vpop.f32.mrb[4].mxu0  ;;  %v15403_v41 = vpack.c.bf16 %v7266_v39, %v7258_v38 }
 0x19d   :  { %19111 = vst [vmem:[#allocation27_spill] sm:$0xff] %v15393_v30  ;;  %v4093_v27 = vpop.f32.mrb[5].mxu0  ;;  %19113 = vst [vmem:[#allocation29_spill] sm:$0xff] %v15407_v55  ;;  %v11385_v23 = vadd.f32 %v4091_v10, %v3450_v8  ;;  %v10953_v10 = vcombine.low %v335_v62, %v339_v54  ;;  %v336_v30 = vld [vmem:[%s19059_s1 + $0x450] sm:$0xff]  ;;  %v3462_v62 = vadd.f32 %v14992_v31, %v15367_v61 }
 0x19e   :  { %19112 = vst [vmem:[#allocation28_spill] sm:$0xff] %v15403_v41  ;;  %v4095_v32 = vpop.f32.mrb[6].mxu0  ;;  %v11387_v44 = vadd.f32 %v4093_v27, %v3452_v33 }
 0x19f   :  { %v4097_v39 = vpop.f32.mrb[7].mxu0  ;;  %v11389_v38 = vadd.f32 %v4095_v32, %v3454_v53  ;;  %4401 = vmatmul.mubr.bf16.vlgmr.msra.gmra.mrb[116].mxu1 %v13688_v63  ;;  %v7273_v3 = vmax.f32 %v11385_v23, 0.0  ;;  %v10962_v53 = vcombine.high %v343_v7, %v347_v16 }
 0x1a0   :  { %v11391_v26 = vadd.f32 %v4097_v39, %v3456_v47  ;;  %4410 = vmatprep.mubr.bf16.mxu1 %v13689_v57  ;;  %4690 = vmatpush1.bf16.msra.mxu1 %v10945_v52  ;;  %v7274_v33 = vmax.f32 %v11387_v44, 0.0  ;;  %v3460_v47 = vadd.f32 %v14987_v1, %v15363_v35  ;;  %v351_v52 = vld [vmem:[%s19059_s1 + $0x4c8] sm:$0xff]  ;;  %v3464_v44 = vadd.f32 %v15006_v21, %v15363_v35  ;;  %v344_v21 = vld [vmem:[%s19059_s1 + $0x490] sm:$0xff] }
 0x1a1   :  { %4360 = vmatmul.mubr.bf16.gmra.mrb[112].mxu0 %v15407_v55  ;;  %v7281_v8 = vmax.f32 %v11389_v38, 0.0  ;;  %4691 = vmatprep.subr.bf16.mxu1 %v10954_v49  ;;  %v355_v1 = vld [vmem:[%s19059_s1 + $0x4e8] sm:$0xff] }
 0x1a2   :  { %5363 = vmatprep.mubr.bf16.mxu0 %v13687_v48  ;;  %v7282_v27 = vmax.f32 %v11391_v26, 0.0  ;;  %v340_v48 = vld [vmem:[%s19059_s1 + $0x470] sm:$0xff]  ;;  %v3466_v26 = vadd.f32 %v15011_v12, %v15367_v61  ;;  %v10970_v12 = vcombine.high %v351_v52, %v355_v1 }
 0x1a3   :  { %v15428_v32 = vpack.c.bf16 %v7281_v8, %v7273_v3  ;;  %v10956_v8 = vcombine.high %v336_v30, %v340_v48 }
 0x1a4   :  { %v4101_v39 = vpop.f32.mrb[8].mxu0  ;;  %v15438_v23 = vpack.c.bf16 %v7282_v27, %v7274_v33  ;;  %4692 = vmatpush1.bf16.msra.mxu1 %v10953_v10  ;;  %v10961_v33 = vcombine.low %v343_v7, %v347_v16  ;;  %v348_v10 = vld [vmem:[%s19059_s1 + $0x4b0] sm:$0xff]  ;;  %v13691_v7 = vld [vmem:[%s19060_s0 + $0x64] ss:$24 sps:$4 sm:$0xff]   ;;  %v359_v16 = vld [vmem:[%s19059_s1 + $0x508] sm:$0xff] }
 0x1a5   :  { %19114 = vst [vmem:[#allocation30_spill] sm:$0xff] %v15428_v32  ;;  %v4103_v54 = vpop.f32.mrb[9].mxu0  ;;  %v11393_v49 = vadd.f32 %v4101_v39, %v3460_v47  ;;  %4693 = vmatprep.subr.bf16.mxu1 %v10962_v53  ;;  %v13690_v32 = vld [vmem:[%s19060_s0 + $0x30] ss:$24 sps:$4 sm:$0xff]  }
 0x1a6   :  { %19115 = vst [vmem:[#allocation31_spill] sm:$0xff] %v15438_v23  ;;  %v4105_v38 = vpop.f32.mrb[10].mxu0  ;;  %v11395_v3 = vadd.f32 %v4103_v54, %v3462_v62  ;;  %v363_v53 = vld [vmem:[%s19059_s1 + $0x528] sm:$0xff]  ;;  %v19116_v54 = vcombine.low %v14976_v59, %v14981_v9  ;;  %v10969_v23 = vcombine.low %v351_v52, %v355_v1  ;;  %v356_v59 = vld [vmem:[%s19059_s1 + $0x4f0] sm:$0xff]  ;;  %v3474_v1 = vadd.f32 %v15041_v22, %v15363_v35 }
 0x1a7   :  { %v4107_v31 = vpop.f32.mrb[11].mxu0  ;;  %v11397_v27 = vadd.f32 %v4105_v38, %v3464_v44  ;;  %4411 = vmatmul.mubr.bf16.gmra.mrb[120].mxu1 %v13690_v32  ;;  %v7289_v39 = vmax.f32 %v11393_v49, 0.0  ;;  %v352_v49 = vld [vmem:[%s19059_s1 + $0x4d0] sm:$0xff]  ;;  %v10978_v9 = vcombine.high %v359_v16, %v363_v53  ;;  %v371_v52 = vld [vmem:[%s19059_s1 + $0x568] sm:$0xff] }
 0x1a8   :  { %v11399_v47 = vadd.f32 %v4107_v31, %v3466_v26  ;;  %4420 = vmatprep.mubr.bf16.mxu1 %v13691_v7  ;;  %v7290_v44 = vmax.f32 %v11395_v3, 0.0  ;;  %v3470_v26 = vadd.f32 %v15022_v51, %v15363_v35  ;;  %v10964_v31 = vcombine.high %v344_v21, %v348_v10  ;;  %4694 = vmatpush1.bf16.msra.mxu1 %v10961_v33  ;;  %v360_v22 = vld [vmem:[%s19059_s1 + $0x510] sm:$0xff] }
 0x1a9   :  { %5364 = vmatmul.mubr.bf16.vlgmr.msra.gmra.mrb[116].mxu0 %v13688_v63  ;;  %v7297_v62 = vmax.f32 %v11397_v27, 0.0  ;;  %v10955_v63 = vcombine.low %v336_v30, %v340_v48  ;;  %4695 = vmatprep.subr.bf16.mxu1 %v10970_v12  ;;  %v3472_v51 = vadd.f32 %v15027_v29, %v15367_v61  ;;  %v367_v48 = vld [vmem:[%s19059_s1 + $0x548] sm:$0xff]  ;;  %v10963_v33 = vcombine.low %v344_v21, %v348_v10 }
 0x1aa   :  { %5653 = vmatpush1.bf16.msra.mxu0 %v19116_v54  ;;  %5373 = vmatprep.mubr.bf16.mxu0 %v13689_v57  ;;  %v7298_v38 = vmax.f32 %v11399_v47, 0.0  ;;  %v3476_v27 = vadd.f32 %v15046_v58, %v15367_v61  ;;  %v10972_v47 = vcombine.high %v352_v49, %v356_v59  ;;  %v13692_v54 = vld [vmem:[%s19060_s0 + $0x60] ss:$24 sps:$4 sm:$0xff]   ;;  %v364_v58 = vld [vmem:[%s19059_s1 + $0x530] sm:$0xff]  ;;  %v375_v10 = vld [vmem:[%s19059_s1 + $0x588] sm:$0xff] }
 0x1ab   :  { %5654 = vmatprep.subr.bf16.mxu0 %v10956_v8  ;;  %v15475_v41 = vpack.c.bf16 %v7297_v62, %v7289_v39  ;;  %v10977_v39 = vcombine.low %v359_v16, %v363_v53  ;;  %v379_v16 = vld [vmem:[%s19059_s1 + $0x5a8] sm:$0xff] }
 0x1ac   :  { %v4111_v55 = vpop.f32.mrb[12].mxu0  ;;  %v15483_v30 = vpack.c.bf16 %v7298_v38, %v7290_v44  ;;  %4696 = vmatpush1.bf16.msra.mxu1 %v10969_v23  ;;  %v13693_v23 = vld [vmem:[%s19060_s0 + $0x94] ss:$24 sps:$4 sm:$0xff]   ;;  %v10971_v44 = vcombine.low %v352_v49, %v356_v59  ;;  %v10994_v49 = vcombine.high %v375_v10, %v379_v16 }
 0x1ad   :  { %v4113_v57 = vpop.f32.mrb[13].mxu0  ;;  %v11401_v3 = vadd.f32 %v4111_v55, %v3470_v26  ;;  %4697 = vmatprep.subr.bf16.mxu1 %v10978_v9  ;;  %v10986_v55 = vcombine.high %v367_v48, %v371_v52  ;;  %v3480_v26 = vadd.f32 %v15054_v28, %v15363_v35  ;;  %v10985_v9 = vcombine.low %v367_v48, %v371_v52  ;;  %v383_v48 = vld [vmem:[%s19059_s1 + $0x5c8] sm:$0xff] }
 0x1ae   :  { %v4115_v8 = vpop.f32.mrb[14].mxu0  ;;  %5655 = vmatpush1.bf16.msra.mxu0 %v10955_v63  ;;  %v11403_v29 = vadd.f32 %v4113_v57, %v3472_v51  ;;  %v3482_v28 = vadd.f32 %v15059_v37, %v15367_v61  ;;  %v387_v52 = vld [vmem:[%s19059_s1 + $0x5e8] sm:$0xff] }
 0x1af   :  { %v4117_v12 = vpop.f32.mrb[15].mxu0  ;;  %5656 = vmatprep.subr.bf16.mxu0 %v10964_v31  ;;  %v11405_v62 = vadd.f32 %v4115_v8, %v3474_v1  ;;  %4421 = vmatmul.mubr.bf16.gmra.mrb[124].mxu1 %v13692_v54  ;;  %v7305_v53 = vmax.f32 %v11401_v3, 0.0  ;;  %v10980_v31 = vcombine.high %v360_v22, %v364_v58  ;;  %v368_v1 = vld [vmem:[%s19059_s1 + $0x550] sm:$0xff]  ;;  %v3484_v8 = vadd.f32 %v15073_v36, %v15363_v35 }
 0x1b0   :  { %v11407_v21 = vadd.f32 %v4117_v12, %v3476_v27  ;;  %4430 = vmatprep.mubr.bf16.mxu1 %v13693_v23  ;;  %v7306_v38 = vmax.f32 %v11403_v29, 0.0  ;;  %4698 = vmatpush1.bf16.msra.mxu1 %v10977_v39  ;;  %v10979_v29 = vcombine.low %v360_v22, %v364_v58  ;;  %v3486_v12 = vadd.f32 %v15078_v40, %v15367_v61  ;;  %v376_v36 = vld [vmem:[%s19059_s1 + $0x590] sm:$0xff] }
 0x1b1   :  { %5374 = vmatmul.mubr.bf16.gmra.mrb[120].mxu0 %v13690_v32  ;;  %v7313_v63 = vmax.f32 %v11405_v62, 0.0  ;;  %4699 = vmatprep.subr.bf16.mxu1 %v10986_v55  ;;  %v10993_v62 = vcombine.low %v375_v10, %v379_v16  ;;  %v380_v40 = vld [vmem:[%s19059_s1 + $0x5b0] sm:$0xff]  ;;  %v11002_v22 = vcombine.high %v383_v48, %v387_v52  ;;  %v13695_v10 = vld [vmem:[%s19060_s0 + $0xc4] ss:$24 sps:$4 sm:$0xff]   ;;  %v391_v16 = vld [vmem:[%s19059_s1 + $0x608] sm:$0xff] }
 0x1b2   :  { %5383 = vmatprep.mubr.bf16.mxu0 %v13691_v7  ;;  %5657 = vmatpush1.bf16.msra.mxu0 %v10963_v33  ;;  %v7314_v32 = vmax.f32 %v11407_v21, 0.0  ;;  %v372_v7 = vld [vmem:[%s19059_s1 + $0x570] sm:$0xff] }
 0x1b3   :  { %5658 = vmatprep.subr.bf16.mxu0 %v10972_v47  ;;  %v15517_v51 = vpack.c.bf16 %v7313_v63, %v7305_v53  ;;  %v10988_v39 = vcombine.high %v368_v1, %v372_v7  ;;  %v13694_v21 = vld [vmem:[%s19060_s0 + $0x90] ss:$24 sps:$4 sm:$0xff]  }
 0x1b4   :  { %v4121_v57 = vpop.f32.mrb[16].mxu0  ;;  %v15525_v59 = vpack.c.bf16 %v7314_v32, %v7306_v38  ;;  %4700 = vmatpush1.bf16.msra.mxu1 %v10985_v9  ;;  %v395_v53 = vld [vmem:[%s19059_s1 + $0x628] sm:$0xff]  ;;  %v10987_v38 = vcombine.low %v368_v1, %v372_v7  ;;  %v11001_v9 = vcombine.low %v383_v48, %v387_v52 }
 0x1b5   :  { %v4123_v3 = vpop.f32.mrb[17].mxu0  ;;  %v11409_v33 = vadd.f32 %v4121_v57, %v3480_v26  ;;  %4701 = vmatprep.subr.bf16.mxu1 %v10994_v49  ;;  %v3490_v26 = vadd.f32 %v15086_v50, %v15363_v35  ;;  %v11010_v1 = vcombine.high %v391_v16, %v395_v53  ;;  %v3492_v50 = vadd.f32 %v15091_v56, %v15367_v61  ;;  %v399_v48 = vld [vmem:[%s19059_s1 + $0x648] sm:$0xff] }
 0x1b6   :  { %v4125_v27 = vpop.f32.mrb[18].mxu0  ;;  %5659 = vmatpush1.bf16.msra.mxu0 %v10971_v44  ;;  %v11411_v37 = vadd.f32 %v4123_v3, %v3482_v28  ;;  %v384_v28 = vld [vmem:[%s19059_s1 + $0x5d0] sm:$0xff]  ;;  %v403_v52 = vld [vmem:[%s19059_s1 + $0x668] sm:$0xff] }
 0x1b7   :  { %v4127_v47 = vpop.f32.mrb[19].mxu0  ;;  %5660 = vmatprep.subr.bf16.mxu0 %v10980_v31  ;;  %v11413_v55 = vadd.f32 %v4125_v27, %v3484_v8  ;;  %4431 = vmatmul.mubr.bf16.gmra.mrb[128].mxu1 %v13694_v21  ;;  %v7321_v63 = vmax.f32 %v11409_v33, 0.0  ;;  %v10996_v31 = vcombine.high %v376_v36, %v380_v40  ;;  %v3494_v8 = vadd.f32 %v15105_v6, %v15363_v35  ;;  %v392_v6 = vld [vmem:[%s19059_s1 + $0x610] sm:$0xff] }
 0x1b8   :  { %v11415_v58 = vadd.f32 %v4127_v47, %v3486_v12  ;;  %4440 = vmatprep.mubr.bf16.mxu1 %v13695_v10  ;;  %v7322_v32 = vmax.f32 %v11411_v37, 0.0  ;;  %4702 = vmatpush1.bf16.msra.mxu1 %v10993_v62  ;;  %v3496_v12 = vadd.f32 %v15110_v11, %v15367_v61  ;;  %v396_v11 = vld [vmem:[%s19059_s1 + $0x630] sm:$0xff] }
 0x1b9   :  { %5384 = vmatmul.mubr.bf16.gmra.mrb[124].mxu0 %v13692_v54  ;;  %v7329_v44 = vmax.f32 %v11413_v55, 0.0  ;;  %4703 = vmatprep.subr.bf16.mxu1 %v11002_v22  ;;  %v13696_v55 = vld [vmem:[%s19060_s0 + $0xc0] ss:$24 sps:$4 sm:$0xff]   ;;  %v13697_v22 = vld [vmem:[%s19060_s0 + $0xf4] ss:$24 sps:$4 sm:$0xff]  }
 0x1ba   :  { %5393 = vmatprep.mubr.bf16.mxu0 %v13693_v23  ;;  %5661 = vmatpush1.bf16.msra.mxu0 %v10979_v29  ;;  %v7330_v54 = vmax.f32 %v11415_v58, 0.0  ;;  %v388_v23 = vld [vmem:[%s19059_s1 + $0x5f0] sm:$0xff]  ;;  %v10995_v29 = vcombine.low %v376_v36, %v380_v40  ;;  %v11018_v36 = vcombine.high %v399_v48, %v403_v52 }
 0x1bb   :  { %5662 = vmatprep.subr.bf16.mxu0 %v10988_v39  ;;  %v15559_v57 = vpack.c.bf16 %v7329_v44, %v7321_v63  ;;  %v11004_v47 = vcombine.high %v384_v28, %v388_v23  ;;  %v11009_v39 = vcombine.low %v391_v16, %v395_v53  ;;  %v3500_v53 = vadd.f32 %v15118_v15, %v15363_v35  ;;  %v404_v15 = vld [vmem:[%s19059_s1 + $0x670] sm:$0xff] }
 0x1bc   :  { %v4131_v49 = vpop.f32.mrb[20].mxu0  ;;  %v15567_v7 = vpack.c.bf16 %v7330_v54, %v7322_v32  ;;  %4704 = vmatpush1.bf16.msra.mxu1 %v11001_v9  ;;  %v11003_v63 = vcombine.low %v384_v28, %v388_v23  ;;  %v11012_v32 = vcombine.high %v392_v6, %v396_v11  ;;  %v11017_v54 = vcombine.low %v399_v48, %v403_v52 }
 0x1bd   :  { %v4133_v3 = vpop.f32.mrb[21].mxu0  ;;  %v11417_v33 = vadd.f32 %v4131_v49, %v3490_v26  ;;  %4705 = vmatprep.subr.bf16.mxu1 %v11010_v1  ;;  %v3502_v9 = vadd.f32 %v15123_v18, %v15367_v61  ;;  %v3504_v49 = vadd.f32 %v15137_v24, %v15363_v35  ;;  %v407_v18 = vld [vmem:[%s19059_s1 + $0x688] sm:$0xff] }
 0x1be   :  { %v4135_v27 = vpop.f32.mrb[22].mxu0  ;;  %5663 = vmatpush1.bf16.msra.mxu0 %v10987_v38  ;;  %v11419_v56 = vadd.f32 %v4133_v3, %v3492_v50  ;;  %v11011_v50 = vcombine.low %v392_v6, %v396_v11  ;;  %v3506_v3 = vadd.f32 %v15142_v25, %v15367_v61  ;;  %v411_v24 = vld [vmem:[%s19059_s1 + $0x6a8] sm:$0xff]  ;;  %v408_v25 = vld [vmem:[%s19059_s1 + $0x690] sm:$0xff] }
 0x1bf   :  { %v4137_v37 = vpop.f32.mrb[23].mxu0  ;;  %5664 = vmatprep.subr.bf16.mxu0 %v10996_v31  ;;  %v11421_v62 = vadd.f32 %v4135_v27, %v3494_v8  ;;  %4441 = vmatmul.mubr.bf16.gmra.mrb[132].mxu1 %v13696_v55  ;;  %v7337_v58 = vmax.f32 %v11417_v33, 0.0  ;;  %v400_v31 = vld [vmem:[%s19059_s1 + $0x650] sm:$0xff] }
 0x1c0   :  { %v11423_v40 = vadd.f32 %v4137_v37, %v3496_v12  ;;  %4450 = vmatprep.mubr.bf16.mxu1 %v13697_v22  ;;  %v7338_v44 = vmax.f32 %v11419_v56, 0.0  ;;  %4706 = vmatpush1.bf16.msra.mxu1 %v11009_v39  ;;  %v11020_v33 = vcombine.high %v400_v31, %v404_v15  ;;  %v13698_v27 = vld [vmem:[%s19060_s0 + $0xf0] ss:$24 sps:$4 sm:$0xff]   ;;  %v11025_v12 = vcombine.low %v407_v18, %v411_v24 }
 0x1c1   :  { %5394 = vmatmul.mubr.bf16.gmra.mrb[128].mxu0 %v13694_v21  ;;  %v7345_v16 = vmax.f32 %v11421_v62, 0.0  ;;  %4707 = vmatprep.subr.bf16.mxu1 %v11018_v36  ;;  %v11026_v56 = vcombine.high %v407_v18, %v411_v24  ;;  %v13699_v62 = vld [vmem:[%s19060_s0 + $0x124] ss:$24 sps:$4 sm:$0xff]   ;;  %v11019_v6 = vcombine.low %v400_v31, %v404_v15  ;;  %v3516_v31 = vadd.f32 %v15174_v14, %v15367_v61  ;;  %v415_v18 = vld [vmem:[%s19059_s1 + $0x6c8] sm:$0xff] }
 0x1c2   :  { %5403 = vmatprep.mubr.bf16.mxu0 %v13695_v10  ;;  %5665 = vmatpush1.bf16.msra.mxu0 %v10995_v29  ;;  %v7346_v38 = vmax.f32 %v11423_v40, 0.0  ;;  %v412_v29 = vld [vmem:[%s19059_s1 + $0x6b0] sm:$0xff]  ;;  %v3510_v40 = vadd.f32 %v15150_v34, %v15363_v35  ;;  %v3512_v34 = vadd.f32 %v15155_v45, %v15367_v61  ;;  %v13700_v45 = vld [vmem:[%s19060_s0 + $0x120] ss:$24 sps:$4 sm:$0xff]   ;;  %v419_v24 = vld [vmem:[%s19059_s1 + $0x6e8] sm:$0xff] }
 0x1c3   :  { %5666 = vmatprep.subr.bf16.mxu0 %v11004_v47  ;;  %v15595_v21 = vpack.c.bf16 %v7345_v16, %v7337_v58  ;;  %v11028_v16 = vcombine.high %v408_v25, %v412_v29 }
 0x1c4   :  { %v4141_v26 = vpop.f32.mrb[24].mxu0  ;;  %v15603_v10 = vpack.c.bf16 %v7346_v38, %v7338_v44  ;;  %4708 = vmatpush1.bf16.msra.mxu1 %v11017_v54  ;;  %v3514_v44 = vadd.f32 %v15169_v5, %v15363_v35 }
 0x1c5   :  { %v11425_v28 = vadd.f32 %v4141_v26, %v3500_v53  ;;  %v4143_v23 = vpop.f32.mrb[25].mxu0  ;;  %4709 = vmatprep.subr.bf16.mxu1 %v11026_v56  ;;  %v11027_v26 = vcombine.low %v408_v25, %v412_v29  ;;  %v3522_v25 = vadd.f32 %v15187_v17, %v15367_v61  ;;  %v11034_v56 = vcombine.high %v415_v18, %v419_v24  ;;  %v13702_v17 = vld [vmem:[%s19060_s0 + $0x150] ss:$24 sps:$4 sm:$0xff]  }
 0x1c6   :  { %v4145_v1 = vpop.f32.mrb[26].mxu0  ;;  %5667 = vmatpush1.bf16.msra.mxu0 %v11003_v63  ;;  %v11427_v48 = vadd.f32 %v4143_v23, %v3502_v9 }
 0x1c7   :  { %v11429_v52 = vadd.f32 %v4145_v1, %v3504_v49  ;;  %v4147_v8 = vpop.f32.mrb[27].mxu0  ;;  %5668 = vmatprep.subr.bf16.mxu0 %v11012_v32  ;;  %4451 = vmatmul.mubr.bf16.gmra.mrb[136].mxu1 %v13698_v27  ;;  %v7353_v47 = vmax.f32 %v11425_v28, 0.0 }
 0x1c8   :  { %v11431_v37 = vadd.f32 %v4147_v8, %v3506_v3  ;;  %4460 = vmatprep.mubr.bf16.mxu1 %v13699_v62  ;;  %v7354_v11 = vmax.f32 %v11427_v48, 0.0  ;;  %4710 = vmatpush1.bf16.msra.mxu1 %v11025_v12 }
 0x1c9   :  { %v7361_v39 = vmax.f32 %v11429_v52, 0.0  ;;  %5404 = vmatmul.mubr.bf16.gmra.mrb[132].mxu0 %v13696_v55  ;;  %v416_v55 = vld [vmem:[%s19059_s1 + $0x6d0] sm:$0xff]  ;;  %v3520_v52 = vadd.f32 %v15182_v13, %v15363_v35  ;;  %v3524_v13 = vadd.f32 %v15201_v4, %v15363_v35  ;;  %4711 = vmatprep.subr.bf16.mxu1 %v11034_v56 }
 0x1ca   :  { %5413 = vmatprep.mubr.bf16.mxu0 %v13697_v22  ;;  %5669 = vmatpush1.bf16.msra.mxu0 %v11011_v50  ;;  %v7362_v36 = vmax.f32 %v11431_v37, 0.0  ;;  %v420_v22 = vld [vmem:[%s19059_s1 + $0x6f0] sm:$0xff] }
 0x1cb   :  { %v15631_v58 = vpack.c.bf16 %v7361_v39, %v7353_v47  ;;  %5670 = vmatprep.subr.bf16.mxu0 %v11020_v33  ;;  %v11036_v28 = vcombine.high %v416_v55, %v420_v22  ;;  %v13701_v50 = vld [vmem:[%s19060_s0 + $0x154] ss:$24 sps:$4 sm:$0xff]   ;;  %v11035_v14 = vcombine.low %v416_v55, %v420_v22  ;;  %v11033_v47 = vcombine.low %v415_v18, %v419_v24 }
 0x1cc   :  { %v4151_v53 = vpop.f32.mrb[28].mxu0  ;;  %v15639_v63 = vpack.c.bf16 %v7362_v36, %v7354_v11  ;;  %v3526_v39 = vadd.f32 %v15206_v20, %v15367_v61  ;;  %v3530_v55 = vadd.f32 %v15214_v43, %v15363_v35  ;;  %v423_v18 = vld [vmem:[%s19059_s1 + $0x708] sm:$0xff] }
 0x1cd   :  { %v11433_v38 = vadd.f32 %v4151_v53, %v3510_v40  ;;  %v4153_v32 = vpop.f32.mrb[29].mxu0  ;;  %4712 = vmatpush1.bf16.msra.mxu1 %v11033_v47  ;;  %v427_v24 = vld [vmem:[%s19059_s1 + $0x728] sm:$0xff] }
 0x1ce   :  { %v4155_v54 = vpop.f32.mrb[30].mxu0  ;;  %5671 = vmatpush1.bf16.msra.mxu0 %v11019_v6  ;;  %v11435_v15 = vadd.f32 %v4153_v32, %v3512_v34  ;;  %v11042_v47 = vcombine.high %v423_v18, %v427_v24 }
 0x1cf   :  { %v11437_v9 = vadd.f32 %v4155_v54, %v3514_v44  ;;  %v4157_v49 = vpop.f32.mrb[31].mxu0  ;;  %5672 = vmatprep.subr.bf16.mxu0 %v11028_v16  ;;  %4461 = vmatmul.mubr.bf16.gmra.mrb[140].mxu1 %v13700_v45  ;;  %v7369_v5 = vmax.f32 %v11433_v38, 0.0  ;;  %v13703_v16 = vld [vmem:[%s19060_s0 + $0x184] ss:$24 sps:$4 sm:$0xff]   ;;  %v424_v44 = vld [vmem:[%s19059_s1 + $0x710] sm:$0xff]  ;;  %v3532_v54 = vadd.f32 %v15219_v46, %v15367_v61 }
 0x1d0   :  { %v11439_v23 = vadd.f32 %v4157_v49, %v3516_v31  ;;  %4470 = vmatprep.mubr.bf16.mxu1 %v13701_v50  ;;  %v7370_v3 = vmax.f32 %v11435_v15, 0.0  ;;  %v428_v38 = vld [vmem:[%s19059_s1 + $0x730] sm:$0xff]  ;;  %4713 = vmatprep.subr.bf16.mxu1 %v11042_v47 }
 0x1d1   :  { %v7377_v1 = vmax.f32 %v11437_v9, 0.0  ;;  %5414 = vmatmul.mubr.bf16.gmra.mrb[136].mxu0 %v13698_v27  ;;  %v11043_v15 = vcombine.low %v424_v44, %v428_v38  ;;  %v11044_v9 = vcombine.high %v424_v44, %v428_v38  ;;  %v19120_v38 = vld [vmem:[#allocation7_spill] sm:$0xff] }
 0x1d2   :  { %5423 = vmatprep.mubr.bf16.mxu0 %v13699_v62  ;;  %5673 = vmatpush1.bf16.msra.mxu0 %v11027_v26  ;;  %v7378_v48 = vmax.f32 %v11439_v23, 0.0  ;;  %v3534_v26 = vadd.f32 %v15233_v19, %v15363_v35 }
 0x1d3   :  { %v15655_v8 = vpack.c.bf16 %v7377_v1, %v7369_v5  ;;  %5674 = vmatprep.subr.bf16.mxu0 %v11036_v28  ;;  %v3536_v28 = vadd.f32 %v15238_v42, %v15367_v61  ;;  %v13704_v1 = vld [vmem:[%s19060_s0 + $0x180] ss:$24 sps:$4 sm:$0xff]  }
 0x1d4   :  { %v4161_v33 = vpop.f32.mrb[32].mxu0  ;;  %v15663_v27 = vpack.c.bf16 %v7378_v48, %v7370_v3  ;;  %v3540_v48 = vadd.f32 %v15250_v60, %v15363_v35 }
 0x1d5   :  { %v11441_v29 = vadd.f32 %v4161_v33, %v3520_v52  ;;  %v4163_v12 = vpop.f32.mrb[33].mxu0 }
 0x1d6   :  { %v4165_v37 = vpop.f32.mrb[34].mxu0  ;;  %5675 = vmatpush1.bf16.msra.mxu0 %v11035_v14  ;;  %v11443_v62 = vadd.f32 %v4163_v12, %v3522_v25  ;;  %v13705_v14 = vld [vmem:[%s19060_s0 + $0x1b4] ss:$24 sps:$4 sm:$0xff]   ;;  %v19118_v12 = vld [vmem:[#allocation5_spill] sm:$0xff] }
 0x1d7   :  { %v11445_v6 = vadd.f32 %v4165_v37, %v3524_v13  ;;  %v4167_v11 = vpop.f32.mrb[35].mxu0  ;;  %4471 = vmatmul.mubr.bf16.gmra.mrb[144].mxu1 %v13702_v17  ;;  %v7385_v4 = vmax.f32 %v11441_v29, 0.0  ;;  %5676 = vmatprep.subr.bf16.mxu0 %v11044_v9  ;;  %v19117_v13 = vld [vmem:[#allocation4_spill] sm:$0xff]  ;;  %v3544_v56 = vadd.f32 %v19118_v12, %v15363_v35 }
 0x1d8   :  { %v11447_v36 = vadd.f32 %v4167_v11, %v3526_v39  ;;  %4480 = vmatprep.mubr.bf16.mxu1 %v13703_v16  ;;  %v7386_v20 = vmax.f32 %v11443_v62, 0.0  ;;  %v3542_v29 = vadd.f32 %v19117_v13, %v15367_v61  ;;  %v11041_v62 = vcombine.low %v423_v18, %v427_v24  ;;  %v13708_v18 = vld [vmem:[%s19060_s0 + $0x1e0] ss:$24 sps:$4 sm:$0xff]   ;;  %v13709_v12 = vld [vmem:[%s19060_s0 + $0x214] ss:$24 sps:$4 sm:$0xff]  }
 0x1d9   :  { %v7393_v40 = vmax.f32 %v11445_v6, 0.0  ;;  %5424 = vmatmul.mubr.bf16.gmra.mrb[140].mxu0 %v13700_v45  ;;  %v19119_v6 = vld [vmem:[#allocation6_spill] sm:$0xff] }
 0x1da   :  { %5433 = vmatprep.mubr.bf16.mxu0 %v13701_v50  ;;  %v7394_v53 = vmax.f32 %v11447_v36, 0.0  ;;  %5677 = vmatpush1.bf16.msra.mxu0 %v11043_v15  ;;  %v3546_v11 = vadd.f32 %v19119_v6, %v15367_v61  ;;  %v431_v6 = vld [vmem:[%s19059_s1 + $0x748] sm:$0xff] }
 0x1db   :  { %v15679_v22 = vpack.c.bf16 %v7393_v40, %v7385_v4  ;;  %v13706_v40 = vld [vmem:[%s19060_s0 + $0x1b0] ss:$24 sps:$4 sm:$0xff]   ;;  %4714 = vmatpush1.bf16.msra.mxu1 %v11041_v62 }
 0x1dc   :  { %v4171_v34 = vpop.f32.mrb[36].mxu0  ;;  %v15687_v32 = vpack.c.bf16 %v7394_v53, %v7386_v20 }
 0x1dd   :  { %v11449_v43 = vadd.f32 %v4171_v34, %v3530_v55  ;;  %v4173_v31 = vpop.f32.mrb[37].mxu0  ;;  %v13707_v55 = vld [vmem:[%s19060_s0 + $0x1e4] ss:$24 sps:$4 sm:$0xff]  }
 0x1de   :  { %v4175_v49 = vpop.f32.mrb[38].mxu0  ;;  %v11451_v45 = vadd.f32 %v4173_v31, %v3532_v54  ;;  %v3550_v54 = vadd.f32 %v19120_v38, %v15363_v35  ;;  %v436_v31 = vld [vmem:[%s19059_s1 + $0x770] sm:$0xff]  ;;  %v19127_v38 = vld [vmem:[#allocation14_spill] sm:$0xff] }
 0x1df   :  { %v11453_v23 = vadd.f32 %v4175_v49, %v3534_v26  ;;  %v4177_v5 = vpop.f32.mrb[39].mxu0  ;;  %4481 = vmatmul.mubr.bf16.gmra.mrb[148].mxu1 %v13704_v1  ;;  %v7401_v19 = vmax.f32 %v11449_v43, 0.0  ;;  %v432_v43 = vld [vmem:[%s19059_s1 + $0x750] sm:$0xff] }
 0x1e0   :  { %v11455_v46 = vadd.f32 %v4177_v5, %v3536_v28  ;;  %4490 = vmatprep.mubr.bf16.mxu1 %v13705_v14  ;;  %v7402_v42 = vmax.f32 %v11451_v45, 0.0  ;;  %v11051_v9 = vcombine.low %v432_v43, %v436_v31  ;;  %v11052_v49 = vcombine.high %v432_v43, %v436_v31  ;;  %v19121_v45 = vld [vmem:[#allocation8_spill] sm:$0xff]  ;;  %v19122_v5 = vld [vmem:[#allocation9_spill] sm:$0xff] }
 0x1e1   :  { %v7409_v50 = vmax.f32 %v11453_v23, 0.0  ;;  %5434 = vmatmul.mubr.bf16.gmra.mrb[144].mxu0 %v13702_v17  ;;  %v3552_v23 = vadd.f32 %v19121_v45, %v15367_v61 }
 0x1e2   :  { %5443 = vmatprep.mubr.bf16.mxu0 %v13703_v16  ;;  %v7410_v3 = vmax.f32 %v11455_v46, 0.0  ;;  %5678 = vmatprep.subr.bf16.mxu0 %v11052_v49 }
 0x1e3   :  { %v15703_v52 = vpack.c.bf16 %v7409_v50, %v7401_v19  ;;  %5679 = vmatpush1.bf16.msra.mxu0 %v11051_v9  ;;  %v13710_v9 = vld [vmem:[%s19060_s0 + $0x210] ss:$24 sps:$4 sm:$0xff]  }
 0x1e4   :  { %v4181_v33 = vpop.f32.mrb[40].mxu0  ;;  %v15711_v25 = vpack.c.bf16 %v7410_v3, %v7402_v42 }
 0x1e5   :  { %v11457_v60 = vadd.f32 %v4181_v33, %v3540_v48  ;;  %v4183_v37 = vpop.f32.mrb[41].mxu0 }
 0x1e6   :  { %v4185_v39 = vpop.f32.mrb[42].mxu0  ;;  %v11459_v17 = vadd.f32 %v4183_v37, %v3542_v29  ;;  %v19124_v37 = vld [vmem:[#allocation11_spill] sm:$0xff] }
 0x1e7   :  { %v11461_v36 = vadd.f32 %v4185_v39, %v3544_v56  ;;  %v4187_v4 = vpop.f32.mrb[43].mxu0  ;;  %4491 = vmatmul.mubr.bf16.gmra.mrb[152].mxu1 %v13706_v40  ;;  %v7417_v20 = vmax.f32 %v11457_v60, 0.0  ;;  %v3560_v47 = vadd.f32 %v19124_v37, %v15363_v35 }
 0x1e8   :  { %v11463_v16 = vadd.f32 %v4187_v4, %v3546_v11  ;;  %4500 = vmatprep.mubr.bf16.mxu1 %v13707_v55  ;;  %v7418_v34 = vmax.f32 %v11459_v17, 0.0  ;;  %v435_v11 = vld [vmem:[%s19059_s1 + $0x768] sm:$0xff] }
 0x1e9   :  { %v7425_v53 = vmax.f32 %v11461_v36, 0.0  ;;  %5444 = vmatmul.mubr.bf16.gmra.mrb[148].mxu0 %v13704_v1  ;;  %v3554_v1 = vadd.f32 %v19122_v5, %v15363_v35  ;;  %v19125_v36 = vld [vmem:[#allocation12_spill] sm:$0xff]  ;;  %v13711_v5 = vld [vmem:[%s19060_s0 + $0x244] ss:$24 sps:$4 sm:$0xff]  }
 0x1ea   :  { %5453 = vmatprep.mubr.bf16.mxu0 %v13705_v14  ;;  %v7426_v44 = vmax.f32 %v11463_v16, 0.0  ;;  %v19123_v14 = vld [vmem:[#allocation10_spill] sm:$0xff]  ;;  %v3562_v4 = vadd.f32 %v19125_v36, %v15367_v61 }
 0x1eb   :  { %v15727_v26 = vpack.c.bf16 %v7425_v53, %v7417_v20  ;;  %v3556_v42 = vadd.f32 %v19123_v14, %v15367_v61  ;;  %v439_v14 = vld [vmem:[%s19059_s1 + $0x788] sm:$0xff] }
 0x1ec   :  { %v4191_v15 = vpop.f32.mrb[44].mxu0  ;;  %v15735_v28 = vpack.c.bf16 %v7426_v44, %v7418_v34  ;;  %v11049_v44 = vcombine.low %v431_v6, %v435_v11 }
 0x1ed   :  { %v11465_v46 = vadd.f32 %v4191_v15, %v3550_v54  ;;  %v4193_v19 = vpop.f32.mrb[45].mxu0  ;;  %v3566_v54 = vadd.f32 %v19127_v38, %v15367_v61 }
 0x1ee   :  { %v4195_v50 = vpop.f32.mrb[46].mxu0  ;;  %v11467_v3 = vadd.f32 %v4193_v19, %v3552_v23 }
 0x1ef   :  { %v11469_v48 = vadd.f32 %v4195_v50, %v3554_v1  ;;  %v4197_v33 = vpop.f32.mrb[47].mxu0  ;;  %4501 = vmatmul.mubr.bf16.gmra.mrb[156].mxu1 %v13708_v18  ;;  %v7433_v13 = vmax.f32 %v11465_v46, 0.0  ;;  %v440_v1 = vld [vmem:[%s19059_s1 + $0x790] sm:$0xff] }
 0x1f0   :  { %v11471_v24 = vadd.f32 %v4197_v33, %v3556_v42  ;;  %4510 = vmatprep.mubr.bf16.mxu1 %v13709_v12  ;;  %v7434_v56 = vmax.f32 %v11467_v3, 0.0  ;;  %v444_v46 = vld [vmem:[%s19059_s1 + $0x7b0] sm:$0xff]  ;;  %v443_v42 = vld [vmem:[%s19059_s1 + $0x7a8] sm:$0xff] }
 0x1f1   :  { %v7441_v29 = vmax.f32 %v11469_v48, 0.0  ;;  %5454 = vmatmul.mubr.bf16.gmra.mrb[152].mxu0 %v13706_v40  ;;  %v19126_v40 = vld [vmem:[#allocation13_spill] sm:$0xff]  ;;  %v11059_v19 = vcombine.low %v440_v1, %v444_v46  ;;  %v11060_v50 = vcombine.high %v440_v1, %v444_v46  ;;  %v19128_v33 = vld [vmem:[#allocation15_spill] sm:$0xff]  ;;  %v19132_v46 = vld [vmem:[#allocation20_spill] sm:$0xff] }
 0x1f2   :  { %5463 = vmatprep.mubr.bf16.mxu0 %v13707_v55  ;;  %v7442_v60 = vmax.f32 %v11471_v24, 0.0  ;;  %v3564_v16 = vadd.f32 %v19126_v40, %v15363_v35  ;;  %v11050_v55 = vcombine.high %v431_v6, %v435_v11 }
 0x1f3   :  { %v15751_v39 = vpack.c.bf16 %v7441_v29, %v7433_v13  ;;  %v11057_v13 = vcombine.low %v439_v14, %v443_v42  ;;  %v11058_v29 = vcombine.high %v439_v14, %v443_v42  ;;  %5680 = vmatprep.subr.bf16.mxu0 %v11060_v50 }
 0x1f4   :  { %v4201_v62 = vpop.f32.mrb[48].mxu0  ;;  %v15759_v17 = vpack.c.bf16 %v7442_v60, %v7434_v56  ;;  %4715 = vmatprep.subr.bf16.mxu1 %v11050_v55  ;;  %v19129_v60 = vld [vmem:[#allocation16_spill] sm:$0xff]  ;;  %5681 = vmatpush1.bf16.msra.mxu0 %v11059_v19  ;;  %v13712_v55 = vld [vmem:[%s19060_s0 + $0x240] ss:$24 sps:$4 sm:$0xff]   ;;  %v3580_v19 = vadd.f32 %v19132_v46, %v15363_v35 }
 0x1f5   :  { %v11473_v20 = vadd.f32 %v4201_v62, %v3560_v47  ;;  %v4203_v53 = vpop.f32.mrb[49].mxu0  ;;  %4716 = vmatpush1.bf16.msra.mxu1 %v11049_v44  ;;  %v3572_v37 = vadd.f32 %v19129_v60, %v15367_v61  ;;  %v19130_v47 = vld [vmem:[#allocation17_spill] sm:$0xff] }
 0x1f6   :  { %v4205_v34 = vpop.f32.mrb[50].mxu0  ;;  %v11475_v43 = vadd.f32 %v4203_v53, %v3562_v4  ;;  %v3574_v62 = vadd.f32 %v19130_v47, %v15363_v35  ;;  %4717 = vmatprep.subr.bf16.mxu1 %v11058_v29  ;;  %v19131_v4 = vld [vmem:[#allocation18_spill] sm:$0xff]  ;;  %v19134_v29 = vld [vmem:[#allocation23_spill] sm:$0xff] }
 0x1f7   :  { %v11477_v31 = vadd.f32 %v4205_v34, %v3564_v16  ;;  %v4207_v15 = vpop.f32.mrb[51].mxu0  ;;  %4511 = vmatmul.mubr.bf16.gmra.mrb[160].mxu1 %v13710_v9  ;;  %v7449_v45 = vmax.f32 %v11473_v20, 0.0  ;;  %v3576_v40 = vadd.f32 %v19131_v4, %v15367_v61 }
 0x1f8   :  { %v11479_v49 = vadd.f32 %v4207_v15, %v3566_v54  ;;  %4520 = vmatprep.mubr.bf16.mxu1 %v13711_v5  ;;  %v7450_v3 = vmax.f32 %v11475_v43, 0.0  ;;  %v13713_v54 = vld [vmem:[%s19060_s0 + $0x274] ss:$24 sps:$4 sm:$0xff]  }
 0x1f9   :  { %v7457_v23 = vmax.f32 %v11477_v31, 0.0  ;;  %5464 = vmatmul.mubr.bf16.gmra.mrb[156].mxu0 %v13708_v18  ;;  %v3570_v18 = vadd.f32 %v19128_v33, %v15363_v35  ;;  %4718 = vmatpush1.bf16.msra.mxu1 %v11057_v13  ;;  %v448_v43 = vld [vmem:[%s19059_s1 + $0x7d0] sm:$0xff]  ;;  %v447_v15 = vld [vmem:[%s19059_s1 + $0x7c8] sm:$0xff] }
 0x1fa   :  { %5473 = vmatprep.mubr.bf16.mxu0 %v13709_v12  ;;  %v7458_v48 = vmax.f32 %v11479_v49, 0.0  ;;  %v452_v31 = vld [vmem:[%s19059_s1 + $0x7f0] sm:$0xff] }
 0x1fb   :  { %v15787_v24 = vpack.c.bf16 %v7457_v23, %v7449_v45  ;;  %v11067_v49 = vcombine.low %v448_v43, %v452_v31  ;;  %v451_v45 = vld [vmem:[%s19059_s1 + $0x7e8] sm:$0xff] }
 0x1fc   :  { %v4211_v12 = vpop.f32.mrb[52].mxu0  ;;  %v15789_v56 = vpack.c.bf16 %v7458_v48, %v7450_v3  ;;  %v11065_v42 = vcombine.low %v447_v15, %v451_v45  ;;  %v11066_v3 = vcombine.high %v447_v15, %v451_v45 }
 0x1fd   :  { %v11481_v6 = vadd.f32 %v4211_v12, %v3570_v18  ;;  %v4213_v11 = vpop.f32.mrb[53].mxu0  ;;  %v19133_v18 = vld [vmem:[#allocation21_spill] sm:$0xff]  ;;  %v3584_v12 = vadd.f32 %v19134_v29, %v15363_v35 }
 0x1fe   :  { %v4215_v36 = vpop.f32.mrb[54].mxu0  ;;  %v11483_v16 = vadd.f32 %v4213_v11, %v3572_v37  ;;  %v3582_v13 = vadd.f32 %v19133_v18, %v15367_v61  ;;  %4719 = vmatprep.subr.bf16.mxu1 %v11066_v3  ;;  %v19135_v11 = vld [vmem:[#allocation24_spill] sm:$0xff] }
 0x1ff   :  { %v11485_v20 = vadd.f32 %v4215_v36, %v3574_v62  ;;  %v4217_v53 = vpop.f32.mrb[55].mxu0  ;;  %4521 = vmatmul.mubr.bf16.gmra.mrb[164].mxu1 %v13712_v55  ;;  %v7465_v44 = vmax.f32 %v11481_v6, 0.0  ;;  %v3586_v36 = vadd.f32 %v19135_v11, %v15367_v61 }
 0x200   :  { %v11487_v34 = vadd.f32 %v4217_v53, %v3576_v40  ;;  %4530 = vmatprep.mubr.bf16.mxu1 %v13713_v54  ;;  %v7466_v23 = vmax.f32 %v11483_v16, 0.0  ;;  %4720 = vmatpush1.bf16.msra.mxu1 %v11065_v42 }
 0x201   :  { %v7473_v38 = vmax.f32 %v11485_v20, 0.0  ;;  %5474 = vmatmul.mubr.bf16.gmra.mrb[160].mxu0 %v13710_v9  ;;  %v11068_v9 = vcombine.high %v448_v43, %v452_v31  ;;  %v13714_v20 = vld [vmem:[%s19060_s0 + $0x270] ss:$24 sps:$4 sm:$0xff]  }
 0x202   :  { %5483 = vmatprep.mubr.bf16.mxu0 %v13711_v5  ;;  %v7474_v1 = vmax.f32 %v11487_v34, 0.0  ;;  %v3910_v14 = vpop.f32.mrb[60].mxu1 }
 0x203   :  { %v15817_v50 = vpack.c.bf16 %v7473_v38, %v7465_v44  ;;  %v3912_v33 = vpop.f32.mrb[61].mxu1  ;;  %5682 = vmatprep.subr.bf16.mxu0 %v11068_v9  ;;  %v13715_v38 = vld [vmem:[%s19060_s0 + $0x2a4] ss:$24 sps:$4 sm:$0xff]   ;;  %v11496_v15 = vadd.f32 %v3910_v14, %v15363_v35 }
 0x204   :  { %v4221_v48 = vpop.f32.mrb[56].mxu0  ;;  %v15819_v5 = vpack.c.bf16 %v7474_v1, %v7466_v23  ;;  %v3914_v47 = vpop.f32.mrb[62].mxu1  ;;  %5683 = vmatpush1.bf16.msra.mxu0 %v11067_v49  ;;  %v11498_v46 = vadd.f32 %v3912_v33, %v15367_v61 }
 0x205   :  { %v11489_v60 = vadd.f32 %v4221_v48, %v3580_v19  ;;  %v4223_v37 = vpop.f32.mrb[57].mxu0  ;;  %v3916_v6 = vpop.f32.mrb[63].mxu1 }
 0x206   :  { %v4225_v62 = vpop.f32.mrb[58].mxu0  ;;  %v11491_v4 = vadd.f32 %v4223_v37, %v3582_v13  ;;  %v11502_v13 = vadd.f32 %v3916_v6, %v15367_v61  ;;  %v15855_v6 = vld [vmem:[%s19059_s1 + $0x830] sm:$0xff] }
 0x207   :  { %v11493_v40 = vadd.f32 %v4225_v62, %v3584_v12  ;;  %v4227_v16 = vpop.f32.mrb[59].mxu0  ;;  %4531 = vmatmul.mubr.bf16.gmra.mrb[168].mxu1 %v13714_v20  ;;  %v7481_v34 = vmax.f32 %v11489_v60, 0.0  ;;  %v13716_v12 = vld [vmem:[%s19060_s0 + $0x2a0] ss:$24 sps:$4 sm:$0xff]   ;;  %v15850_v62 = vld [vmem:[%s19059_s1 + $0x810] sm:$0xff] }
 0x208   :  { %v11495_v53 = vadd.f32 %v4227_v16, %v3586_v36  ;;  %4540 = vmatprep.mubr.bf16.mxu1 %v13715_v38  ;;  %v7482_v43 = vmax.f32 %v11491_v4, 0.0  ;;  %v11076_v36 = vcombine.high %v15850_v62, %v15855_v6 }
 0x209   :  { %v7489_v44 = vmax.f32 %v11493_v40, 0.0  ;;  %5484 = vmatmul.mubr.bf16.gmra.mrb[164].mxu0 %v13712_v55  ;;  %v11500_v55 = vadd.f32 %v3914_v47, %v15363_v35  ;;  %v13717_v47 = vld [vmem:[%s19060_s0 + $0x2d4] ss:$24 sps:$4 sm:$0xff]  }
 0x20a   :  { %5493 = vmatprep.mubr.bf16.mxu0 %v13713_v54  ;;  %v7490_v31 = vmax.f32 %v11495_v53, 0.0  ;;  %v3920_v9 = vpop.f32.mrb[64].mxu1  ;;  %5973 = vmatprep.subr.bf16.mxu0 %v11076_v36 }
 0x20b   :  { %v15834_v49 = vpack.c.bf16 %v7489_v44, %v7481_v34  ;;  %v3922_v23 = vpop.f32.mrb[65].mxu1  ;;  %v11504_v16 = vadd.f32 %v3920_v9, %v15363_v35 }
 0x20c   :  { %v4231_v45 = vpop.f32.mrb[60].mxu0  ;;  %v15836_v1 = vpack.c.bf16 %v7490_v31, %v7482_v43  ;;  %v3924_v3 = vpop.f32.mrb[66].mxu1 }
 0x20d   :  { %v11497_v19 = vadd.f32 %v11496_v15, %v4231_v45  ;;  %v4233_v42 = vpop.f32.mrb[61].mxu0  ;;  %v3926_v54 = vpop.f32.mrb[67].mxu1  ;;  %v11508_v31 = vadd.f32 %v3924_v3, %v15363_v35  ;;  %v13719_v3 = vld [vmem:[%s19060_s0 + $0x304] ss:$24 sps:$4 sm:$0xff]  }
 0x20e   :  { %v4235_v48 = vpop.f32.mrb[62].mxu0  ;;  %v11499_v18 = vadd.f32 %v11498_v46, %v4233_v42  ;;  %v11510_v9 = vadd.f32 %v3926_v54, %v15367_v61  ;;  %v15878_v54 = vld [vmem:[%s19059_s1 + $0x808] sm:$0xff] }
 0x20f   :  { %v11501_v14 = vadd.f32 %v11500_v55, %v4235_v48  ;;  %v4237_v29 = vpop.f32.mrb[63].mxu0  ;;  %4541 = vmatmul.mubr.bf16.gmra.mrb[172].mxu1 %v13716_v12  ;;  %v7497_v37 = vmax.f32 %v11497_v19, 0.0 }
 0x210   :  { %v11503_v60 = vadd.f32 %v11502_v13, %v4237_v29  ;;  %4550 = vmatprep.mubr.bf16.mxu1 %v13717_v47  ;;  %v7498_v4 = vmax.f32 %v11499_v18, 0.0  ;;  %v13718_v13 = vld [vmem:[%s19060_s0 + $0x2d0] ss:$24 sps:$4 sm:$0xff]  }
 0x211   :  { %v7505_v33 = vmax.f32 %v11501_v14, 0.0  ;;  %5494 = vmatmul.mubr.bf16.gmra.mrb[168].mxu0 %v13714_v20 }
 0x212   :  { %5503 = vmatprep.mubr.bf16.mxu0 %v13715_v38  ;;  %v7506_v40 = vmax.f32 %v11503_v60, 0.0  ;;  %v3930_v53 = vpop.f32.mrb[68].mxu1  ;;  %v11506_v38 = vadd.f32 %v3922_v23, %v15367_v61  ;;  %v15883_v60 = vld [vmem:[%s19059_s1 + $0x828] sm:$0xff] }
 0x213   :  { %v15862_v20 = vpack.c.bf16 %v7505_v33, %v7497_v37  ;;  %v3932_v44 = vpop.f32.mrb[69].mxu1 }
 0x214   :  { %v4241_v34 = vpop.f32.mrb[64].mxu0  ;;  %v15864_v43 = vpack.c.bf16 %v7506_v40, %v7498_v4  ;;  %v3934_v46 = vpop.f32.mrb[70].mxu1  ;;  %v11512_v4 = vadd.f32 %v3930_v53, %v15363_v35 }
 0x215   :  { %v11505_v15 = vadd.f32 %v11504_v16, %v4241_v34  ;;  %v4243_v45 = vpop.f32.mrb[65].mxu0  ;;  %v3936_v19 = vpop.f32.mrb[71].mxu1 }
 0x216   :  { %v4245_v55 = vpop.f32.mrb[66].mxu0  ;;  %v11507_v42 = vadd.f32 %v11506_v38, %v4243_v45  ;;  %v11518_v53 = vadd.f32 %v3936_v19, %v15367_v61 }
 0x217   :  { %v11509_v48 = vadd.f32 %v11508_v31, %v4245_v55  ;;  %v4247_v18 = vpop.f32.mrb[67].mxu0  ;;  %4551 = vmatmul.mubr.bf16.gmra.mrb[176].mxu1 %v13718_v13  ;;  %v7513_v29 = vmax.f32 %v11505_v15, 0.0  ;;  %v11516_v15 = vadd.f32 %v3934_v46, %v15363_v35  ;;  %v13721_v46 = vld [vmem:[%s19060_s0 + $0x334] ss:$24 sps:$4 sm:$0xff]  }
 0x218   :  { %v11511_v14 = vadd.f32 %v11510_v9, %v4247_v18  ;;  %4560 = vmatprep.mubr.bf16.mxu1 %v13719_v3  ;;  %v7514_v33 = vmax.f32 %v11507_v42, 0.0 }
 0x219   :  { %v7521_v23 = vmax.f32 %v11509_v48, 0.0  ;;  %5504 = vmatmul.mubr.bf16.gmra.mrb[172].mxu0 %v13716_v12  ;;  %v11074_v12 = vcombine.high %v15878_v54, %v15883_v60 }
 0x21a   :  { %5513 = vmatprep.mubr.bf16.mxu0 %v13717_v47  ;;  %v7522_v36 = vmax.f32 %v11511_v14, 0.0  ;;  %v3940_v16 = vpop.f32.mrb[72].mxu1  ;;  %v11514_v47 = vadd.f32 %v3932_v44, %v15367_v61 }
 0x21b   :  { %v15890_v40 = vpack.c.bf16 %v7521_v23, %v7513_v29  ;;  %v3942_v38 = vpop.f32.mrb[73].mxu1  ;;  %5010 = vmatprep.subr.bf16.mxu1 %v11074_v12  ;;  %v13720_v23 = vld [vmem:[%s19060_s0 + $0x300] ss:$24 sps:$4 sm:$0xff]   ;;  %v11520_v19 = vadd.f32 %v3940_v16, %v15363_v35 }
 0x21c   :  { %v4251_v34 = vpop.f32.mrb[68].mxu0  ;;  %v15892_v31 = vpack.c.bf16 %v7522_v36, %v7514_v33  ;;  %v3944_v9 = vpop.f32.mrb[74].mxu1 }
 0x21d   :  { %v11513_v45 = vadd.f32 %v11512_v4, %v4251_v34  ;;  %v4253_v55 = vpop.f32.mrb[69].mxu0  ;;  %v3946_v42 = vpop.f32.mrb[75].mxu1 }
 0x21e   :  { %v4255_v48 = vpop.f32.mrb[70].mxu0  ;;  %v11515_v18 = vadd.f32 %v11514_v47, %v4253_v55 }
 0x21f   :  { %v11517_v14 = vadd.f32 %v11516_v15, %v4255_v48  ;;  %v4257_v29 = vpop.f32.mrb[71].mxu0  ;;  %4561 = vmatmul.mubr.bf16.gmra.mrb[180].mxu1 %v13720_v23  ;;  %v7529_v33 = vmax.f32 %v11513_v45, 0.0  ;;  %v11522_v45 = vadd.f32 %v3942_v38, %v15367_v61 }
 0x220   :  { %v11519_v12 = vadd.f32 %v11518_v53, %v4257_v29  ;;  %4570 = vmatprep.mubr.bf16.mxu1 %v13721_v46  ;;  %v7530_v36 = vmax.f32 %v11515_v18, 0.0 }
 0x221   :  { %v7537_v44 = vmax.f32 %v11517_v14, 0.0  ;;  %5514 = vmatmul.mubr.bf16.gmra.mrb[176].mxu0 %v13718_v13  ;;  %v11524_v13 = vadd.f32 %v3944_v9, %v15363_v35  ;;  %v13723_v9 = vld [vmem:[%s19060_s0 + $0x364] ss:$24 sps:$4 sm:$0xff]  }
 0x222   :  { %5523 = vmatprep.mubr.bf16.mxu0 %v13719_v3  ;;  %v7538_v4 = vmax.f32 %v11519_v12, 0.0  ;;  %v3950_v47 = vpop.f32.mrb[76].mxu1  ;;  %v11526_v12 = vadd.f32 %v3946_v42, %v15367_v61 }
 0x223   :  { %v15904_v34 = vpack.c.bf16 %v7537_v44, %v7529_v33  ;;  %v3952_v55 = vpop.f32.mrb[77].mxu1  ;;  %v13722_v44 = vld [vmem:[%s19060_s0 + $0x330] ss:$24 sps:$4 sm:$0xff]  }
 0x224   :  { %v4261_v15 = vpop.f32.mrb[72].mxu0  ;;  %v15906_v48 = vpack.c.bf16 %v7538_v4, %v7530_v36  ;;  %v3954_v29 = vpop.f32.mrb[78].mxu1 }
 0x225   :  { %19136 = vst [vmem:[#allocation4_spill] sm:$0xff] %v15904_v34  ;;  %v11521_v53 = vadd.f32 %v11520_v19, %v4261_v15  ;;  %v4263_v14 = vpop.f32.mrb[73].mxu0  ;;  %v3956_v3 = vpop.f32.mrb[79].mxu1 }
 0x226   :  { %v4265_v11 = vpop.f32.mrb[74].mxu0  ;;  %v11523_v18 = vadd.f32 %v11522_v45, %v4263_v14 }
 0x227   :  { %v11525_v16 = vadd.f32 %v11524_v13, %v4265_v11  ;;  %v4267_v33 = vpop.f32.mrb[75].mxu0  ;;  %4571 = vmatmul.mubr.bf16.gmra.mrb[184].mxu1 %v13722_v44  ;;  %v7545_v4 = vmax.f32 %v11521_v53, 0.0  ;;  %v11528_v11 = vadd.f32 %v3950_v47, %v15363_v35  ;;  %v11530_v53 = vadd.f32 %v3952_v55, %v15367_v61 }
 0x228   :  { %v11527_v36 = vadd.f32 %v11526_v12, %v4267_v33  ;;  %4580 = vmatprep.mubr.bf16.mxu1 %v13723_v9  ;;  %v7546_v19 = vmax.f32 %v11523_v18, 0.0 }
 0x229   :  { %v7553_v38 = vmax.f32 %v11525_v16, 0.0  ;;  %5524 = vmatmul.mubr.bf16.gmra.mrb[180].mxu0 %v13720_v23  ;;  %v11532_v23 = vadd.f32 %v3954_v29, %v15363_v35  ;;  %v13725_v29 = vld [vmem:[%s19060_s0 + $0x394] ss:$24 sps:$4 sm:$0xff]  }
 0x22a   :  { %5533 = vmatprep.mubr.bf16.mxu0 %v13721_v46  ;;  %v7554_v15 = vmax.f32 %v11527_v36, 0.0  ;;  %v3960_v45 = vpop.f32.mrb[80].mxu1  ;;  %v11534_v36 = vadd.f32 %v3956_v3, %v15367_v61 }
 0x22b   :  { %v15918_v42 = vpack.c.bf16 %v7553_v38, %v7545_v4  ;;  %v3962_v14 = vpop.f32.mrb[81].mxu1  ;;  %v13724_v38 = vld [vmem:[%s19060_s0 + $0x360] ss:$24 sps:$4 sm:$0xff]  }
 0x22c   :  { %v4271_v13 = vpop.f32.mrb[76].mxu0  ;;  %v15920_v37 = vpack.c.bf16 %v7554_v15, %v7546_v19  ;;  %v3964_v33 = vpop.f32.mrb[82].mxu1 }
 0x22d   :  { %19137 = vst [vmem:[#allocation5_spill] sm:$0xff] %v15918_v42  ;;  %v11529_v12 = vadd.f32 %v11528_v11, %v4271_v13  ;;  %v4273_v16 = vpop.f32.mrb[77].mxu0  ;;  %v3966_v46 = vpop.f32.mrb[83].mxu1 }
 0x22e   :  { %19138 = vst [vmem:[#allocation6_spill] sm:$0xff] %v15920_v37  ;;  %v4275_v34 = vpop.f32.mrb[78].mxu0  ;;  %v11531_v18 = vadd.f32 %v11530_v53, %v4273_v16 }
 0x22f   :  { %v11533_v47 = vadd.f32 %v11532_v23, %v4275_v34  ;;  %v4277_v4 = vpop.f32.mrb[79].mxu0  ;;  %4581 = vmatmul.mubr.bf16.gmra.mrb[188].mxu1 %v13724_v38  ;;  %v7561_v15 = vmax.f32 %v11529_v12, 0.0  ;;  %v11536_v34 = vadd.f32 %v3960_v45, %v15363_v35  ;;  %v11538_v12 = vadd.f32 %v3962_v14, %v15367_v61 }
 0x230   :  { %v11535_v19 = vadd.f32 %v11534_v36, %v4277_v4  ;;  %4590 = vmatprep.mubr.bf16.mxu1 %v13725_v29  ;;  %v7562_v11 = vmax.f32 %v11531_v18, 0.0 }
 0x231   :  { %v7569_v55 = vmax.f32 %v11533_v47, 0.0  ;;  %5534 = vmatmul.mubr.bf16.gmra.mrb[184].mxu0 %v13722_v44  ;;  %v11540_v44 = vadd.f32 %v3964_v33, %v15363_v35  ;;  %v13727_v33 = vld [vmem:[%s19060_s0 + $0x3c4] ss:$24 sps:$4 sm:$0xff]  }
 0x232   :  { %5543 = vmatprep.mubr.bf16.mxu0 %v13723_v9  ;;  %v7570_v13 = vmax.f32 %v11535_v19, 0.0  ;;  %v3970_v53 = vpop.f32.mrb[84].mxu1  ;;  %v11542_v19 = vadd.f32 %v3966_v46, %v15367_v61 }
 0x233   :  { %v15932_v3 = vpack.c.bf16 %v7569_v55, %v7561_v15  ;;  %v3972_v16 = vpop.f32.mrb[85].mxu1  ;;  %v13726_v55 = vld [vmem:[%s19060_s0 + $0x390] ss:$24 sps:$4 sm:$0xff]  }
 0x234   :  { %v4281_v23 = vpop.f32.mrb[80].mxu0  ;;  %v15934_v42 = vpack.c.bf16 %v7570_v13, %v7562_v11  ;;  %v3974_v4 = vpop.f32.mrb[86].mxu1 }
 0x235   :  { %19139 = vst [vmem:[#allocation7_spill] sm:$0xff] %v15932_v3  ;;  %v11537_v36 = vadd.f32 %v11536_v34, %v4281_v23  ;;  %v4283_v47 = vpop.f32.mrb[81].mxu0  ;;  %v3976_v9 = vpop.f32.mrb[87].mxu1 }
 0x236   :  { %19140 = vst [vmem:[#allocation8_spill] sm:$0xff] %v15934_v42  ;;  %v4285_v37 = vpop.f32.mrb[82].mxu0  ;;  %v11539_v18 = vadd.f32 %v11538_v12, %v4283_v47 }
 0x237   :  { %v11541_v45 = vadd.f32 %v11540_v44, %v4285_v37  ;;  %v4287_v15 = vpop.f32.mrb[83].mxu0  ;;  %4591 = vmatmul.mubr.bf16.gmra.mrb[192].mxu1 %v13726_v55  ;;  %v7577_v13 = vmax.f32 %v11537_v36, 0.0  ;;  %v11544_v37 = vadd.f32 %v3970_v53, %v15363_v35  ;;  %v11546_v36 = vadd.f32 %v3972_v16, %v15367_v61 }
 0x238   :  { %v11543_v11 = vadd.f32 %v11542_v19, %v4287_v15  ;;  %4600 = vmatprep.mubr.bf16.mxu1 %v13727_v33  ;;  %v7578_v34 = vmax.f32 %v11539_v18, 0.0 }
 0x239   :  { %v7585_v14 = vmax.f32 %v11541_v45, 0.0  ;;  %5544 = vmatmul.mubr.bf16.gmra.mrb[188].mxu0 %v13724_v38  ;;  %v11548_v38 = vadd.f32 %v3974_v4, %v15363_v35  ;;  %v13729_v4 = vld [vmem:[%s19060_s0 + $0x3f4] ss:$24 sps:$4 sm:$0xff]  }
 0x23a   :  { %5553 = vmatprep.mubr.bf16.mxu0 %v13725_v29  ;;  %v7586_v23 = vmax.f32 %v11543_v11, 0.0  ;;  %v3980_v12 = vpop.f32.mrb[88].mxu1  ;;  %v11550_v11 = vadd.f32 %v3976_v9, %v15367_v61 }
 0x23b   :  { %v15946_v46 = vpack.c.bf16 %v7585_v14, %v7577_v13  ;;  %v3982_v47 = vpop.f32.mrb[89].mxu1  ;;  %v13728_v14 = vld [vmem:[%s19060_s0 + $0x3c0] ss:$24 sps:$4 sm:$0xff]  }
 0x23c   :  { %v4291_v44 = vpop.f32.mrb[84].mxu0  ;;  %v15948_v3 = vpack.c.bf16 %v7586_v23, %v7578_v34  ;;  %v3984_v15 = vpop.f32.mrb[90].mxu1 }
 0x23d   :  { %19141 = vst [vmem:[#allocation9_spill] sm:$0xff] %v15946_v46  ;;  %v11545_v19 = vadd.f32 %v11544_v37, %v4291_v44  ;;  %v4293_v45 = vpop.f32.mrb[85].mxu0  ;;  %v3986_v29 = vpop.f32.mrb[91].mxu1 }
 0x23e   :  { %19142 = vst [vmem:[#allocation10_spill] sm:$0xff] %v15948_v3  ;;  %v4295_v42 = vpop.f32.mrb[86].mxu0  ;;  %v11547_v18 = vadd.f32 %v11546_v36, %v4293_v45 }
 0x23f   :  { %v11549_v53 = vadd.f32 %v11548_v38, %v4295_v42  ;;  %v4297_v13 = vpop.f32.mrb[87].mxu0  ;;  %4601 = vmatmul.mubr.bf16.gmra.mrb[196].mxu1 %v13728_v14  ;;  %v7593_v23 = vmax.f32 %v11545_v19, 0.0  ;;  %v11552_v42 = vadd.f32 %v3980_v12, %v15363_v35  ;;  %v11554_v19 = vadd.f32 %v3982_v47, %v15367_v61 }
 0x240   :  { %v11551_v34 = vadd.f32 %v11550_v11, %v4297_v13  ;;  %4610 = vmatprep.mubr.bf16.mxu1 %v13729_v4  ;;  %v7594_v37 = vmax.f32 %v11547_v18, 0.0 }
 0x241   :  { %v7601_v16 = vmax.f32 %v11549_v53, 0.0  ;;  %5554 = vmatmul.mubr.bf16.gmra.mrb[192].mxu0 %v13726_v55  ;;  %v11556_v55 = vadd.f32 %v3984_v15, %v15363_v35  ;;  %v13731_v15 = vld [vmem:[%s19060_s0 + $0x424] ss:$24 sps:$4 sm:$0xff]  }
 0x242   :  { %5563 = vmatprep.mubr.bf16.mxu0 %v13727_v33  ;;  %v7602_v44 = vmax.f32 %v11551_v34, 0.0  ;;  %v3990_v36 = vpop.f32.mrb[92].mxu1  ;;  %v11558_v34 = vadd.f32 %v3986_v29, %v15367_v61 }
 0x243   :  { %v15960_v9 = vpack.c.bf16 %v7601_v16, %v7593_v23  ;;  %v3992_v45 = vpop.f32.mrb[93].mxu1  ;;  %v13730_v16 = vld [vmem:[%s19060_s0 + $0x3f0] ss:$24 sps:$4 sm:$0xff]  }
 0x244   :  { %v4301_v38 = vpop.f32.mrb[88].mxu0  ;;  %v15962_v46 = vpack.c.bf16 %v7602_v44, %v7594_v37  ;;  %v3994_v13 = vpop.f32.mrb[94].mxu1 }
 0x245   :  { %19143 = vst [vmem:[#allocation11_spill] sm:$0xff] %v15960_v9  ;;  %v11553_v11 = vadd.f32 %v11552_v42, %v4301_v38  ;;  %v4303_v53 = vpop.f32.mrb[89].mxu0  ;;  %v3996_v33 = vpop.f32.mrb[95].mxu1  ;;  %v11564_v9 = vadd.f32 %v3994_v13, %v15363_v35  ;;  %v13733_v13 = vld [vmem:[%s19060_s0 + $0x454] ss:$24 sps:$4 sm:$0xff]  }
 0x246   :  { %19144 = vst [vmem:[#allocation12_spill] sm:$0xff] %v15962_v46  ;;  %v4305_v3 = vpop.f32.mrb[90].mxu0  ;;  %v11555_v18 = vadd.f32 %v11554_v19, %v4303_v53  ;;  %v11560_v19 = vadd.f32 %v3990_v36, %v15363_v35  ;;  %v13732_v36 = vld [vmem:[%s19060_s0 + $0x420] ss:$24 sps:$4 sm:$0xff]  }
 0x247   :  { %v11557_v12 = vadd.f32 %v11556_v55, %v4305_v3  ;;  %v4307_v23 = vpop.f32.mrb[91].mxu0  ;;  %4611 = vmatmul.mubr.bf16.gmra.mrb[200].mxu1 %v13730_v16  ;;  %v7609_v44 = vmax.f32 %v11553_v11, 0.0 }
 0x248   :  { %v11559_v37 = vadd.f32 %v11558_v34, %v4307_v23  ;;  %4620 = vmatprep.mubr.bf16.mxu1 %v13731_v15  ;;  %v7610_v42 = vmax.f32 %v11555_v18, 0.0  ;;  %v11562_v34 = vadd.f32 %v3992_v45, %v15367_v61 }
 0x249   :  { %v7617_v47 = vmax.f32 %v11557_v12, 0.0  ;;  %5564 = vmatmul.mubr.bf16.gmra.mrb[196].mxu0 %v13728_v14 }
 0x24a   :  { %5573 = vmatprep.mubr.bf16.mxu0 %v13729_v4  ;;  %v7618_v38 = vmax.f32 %v11559_v37, 0.0  ;;  %v4000_v3 = vpop.f32.mrb[96].mxu1  ;;  %v11566_v37 = vadd.f32 %v3996_v33, %v15367_v61 }
 0x24b   :  { %v15973_v29 = vpack.c.bf16 %v7617_v47, %v7609_v44  ;;  %v4002_v53 = vpop.f32.mrb[97].mxu1 }
 0x24c   :  { %v4311_v55 = vpop.f32.mrb[92].mxu0  ;;  %v15977_v11 = vpack.c.bf16 %v7618_v38, %v7610_v42  ;;  %v4004_v23 = vpop.f32.mrb[98].mxu1 }
 0x24d   :  { %19145 = vst [vmem:[#allocation13_spill] sm:$0xff] %v15973_v29  ;;  %v11561_v14 = vadd.f32 %v11560_v19, %v4311_v55  ;;  %v4313_v12 = vpop.f32.mrb[93].mxu0  ;;  %v4006_v18 = vpop.f32.mrb[99].mxu1  ;;  %v11568_v55 = vadd.f32 %v4000_v3, %v15363_v35  ;;  %v13734_v3 = vld [vmem:[%s19060_s0 + $0x450] ss:$24 sps:$4 sm:$0xff]  }
 0x24e   :  { %19146 = vst [vmem:[#allocation14_spill] sm:$0xff] %v15977_v11  ;;  %v11563_v46 = vadd.f32 %v11562_v34, %v4313_v12  ;;  %v4315_v4 = vpop.f32.mrb[94].mxu0 }
 0x24f   :  { %v11565_v44 = vadd.f32 %v11564_v9, %v4315_v4  ;;  %v4317_v47 = vpop.f32.mrb[95].mxu0  ;;  %4621 = vmatmul.mubr.bf16.gmra.mrb[204].mxu1 %v13732_v36  ;;  %v7625_v45 = vmax.f32 %v11561_v14, 0.0  ;;  %v11570_v14 = vadd.f32 %v4002_v53, %v15367_v61 }
 0x250   :  { %v11567_v29 = vadd.f32 %v11566_v37, %v4317_v47  ;;  %4630 = vmatprep.mubr.bf16.mxu1 %v13733_v13  ;;  %v7626_v38 = vmax.f32 %v11563_v46, 0.0  ;;  %v11572_v47 = vadd.f32 %v4004_v23, %v15363_v35  ;;  %v13735_v23 = vld [vmem:[%s19060_s0 + $0x484] ss:$24 sps:$4 sm:$0xff]  }
 0x251   :  { %v7633_v42 = vmax.f32 %v11565_v44, 0.0  ;;  %5574 = vmatmul.mubr.bf16.gmra.mrb[200].mxu0 %v13730_v16 }
 0x252   :  { %v7634_v19 = vmax.f32 %v11567_v29, 0.0  ;;  %5583 = vmatprep.mubr.bf16.mxu0 %v13731_v15  ;;  %v4010_v9 = vpop.f32.mrb[100].mxu1  ;;  %v11574_v15 = vadd.f32 %v4006_v18, %v15367_v61 }
 0x253   :  { %v15987_v33 = vpack.c.bf16 %v7633_v42, %v7625_v45  ;;  %v4012_v4 = vpop.f32.mrb[101].mxu1 }
 0x254   :  { %v15990_v34 = vpack.c.bf16 %v7634_v19, %v7626_v38  ;;  %v4321_v12 = vpop.f32.mrb[96].mxu0  ;;  %v4014_v44 = vpop.f32.mrb[102].mxu1 }
 0x255   :  { %19147 = vst [vmem:[#allocation15_spill] sm:$0xff] %v15987_v33  ;;  %v11569_v16 = vadd.f32 %v11568_v55, %v4321_v12  ;;  %v4323_v37 = vpop.f32.mrb[97].mxu0  ;;  %v4016_v29 = vpop.f32.mrb[103].mxu1 }
 0x256   :  { %19148 = vst [vmem:[#allocation16_spill] sm:$0xff] %v15990_v34  ;;  %v11571_v11 = vadd.f32 %v11570_v14, %v4323_v37  ;;  %v4325_v46 = vpop.f32.mrb[98].mxu0  ;;  %v11576_v14 = vadd.f32 %v4010_v9, %v15363_v35  ;;  %v13736_v9 = vld [vmem:[%s19060_s0 + $0x480] ss:$24 sps:$4 sm:$0xff]  }
 0x257   :  { %v11573_v45 = vadd.f32 %v11572_v47, %v4325_v46  ;;  %v4327_v42 = vpop.f32.mrb[99].mxu0  ;;  %4631 = vmatmul.mubr.bf16.gmra.mrb[208].mxu1 %v13734_v3  ;;  %v7641_v38 = vmax.f32 %v11569_v16, 0.0  ;;  %v11578_v16 = vadd.f32 %v4012_v4, %v15367_v61 }
 0x258   :  { %v11575_v33 = vadd.f32 %v11574_v15, %v4327_v42  ;;  %4640 = vmatprep.mubr.bf16.mxu1 %v13735_v23  ;;  %v7642_v19 = vmax.f32 %v11571_v11, 0.0  ;;  %v11580_v42 = vadd.f32 %v4014_v44, %v15363_v35  ;;  %v13737_v44 = vld [vmem:[%s19060_s0 + $0x4b4] ss:$24 sps:$4 sm:$0xff]  }
 0x259   :  { %v7649_v53 = vmax.f32 %v11573_v45, 0.0  ;;  %5584 = vmatmul.mubr.bf16.gmra.mrb[204].mxu0 %v13732_v36 }
 0x25a   :  { %v7650_v55 = vmax.f32 %v11575_v33, 0.0  ;;  %5593 = vmatprep.mubr.bf16.mxu0 %v13733_v13  ;;  %v4020_v12 = vpop.f32.mrb[104].mxu1  ;;  %v11582_v13 = vadd.f32 %v4016_v29, %v15367_v61 }
 0x25b   :  { %v16001_v18 = vpack.c.bf16 %v7649_v53, %v7641_v38  ;;  %v4022_v46 = vpop.f32.mrb[105].mxu1 }
 0x25c   :  { %v16004_v37 = vpack.c.bf16 %v7650_v55, %v7642_v19  ;;  %v4331_v47 = vpop.f32.mrb[100].mxu0  ;;  %v4024_v45 = vpop.f32.mrb[106].mxu1 }
 0x25d   :  { %19149 = vst [vmem:[#allocation17_spill] sm:$0xff] %v16001_v18  ;;  %v11577_v36 = vadd.f32 %v11576_v14, %v4331_v47  ;;  %v4333_v15 = vpop.f32.mrb[101].mxu0  ;;  %v4026_v33 = vpop.f32.mrb[107].mxu1 }
 0x25e   :  { %19150 = vst [vmem:[#allocation18_spill] sm:$0xff] %v16004_v37  ;;  %v11579_v34 = vadd.f32 %v11578_v16, %v4333_v15  ;;  %v4335_v11 = vpop.f32.mrb[102].mxu0  ;;  %v11584_v16 = vadd.f32 %v4020_v12, %v15363_v35  ;;  %v13738_v12 = vld [vmem:[%s19060_s0 + $0x4b0] ss:$24 sps:$4 sm:$0xff]  }
 0x25f   :  { %v11581_v38 = vadd.f32 %v11580_v42, %v4335_v11  ;;  %v4337_v53 = vpop.f32.mrb[103].mxu0  ;;  %4641 = vmatmul.mubr.bf16.gmra.mrb[212].mxu1 %v13736_v9  ;;  %v7657_v19 = vmax.f32 %v11577_v36, 0.0  ;;  %v11586_v36 = vadd.f32 %v4022_v46, %v15367_v61 }
 0x260   :  { %v11583_v18 = vadd.f32 %v11582_v13, %v4337_v53  ;;  %4650 = vmatprep.mubr.bf16.mxu1 %v13737_v44  ;;  %v7658_v55 = vmax.f32 %v11579_v34, 0.0  ;;  %v11588_v53 = vadd.f32 %v4024_v45, %v15363_v35  ;;  %v13739_v45 = vld [vmem:[%s19060_s0 + $0x4e4] ss:$24 sps:$4 sm:$0xff]  }
 0x261   :  { %v7665_v4 = vmax.f32 %v11581_v38, 0.0  ;;  %5594 = vmatmul.mubr.bf16.gmra.mrb[208].mxu0 %v13734_v3 }
 0x262   :  { %v7666_v14 = vmax.f32 %v11583_v18, 0.0  ;;  %5603 = vmatprep.mubr.bf16.mxu0 %v13735_v23  ;;  %v4030_v47 = vpop.f32.mrb[108].mxu1  ;;  %v11590_v23 = vadd.f32 %v4026_v33, %v15367_v61 }
 0x263   :  { %v16015_v29 = vpack.c.bf16 %v7665_v4, %v7657_v19  ;;  %v4032_v11 = vpop.f32.mrb[109].mxu1 }
 0x264   :  { %v16018_v15 = vpack.c.bf16 %v7666_v14, %v7658_v55  ;;  %v4341_v42 = vpop.f32.mrb[104].mxu0  ;;  %v4034_v38 = vpop.f32.mrb[110].mxu1 }
 0x265   :  { %19151 = vst [vmem:[#allocation20_spill] sm:$0xff] %v16015_v29  ;;  %v11585_v3 = vadd.f32 %v11584_v16, %v4341_v42  ;;  %v4343_v13 = vpop.f32.mrb[105].mxu0  ;;  %v4036_v18 = vpop.f32.mrb[111].mxu1 }
 0x266   :  { %19152 = vst [vmem:[#allocation21_spill] sm:$0xff] %v16018_v15  ;;  %v11587_v37 = vadd.f32 %v11586_v36, %v4343_v13  ;;  %v4345_v34 = vpop.f32.mrb[106].mxu0  ;;  %v11592_v36 = vadd.f32 %v4030_v47, %v15363_v35  ;;  %v13740_v47 = vld [vmem:[%s19060_s0 + $0x4e0] ss:$24 sps:$4 sm:$0xff]  }
 0x267   :  { %v11589_v19 = vadd.f32 %v11588_v53, %v4345_v34  ;;  %v4347_v4 = vpop.f32.mrb[107].mxu0  ;;  %4651 = vmatmul.mubr.bf16.gmra.mrb[216].mxu1 %v13738_v12  ;;  %v7673_v55 = vmax.f32 %v11585_v3, 0.0  ;;  %v11594_v3 = vadd.f32 %v4032_v11, %v15367_v61 }
 0x268   :  { %v11591_v29 = vadd.f32 %v11590_v23, %v4347_v4  ;;  %4660 = vmatprep.mubr.bf16.mxu1 %v13739_v45  ;;  %v7674_v14 = vmax.f32 %v11587_v37, 0.0  ;;  %v11596_v4 = vadd.f32 %v4034_v38, %v15363_v35  ;;  %v13741_v38 = vld [vmem:[%s19060_s0 + $0x514] ss:$24 sps:$4 sm:$0xff]  }
 0x269   :  { %v7681_v46 = vmax.f32 %v11589_v19, 0.0  ;;  %5604 = vmatmul.mubr.bf16.gmra.mrb[212].mxu0 %v13736_v9 }
 0x26a   :  { %v7682_v16 = vmax.f32 %v11591_v29, 0.0  ;;  %5613 = vmatprep.mubr.bf16.mxu0 %v13737_v44  ;;  %v4040_v42 = vpop.f32.mrb[112].mxu1  ;;  %v11598_v44 = vadd.f32 %v4036_v18, %v15367_v61 }
 0x26b   :  { %v16029_v33 = vpack.c.bf16 %v7681_v46, %v7673_v55  ;;  %v4042_v34 = vpop.f32.mrb[113].mxu1 }
 0x26c   :  { %v16032_v13 = vpack.c.bf16 %v7682_v16, %v7674_v14  ;;  %v4351_v53 = vpop.f32.mrb[108].mxu0  ;;  %v4044_v19 = vpop.f32.mrb[114].mxu1 }
 0x26d   :  { %19153 = vst [vmem:[#allocation23_spill] sm:$0xff] %v16029_v33  ;;  %v11593_v9 = vadd.f32 %v11592_v36, %v4351_v53  ;;  %v4353_v23 = vpop.f32.mrb[109].mxu0  ;;  %v4045_v29 = vpop.f32.mrb[115].mxu1  ;;  %v11600_v53 = vadd.f32 %v4040_v42, %v15363_v35  ;;  %v11602_v19 = vadd.f32 %v4042_v34, %v15367_v61  ;;  %v19158_v35 = vld [vmem:[#allocation3_spill] sm:$0xff] }
 0x26e   :  { %v11595_v15 = vadd.f32 %v11594_v3, %v4353_v23  ;;  %v4355_v37 = vpop.f32.mrb[110].mxu0  ;;  %v13743_v61 = vld [vmem:[%s19060_s0 + $0xc] ss:$24 sps:$4 sm:$0xff]  }
 0x26f   :  { %v11597_v55 = vadd.f32 %v11596_v4, %v4355_v37  ;;  %v4357_v46 = vpop.f32.mrb[111].mxu0  ;;  %4661 = vmatmul.mubr.bf16.gmra.mrb[220].mxu1 %v13740_v47  ;;  %v7689_v14 = vmax.f32 %v11593_v9, 0.0  ;;  %v467_v42 = vld [vmem:[%s19059_s1 + $0x868] sm:$0xff] }
 0x270   :  { %v11599_v33 = vadd.f32 %v11598_v44, %v4357_v46  ;;  %4670 = vmatprep.mubr.bf16.mxu1 %v13741_v38  ;;  %v7690_v16 = vmax.f32 %v11595_v15, 0.0  ;;  %v13742_v15 = vld [vmem:[%s19060_s0 + $0x510] ss:$24 sps:$4 sm:$0xff]  }
 0x271   :  { %v7697_v11 = vmax.f32 %v11597_v55, 0.0  ;;  %5614 = vmatmul.mubr.bf16.gmra.mrb[216].mxu0 %v13738_v12  ;;  %v13744_v44 = vld [vmem:[%s19060_s0 + $0x8] ss:$24 sps:$4 sm:$0xff]  }
 0x272   :  { %v7698_v36 = vmax.f32 %v11599_v33, 0.0  ;;  %5623 = vmatprep.mubr.bf16.mxu0 %v13739_v45  ;;  %v19157_v45 = vld [vmem:[#allocation2_spill] sm:$0xff]  ;;  %v463_v33 = vld [vmem:[%s19059_s1 + $0x848] sm:$0xff] }
 0x273   :  { %v16043_v18 = vpack.c.bf16 %v7697_v11, %v7689_v14  ;;  %v11082_v34 = vcombine.high %v463_v33, %v467_v42  ;;  %v471_v55 = vld [vmem:[%s19059_s1 + $0x888] sm:$0xff]  ;;  %v19159_v14 = vcombine.low %v15878_v54, %v15883_v60  ;;  %v11081_v11 = vcombine.low %v463_v33, %v467_v42 }
 0x274   :  { %v16046_v3 = vpack.c.bf16 %v7698_v36, %v7690_v16  ;;  %v4361_v23 = vpop.f32.mrb[112].mxu0  ;;  %v475_v46 = vld [vmem:[%s19059_s1 + $0x8a8] sm:$0xff]  ;;  %v464_v16 = vld [vmem:[%s19059_s1 + $0x850] sm:$0xff]  ;;  %v19160_v42 = vcombine.low %v15850_v62, %v15855_v6 }
 0x275   :  { %19154 = vst [vmem:[#allocation24_spill] sm:$0xff] %v16043_v18  ;;  %v16049_v9 = vadd.f32 %v11600_v53, %v4361_v23  ;;  %v4363_v12 = vpop.f32.mrb[113].mxu0  ;;  %v468_v36 = vld [vmem:[%s19059_s1 + $0x870] sm:$0xff]  ;;  %v479_v53 = vld [vmem:[%s19059_s1 + $0x8c8] sm:$0xff]  ;;  %v11089_v23 = vcombine.low %v471_v55, %v475_v46 }
 0x276   :  { %v16051_v4 = vadd.f32 %v11602_v19, %v4363_v12  ;;  %v4365_v37 = vpop.f32.mrb[114].mxu0  ;;  %v483_v54 = vld [vmem:[%s19059_s1 + $0x8e8] sm:$0xff]  ;;  %v11084_v60 = vcombine.high %v464_v16, %v468_v36  ;;  %v13746_v19 = vld [vmem:[%s19060_s0 + $0x38] ss:$24 sps:$4 sm:$0xff]  }
 0x277   :  { %19155 = vst [vmem:[#allocation32_spill] sm:$0xff] %v16049_v9  ;;  %v4366_v29 = vpop.f32.mrb[115].mxu0  ;;  %4671 = vmatmul.mubr.bf16.gmra.mrb[224].mxu1 %v13742_v15  ;;  %v472_v12 = vld [vmem:[%s19059_s1 + $0x890] sm:$0xff]  ;;  %v491_v33 = vld [vmem:[%s19059_s1 + $0x928] sm:$0xff] }
 0x278   :  { %19156 = vst [vmem:[#allocation33_spill] sm:$0xff] %v16051_v4  ;;  %4680 = vmatprep.mubr.bf16.mxu1 %v19157_v45  ;;  %v476_v37 = vld [vmem:[%s19059_s1 + $0x8b0] sm:$0xff]  ;;  %v11098_v29 = vcombine.high %v479_v53, %v483_v54  ;;  %v495_v62 = vld [vmem:[%s19059_s1 + $0x948] sm:$0xff] }
 0x279   :  { %5624 = vmatmul.mubr.bf16.gmra.mrb[220].mxu0 %v13740_v47  ;;  %v13745_v47 = vld [vmem:[%s19060_s0 + $0x3c] ss:$24 sps:$4 sm:$0xff]   ;;  %v499_v6 = vld [vmem:[%s19059_s1 + $0x968] sm:$0xff] }
 0x27a   :  { %5633 = vmatprep.mubr.bf16.mxu0 %v13741_v38  ;;  %v11090_v38 = vcombine.high %v471_v55, %v475_v46  ;;  %v11097_v55 = vcombine.low %v479_v53, %v483_v54  ;;  %v480_v46 = vld [vmem:[%s19059_s1 + $0x8d0] sm:$0xff] }
 0x27b   :  { %v488_v53 = vld [vmem:[%s19059_s1 + $0x910] sm:$0xff] }
 0x27c   :  { %v492_v54 = vld [vmem:[%s19059_s1 + $0x930] sm:$0xff] }
 0x27f   :  { %4681 = vmatmul.mubr.bf16.gmra.mrb[228].mxu1 %v19158_v35 }
 0x280   :  { %4721 = vmatprep.mubr.bf16.mxu1 %v13743_v61 }
 0x281   :  { %5634 = vmatmul.mubr.bf16.gmra.mrb[224].mxu0 %v13742_v15  ;;  %v13747_v15 = vld [vmem:[%s19060_s0 + $0x6c] ss:$24 sps:$4 sm:$0xff]  }
 0x282   :  { %5643 = vmatprep.mubr.bf16.mxu0 %v19157_v45 }
 0x287   :  { %4722 = vmatmul.mubr.bf16.vlgmr.msra.gmra.mrb[116].mxu1 %v13744_v44 }
 0x288   :  { %4731 = vmatprep.mubr.bf16.mxu1 %v13745_v47  ;;  %5011 = vmatpush1.bf16.msra.mxu1 %v19159_v14  ;;  %v484_v14 = vld [vmem:[%s19059_s1 + $0x8f0] sm:$0xff] }
 0x289   :  { %5644 = vmatmul.mubr.bf16.gmra.mrb[228].mxu0 %v19158_v35  ;;  %5012 = vmatprep.subr.bf16.mxu1 %v11082_v34  ;;  %v11083_v34 = vcombine.low %v464_v16, %v468_v36  ;;  %v13748_v36 = vld [vmem:[%s19060_s0 + $0x68] ss:$24 sps:$4 sm:$0xff]  }
 0x28a   :  { %5684 = vmatprep.mubr.bf16.mxu0 %v13743_v61  ;;  %v487_v61 = vld [vmem:[%s19059_s1 + $0x908] sm:$0xff] }
 0x28b   :  { %v11105_v16 = vcombine.low %v487_v61, %v491_v33 }
 0x28c   :  { %5013 = vmatpush1.bf16.msra.mxu1 %v11081_v11  ;;  %v11106_v11 = vcombine.high %v487_v61, %v491_v33  ;;  %v11108_v61 = vcombine.high %v488_v53, %v492_v54  ;;  %v496_v33 = vld [vmem:[%s19059_s1 + $0x950] sm:$0xff] }
 0x28d   :  { %5014 = vmatprep.subr.bf16.mxu1 %v11090_v38  ;;  %v11100_v38 = vcombine.high %v480_v46, %v484_v14 }
 0x28f   :  { %4732 = vmatmul.mubr.bf16.gmra.mrb[120].mxu1 %v13746_v19 }
 0x290   :  { %4741 = vmatprep.mubr.bf16.mxu1 %v13747_v15  ;;  %5015 = vmatpush1.bf16.msra.mxu1 %v11089_v23  ;;  %v13749_v23 = vld [vmem:[%s19060_s0 + $0x9c] ss:$24 sps:$4 sm:$0xff]  }
 0x291   :  { %5685 = vmatmul.mubr.bf16.vlgmr.msra.gmra.mrb[116].mxu0 %v13744_v44  ;;  %v11092_v44 = vcombine.high %v472_v12, %v476_v37  ;;  %5016 = vmatprep.subr.bf16.mxu1 %v11098_v29  ;;  %v11099_v29 = vcombine.low %v480_v46, %v484_v14 }
 0x292   :  { %5974 = vmatpush1.bf16.msra.mxu0 %v19160_v42  ;;  %5694 = vmatprep.mubr.bf16.mxu0 %v13745_v47  ;;  %v11091_v47 = vcombine.low %v472_v12, %v476_v37  ;;  %v503_v12 = vld [vmem:[%s19059_s1 + $0x988] sm:$0xff]  ;;  %v500_v42 = vld [vmem:[%s19059_s1 + $0x970] sm:$0xff] }
 0x293   :  { %5975 = vmatprep.subr.bf16.mxu0 %v11084_v60  ;;  %v11114_v60 = vcombine.high %v495_v62, %v499_v6  ;;  %v507_v37 = vld [vmem:[%s19059_s1 + $0x9a8] sm:$0xff]  ;;  %v11116_v46 = vcombine.high %v496_v33, %v500_v42 }
 0x294   :  { %5017 = vmatpush1.bf16.msra.mxu1 %v11097_v55  ;;  %v11107_v55 = vcombine.low %v488_v53, %v492_v54  ;;  %v11121_v14 = vcombine.low %v503_v12, %v507_v37  ;;  %v523_v53 = vld [vmem:[%s19059_s1 + $0xa28] sm:$0xff]  ;;  %v11115_v54 = vcombine.low %v496_v33, %v500_v42 }
 0x295   :  { %5018 = vmatprep.subr.bf16.mxu1 %v11106_v11  ;;  %v13750_v11 = vld [vmem:[%s19060_s0 + $0x98] ss:$24 sps:$4 sm:$0xff]  }
 0x296   :  { %5976 = vmatpush1.bf16.msra.mxu0 %v11083_v34  ;;  %v11122_v34 = vcombine.high %v503_v12, %v507_v37  ;;  %v512_v12 = vld [vmem:[%s19059_s1 + $0x9d0] sm:$0xff] }
 0x297   :  { %5977 = vmatprep.subr.bf16.mxu0 %v11092_v44  ;;  %4742 = vmatmul.mubr.bf16.gmra.mrb[124].mxu1 %v13748_v36  ;;  %v515_v44 = vld [vmem:[%s19059_s1 + $0x9e8] sm:$0xff]  ;;  %v516_v37 = vld [vmem:[%s19059_s1 + $0x9f0] sm:$0xff] }
 0x298   :  { %4751 = vmatprep.mubr.bf16.mxu1 %v13749_v23  ;;  %5019 = vmatpush1.bf16.msra.mxu1 %v11105_v16  ;;  %v519_v16 = vld [vmem:[%s19059_s1 + $0xa08] sm:$0xff]  ;;  %v11132_v33 = vcombine.high %v512_v12, %v516_v37 }
 0x299   :  { %5695 = vmatmul.mubr.bf16.gmra.mrb[120].mxu0 %v13746_v19  ;;  %v11113_v19 = vcombine.low %v495_v62, %v499_v6  ;;  %5020 = vmatprep.subr.bf16.mxu1 %v11114_v60  ;;  %v504_v62 = vld [vmem:[%s19059_s1 + $0x990] sm:$0xff]  ;;  %v11137_v42 = vcombine.low %v519_v16, %v523_v53 }
 0x29a   :  { %5704 = vmatprep.mubr.bf16.mxu0 %v13747_v15  ;;  %5978 = vmatpush1.bf16.msra.mxu0 %v11091_v47  ;;  %v511_v15 = vld [vmem:[%s19059_s1 + $0x9c8] sm:$0xff]  ;;  %v508_v6 = vld [vmem:[%s19059_s1 + $0x9b0] sm:$0xff] }
 0x29b   :  { %5979 = vmatprep.subr.bf16.mxu0 %v11100_v38  ;;  %v11130_v47 = vcombine.high %v511_v15, %v515_v44  ;;  %v13751_v38 = vld [vmem:[%s19060_s0 + $0xcc] ss:$24 sps:$4 sm:$0xff]   ;;  %v11124_v60 = vcombine.high %v504_v62, %v508_v6 }
 0x29c   :  { %5021 = vmatpush1.bf16.msra.mxu1 %v11113_v19  ;;  %v11123_v19 = vcombine.low %v504_v62, %v508_v6  ;;  %v539_v62 = vld [vmem:[%s19059_s1 + $0xaa8] sm:$0xff]  ;;  %v11131_v6 = vcombine.low %v512_v12, %v516_v37  ;;  %v13754_v12 = vld [vmem:[%s19060_s0 + $0xf8] ss:$24 sps:$4 sm:$0xff]  }
 0x29d   :  { %5022 = vmatprep.subr.bf16.mxu1 %v11122_v34  ;;  %v13752_v34 = vld [vmem:[%s19060_s0 + $0xc8] ss:$24 sps:$4 sm:$0xff]   ;;  %v536_v37 = vld [vmem:[%s19059_s1 + $0xa90] sm:$0xff] }
 0x29e   :  { %5980 = vmatpush1.bf16.msra.mxu0 %v11099_v29  ;;  %v11138_v29 = vcombine.high %v519_v16, %v523_v53  ;;  %v528_v16 = vld [vmem:[%s19059_s1 + $0xa50] sm:$0xff] }
 0x29f   :  { %5981 = vmatprep.subr.bf16.mxu0 %v11108_v61  ;;  %4752 = vmatmul.mubr.bf16.gmra.mrb[128].mxu1 %v13750_v11  ;;  %v531_v61 = vld [vmem:[%s19059_s1 + $0xa68] sm:$0xff]  ;;  %v532_v53 = vld [vmem:[%s19059_s1 + $0xa70] sm:$0xff] }
 0x2a0   :  { %4761 = vmatprep.mubr.bf16.mxu1 %v13751_v38  ;;  %5023 = vmatpush1.bf16.msra.mxu1 %v11121_v14  ;;  %v535_v14 = vld [vmem:[%s19059_s1 + $0xa88] sm:$0xff] }
 0x2a1   :  { %5705 = vmatmul.mubr.bf16.gmra.mrb[124].mxu0 %v13748_v36  ;;  %v11129_v36 = vcombine.low %v511_v15, %v515_v44  ;;  %5024 = vmatprep.subr.bf16.mxu1 %v11130_v47  ;;  %v520_v15 = vld [vmem:[%s19059_s1 + $0xa10] sm:$0xff] }
 0x2a2   :  { %5714 = vmatprep.mubr.bf16.mxu0 %v13749_v23  ;;  %5982 = vmatpush1.bf16.msra.mxu0 %v11107_v55  ;;  %v527_v23 = vld [vmem:[%s19059_s1 + $0xa48] sm:$0xff]  ;;  %v524_v44 = vld [vmem:[%s19059_s1 + $0xa30] sm:$0xff] }
 0x2a3   :  { %5983 = vmatprep.subr.bf16.mxu0 %v11116_v46  ;;  %v11146_v55 = vcombine.high %v527_v23, %v531_v61  ;;  %v13753_v46 = vld [vmem:[%s19060_s0 + $0xfc] ss:$24 sps:$4 sm:$0xff]   ;;  %v11140_v47 = vcombine.high %v520_v15, %v524_v44 }
 0x2a4   :  { %5025 = vmatpush1.bf16.msra.mxu1 %v11129_v36  ;;  %v11153_v36 = vcombine.low %v535_v14, %v539_v62 }
 0x2a5   :  { %5026 = vmatprep.subr.bf16.mxu1 %v11138_v29  ;;  %v540_v29 = vld [vmem:[%s19059_s1 + $0xab0] sm:$0xff] }
 0x2a6   :  { %5984 = vmatpush1.bf16.msra.mxu0 %v11115_v54  ;;  %v11154_v54 = vcombine.high %v535_v14, %v539_v62  ;;  %v547_v14 = vld [vmem:[%s19059_s1 + $0xae8] sm:$0xff]  ;;  %v552_v62 = vld [vmem:[%s19059_s1 + $0xb10] sm:$0xff] }
 0x2a7   :  { %5985 = vmatprep.subr.bf16.mxu0 %v11124_v60  ;;  %4762 = vmatmul.mubr.bf16.gmra.mrb[132].mxu1 %v13752_v34  ;;  %v11139_v60 = vcombine.low %v520_v15, %v524_v44  ;;  %v13756_v44 = vld [vmem:[%s19060_s0 + $0x128] ss:$24 sps:$4 sm:$0xff]  }
 0x2a8   :  { %4771 = vmatprep.mubr.bf16.mxu1 %v13753_v46  ;;  %5027 = vmatpush1.bf16.msra.mxu1 %v11137_v42  ;;  %v548_v42 = vld [vmem:[%s19059_s1 + $0xaf0] sm:$0xff] }
 0x2a9   :  { %5715 = vmatmul.mubr.bf16.gmra.mrb[128].mxu0 %v13750_v11  ;;  %v11145_v11 = vcombine.low %v527_v23, %v531_v61  ;;  %5028 = vmatprep.subr.bf16.mxu1 %v11146_v55  ;;  %v13755_v23 = vld [vmem:[%s19060_s0 + $0x12c] ss:$24 sps:$4 sm:$0xff]   ;;  %v11147_v61 = vcombine.low %v528_v16, %v532_v53  ;;  %v13757_v55 = vld [vmem:[%s19060_s0 + $0x15c] ss:$24 sps:$4 sm:$0xff]  }
 0x2aa   :  { %5724 = vmatprep.mubr.bf16.mxu0 %v13751_v38  ;;  %5986 = vmatpush1.bf16.msra.mxu0 %v11123_v19  ;;  %v11148_v38 = vcombine.high %v528_v16, %v532_v53  ;;  %v11156_v19 = vcombine.high %v536_v37, %v540_v29  ;;  %v556_v16 = vld [vmem:[%s19059_s1 + $0xb30] sm:$0xff] }
 0x2ab   :  { %5987 = vmatprep.subr.bf16.mxu0 %v11132_v33  ;;  %v544_v33 = vld [vmem:[%s19059_s1 + $0xad0] sm:$0xff]  ;;  %v11172_v53 = vcombine.high %v552_v62, %v556_v16 }
 0x2ac   :  { %5029 = vmatpush1.bf16.msra.mxu1 %v11145_v11  ;;  %v11164_v15 = vcombine.high %v544_v33, %v548_v42 }
 0x2ad   :  { %5030 = vmatprep.subr.bf16.mxu1 %v11154_v54  ;;  %v11171_v54 = vcombine.low %v552_v62, %v556_v16  ;;  %v572_v16 = vld [vmem:[%s19059_s1 + $0xbb0] sm:$0xff] }
 0x2ae   :  { %5988 = vmatpush1.bf16.msra.mxu0 %v11131_v6  ;;  %v11163_v6 = vcombine.low %v544_v33, %v548_v42  ;;  %v564_v33 = vld [vmem:[%s19059_s1 + $0xb70] sm:$0xff] }
 0x2af   :  { %5989 = vmatprep.subr.bf16.mxu0 %v11140_v47  ;;  %4772 = vmatmul.mubr.bf16.gmra.mrb[136].mxu1 %v13754_v12 }
 0x2b0   :  { %4781 = vmatprep.mubr.bf16.mxu1 %v13755_v23  ;;  %5031 = vmatpush1.bf16.msra.mxu1 %v11153_v36  ;;  %v13760_v36 = vld [vmem:[%s19060_s0 + $0x188] ss:$24 sps:$4 sm:$0xff]  }
 0x2b1   :  { %5725 = vmatmul.mubr.bf16.gmra.mrb[132].mxu0 %v13752_v34  ;;  %v11155_v34 = vcombine.low %v536_v37, %v540_v29  ;;  %v555_v37 = vld [vmem:[%s19059_s1 + $0xb28] sm:$0xff]  ;;  %v13761_v29 = vld [vmem:[%s19060_s0 + $0x1bc] ss:$24 sps:$4 sm:$0xff]  }
 0x2b2   :  { %5734 = vmatprep.mubr.bf16.mxu0 %v13753_v46  ;;  %5990 = vmatpush1.bf16.msra.mxu0 %v11139_v60  ;;  %v543_v46 = vld [vmem:[%s19059_s1 + $0xac8] sm:$0xff]  ;;  %v13758_v60 = vld [vmem:[%s19060_s0 + $0x158] ss:$24 sps:$4 sm:$0xff]  }
 0x2b3   :  { %5991 = vmatprep.subr.bf16.mxu0 %v11148_v38  ;;  %v11161_v47 = vcombine.low %v543_v46, %v547_v14  ;;  %v11162_v11 = vcombine.high %v543_v46, %v547_v14  ;;  %v13759_v38 = vld [vmem:[%s19060_s0 + $0x18c] ss:$24 sps:$4 sm:$0xff]  }
 0x2b4   :  { %v563_v46 = vld [vmem:[%s19059_s1 + $0xb68] sm:$0xff] }
 0x2b5   :  { %5032 = vmatprep.subr.bf16.mxu1 %v11162_v11  ;;  %v568_v11 = vld [vmem:[%s19059_s1 + $0xb90] sm:$0xff] }
 0x2b6   :  { %5992 = vmatpush1.bf16.msra.mxu0 %v11147_v61  ;;  %5033 = vmatpush1.bf16.msra.mxu1 %v11161_v47  ;;  %v13765_v47 = vld [vmem:[%s19060_s0 + $0x21c] ss:$24 sps:$4 sm:$0xff]  }
 0x2b7   :  { %5993 = vmatprep.subr.bf16.mxu0 %v11156_v19  ;;  %4782 = vmatmul.mubr.bf16.gmra.mrb[140].mxu1 %v13756_v44  ;;  %v560_v19 = vld [vmem:[%s19059_s1 + $0xb50] sm:$0xff] }
 0x2b8   :  { %4791 = vmatprep.mubr.bf16.mxu1 %v13757_v55  ;;  %v11179_v42 = vcombine.low %v560_v19, %v564_v33 }
 0x2b9   :  { %5735 = vmatmul.mubr.bf16.gmra.mrb[136].mxu0 %v13754_v12  ;;  %v551_v12 = vld [vmem:[%s19059_s1 + $0xb08] sm:$0xff] }
 0x2ba   :  { %5744 = vmatprep.mubr.bf16.mxu0 %v13755_v23  ;;  %5994 = vmatpush1.bf16.msra.mxu0 %v11155_v34  ;;  %v11169_v23 = vcombine.low %v551_v12, %v555_v37  ;;  %v11170_v61 = vcombine.high %v551_v12, %v555_v37  ;;  %v11180_v34 = vcombine.high %v560_v19, %v564_v33  ;;  %v571_v12 = vld [vmem:[%s19059_s1 + $0xba8] sm:$0xff]  ;;  %v576_v19 = vld [vmem:[%s19059_s1 + $0xbd0] sm:$0xff] }
 0x2bb   :  { %5995 = vmatprep.subr.bf16.mxu0 %v11164_v15  ;;  %v13762_v15 = vld [vmem:[%s19060_s0 + $0x1b8] ss:$24 sps:$4 sm:$0xff]  }
 0x2bc   :  { %5034 = vmatprep.subr.bf16.mxu1 %v11170_v61  ;;  %v13769_v61 = vld [vmem:[%s19060_s0 + $0x27c] ss:$24 sps:$4 sm:$0xff]  }
 0x2bd   :  { %5035 = vmatpush1.bf16.msra.mxu1 %v11169_v23  ;;  %v13768_v23 = vld [vmem:[%s19060_s0 + $0x248] ss:$24 sps:$4 sm:$0xff]   ;;  %v580_v33 = vld [vmem:[%s19059_s1 + $0xbf0] sm:$0xff] }
 0x2be   :  { %5996 = vmatpush1.bf16.msra.mxu0 %v11163_v6  ;;  %v13764_v6 = vld [vmem:[%s19060_s0 + $0x1e8] ss:$24 sps:$4 sm:$0xff]  }
 0x2bf   :  { %5997 = vmatprep.subr.bf16.mxu0 %v11172_v53  ;;  %4792 = vmatmul.mubr.bf16.gmra.mrb[144].mxu1 %v13758_v60  ;;  %v11187_v53 = vcombine.low %v568_v11, %v572_v16 }
 0x2c0   :  { %4801 = vmatprep.mubr.bf16.mxu1 %v13759_v38 }
 0x2c1   :  { %5745 = vmatmul.mubr.bf16.gmra.mrb[140].mxu0 %v13756_v44  ;;  %v13763_v44 = vld [vmem:[%s19060_s0 + $0x1ec] ss:$24 sps:$4 sm:$0xff]  }
 0x2c2   :  { %5754 = vmatprep.mubr.bf16.mxu0 %v13757_v55  ;;  %5998 = vmatpush1.bf16.msra.mxu0 %v11171_v54  ;;  %v559_v55 = vld [vmem:[%s19059_s1 + $0xb48] sm:$0xff]  ;;  %v11188_v54 = vcombine.high %v568_v11, %v572_v16  ;;  %v13774_v16 = vld [vmem:[%s19060_s0 + $0x2d8] ss:$24 sps:$4 sm:$0xff]  }
 0x2c3   :  { %5999 = vmatprep.subr.bf16.mxu0 %v11180_v34  ;;  %v11177_v14 = vcombine.low %v559_v55, %v563_v46  ;;  %v11178_v62 = vcombine.high %v559_v55, %v563_v46  ;;  %v11195_v34 = vcombine.low %v576_v19, %v580_v33  ;;  %v13481_v11 = vld [vmem:[%s19062_s3 + $0x4] ss:$8 sps:$4 sm:$0xff]  }
 0x2c5   :  { %5036 = vmatprep.subr.bf16.mxu1 %v11178_v62  ;;  %v13771_v62 = vld [vmem:[%s19060_s0 + $0x2ac] ss:$24 sps:$4 sm:$0xff]  }
 0x2c6   :  { %6000 = vmatpush1.bf16.msra.mxu0 %v11179_v42  ;;  %5037 = vmatpush1.bf16.msra.mxu1 %v11177_v14  ;;  %v575_v42 = vld [vmem:[%s19059_s1 + $0xbc8] sm:$0xff]  ;;  %v13770_v14 = vld [vmem:[%s19060_s0 + $0x278] ss:$24 sps:$4 sm:$0xff]  }
 0x2c7   :  { %4802 = vmatmul.mubr.bf16.gmra.mrb[148].mxu1 %v13760_v36  ;;  %6001 = vmatprep.subr.bf16.mxu0 %v11188_v54  ;;  %v16351_v54 = vld [vmem:[%s19059_s1 + $0x18] sm:$0xff] }
 0x2c8   :  { %4811 = vmatprep.mubr.bf16.mxu1 %v13761_v29 }
 0x2c9   :  { %5755 = vmatmul.mubr.bf16.gmra.mrb[144].mxu0 %v13758_v60  ;;  %v13766_v60 = vld [vmem:[%s19060_s0 + $0x218] ss:$24 sps:$4 sm:$0xff]  }
 0x2ca   :  { %5764 = vmatprep.mubr.bf16.mxu0 %v13759_v38  ;;  %6002 = vmatpush1.bf16.msra.mxu0 %v11187_v53  ;;  %v13767_v38 = vld [vmem:[%s19060_s0 + $0x24c] ss:$24 sps:$4 sm:$0xff]  }
 0x2cb   :  { %v13775_v53 = vld [vmem:[%s19060_s0 + $0x30c] ss:$24 sps:$4 sm:$0xff]  }
 0x2cf   :  { %4812 = vmatmul.mubr.bf16.gmra.mrb[152].mxu1 %v13762_v15 }
 0x2d0   :  { %4821 = vmatprep.mubr.bf16.mxu1 %v13763_v44 }
 0x2d1   :  { %5765 = vmatmul.mubr.bf16.gmra.mrb[148].mxu0 %v13760_v36  ;;  %v567_v36 = vld [vmem:[%s19059_s1 + $0xb88] sm:$0xff] }
 0x2d2   :  { %5774 = vmatprep.mubr.bf16.mxu0 %v13761_v29  ;;  %v11185_v37 = vcombine.low %v567_v36, %v571_v12  ;;  %v11186_v29 = vcombine.high %v567_v36, %v571_v12  ;;  %v13776_v12 = vld [vmem:[%s19060_s0 + $0x308] ss:$24 sps:$4 sm:$0xff]  }
 0x2d4   :  { %5038 = vmatprep.subr.bf16.mxu1 %v11186_v29  ;;  %v13778_v29 = vld [vmem:[%s19060_s0 + $0x338] ss:$24 sps:$4 sm:$0xff]  }
 0x2d5   :  { %5039 = vmatpush1.bf16.msra.mxu1 %v11185_v37  ;;  %v13777_v37 = vld [vmem:[%s19060_s0 + $0x33c] ss:$24 sps:$4 sm:$0xff]  }
 0x2d7   :  { %4822 = vmatmul.mubr.bf16.gmra.mrb[156].mxu1 %v13764_v6 }
 0x2d8   :  { %4831 = vmatprep.mubr.bf16.mxu1 %v13765_v47 }
 0x2d9   :  { %5775 = vmatmul.mubr.bf16.gmra.mrb[152].mxu0 %v13762_v15  ;;  %v11196_v15 = vcombine.high %v576_v19, %v580_v33  ;;  %v13781_v19 = vld [vmem:[%s19060_s0 + $0x39c] ss:$24 sps:$4 sm:$0xff]   ;;  %v13782_v33 = vld [vmem:[%s19060_s0 + $0x398] ss:$24 sps:$4 sm:$0xff]  }
 0x2da   :  { %5784 = vmatprep.mubr.bf16.mxu0 %v13763_v44  ;;  %v579_v44 = vld [vmem:[%s19059_s1 + $0xbe8] sm:$0xff] }
 0x2db   :  { %v11193_v55 = vcombine.low %v575_v42, %v579_v44  ;;  %v11194_v46 = vcombine.high %v575_v42, %v579_v44  ;;  %6003 = vmatprep.subr.bf16.mxu0 %v11196_v15  ;;  %v13783_v42 = vld [vmem:[%s19060_s0 + $0x3cc] ss:$24 sps:$4 sm:$0xff]   ;;  %v13785_v15 = vld [vmem:[%s19060_s0 + $0x3fc] ss:$24 sps:$4 sm:$0xff]   ;;  %v13786_v44 = vld [vmem:[%s19060_s0 + $0x3f8] ss:$24 sps:$4 sm:$0xff]  }
 0x2dc   :  { %6004 = vmatpush1.bf16.msra.mxu0 %v11195_v34  ;;  %v13784_v34 = vld [vmem:[%s19060_s0 + $0x3c8] ss:$24 sps:$4 sm:$0xff]  }
 0x2dd   :  { %5040 = vmatprep.subr.bf16.mxu1 %v11194_v46  ;;  %8725 = vmatprep.subr.bf16.mxu0 %v13481_v11  ;;  %v13788_v46 = vld [vmem:[%s19060_s0 + $0x428] ss:$24 sps:$4 sm:$0xff]   ;;  %v13793_v11 = vld [vmem:[%s19060_s0 + $0x4bc] ss:$24 sps:$4 sm:$0xff]  }
 0x2de   :  { %5041 = vmatpush1.bf16.msra.mxu1 %v11193_v55  ;;  %v13787_v55 = vld [vmem:[%s19060_s0 + $0x42c] ss:$24 sps:$4 sm:$0xff]  }
 0x2df   :  { %4832 = vmatmul.mubr.bf16.gmra.mrb[160].mxu1 %v13766_v60 }
 0x2e0   :  { %4841 = vmatprep.mubr.bf16.mxu1 %v13767_v38 }
 0x2e1   :  { %5785 = vmatmul.mubr.bf16.gmra.mrb[156].mxu0 %v13764_v6  ;;  %v13772_v6 = vld [vmem:[%s19060_s0 + $0x2a8] ss:$24 sps:$4 sm:$0xff]  }
 0x2e2   :  { %5794 = vmatprep.mubr.bf16.mxu0 %v13765_v47  ;;  %v13773_v47 = vld [vmem:[%s19060_s0 + $0x2dc] ss:$24 sps:$4 sm:$0xff]  }
 0x2e7   :  { %4842 = vmatmul.mubr.bf16.gmra.mrb[164].mxu1 %v13768_v23 }
 0x2e8   :  { %4851 = vmatprep.mubr.bf16.mxu1 %v13769_v61 }
 0x2e9   :  { %5795 = vmatmul.mubr.bf16.gmra.mrb[160].mxu0 %v13766_v60  ;;  %v16356_v60 = vld [vmem:[%s19059_s1 + $0x38] sm:$0xff] }
 0x2ea   :  { %5804 = vmatprep.mubr.bf16.mxu0 %v13767_v38  ;;  %v10821_v38 = vcombine.low %v16351_v54, %v16356_v60  ;;  %v10822_v36 = vcombine.high %v16351_v54, %v16356_v60  ;;  %v13484_v54 = vld [vmem:[%s19062_s3 + $0x14] ss:$8 sps:$4 sm:$0xff]  }
 0x2ec   :  { %6294 = vmatprep.subr.bf16.mxu1 %v10822_v36  ;;  %v13796_v36 = vld [vmem:[%s19060_s0 + $0x4e8] ss:$24 sps:$4 sm:$0xff]  }
 0x2ef   :  { %4852 = vmatmul.mubr.bf16.gmra.mrb[168].mxu1 %v13770_v14 }
 0x2f0   :  { %4861 = vmatprep.mubr.bf16.mxu1 %v13771_v62 }
 0x2f1   :  { %5805 = vmatmul.mubr.bf16.gmra.mrb[164].mxu0 %v13768_v23  ;;  %v13779_v23 = vld [vmem:[%s19060_s0 + $0x36c] ss:$24 sps:$4 sm:$0xff]  }
 0x2f2   :  { %5814 = vmatprep.mubr.bf16.mxu0 %v13769_v61  ;;  %v13780_v61 = vld [vmem:[%s19060_s0 + $0x368] ss:$24 sps:$4 sm:$0xff]  }
 0x2f7   :  { %4862 = vmatmul.mubr.bf16.gmra.mrb[172].mxu1 %v13772_v6 }
 0x2f8   :  { %4871 = vmatprep.mubr.bf16.mxu1 %v13773_v47 }
 0x2f9   :  { %5815 = vmatmul.mubr.bf16.gmra.mrb[168].mxu0 %v13770_v14  ;;  %v13789_v14 = vld [vmem:[%s19060_s0 + $0x45c] ss:$24 sps:$4 sm:$0xff]  }
 0x2fa   :  { %5824 = vmatprep.mubr.bf16.mxu0 %v13771_v62  ;;  %v13790_v62 = vld [vmem:[%s19060_s0 + $0x458] ss:$24 sps:$4 sm:$0xff]  }
 0x2ff   :  { %4872 = vmatmul.mubr.bf16.gmra.mrb[176].mxu1 %v13774_v16 }
 0x300   :  { %4881 = vmatprep.mubr.bf16.mxu1 %v13775_v53 }
 0x301   :  { %5825 = vmatmul.mubr.bf16.gmra.mrb[172].mxu0 %v13772_v6  ;;  %v13791_v6 = vld [vmem:[%s19060_s0 + $0x48c] ss:$24 sps:$4 sm:$0xff]  }
 0x302   :  { %5834 = vmatprep.mubr.bf16.mxu0 %v13773_v47  ;;  %v13792_v47 = vld [vmem:[%s19060_s0 + $0x488] ss:$24 sps:$4 sm:$0xff]  }
 0x307   :  { %4882 = vmatmul.mubr.bf16.gmra.mrb[180].mxu1 %v13776_v12 }
 0x308   :  { %4891 = vmatprep.mubr.bf16.mxu1 %v13777_v37 }
 0x309   :  { %5835 = vmatmul.mubr.bf16.gmra.mrb[176].mxu0 %v13774_v16  ;;  %v13794_v16 = vld [vmem:[%s19060_s0 + $0x4b8] ss:$24 sps:$4 sm:$0xff]  }
 0x30a   :  { %5844 = vmatprep.mubr.bf16.mxu0 %v13775_v53  ;;  %v13795_v53 = vld [vmem:[%s19060_s0 + $0x4ec] ss:$24 sps:$4 sm:$0xff]  }
 0x30f   :  { %4892 = vmatmul.mubr.bf16.gmra.mrb[184].mxu1 %v13778_v29 }
 0x310   :  { %4901 = vmatprep.mubr.bf16.mxu1 %v13779_v23 }
 0x311   :  { %5845 = vmatmul.mubr.bf16.gmra.mrb[180].mxu0 %v13776_v12  ;;  %v13797_v12 = vld [vmem:[%s19060_s0 + $0x51c] ss:$24 sps:$4 sm:$0xff]  }
 0x312   :  { %5854 = vmatprep.mubr.bf16.mxu0 %v13777_v37  ;;  %v13798_v37 = vld [vmem:[%s19060_s0 + $0x518] ss:$24 sps:$4 sm:$0xff]  }
 0x317   :  { %4902 = vmatmul.mubr.bf16.gmra.mrb[188].mxu1 %v13780_v61 }
 0x318   :  { %4911 = vmatprep.mubr.bf16.mxu1 %v13781_v19 }
 0x319   :  { %5855 = vmatmul.mubr.bf16.gmra.mrb[184].mxu0 %v13778_v29  ;;  %v19161_v29 = vld [vmem:[#allocation22_spill] sm:$0xff] }
 0x31a   :  { %5864 = vmatprep.mubr.bf16.mxu0 %v13779_v23  ;;  %v13799_v23 = vld [vmem:[%s19060_s0 + $0x14] ss:$24 sps:$4 sm:$0xff]  }
 0x31f   :  { %4912 = vmatmul.mubr.bf16.gmra.mrb[192].mxu1 %v13782_v33 }
 0x320   :  { %4921 = vmatprep.mubr.bf16.mxu1 %v13783_v42 }
 0x321   :  { %5865 = vmatmul.mubr.bf16.gmra.mrb[188].mxu0 %v13780_v61  ;;  %v209_v61 = vld [vmem:[%s19059_s1 + $0x58] sm:$0xff] }
 0x322   :  { %5874 = vmatprep.mubr.bf16.mxu0 %v13781_v19  ;;  %v213_v19 = vld [vmem:[%s19059_s1 + $0x78] sm:$0xff] }
 0x327   :  { %4922 = vmatmul.mubr.bf16.gmra.mrb[196].mxu1 %v13784_v34 }
 0x328   :  { %4931 = vmatprep.mubr.bf16.mxu1 %v13785_v15 }
 0x329   :  { %5875 = vmatmul.mubr.bf16.gmra.mrb[192].mxu0 %v13782_v33  ;;  %v10830_v33 = vcombine.high %v209_v61, %v213_v19 }
 0x32a   :  { %5884 = vmatprep.mubr.bf16.mxu0 %v13783_v42  ;;  %v13800_v42 = vld [vmem:[%s19060_s0 + $0x10] ss:$24 sps:$4 sm:$0xff]  }
 0x32f   :  { %4932 = vmatmul.mubr.bf16.gmra.mrb[200].mxu1 %v13786_v44 }
 0x330   :  { %4941 = vmatprep.mubr.bf16.mxu1 %v13787_v55 }
 0x331   :  { %5885 = vmatmul.mubr.bf16.gmra.mrb[196].mxu0 %v13784_v34  ;;  %v217_v34 = vld [vmem:[%s19059_s1 + $0x98] sm:$0xff] }
 0x332   :  { %5894 = vmatprep.mubr.bf16.mxu0 %v13785_v15  ;;  %v221_v15 = vld [vmem:[%s19059_s1 + $0xb8] sm:$0xff] }
 0x333   :  { %v10837_v60 = vcombine.low %v217_v34, %v221_v15 }
 0x337   :  { %4942 = vmatmul.mubr.bf16.gmra.mrb[204].mxu1 %v13788_v46 }
 0x338   :  { %4951 = vmatprep.mubr.bf16.mxu1 %v13789_v14 }
 0x339   :  { %5895 = vmatmul.mubr.bf16.gmra.mrb[200].mxu0 %v13786_v44  ;;  %v13801_v44 = vld [vmem:[%s19060_s0 + $0x44] ss:$24 sps:$4 sm:$0xff]  }
 0x33a   :  { %5904 = vmatprep.mubr.bf16.mxu0 %v13787_v55  ;;  %v10829_v55 = vcombine.low %v209_v61, %v213_v19  ;;  %v241_v61 = vld [vmem:[%s19059_s1 + $0x158] sm:$0xff] }
 0x33b   :  { %v245_v19 = vld [vmem:[%s19059_s1 + $0x178] sm:$0xff] }
 0x33f   :  { %4952 = vmatmul.mubr.bf16.gmra.mrb[208].mxu1 %v13790_v62 }
 0x340   :  { %4961 = vmatprep.mubr.bf16.mxu1 %v13791_v6 }
 0x341   :  { %5905 = vmatmul.mubr.bf16.gmra.mrb[204].mxu0 %v13788_v46  ;;  %v10838_v46 = vcombine.high %v217_v34, %v221_v15  ;;  %v13804_v15 = vld [vmem:[%s19060_s0 + $0x70] ss:$24 sps:$4 sm:$0xff]  }
 0x342   :  { %5914 = vmatprep.mubr.bf16.mxu0 %v13789_v14  ;;  %v225_v14 = vld [vmem:[%s19059_s1 + $0xd8] sm:$0xff] }
 0x347   :  { %4962 = vmatmul.mubr.bf16.gmra.mrb[212].mxu1 %v13792_v47 }
 0x348   :  { %4971 = vmatprep.mubr.bf16.mxu1 %v13793_v11 }
 0x349   :  { %5915 = vmatmul.mubr.bf16.gmra.mrb[208].mxu0 %v13790_v62  ;;  %v229_v62 = vld [vmem:[%s19059_s1 + $0xf8] sm:$0xff] }
 0x34a   :  { %5924 = vmatprep.mubr.bf16.mxu0 %v13791_v6  ;;  %v13479_v6 = vld [vmem:[%s19062_s3] ss:$8 sps:$4 sm:$0xff]  }
 0x34f   :  { %4972 = vmatmul.mubr.bf16.gmra.mrb[216].mxu1 %v13794_v16 }
 0x350   :  { %4981 = vmatprep.mubr.bf16.mxu1 %v13795_v53 }
 0x351   :  { %5925 = vmatmul.mubr.bf16.gmra.mrb[212].mxu0 %v13792_v47  ;;  %v10846_v47 = vcombine.high %v225_v14, %v229_v62 }
 0x352   :  { %5934 = vmatprep.mubr.bf16.mxu0 %v13793_v11  ;;  %v13803_v11 = vld [vmem:[%s19060_s0 + $0x74] ss:$24 sps:$4 sm:$0xff]  }
 0x357   :  { %4982 = vmatmul.mubr.bf16.gmra.mrb[220].mxu1 %v13796_v36 }
 0x358   :  { %4991 = vmatprep.mubr.bf16.mxu1 %v13797_v12 }
 0x359   :  { %5935 = vmatmul.mubr.bf16.gmra.mrb[216].mxu0 %v13794_v16  ;;  %v233_v16 = vld [vmem:[%s19059_s1 + $0x118] sm:$0xff] }
 0x35a   :  { %5944 = vmatprep.mubr.bf16.mxu0 %v13795_v53  ;;  %v237_v53 = vld [vmem:[%s19059_s1 + $0x138] sm:$0xff] }
 0x35b   :  { %v10853_v34 = vcombine.low %v233_v16, %v237_v53 }
 0x35f   :  { %4992 = vmatmul.mubr.bf16.gmra.mrb[224].mxu1 %v13798_v37 }
 0x360   :  { %5001 = vmatprep.mubr.bf16.mxu1 %v19161_v29 }
 0x361   :  { %5945 = vmatmul.mubr.bf16.gmra.mrb[220].mxu0 %v13796_v36  ;;  %v13482_v36 = vld [vmem:[%s19062_s3 + $0x10] ss:$8 sps:$4 sm:$0xff]  }
 0x362   :  { %5954 = vmatprep.mubr.bf16.mxu0 %v13797_v12  ;;  %v13487_v12 = vld [vmem:[%s19062_s3 + $0x24] ss:$8 sps:$4 sm:$0xff]  }
 0x367   :  { %5002 = vmatmul.mubr.bf16.gmra.mrb[228].mxu1 %v15375_v2 }
 0x368   :  { %5042 = vmatprep.mubr.bf16.mxu1 %v13799_v23 }
 0x369   :  { %5955 = vmatmul.mubr.bf16.gmra.mrb[224].mxu0 %v13798_v37  ;;  %v10845_v37 = vcombine.low %v225_v14, %v229_v62  ;;  %v253_v14 = vld [vmem:[%s19059_s1 + $0x1b8] sm:$0xff] }
 0x36a   :  { %5964 = vmatprep.mubr.bf16.mxu0 %v19161_v29  ;;  %v13488_v62 = vld [vmem:[%s19062_s3 + $0x30] ss:$8 sps:$4 sm:$0xff]  }
 0x36f   :  { %5043 = vmatmul.mubr.bf16.vlgmr.msra.gmra.mrb[116].mxu1 %v13800_v42 }
 0x370   :  { %5052 = vmatprep.mubr.bf16.mxu1 %v13801_v44  ;;  %6295 = vmatpush1.bf16.msra.mxu1 %v10821_v38  ;;  %v13802_v38 = vld [vmem:[%s19060_s0 + $0x40] ss:$24 sps:$4 sm:$0xff]  }
 0x371   :  { %5965 = vmatmul.mubr.bf16.gmra.mrb[228].mxu0 %v15375_v2  ;;  %6296 = vmatprep.subr.bf16.mxu1 %v10830_v33  ;;  %v13485_v33 = vld [vmem:[%s19062_s3 + $0x20] ss:$8 sps:$4 sm:$0xff]  }
 0x372   :  { %6005 = vmatprep.mubr.bf16.mxu0 %v13799_v23  ;;  %v10854_v23 = vcombine.high %v233_v16, %v237_v53  ;;  %v13496_v16 = vld [vmem:[%s19062_s3 + $0x54] ss:$8 sps:$4 sm:$0xff]  }
 0x374   :  { %6297 = vmatpush1.bf16.msra.mxu1 %v10829_v55  ;;  %v13805_v55 = vld [vmem:[%s19060_s0 + $0xa4] ss:$24 sps:$4 sm:$0xff]  }
 0x375   :  { %6298 = vmatprep.subr.bf16.mxu1 %v10838_v46  ;;  %v249_v46 = vld [vmem:[%s19059_s1 + $0x198] sm:$0xff] }
 0x376   :  { %v10869_v53 = vcombine.low %v249_v46, %v253_v14 }
 0x377   :  { %5053 = vmatmul.mubr.bf16.gmra.mrb[120].mxu1 %v13802_v38 }
 0x378   :  { %5062 = vmatprep.mubr.bf16.mxu1 %v13803_v11  ;;  %6299 = vmatpush1.bf16.msra.mxu1 %v10837_v60  ;;  %v10870_v60 = vcombine.high %v249_v46, %v253_v14  ;;  %v13502_v46 = vld [vmem:[%s19062_s3 + $0x74] ss:$8 sps:$4 sm:$0xff]  }
 0x379   :  { %6006 = vmatmul.mubr.bf16.vlgmr.msra.gmra.mrb[116].mxu0 %v13800_v42  ;;  %6300 = vmatprep.subr.bf16.mxu1 %v10846_v47  ;;  %v13490_v42 = vld [vmem:[%s19062_s3 + $0x34] ss:$8 sps:$4 sm:$0xff]  }
 0x37a   :  { %8726 = vmatpush1.bf16.msra.mxu0 %v13479_v6  ;;  %6015 = vmatprep.mubr.bf16.mxu0 %v13801_v44  ;;  %v10862_v44 = vcombine.high %v241_v61, %v245_v19  ;;  %v13493_v6 = vld [vmem:[%s19062_s3 + $0x44] ss:$8 sps:$4 sm:$0xff]   ;;  %v261_v47 = vld [vmem:[%s19059_s1 + $0x1f8] sm:$0xff] }
 0x37b   :  { %8727 = vmatprep.subr.bf16.mxu0 %v13484_v54  ;;  %v10861_v54 = vcombine.low %v241_v61, %v245_v19  ;;  %v269_v61 = vld [vmem:[%s19059_s1 + $0x238] sm:$0xff] }
 0x37c   :  { %6301 = vmatpush1.bf16.msra.mxu1 %v10845_v37  ;;  %v13807_v37 = vld [vmem:[%s19060_s0 + $0xd4] ss:$24 sps:$4 sm:$0xff]   ;;  %v13494_v19 = vld [vmem:[%s19062_s3 + $0x50] ss:$8 sps:$4 sm:$0xff]  }
 0x37d   :  { %6302 = vmatprep.subr.bf16.mxu1 %v10854_v23  ;;  %v265_v23 = vld [vmem:[%s19059_s1 + $0x218] sm:$0xff] }
 0x37e   :  { %8728 = vmatpush1.bf16.msra.mxu0 %v13482_v36  ;;  %v13806_v36 = vld [vmem:[%s19060_s0 + $0xa0] ss:$24 sps:$4 sm:$0xff]   ;;  %v10885_v14 = vcombine.low %v265_v23, %v269_v61 }
 0x37f   :  { %8729 = vmatprep.subr.bf16.mxu0 %v13487_v12  ;;  %5063 = vmatmul.mubr.bf16.gmra.mrb[124].mxu1 %v13804_v15 }
 0x380   :  { %5072 = vmatprep.mubr.bf16.mxu1 %v13805_v55  ;;  %6303 = vmatpush1.bf16.msra.mxu1 %v10853_v34  ;;  %v10886_v34 = vcombine.high %v265_v23, %v269_v61  ;;  %v13810_v23 = vld [vmem:[%s19060_s0 + $0x100] ss:$24 sps:$4 sm:$0xff]   ;;  %v13811_v61 = vld [vmem:[%s19060_s0 + $0x134] ss:$24 sps:$4 sm:$0xff]  }
 0x381   :  { %6016 = vmatmul.mubr.bf16.gmra.mrb[120].mxu0 %v13802_v38  ;;  %6304 = vmatprep.subr.bf16.mxu1 %v10862_v44  ;;  %v257_v38 = vld [vmem:[%s19059_s1 + $0x1d8] sm:$0xff] }
 0x382   :  { %6025 = vmatprep.mubr.bf16.mxu0 %v13803_v11  ;;  %8730 = vmatpush1.bf16.msra.mxu0 %v13485_v33  ;;  %v13491_v11 = vld [vmem:[%s19062_s3 + $0x40] ss:$8 sps:$4 sm:$0xff]   ;;  %v10878_v12 = vcombine.high %v257_v38, %v261_v47  ;;  %v13499_v33 = vld [vmem:[%s19062_s3 + $0x64] ss:$8 sps:$4 sm:$0xff]   ;;  %v277_v44 = vld [vmem:[%s19059_s1 + $0x278] sm:$0xff] }
 0x383   :  { %8731 = vmatprep.subr.bf16.mxu0 %v13490_v42  ;;  %v10877_v42 = vcombine.low %v257_v38, %v261_v47  ;;  %v285_v38 = vld [vmem:[%s19059_s1 + $0x2b8] sm:$0xff] }
 0x384   :  { %6305 = vmatpush1.bf16.msra.mxu1 %v10861_v54  ;;  %v13809_v54 = vld [vmem:[%s19060_s0 + $0x104] ss:$24 sps:$4 sm:$0xff]   ;;  %v13500_v47 = vld [vmem:[%s19062_s3 + $0x70] ss:$8 sps:$4 sm:$0xff]  }
 0x385   :  { %6306 = vmatprep.subr.bf16.mxu1 %v10870_v60  ;;  %v281_v60 = vld [vmem:[%s19059_s1 + $0x298] sm:$0xff] }
 0x386   :  { %8732 = vmatpush1.bf16.msra.mxu0 %v13488_v62  ;;  %v13808_v62 = vld [vmem:[%s19060_s0 + $0xd0] ss:$24 sps:$4 sm:$0xff]  }
 0x387   :  { %8733 = vmatprep.subr.bf16.mxu0 %v13493_v6  ;;  %5073 = vmatmul.mubr.bf16.gmra.mrb[128].mxu1 %v13806_v36 }
 0x388   :  { %5082 = vmatprep.mubr.bf16.mxu1 %v13807_v37  ;;  %6307 = vmatpush1.bf16.msra.mxu1 %v10869_v53  ;;  %v10902_v53 = vcombine.high %v281_v60, %v285_v38 }
 0x389   :  { %6026 = vmatmul.mubr.bf16.gmra.mrb[124].mxu0 %v13804_v15  ;;  %6308 = vmatprep.subr.bf16.mxu1 %v10878_v12  ;;  %v273_v15 = vld [vmem:[%s19059_s1 + $0x258] sm:$0xff] }
 0x38a   :  { %6035 = vmatprep.mubr.bf16.mxu0 %v13805_v55  ;;  %8734 = vmatpush1.bf16.msra.mxu0 %v13491_v11  ;;  %v13497_v55 = vld [vmem:[%s19062_s3 + $0x60] ss:$8 sps:$4 sm:$0xff]   ;;  %v10894_v6 = vcombine.high %v273_v15, %v277_v44  ;;  %v13505_v11 = vld [vmem:[%s19062_s3 + $0x84] ss:$8 sps:$4 sm:$0xff]   ;;  %v13508_v12 = vld [vmem:[%s19062_s3 + $0x94] ss:$8 sps:$4 sm:$0xff]  }
 0x38b   :  { %8735 = vmatprep.subr.bf16.mxu0 %v13496_v16  ;;  %v10893_v16 = vcombine.low %v273_v15, %v277_v44  ;;  %v13812_v15 = vld [vmem:[%s19060_s0 + $0x130] ss:$24 sps:$4 sm:$0xff]   ;;  %v13813_v44 = vld [vmem:[%s19060_s0 + $0x164] ss:$24 sps:$4 sm:$0xff]  }
 0x38c   :  { %6309 = vmatpush1.bf16.msra.mxu1 %v10877_v42  ;;  %v13509_v42 = vld [vmem:[%s19062_s3 + $0xa0] ss:$8 sps:$4 sm:$0xff]  }
 0x38d   :  { %6310 = vmatprep.subr.bf16.mxu1 %v10886_v34  ;;  %v13514_v34 = vld [vmem:[%s19062_s3 + $0xb4] ss:$8 sps:$4 sm:$0xff]  }
 0x38e   :  { %8736 = vmatpush1.bf16.msra.mxu0 %v13494_v19  ;;  %v13506_v19 = vld [vmem:[%s19062_s3 + $0x90] ss:$8 sps:$4 sm:$0xff]  }
 0x38f   :  { %8737 = vmatprep.subr.bf16.mxu0 %v13499_v33  ;;  %5083 = vmatmul.mubr.bf16.gmra.mrb[132].mxu1 %v13808_v62  ;;  %v13511_v33 = vld [vmem:[%s19062_s3 + $0xa4] ss:$8 sps:$4 sm:$0xff]  }
 0x390   :  { %5092 = vmatprep.mubr.bf16.mxu1 %v13809_v54  ;;  %6311 = vmatpush1.bf16.msra.mxu1 %v10885_v14  ;;  %v13512_v14 = vld [vmem:[%s19062_s3 + $0xb0] ss:$8 sps:$4 sm:$0xff]  }
 0x391   :  { %6036 = vmatmul.mubr.bf16.gmra.mrb[128].mxu0 %v13806_v36  ;;  %6312 = vmatprep.subr.bf16.mxu1 %v10894_v6  ;;  %v13503_v36 = vld [vmem:[%s19062_s3 + $0x80] ss:$8 sps:$4 sm:$0xff]  }
 0x392   :  { %6045 = vmatprep.mubr.bf16.mxu0 %v13807_v37  ;;  %8738 = vmatpush1.bf16.msra.mxu0 %v13497_v55  ;;  %v10901_v37 = vcombine.low %v281_v60, %v285_v38  ;;  %v289_v55 = vld [vmem:[%s19059_s1 + $0x2d8] sm:$0xff]  ;;  %v13515_v60 = vld [vmem:[%s19062_s3 + $0xc0] ss:$8 sps:$4 sm:$0xff]  }
 0x393   :  { %8739 = vmatprep.subr.bf16.mxu0 %v13502_v46  ;;  %v293_v46 = vld [vmem:[%s19059_s1 + $0x2f8] sm:$0xff] }
 0x394   :  { %6313 = vmatpush1.bf16.msra.mxu1 %v10893_v16  ;;  %v10910_v6 = vcombine.high %v289_v55, %v293_v46  ;;  %v13814_v38 = vld [vmem:[%s19060_s0 + $0x160] ss:$24 sps:$4 sm:$0xff]   ;;  %v13817_v16 = vld [vmem:[%s19060_s0 + $0x1c4] ss:$24 sps:$4 sm:$0xff]  }
 0x395   :  { %6314 = vmatprep.subr.bf16.mxu1 %v10902_v53  ;;  %v297_v53 = vld [vmem:[%s19059_s1 + $0x318] sm:$0xff] }
 0x396   :  { %8740 = vmatpush1.bf16.msra.mxu0 %v13500_v47  ;;  %v13815_v47 = vld [vmem:[%s19060_s0 + $0x194] ss:$24 sps:$4 sm:$0xff]  }
 0x397   :  { %8741 = vmatprep.subr.bf16.mxu0 %v13505_v11  ;;  %5093 = vmatmul.mubr.bf16.gmra.mrb[136].mxu1 %v13810_v23  ;;  %v13816_v11 = vld [vmem:[%s19060_s0 + $0x190] ss:$24 sps:$4 sm:$0xff]  }
 0x398   :  { %5102 = vmatprep.mubr.bf16.mxu1 %v13811_v61  ;;  %6315 = vmatpush1.bf16.msra.mxu1 %v10901_v37 }
 0x399   :  { %6046 = vmatmul.mubr.bf16.gmra.mrb[132].mxu0 %v13808_v62  ;;  %v10909_v62 = vcombine.low %v289_v55, %v293_v46  ;;  %6316 = vmatprep.subr.bf16.mxu1 %v10910_v6  ;;  %v13820_v55 = vld [vmem:[%s19060_s0 + $0x1f0] ss:$24 sps:$4 sm:$0xff]   ;;  %v13821_v46 = vld [vmem:[%s19060_s0 + $0x224] ss:$24 sps:$4 sm:$0xff]   ;;  %v13822_v6 = vld [vmem:[%s19060_s0 + $0x220] ss:$24 sps:$4 sm:$0xff]  }
 0x39a   :  { %6055 = vmatprep.mubr.bf16.mxu0 %v13809_v54  ;;  %8742 = vmatpush1.bf16.msra.mxu0 %v13503_v36  ;;  %v13517_v54 = vld [vmem:[%s19062_s3 + $0xc4] ss:$8 sps:$4 sm:$0xff]   ;;  %v301_v36 = vld [vmem:[%s19059_s1 + $0x338] sm:$0xff] }
 0x39b   :  { %8743 = vmatprep.subr.bf16.mxu0 %v13508_v12  ;;  %v13518_v12 = vld [vmem:[%s19062_s3 + $0xd0] ss:$8 sps:$4 sm:$0xff]   ;;  %v10917_v37 = vcombine.low %v297_v53, %v301_v36 }
 0x39c   :  { %6317 = vmatpush1.bf16.msra.mxu1 %v10909_v62  ;;  %v13523_v62 = vld [vmem:[%s19062_s3 + $0xe4] ss:$8 sps:$4 sm:$0xff]  }
 0x39e   :  { %8744 = vmatpush1.bf16.msra.mxu0 %v13506_v19  ;;  %v13818_v19 = vld [vmem:[%s19060_s0 + $0x1c0] ss:$24 sps:$4 sm:$0xff]  }
 0x39f   :  { %8745 = vmatprep.subr.bf16.mxu0 %v13511_v33  ;;  %5103 = vmatmul.mubr.bf16.gmra.mrb[140].mxu1 %v13812_v15  ;;  %v13819_v33 = vld [vmem:[%s19060_s0 + $0x1f4] ss:$24 sps:$4 sm:$0xff]  }
 0x3a0   :  { %5112 = vmatprep.mubr.bf16.mxu1 %v13813_v44 }
 0x3a1   :  { %6056 = vmatmul.mubr.bf16.gmra.mrb[136].mxu0 %v13810_v23  ;;  %v10918_v23 = vcombine.high %v297_v53, %v301_v36  ;;  %v13825_v53 = vld [vmem:[%s19060_s0 + $0x284] ss:$24 sps:$4 sm:$0xff]  }
 0x3a2   :  { %6065 = vmatprep.mubr.bf16.mxu0 %v13811_v61  ;;  %8746 = vmatpush1.bf16.msra.mxu0 %v13509_v42  ;;  %v13520_v61 = vld [vmem:[%s19062_s3 + $0xd4] ss:$8 sps:$4 sm:$0xff]  }
 0x3a3   :  { %8747 = vmatprep.subr.bf16.mxu0 %v13514_v34  ;;  %6318 = vmatprep.subr.bf16.mxu1 %v10918_v23  ;;  %v305_v42 = vld [vmem:[%s19059_s1 + $0x358] sm:$0xff] }
 0x3a4   :  { %6319 = vmatpush1.bf16.msra.mxu1 %v10917_v37  ;;  %v309_v34 = vld [vmem:[%s19059_s1 + $0x378] sm:$0xff] }
 0x3a5   :  { %v321_v36 = vld [vmem:[%s19059_s1 + $0x3d8] sm:$0xff] }
 0x3a6   :  { %8748 = vmatpush1.bf16.msra.mxu0 %v13512_v14  ;;  %v13521_v14 = vld [vmem:[%s19062_s3 + $0xe0] ss:$8 sps:$4 sm:$0xff]   ;;  %v13524_v23 = vld [vmem:[%s19062_s3 + $0xf0] ss:$8 sps:$4 sm:$0xff]  }
 0x3a7   :  { %8749 = vmatprep.subr.bf16.mxu0 %v13517_v54  ;;  %5113 = vmatmul.mubr.bf16.gmra.mrb[144].mxu1 %v13814_v38  ;;  %v13823_v54 = vld [vmem:[%s19060_s0 + $0x254] ss:$24 sps:$4 sm:$0xff]  }
 0x3a8   :  { %5122 = vmatprep.mubr.bf16.mxu1 %v13815_v47 }
 0x3a9   :  { %6066 = vmatmul.mubr.bf16.gmra.mrb[140].mxu0 %v13812_v15  ;;  %v10925_v15 = vcombine.low %v305_v42, %v309_v34 }
 0x3aa   :  { %6075 = vmatprep.mubr.bf16.mxu0 %v13813_v44  ;;  %8750 = vmatpush1.bf16.msra.mxu0 %v13515_v60  ;;  %v10926_v44 = vcombine.high %v305_v42, %v309_v34  ;;  %v313_v60 = vld [vmem:[%s19059_s1 + $0x398] sm:$0xff]  ;;  %v13827_v42 = vld [vmem:[%s19060_s0 + $0x2b4] ss:$24 sps:$4 sm:$0xff]   ;;  %v13828_v34 = vld [vmem:[%s19060_s0 + $0x2b0] ss:$24 sps:$4 sm:$0xff]  }
 0x3ab   :  { %8751 = vmatprep.subr.bf16.mxu0 %v13520_v61  ;;  %v13526_v61 = vld [vmem:[%s19062_s3 + $0xf4] ss:$8 sps:$4 sm:$0xff]  }
 0x3ac   :  { %6320 = vmatprep.subr.bf16.mxu1 %v10926_v44  ;;  %v13529_v44 = vld [vmem:[%s19062_s3 + $0x104] ss:$8 sps:$4 sm:$0xff]  }
 0x3ad   :  { %6321 = vmatpush1.bf16.msra.mxu1 %v10925_v15  ;;  %v13829_v15 = vld [vmem:[%s19060_s0 + $0x2e4] ss:$24 sps:$4 sm:$0xff]  }
 0x3ae   :  { %8752 = vmatpush1.bf16.msra.mxu0 %v13518_v12  ;;  %v325_v12 = vld [vmem:[%s19059_s1 + $0x3f8] sm:$0xff] }
 0x3af   :  { %5123 = vmatmul.mubr.bf16.gmra.mrb[148].mxu1 %v13816_v11  ;;  %8753 = vmatprep.subr.bf16.mxu0 %v13523_v62  ;;  %v10942_v37 = vcombine.high %v321_v36, %v325_v12  ;;  %v16731_v62 = vld [vmem:[%s19059_s1 + $0x438] sm:$0xff] }
 0x3b0   :  { %5132 = vmatprep.mubr.bf16.mxu1 %v13817_v16 }
 0x3b1   :  { %6076 = vmatmul.mubr.bf16.gmra.mrb[144].mxu0 %v13814_v38  ;;  %v317_v38 = vld [vmem:[%s19059_s1 + $0x3b8] sm:$0xff] }
 0x3b2   :  { %6085 = vmatprep.mubr.bf16.mxu0 %v13815_v47  ;;  %8754 = vmatpush1.bf16.msra.mxu0 %v13521_v14  ;;  %v10934_v47 = vcombine.high %v313_v60, %v317_v38  ;;  %v16726_v14 = vld [vmem:[%s19059_s1 + $0x418] sm:$0xff] }
 0x3b3   :  { %8755 = vmatprep.subr.bf16.mxu0 %v13526_v61  ;;  %v13842_v61 = vld [vmem:[%s19060_s0 + $0x400] ss:$24 sps:$4 sm:$0xff]   ;;  %v19172_v35 = vcombine.low %v16726_v14, %v16731_v62 }
 0x3b4   :  { %6322 = vmatprep.subr.bf16.mxu1 %v10934_v47  ;;  %v13834_v47 = vld [vmem:[%s19060_s0 + $0x340] ss:$24 sps:$4 sm:$0xff]  }
 0x3b6   :  { %8756 = vmatpush1.bf16.msra.mxu0 %v13524_v23  ;;  %v13841_v23 = vld [vmem:[%s19060_s0 + $0x404] ss:$24 sps:$4 sm:$0xff]  }
 0x3b7   :  { %5133 = vmatmul.mubr.bf16.gmra.mrb[152].mxu1 %v13818_v19  ;;  %9046 = vmatprep.subr.bf16.mxu0 %v13529_v44  ;;  %v13848_v44 = vld [vmem:[%s19060_s0 + $0x490] ss:$24 sps:$4 sm:$0xff]  }
 0x3b8   :  { %5142 = vmatprep.mubr.bf16.mxu1 %v13819_v33 }
 0x3b9   :  { %6086 = vmatmul.mubr.bf16.gmra.mrb[148].mxu0 %v13816_v11  ;;  %v13824_v11 = vld [vmem:[%s19060_s0 + $0x250] ss:$24 sps:$4 sm:$0xff]  }
 0x3ba   :  { %6095 = vmatprep.mubr.bf16.mxu0 %v13817_v16  ;;  %v10933_v16 = vcombine.low %v313_v60, %v317_v38  ;;  %v13832_v60 = vld [vmem:[%s19060_s0 + $0x310] ss:$24 sps:$4 sm:$0xff]   ;;  %v13833_v38 = vld [vmem:[%s19060_s0 + $0x344] ss:$24 sps:$4 sm:$0xff]  }
 0x3bc   :  { %6323 = vmatpush1.bf16.msra.mxu1 %v10933_v16  ;;  %v13836_v16 = vld [vmem:[%s19060_s0 + $0x370] ss:$24 sps:$4 sm:$0xff]  }
 0x3bd   :  { %6324 = vmatprep.subr.bf16.mxu1 %v10942_v37  ;;  %v13840_v37 = vld [vmem:[%s19060_s0 + $0x3d0] ss:$24 sps:$4 sm:$0xff]  }
 0x3bf   :  { %5143 = vmatmul.mubr.bf16.gmra.mrb[156].mxu1 %v13820_v55 }
 0x3c0   :  { %5152 = vmatprep.mubr.bf16.mxu1 %v13821_v46 }
 0x3c1   :  { %6096 = vmatmul.mubr.bf16.gmra.mrb[152].mxu0 %v13818_v19  ;;  %v10941_v19 = vcombine.low %v321_v36, %v325_v12  ;;  %v13838_v36 = vld [vmem:[%s19060_s0 + $0x3a0] ss:$24 sps:$4 sm:$0xff]   ;;  %v13839_v12 = vld [vmem:[%s19060_s0 + $0x3d4] ss:$24 sps:$4 sm:$0xff]  }
 0x3c2   :  { %6105 = vmatprep.mubr.bf16.mxu0 %v13819_v33  ;;  %v13826_v33 = vld [vmem:[%s19060_s0 + $0x280] ss:$24 sps:$4 sm:$0xff]  }
 0x3c3   :  { %6325 = vmatpush1.bf16.msra.mxu1 %v10941_v19  ;;  %v13843_v19 = vld [vmem:[%s19060_s0 + $0x434] ss:$24 sps:$4 sm:$0xff]  }
 0x3c7   :  { %5153 = vmatmul.mubr.bf16.gmra.mrb[160].mxu1 %v13822_v6 }
 0x3c8   :  { %5162 = vmatprep.mubr.bf16.mxu1 %v13823_v54 }
 0x3c9   :  { %6106 = vmatmul.mubr.bf16.gmra.mrb[156].mxu0 %v13820_v55  ;;  %v13830_v55 = vld [vmem:[%s19060_s0 + $0x2e0] ss:$24 sps:$4 sm:$0xff]  }
 0x3ca   :  { %6115 = vmatprep.mubr.bf16.mxu0 %v13821_v46  ;;  %v13831_v46 = vld [vmem:[%s19060_s0 + $0x314] ss:$24 sps:$4 sm:$0xff]  }
 0x3cf   :  { %5163 = vmatmul.mubr.bf16.gmra.mrb[164].mxu1 %v13824_v11 }
 0x3d0   :  { %5172 = vmatprep.mubr.bf16.mxu1 %v13825_v53 }
 0x3d1   :  { %6116 = vmatmul.mubr.bf16.gmra.mrb[160].mxu0 %v13822_v6 }
 0x3d2   :  { %6125 = vmatprep.mubr.bf16.mxu0 %v13823_v54  ;;  %v10950_v54 = vcombine.high %v16726_v14, %v16731_v62 }
 0x3d4   :  { %6615 = vmatprep.subr.bf16.mxu1 %v10950_v54  ;;  %v13851_v54 = vld [vmem:[%s19060_s0 + $0x4f4] ss:$24 sps:$4 sm:$0xff]  }
 0x3d7   :  { %5173 = vmatmul.mubr.bf16.gmra.mrb[168].mxu1 %v13826_v33 }
 0x3d8   :  { %5182 = vmatprep.mubr.bf16.mxu1 %v13827_v42 }
 0x3d9   :  { %6126 = vmatmul.mubr.bf16.gmra.mrb[164].mxu0 %v13824_v11  ;;  %v13835_v11 = vld [vmem:[%s19060_s0 + $0x374] ss:$24 sps:$4 sm:$0xff]  }
 0x3da   :  { %6135 = vmatprep.mubr.bf16.mxu0 %v13825_v53  ;;  %v13837_v53 = vld [vmem:[%s19060_s0 + $0x3a4] ss:$24 sps:$4 sm:$0xff]  }
 0x3df   :  { %5183 = vmatmul.mubr.bf16.gmra.mrb[172].mxu1 %v13828_v34 }
 0x3e0   :  { %5192 = vmatprep.mubr.bf16.mxu1 %v13829_v15 }
 0x3e1   :  { %6136 = vmatmul.mubr.bf16.gmra.mrb[168].mxu0 %v13826_v33  ;;  %v13844_v33 = vld [vmem:[%s19060_s0 + $0x430] ss:$24 sps:$4 sm:$0xff]  }
 0x3e2   :  { %6145 = vmatprep.mubr.bf16.mxu0 %v13827_v42  ;;  %v13845_v42 = vld [vmem:[%s19060_s0 + $0x464] ss:$24 sps:$4 sm:$0xff]  }
 0x3e7   :  { %5193 = vmatmul.mubr.bf16.gmra.mrb[176].mxu1 %v13830_v55 }
 0x3e8   :  { %5202 = vmatprep.mubr.bf16.mxu1 %v13831_v46 }
 0x3e9   :  { %6146 = vmatmul.mubr.bf16.gmra.mrb[172].mxu0 %v13828_v34  ;;  %v13846_v34 = vld [vmem:[%s19060_s0 + $0x460] ss:$24 sps:$4 sm:$0xff]  }
 0x3ea   :  { %6155 = vmatprep.mubr.bf16.mxu0 %v13829_v15  ;;  %v13847_v15 = vld [vmem:[%s19060_s0 + $0x494] ss:$24 sps:$4 sm:$0xff]  }
 0x3ef   :  { %5203 = vmatmul.mubr.bf16.gmra.mrb[180].mxu1 %v13832_v60 }
 0x3f0   :  { %5212 = vmatprep.mubr.bf16.mxu1 %v13833_v38 }
 0x3f1   :  { %6156 = vmatmul.mubr.bf16.gmra.mrb[176].mxu0 %v13830_v55  ;;  %v13849_v55 = vld [vmem:[%s19060_s0 + $0x4c4] ss:$24 sps:$4 sm:$0xff]  }
 0x3f2   :  { %6165 = vmatprep.mubr.bf16.mxu0 %v13831_v46  ;;  %v13850_v46 = vld [vmem:[%s19060_s0 + $0x4c0] ss:$24 sps:$4 sm:$0xff]  }
 0x3f7   :  { %5213 = vmatmul.mubr.bf16.gmra.mrb[184].mxu1 %v13834_v47 }
 0x3f8   :  { %5222 = vmatprep.mubr.bf16.mxu1 %v13835_v11 }
 0x3f9   :  { %6166 = vmatmul.mubr.bf16.gmra.mrb[180].mxu0 %v13832_v60  ;;  %v19162_v60 = vld [vmem:[#allocation19_spill] sm:$0xff] }
 0x3fa   :  { %6175 = vmatprep.mubr.bf16.mxu0 %v13833_v38  ;;  %v594_v38 = vsub.s32 2, %v19162_v60 }
 0x3ff   :  { %5223 = vmatmul.mubr.bf16.gmra.mrb[188].mxu1 %v13836_v16 }
 0x400   :  { %5232 = vmatprep.mubr.bf16.mxu1 %v13837_v53 }
 0x401   :  { %6176 = vmatmul.mubr.bf16.gmra.mrb[184].mxu0 %v13834_v47  ;;  %v598_v47 = vsub.s32 3, %v19162_v60 }
 0x402   :  { %6185 = vmatprep.mubr.bf16.mxu0 %v13835_v11  ;;  %v13852_v11 = vld [vmem:[%s19060_s0 + $0x4f0] ss:$24 sps:$4 sm:$0xff]  }
 0x407   :  { %5233 = vmatmul.mubr.bf16.gmra.mrb[192].mxu1 %v13838_v36 }
 0x408   :  { %5242 = vmatprep.mubr.bf16.mxu1 %v13839_v12 }
 0x409   :  { %6186 = vmatmul.mubr.bf16.gmra.mrb[188].mxu0 %v13836_v16  ;;  %v13853_v16 = vld [vmem:[%s19061_s2] sm:$0xff] }
 0x40a   :  { %6195 = vmatprep.mubr.bf16.mxu0 %v13837_v53  ;;  %v16805_v53 = vrot.slane %v13853_v16, %v594_v38 }
 0x40c   :  { %19163 = vst [vmem:[#allocation2_spill] sm:$0xff] %v16805_v53 }
 0x40f   :  { %5243 = vmatmul.mubr.bf16.gmra.mrb[196].mxu1 %v13840_v37 }
 0x410   :  { %5252 = vmatprep.mubr.bf16.mxu1 %v13841_v23 }
 0x411   :  { %6196 = vmatmul.mubr.bf16.gmra.mrb[192].mxu0 %v13838_v36  ;;  %v16807_v36 = vrot.slane %v13853_v16, %v598_v47 }
 0x412   :  { %6205 = vmatprep.mubr.bf16.mxu0 %v13839_v12  ;;  %v13854_v12 = vld [vmem:[%s19060_s0 + $0x524] ss:$24 sps:$4 sm:$0xff]  }
 0x417   :  { %5253 = vmatmul.mubr.bf16.gmra.mrb[200].mxu1 %v13842_v61 }
 0x418   :  { %5262 = vmatprep.mubr.bf16.mxu1 %v13843_v19 }
 0x419   :  { %6206 = vmatmul.mubr.bf16.gmra.mrb[196].mxu0 %v13840_v37 }
 0x41a   :  { %6215 = vmatprep.mubr.bf16.mxu0 %v13841_v23 }
 0x41f   :  { %5263 = vmatmul.mubr.bf16.gmra.mrb[204].mxu1 %v13844_v33 }
 0x420   :  { %5272 = vmatprep.mubr.bf16.mxu1 %v13845_v42 }
 0x421   :  { %6216 = vmatmul.mubr.bf16.gmra.mrb[200].mxu0 %v13842_v61 }
 0x422   :  { %6225 = vmatprep.mubr.bf16.mxu0 %v13843_v19 }
 0x427   :  { %5273 = vmatmul.mubr.bf16.gmra.mrb[208].mxu1 %v13846_v34 }
 0x428   :  { %5282 = vmatprep.mubr.bf16.mxu1 %v13847_v15 }
 0x429   :  { %6226 = vmatmul.mubr.bf16.gmra.mrb[204].mxu0 %v13844_v33 }
 0x42a   :  { %6235 = vmatprep.mubr.bf16.mxu0 %v13845_v42  ;;  %v602_v42 = vsub.s32 4, %v19162_v60 }
 0x42f   :  { %5283 = vmatmul.mubr.bf16.gmra.mrb[212].mxu1 %v13848_v44 }
 0x430   :  { %5292 = vmatprep.mubr.bf16.mxu1 %v13849_v55 }
 0x431   :  { %6236 = vmatmul.mubr.bf16.gmra.mrb[208].mxu0 %v13846_v34 }
 0x432   :  { %6245 = vmatprep.mubr.bf16.mxu0 %v13847_v15 }
 0x437   :  { %5293 = vmatmul.mubr.bf16.gmra.mrb[216].mxu1 %v13850_v46 }
 0x438   :  { %5302 = vmatprep.mubr.bf16.mxu1 %v13851_v54 }
 0x439   :  { %6246 = vmatmul.mubr.bf16.gmra.mrb[212].mxu0 %v13848_v44  ;;  %v606_v44 = vsub.s32 5, %v19162_v60 }
 0x43a   :  { %6255 = vmatprep.mubr.bf16.mxu0 %v13849_v55 }
 0x43b   :  { %v16826_v6 = vrot.slane %v13853_v16, %v606_v44 }
 0x43f   :  { %5303 = vmatmul.mubr.bf16.gmra.mrb[220].mxu1 %v13852_v11 }
 0x440   :  { %5312 = vmatprep.mubr.bf16.mxu1 %v13854_v12 }
 0x441   :  { %6256 = vmatmul.mubr.bf16.gmra.mrb[216].mxu0 %v13850_v46 }
 0x442   :  { %6265 = vmatprep.mubr.bf16.mxu0 %v13851_v54  ;;  %v5044_v37 = vpop.f32.mrb[116].mxu1  ;;  %v13855_v54 = vld [vmem:[%s19060_s0 + $0x520] ss:$24 sps:$4 sm:$0xff]  }
 0x443   :  { %v11604_v23 = vadd.f32 %v5044_v37, %v16805_v53  ;;  %v5046_v61 = vpop.f32.mrb[117].mxu1 }
 0x444   :  { %v11605_v19 = vadd.f32 %v5046_v61, %v16807_v36  ;;  %v5048_v33 = vpop.f32.mrb[118].mxu1  ;;  %v16821_v61 = vrot.slane %v13853_v16, %v602_v42 }
 0x445   :  { %v11606_v34 = vadd.f32 %v5048_v33, %v16805_v53  ;;  %v5050_v15 = vpop.f32.mrb[119].mxu1  ;;  %v7259_v46 = vmax.f32 %v11604_v23, 0.0 }
 0x446   :  { %v11607_v55 = vadd.f32 %v5050_v15, %v16807_v36  ;;  %v7260_v47 = vmax.f32 %v11605_v19, 0.0 }
 0x447   :  { %v7267_v38 = vmax.f32 %v11606_v34, 0.0  ;;  %5313 = vmatmul.mubr.bf16.gmra.mrb[224].mxu1 %v13855_v54 }
 0x448   :  { %v7268_v37 = vmax.f32 %v11607_v55, 0.0  ;;  %5322 = vmatprep.mubr.bf16.mxu1 %v15384_v0 }
 0x449   :  { %6266 = vmatmul.mubr.bf16.gmra.mrb[220].mxu0 %v13852_v11  ;;  %v16824_v33 = vpack.c.bf16 %v7267_v38, %v7259_v46 }
 0x44a   :  { %6275 = vmatprep.mubr.bf16.mxu0 %v13854_v12  ;;  %v5054_v15 = vpop.f32.mrb[120].mxu1  ;;  %v16828_v23 = vpack.c.bf16 %v7268_v37, %v7260_v47 }
 0x44b   :  { %19164 = vst [vmem:[#allocation34_spill] sm:$0xff] %v16824_v33  ;;  %v11608_v34 = vadd.f32 %v5054_v15, %v16805_v53  ;;  %v5056_v2 = vpop.f32.mrb[121].mxu1 }
 0x44c   :  { %19165 = vst [vmem:[#allocation35_spill] sm:$0xff] %v16828_v23  ;;  %v6007_v60 = vpop.f32.mrb[116].mxu0  ;;  %v11609_v11 = vadd.f32 %v5056_v2, %v16807_v36  ;;  %v5058_v55 = vpop.f32.mrb[122].mxu1 }
 0x44d   :  { %v11718_v19 = vadd.f32 %v6007_v60, %v16821_v61  ;;  %v6009_v42 = vpop.f32.mrb[117].mxu0  ;;  %v11610_v46 = vadd.f32 %v5058_v55, %v16805_v53  ;;  %v5060_v44 = vpop.f32.mrb[123].mxu1  ;;  %v7275_v37 = vmax.f32 %v11608_v34, 0.0  ;;  %v19166_v60 = vld [vmem:[#allocation29_spill] sm:$0xff] }
 0x44e   :  { %v11719_v29 = vadd.f32 %v6009_v42, %v16826_v6  ;;  %v6011_v16 = vpop.f32.mrb[118].mxu0  ;;  %v11611_v38 = vadd.f32 %v5060_v44, %v16807_v36  ;;  %v7276_v23 = vmax.f32 %v11609_v11, 0.0  ;;  %v13856_v42 = vld [vmem:[%s19060_s0 + $0x4] ss:$24 sps:$4 sm:$0xff]  }
 0x44f   :  { %v11720_v12 = vadd.f32 %v6011_v16, %v16821_v61  ;;  %v6013_v47 = vpop.f32.mrb[119].mxu0  ;;  %v7283_v15 = vmax.f32 %v11610_v46, 0.0  ;;  %5323 = vmatmul.mubr.bf16.gmra.mrb[228].mxu1 %v19166_v60  ;;  %v7261_v2 = vmax.f32 %v11718_v19, 0.0 }
 0x450   :  { %v11721_v33 = vadd.f32 %v6013_v47, %v16826_v6  ;;  %v7284_v18 = vmax.f32 %v11611_v38, 0.0  ;;  %6326 = vmatprep.mubr.bf16.mxu1 %v13856_v42  ;;  %v7262_v55 = vmax.f32 %v11719_v29, 0.0  ;;  %v337_v29 = vld [vmem:[%s19059_s1 + $0x458] sm:$0xff] }
 0x451   :  { %v7269_v9 = vmax.f32 %v11720_v12, 0.0  ;;  %6276 = vmatmul.mubr.bf16.gmra.mrb[224].mxu0 %v13855_v54  ;;  %v16843_v34 = vpack.c.bf16 %v7283_v15, %v7275_v37 }
 0x452   :  { %v7270_v16 = vmax.f32 %v11721_v33, 0.0  ;;  %6285 = vmatprep.mubr.bf16.mxu0 %v15384_v0  ;;  %v5064_v44 = vpop.f32.mrb[124].mxu1  ;;  %v16847_v47 = vpack.c.bf16 %v7284_v18, %v7276_v23  ;;  %v341_v33 = vld [vmem:[%s19059_s1 + $0x478] sm:$0xff] }
 0x453   :  { %19167 = vst [vmem:[#allocation36_spill] sm:$0xff] %v16843_v34  ;;  %v16845_v46 = vpack.c.bf16 %v7269_v9, %v7261_v2  ;;  %v11612_v54 = vadd.f32 %v5064_v44, %v16805_v53  ;;  %v5066_v12 = vpop.f32.mrb[125].mxu1  ;;  %v10958_v0 = vcombine.high %v337_v29, %v341_v33  ;;  %v10957_v4 = vcombine.low %v337_v29, %v341_v33 }
 0x454   :  { %19169 = vst [vmem:[#allocation38_spill] sm:$0xff] %v16847_v47  ;;  %v16849_v19 = vpack.c.bf16 %v7270_v16, %v7262_v55  ;;  %v6017_v11 = vpop.f32.mrb[120].mxu0  ;;  %v11613_v38 = vadd.f32 %v5066_v12, %v16807_v36  ;;  %v5068_v23 = vpop.f32.mrb[126].mxu1  ;;  %v13857_v12 = vld [vmem:[%s19060_s0] ss:$24 sps:$4 sm:$0xff]   ;;  %v19171_v47 = vld [vmem:[#allocation28_spill] sm:$0xff] }
 0x455   :  { %19168 = vst [vmem:[#allocation37_spill] sm:$0xff] %v16845_v46  ;;  %v11722_v9 = vadd.f32 %v6017_v11, %v16821_v61  ;;  %v6019_v18 = vpop.f32.mrb[121].mxu0  ;;  %v11614_v15 = vadd.f32 %v5068_v23, %v16805_v53  ;;  %v5070_v42 = vpop.f32.mrb[127].mxu1  ;;  %v7291_v46 = vmax.f32 %v11612_v54, 0.0  ;;  %v16876_v23 = vld [vmem:[%s19059_s1 + $0x4b8] sm:$0xff] }
 0x456   :  { %19170 = vst [vmem:[#allocation39_spill] sm:$0xff] %v16849_v19  ;;  %v11723_v37 = vadd.f32 %v6019_v18, %v16826_v6  ;;  %v6021_v2 = vpop.f32.mrb[122].mxu0  ;;  %v11615_v16 = vadd.f32 %v5070_v42, %v16807_v36  ;;  %v16871_v18 = vld [vmem:[%s19059_s1 + $0x498] sm:$0xff]  ;;  %v7292_v54 = vmax.f32 %v11613_v38, 0.0 }
 0x457   :  { %v11724_v55 = vadd.f32 %v6021_v2, %v16821_v61  ;;  %v6023_v44 = vpop.f32.mrb[123].mxu0  ;;  %v7299_v19 = vmax.f32 %v11614_v15, 0.0  ;;  %6327 = vmatmul.mubr.bf16.vlgmr.msra.gmra.mrb[232].mxu1 %v13857_v12  ;;  %v7277_v2 = vmax.f32 %v11722_v9, 0.0 }
 0x458   :  { %v11725_v11 = vadd.f32 %v6023_v44, %v16826_v6  ;;  %v7300_v42 = vmax.f32 %v11615_v16, 0.0  ;;  %v13858_v44 = vld [vmem:[%s19060_s0 + $0x34] ss:$24 sps:$4 sm:$0xff]   ;;  %v7278_v12 = vmax.f32 %v11723_v37, 0.0  ;;  %6616 = vmatpush1.bf16.msra.mxu1 %v19172_v35  ;;  %v10966_v16 = vcombine.high %v16871_v18, %v16876_v23 }
 0x459   :  { %v7285_v15 = vmax.f32 %v11724_v55, 0.0  ;;  %6286 = vmatmul.mubr.bf16.gmra.mrb[228].mxu0 %v19166_v60  ;;  %6336 = vmatprep.mubr.bf16.mxu1 %v13858_v44  ;;  %v16886_v9 = vpack.c.bf16 %v7299_v19, %v7291_v46 }
 0x45a   :  { %v7286_v34 = vmax.f32 %v11725_v11, 0.0  ;;  %8757 = vmatprep.mubr.bf16.mxu0 %v19171_v47  ;;  %v5074_v55 = vpop.f32.mrb[128].mxu1  ;;  %6617 = vmatprep.subr.bf16.mxu1 %v10958_v0  ;;  %v16892_v60 = vpack.c.bf16 %v7300_v42, %v7292_v54  ;;  %v16902_v0 = vld [vmem:[%s19059_s1 + $0x4d8] sm:$0xff]  ;;  %v13527_v54 = vld [vmem:[%s19062_s3 + $0x100] ss:$8 sps:$4 sm:$0xff]  }
 0x45b   :  { %19173 = vst [vmem:[#allocation28_spill] sm:$0xff] %v16886_v9  ;;  %v16888_v38 = vpack.c.bf16 %v7285_v15, %v7277_v2  ;;  %v11616_v47 = vadd.f32 %v5074_v55, %v16805_v53  ;;  %v5076_v44 = vpop.f32.mrb[129].mxu1  ;;  %v13532_v55 = vld [vmem:[%s19062_s3 + $0x114] ss:$8 sps:$4 sm:$0xff]  }
 0x45c   :  { %19175 = vst [vmem:[#allocation41_spill] sm:$0xff] %v16892_v60  ;;  %v16894_v37 = vpack.c.bf16 %v7286_v34, %v7278_v12  ;;  %v6027_v11 = vpop.f32.mrb[124].mxu0  ;;  %v11617_v14 = vadd.f32 %v5076_v44, %v16807_v36  ;;  %v5078_v46 = vpop.f32.mrb[130].mxu1  ;;  %v16907_v34 = vld [vmem:[%s19059_s1 + $0x4f8] sm:$0xff]  ;;  %6618 = vmatpush1.bf16.msra.mxu1 %v10957_v4  ;;  %v13859_v4 = vld [vmem:[%s19060_s0 + $0x30] ss:$24 sps:$4 sm:$0xff]  }
 0x45d   :  { %19174 = vst [vmem:[#allocation40_spill] sm:$0xff] %v16888_v38  ;;  %v11726_v35 = vadd.f32 %v6027_v11, %v16821_v61  ;;  %v6029_v62 = vpop.f32.mrb[125].mxu0  ;;  %v11618_v29 = vadd.f32 %v5078_v46, %v16805_v53  ;;  %v5080_v2 = vpop.f32.mrb[131].mxu1  ;;  %v10965_v11 = vcombine.low %v16871_v18, %v16876_v23  ;;  %6619 = vmatprep.subr.bf16.mxu1 %v10966_v16  ;;  %v7307_v44 = vmax.f32 %v11616_v47, 0.0  ;;  %v19177_v60 = vld [vmem:[#allocation27_spill] sm:$0xff]  ;;  %v16934_v23 = vld [vmem:[%s19059_s1 + $0x518] sm:$0xff] }
 0x45e   :  { %19176 = vst [vmem:[#allocation42_spill] sm:$0xff] %v16894_v37  ;;  %v11727_v19 = vadd.f32 %v6029_v62, %v16826_v6  ;;  %v6031_v33 = vpop.f32.mrb[126].mxu0  ;;  %v11619_v42 = vadd.f32 %v5080_v2, %v16807_v36  ;;  %v7308_v38 = vmax.f32 %v11617_v14, 0.0  ;;  %v13860_v18 = vld [vmem:[%s19060_s0 + $0x64] ss:$24 sps:$4 sm:$0xff]   ;;  %v19178_v14 = vld [vmem:[#allocation31_spill] sm:$0xff] }
 0x45f   :  { %v11728_v15 = vadd.f32 %v6031_v33, %v16821_v61  ;;  %v6033_v12 = vpop.f32.mrb[127].mxu0  ;;  %v7315_v62 = vmax.f32 %v11618_v29, 0.0  ;;  %6337 = vmatmul.mubr.bf16.gmra.mrb[236].mxu1 %v13859_v4  ;;  %v10974_v33 = vcombine.high %v16902_v0, %v16907_v34  ;;  %v7293_v2 = vmax.f32 %v11726_v35, 0.0  ;;  %v16939_v16 = vld [vmem:[%s19059_s1 + $0x538] sm:$0xff] }
 0x460   :  { %v11729_v46 = vadd.f32 %v6033_v12, %v16826_v6  ;;  %v7316_v9 = vmax.f32 %v11619_v42, 0.0  ;;  %6346 = vmatprep.mubr.bf16.mxu1 %v13860_v18  ;;  %v7294_v47 = vmax.f32 %v11727_v19, 0.0  ;;  %v13535_v12 = vld [vmem:[%s19062_s3 + $0x124] ss:$8 sps:$4 sm:$0xff]   ;;  %6620 = vmatpush1.bf16.msra.mxu1 %v10965_v11  ;;  %v10973_v19 = vcombine.low %v16902_v0, %v16907_v34 }
 0x461   :  { %v7301_v37 = vmax.f32 %v11728_v15, 0.0  ;;  %8758 = vmatmul.mubr.bf16.vlgmr.msra.gmra.mrb[232].mxu0 %v19177_v60  ;;  %v13530_v60 = vld [vmem:[%s19062_s3 + $0x110] ss:$8 sps:$4 sm:$0xff]   ;;  %v16945_v29 = vpack.c.bf16 %v7315_v62, %v7307_v44  ;;  %6621 = vmatprep.subr.bf16.mxu1 %v10974_v33 }
 0x462   :  { %v7302_v35 = vmax.f32 %v11729_v46, 0.0  ;;  %8767 = vmatprep.mubr.bf16.mxu0 %v19178_v14  ;;  %9047 = vmatpush1.bf16.msra.mxu0 %v13527_v54  ;;  %v5084_v42 = vpop.f32.mrb[132].mxu1  ;;  %v16954_v46 = vpack.c.bf16 %v7316_v9, %v7308_v38  ;;  %v16966_v9 = vld [vmem:[%s19059_s1 + $0x558] sm:$0xff] }
 0x463   :  { %19179 = vst [vmem:[#allocation27_spill] sm:$0xff] %v16945_v29  ;;  %v16947_v15 = vpack.c.bf16 %v7301_v37, %v7293_v2  ;;  %9048 = vmatprep.subr.bf16.mxu0 %v13532_v55  ;;  %v11620_v4 = vadd.f32 %v5084_v42, %v16805_v53  ;;  %v5086_v62 = vpop.f32.mrb[133].mxu1  ;;  %v10982_v37 = vcombine.high %v16934_v23, %v16939_v16  ;;  %v16971_v38 = vld [vmem:[%s19059_s1 + $0x578] sm:$0xff] }
 0x464   :  { %19181 = vst [vmem:[#allocation43_spill] sm:$0xff] %v16954_v46  ;;  %v16956_v54 = vpack.c.bf16 %v7302_v35, %v7294_v47  ;;  %v6037_v44 = vpop.f32.mrb[128].mxu0  ;;  %v11621_v2 = vadd.f32 %v5086_v62, %v16807_v36  ;;  %v5088_v18 = vpop.f32.mrb[134].mxu1  ;;  %v13533_v35 = vld [vmem:[%s19062_s3 + $0x120] ss:$8 sps:$4 sm:$0xff]   ;;  %6622 = vmatpush1.bf16.msra.mxu1 %v10973_v19 }
 0x465   :  { %19180 = vst [vmem:[#allocation31_spill] sm:$0xff] %v16947_v15  ;;  %v11730_v55 = vadd.f32 %v6037_v44, %v16821_v61  ;;  %v6039_v11 = vpop.f32.mrb[129].mxu0  ;;  %v11622_v34 = vadd.f32 %v5088_v18, %v16805_v53  ;;  %v5090_v47 = vpop.f32.mrb[135].mxu1  ;;  %v13538_v62 = vld [vmem:[%s19062_s3 + $0x134] ss:$8 sps:$4 sm:$0xff]   ;;  %v7323_v18 = vmax.f32 %v11620_v4, 0.0  ;;  %6623 = vmatprep.subr.bf16.mxu1 %v10982_v37 }
 0x466   :  { %19182 = vst [vmem:[#allocation44_spill] sm:$0xff] %v16956_v54  ;;  %v11731_v0 = vadd.f32 %v6039_v11, %v16826_v6  ;;  %v6041_v33 = vpop.f32.mrb[130].mxu0  ;;  %9049 = vmatpush1.bf16.msra.mxu0 %v13530_v60  ;;  %v11623_v42 = vadd.f32 %v5090_v47, %v16807_v36  ;;  %v10981_v11 = vcombine.low %v16934_v23, %v16939_v16  ;;  %v7324_v54 = vmax.f32 %v11621_v2, 0.0  ;;  %v19183_v46 = vld [vmem:[#allocation30_spill] sm:$0xff]  ;;  %v13862_v23 = vld [vmem:[%s19060_s0 + $0x94] ss:$24 sps:$4 sm:$0xff]  }
 0x467   :  { %v11732_v14 = vadd.f32 %v6041_v33, %v16821_v61  ;;  %v6043_v44 = vpop.f32.mrb[131].mxu0  ;;  %9050 = vmatprep.subr.bf16.mxu0 %v13535_v12  ;;  %v7331_v60 = vmax.f32 %v11622_v34, 0.0  ;;  %v13861_v33 = vld [vmem:[%s19060_s0 + $0x60] ss:$24 sps:$4 sm:$0xff]   ;;  %v10990_v12 = vcombine.high %v16966_v9, %v16971_v38  ;;  %v7309_v47 = vmax.f32 %v11730_v55, 0.0 }
 0x468   :  { %v11733_v15 = vadd.f32 %v6043_v44, %v16826_v6  ;;  %6347 = vmatmul.mubr.bf16.gmra.mrb[240].mxu1 %v13861_v33  ;;  %v7332_v19 = vmax.f32 %v11623_v42, 0.0  ;;  %v16998_v16 = vld [vmem:[%s19059_s1 + $0x598] sm:$0xff]  ;;  %v7310_v37 = vmax.f32 %v11731_v0, 0.0  ;;  %v13541_v42 = vld [vmem:[%s19062_s3 + $0x144] ss:$8 sps:$4 sm:$0xff]  }
 0x469   :  { %v7317_v29 = vmax.f32 %v11732_v14, 0.0  ;;  %8768 = vmatmul.mubr.bf16.gmra.mrb[236].mxu0 %v19183_v46  ;;  %6356 = vmatprep.mubr.bf16.mxu1 %v13862_v23  ;;  %v17003_v4 = vld [vmem:[%s19059_s1 + $0x5b8] sm:$0xff]  ;;  %v17009_v2 = vpack.c.bf16 %v7331_v60, %v7323_v18  ;;  %v13539_v23 = vld [vmem:[%s19062_s3 + $0x140] ss:$8 sps:$4 sm:$0xff]  }
 0x46a   :  { %v7318_v55 = vmax.f32 %v11733_v15, 0.0  ;;  %8777 = vmatprep.mubr.bf16.mxu0 %v15483_v30  ;;  %9051 = vmatpush1.bf16.msra.mxu0 %v13533_v35  ;;  %v13536_v46 = vld [vmem:[%s19062_s3 + $0x130] ss:$8 sps:$4 sm:$0xff]   ;;  %v5094_v14 = vpop.f32.mrb[136].mxu1  ;;  %v10989_v15 = vcombine.low %v16966_v9, %v16971_v38  ;;  %v17018_v30 = vpack.c.bf16 %v7332_v19, %v7324_v54 }
 0x46b   :  { %v17011_v34 = vpack.c.bf16 %v7317_v29, %v7309_v47  ;;  %9052 = vmatprep.subr.bf16.mxu0 %v13538_v62  ;;  %6624 = vmatpush1.bf16.msra.mxu1 %v10981_v11  ;;  %v11624_v35 = vadd.f32 %v5094_v14, %v16805_v53  ;;  %v5096_v18 = vpop.f32.mrb[137].mxu1  ;;  %v10998_v29 = vcombine.high %v16998_v16, %v17003_v4  ;;  %v17030_v54 = vld [vmem:[%s19059_s1 + $0x5d8] sm:$0xff] }
 0x46c   :  { %v17020_v0 = vpack.c.bf16 %v7318_v55, %v7310_v37  ;;  %v6047_v44 = vpop.f32.mrb[132].mxu0  ;;  %6625 = vmatprep.subr.bf16.mxu1 %v10990_v12  ;;  %v11625_v60 = vadd.f32 %v5096_v18, %v16807_v36  ;;  %v5098_v33 = vpop.f32.mrb[138].mxu1  ;;  %v17035_v9 = vld [vmem:[%s19059_s1 + $0x5f8] sm:$0xff]  ;;  %v10997_v18 = vcombine.low %v16998_v16, %v17003_v4 }
 0x46d   :  { %19184 = vst [vmem:[#allocation30_spill] sm:$0xff] %v17011_v34  ;;  %v11734_v62 = vadd.f32 %v6047_v44, %v16821_v61  ;;  %v6049_v11 = vpop.f32.mrb[133].mxu0  ;;  %v11626_v12 = vadd.f32 %v5098_v33, %v16805_v53  ;;  %v5100_v19 = vpop.f32.mrb[139].mxu1  ;;  %v13544_v44 = vld [vmem:[%s19062_s3 + $0x154] ss:$8 sps:$4 sm:$0xff]  }
 0x46e   :  { %19185 = vst [vmem:[#allocation45_spill] sm:$0xff] %v17020_v0  ;;  %v11735_v38 = vadd.f32 %v6049_v11, %v16826_v6  ;;  %v6051_v47 = vpop.f32.mrb[134].mxu0  ;;  %9053 = vmatpush1.bf16.msra.mxu0 %v13536_v46  ;;  %v11627_v55 = vadd.f32 %v5100_v19, %v16807_v36  ;;  %v7339_v11 = vmax.f32 %v11624_v35, 0.0  ;;  %v7340_v34 = vmax.f32 %v11625_v60, 0.0  ;;  %v13864_v16 = vld [vmem:[%s19060_s0 + $0xc4] ss:$24 sps:$4 sm:$0xff]  }
 0x46f   :  { %v11736_v37 = vadd.f32 %v6051_v47, %v16821_v61  ;;  %v6053_v14 = vpop.f32.mrb[135].mxu0  ;;  %9054 = vmatprep.subr.bf16.mxu0 %v13541_v42  ;;  %6626 = vmatpush1.bf16.msra.mxu1 %v10989_v15  ;;  %v7347_v46 = vmax.f32 %v11626_v12, 0.0  ;;  %v13863_v47 = vld [vmem:[%s19060_s0 + $0x90] ss:$24 sps:$4 sm:$0xff]   ;;  %v11006_v42 = vcombine.high %v17030_v54, %v17035_v9  ;;  %v7325_v19 = vmax.f32 %v11734_v62, 0.0  ;;  %v17062_v4 = vld [vmem:[%s19059_s1 + $0x618] sm:$0xff] }
 0x470   :  { %v11737_v33 = vadd.f32 %v6053_v14, %v16826_v6  ;;  %6357 = vmatmul.mubr.bf16.gmra.mrb[244].mxu1 %v13863_v47  ;;  %6627 = vmatprep.subr.bf16.mxu1 %v10998_v29  ;;  %v7348_v15 = vmax.f32 %v11627_v55, 0.0  ;;  %v17067_v35 = vld [vmem:[%s19059_s1 + $0x638] sm:$0xff]  ;;  %v7326_v29 = vmax.f32 %v11735_v38, 0.0  ;;  %v13547_v55 = vld [vmem:[%s19062_s3 + $0x164] ss:$8 sps:$4 sm:$0xff]   ;;  %v11005_v38 = vcombine.low %v17030_v54, %v17035_v9 }
 0x471   :  { %v7333_v0 = vmax.f32 %v11736_v37, 0.0  ;;  %8778 = vmatmul.mubr.bf16.gmra.mrb[240].mxu0 %v15475_v41  ;;  %6366 = vmatprep.mubr.bf16.mxu1 %v13864_v16  ;;  %v13542_v41 = vld [vmem:[%s19062_s3 + $0x150] ss:$8 sps:$4 sm:$0xff]   ;;  %v17073_v60 = vpack.c.bf16 %v7347_v46, %v7339_v11  ;;  %v13545_v16 = vld [vmem:[%s19062_s3 + $0x160] ss:$8 sps:$4 sm:$0xff]  }
 0x472   :  { %v7334_v62 = vmax.f32 %v11737_v33, 0.0  ;;  %8787 = vmatprep.mubr.bf16.mxu0 %v15525_v59  ;;  %9055 = vmatpush1.bf16.msra.mxu0 %v13539_v23  ;;  %v5104_v37 = vpop.f32.mrb[140].mxu1  ;;  %v17082_v59 = vpack.c.bf16 %v7348_v15, %v7340_v34  ;;  %v17094_v34 = vld [vmem:[%s19059_s1 + $0x658] sm:$0xff] }
 0x473   :  { %19186 = vst [vmem:[#allocation46_spill] sm:$0xff] %v17073_v60  ;;  %v17075_v12 = vpack.c.bf16 %v7333_v0, %v7325_v19  ;;  %9056 = vmatprep.subr.bf16.mxu0 %v13544_v44  ;;  %6628 = vmatpush1.bf16.msra.mxu1 %v10997_v18  ;;  %v11628_v14 = vadd.f32 %v5104_v37, %v16805_v53  ;;  %v5106_v46 = vpop.f32.mrb[141].mxu1  ;;  %v405_v54 = vld [vmem:[%s19059_s1 + $0x678] sm:$0xff] }
 0x474   :  { %v17084_v23 = vpack.c.bf16 %v7334_v62, %v7326_v29  ;;  %v6057_v11 = vpop.f32.mrb[136].mxu0  ;;  %6629 = vmatprep.subr.bf16.mxu1 %v11006_v42  ;;  %v11014_v0 = vcombine.high %v17062_v4, %v17067_v35  ;;  %v11629_v33 = vadd.f32 %v5106_v46, %v16807_v36  ;;  %v5108_v47 = vpop.f32.mrb[142].mxu1  ;;  %v11013_v46 = vcombine.low %v17062_v4, %v17067_v35  ;;  %v13866_v4 = vld [vmem:[%s19060_s0 + $0xf4] ss:$24 sps:$4 sm:$0xff]  }
 0x475   :  { %19187 = vst [vmem:[#allocation47_spill] sm:$0xff] %v17075_v12  ;;  %v11738_v44 = vadd.f32 %v6057_v11, %v16821_v61  ;;  %v6059_v18 = vpop.f32.mrb[137].mxu0  ;;  %v11630_v42 = vadd.f32 %v5108_v47, %v16805_v53  ;;  %v5110_v15 = vpop.f32.mrb[143].mxu1  ;;  %v13550_v11 = vld [vmem:[%s19062_s3 + $0x174] ss:$8 sps:$4 sm:$0xff]  }
 0x476   :  { %19188 = vst [vmem:[#allocation48_spill] sm:$0xff] %v17084_v23  ;;  %v11739_v9 = vadd.f32 %v6059_v18, %v16826_v6  ;;  %v6061_v19 = vpop.f32.mrb[138].mxu0  ;;  %9057 = vmatpush1.bf16.msra.mxu0 %v13542_v41  ;;  %v11631_v62 = vadd.f32 %v5110_v15, %v16807_v36  ;;  %v7355_v18 = vmax.f32 %v11628_v14, 0.0  ;;  %v7356_v12 = vmax.f32 %v11629_v33, 0.0 }
 0x477   :  { %v11740_v29 = vadd.f32 %v6061_v19, %v16821_v61  ;;  %v6063_v37 = vpop.f32.mrb[139].mxu0  ;;  %9058 = vmatprep.subr.bf16.mxu0 %v13547_v55  ;;  %6630 = vmatpush1.bf16.msra.mxu1 %v11005_v38  ;;  %v7363_v41 = vmax.f32 %v11630_v42, 0.0  ;;  %v13865_v19 = vld [vmem:[%s19060_s0 + $0xc0] ss:$24 sps:$4 sm:$0xff]   ;;  %v11022_v55 = vcombine.high %v17094_v34, %v405_v54  ;;  %v7341_v15 = vmax.f32 %v11738_v44, 0.0 }
 0x478   :  { %v11741_v47 = vadd.f32 %v6063_v37, %v16826_v6  ;;  %6367 = vmatmul.mubr.bf16.gmra.mrb[248].mxu1 %v13865_v19  ;;  %6631 = vmatprep.subr.bf16.mxu1 %v11014_v0  ;;  %v7364_v60 = vmax.f32 %v11631_v62, 0.0  ;;  %v7342_v35 = vmax.f32 %v11739_v9, 0.0  ;;  %v13548_v0 = vld [vmem:[%s19062_s3 + $0x170] ss:$8 sps:$4 sm:$0xff]   ;;  %v11021_v9 = vcombine.low %v17094_v34, %v405_v54 }
 0x479   :  { %v7349_v23 = vmax.f32 %v11740_v29, 0.0  ;;  %8788 = vmatmul.mubr.bf16.gmra.mrb[244].mxu0 %v15517_v51  ;;  %6376 = vmatprep.mubr.bf16.mxu1 %v13866_v4  ;;  %v17120_v38 = vpack.c.bf16 %v7363_v41, %v7355_v18  ;;  %v13553_v51 = vld [vmem:[%s19062_s3 + $0x184] ss:$8 sps:$4 sm:$0xff]   ;;  %v409_v4 = vld [vmem:[%s19059_s1 + $0x698] sm:$0xff] }
 0x47a   :  { %v7350_v14 = vmax.f32 %v11741_v47, 0.0  ;;  %8797 = vmatprep.mubr.bf16.mxu0 %v15567_v7  ;;  %9059 = vmatpush1.bf16.msra.mxu0 %v13545_v16  ;;  %v5114_v33 = vpop.f32.mrb[144].mxu1  ;;  %v17132_v42 = vpack.c.bf16 %v7364_v60, %v7356_v12  ;;  %v13551_v12 = vld [vmem:[%s19062_s3 + $0x180] ss:$8 sps:$4 sm:$0xff]  }
 0x47b   :  { %v17126_v44 = vpack.c.bf16 %v7349_v23, %v7341_v15  ;;  %9060 = vmatprep.subr.bf16.mxu0 %v13550_v11  ;;  %6632 = vmatpush1.bf16.msra.mxu1 %v11013_v46  ;;  %v11632_v7 = vadd.f32 %v5114_v33, %v16805_v53  ;;  %v5116_v62 = vpop.f32.mrb[145].mxu1  ;;  %v13556_v15 = vld [vmem:[%s19062_s3 + $0x194] ss:$8 sps:$4 sm:$0xff]  }
 0x47c   :  { %v17134_v29 = vpack.c.bf16 %v7350_v14, %v7342_v35  ;;  %v6067_v16 = vpop.f32.mrb[140].mxu0  ;;  %6633 = vmatprep.subr.bf16.mxu1 %v11022_v55  ;;  %v11633_v37 = vadd.f32 %v5116_v62, %v16807_v36  ;;  %v5118_v18 = vpop.f32.mrb[146].mxu1  ;;  %v413_v35 = vld [vmem:[%s19059_s1 + $0x6b8] sm:$0xff] }
 0x47d   :  { %19189 = vst [vmem:[#allocation49_spill] sm:$0xff] %v17126_v44  ;;  %v11742_v23 = vadd.f32 %v6067_v16, %v16821_v61  ;;  %v6069_v11 = vpop.f32.mrb[141].mxu0  ;;  %v11634_v46 = vadd.f32 %v5118_v18, %v16805_v53  ;;  %v5120_v60 = vpop.f32.mrb[147].mxu1  ;;  %v7371_v54 = vmax.f32 %v11632_v7, 0.0  ;;  %v11029_v7 = vcombine.low %v409_v4, %v413_v35 }
 0x47e   :  { %19190 = vst [vmem:[#allocation50_spill] sm:$0xff] %v17134_v29  ;;  %v11743_v41 = vadd.f32 %v6069_v11, %v16826_v6  ;;  %v6071_v34 = vpop.f32.mrb[142].mxu0  ;;  %9061 = vmatpush1.bf16.msra.mxu0 %v13548_v0  ;;  %v11635_v19 = vadd.f32 %v5120_v60, %v16807_v36  ;;  %v7372_v16 = vmax.f32 %v11633_v37, 0.0  ;;  %v13868_v11 = vld [vmem:[%s19060_s0 + $0x124] ss:$24 sps:$4 sm:$0xff]  }
 0x47f   :  { %v11744_v47 = vadd.f32 %v6071_v34, %v16821_v61  ;;  %v6073_v55 = vpop.f32.mrb[143].mxu0  ;;  %9062 = vmatprep.subr.bf16.mxu0 %v13553_v51  ;;  %6634 = vmatpush1.bf16.msra.mxu1 %v11021_v9  ;;  %v7357_v14 = vmax.f32 %v11742_v23, 0.0  ;;  %v7379_v0 = vmax.f32 %v11634_v46, 0.0  ;;  %v13867_v51 = vld [vmem:[%s19060_s0 + $0xf0] ss:$24 sps:$4 sm:$0xff]   ;;  %v11030_v23 = vcombine.high %v409_v4, %v413_v35 }
 0x480   :  { %v11745_v33 = vadd.f32 %v6073_v55, %v16826_v6  ;;  %6377 = vmatmul.mubr.bf16.gmra.mrb[252].mxu1 %v13867_v51  ;;  %v7380_v62 = vmax.f32 %v11635_v19, 0.0  ;;  %v7358_v18 = vmax.f32 %v11743_v41, 0.0  ;;  %v13554_v37 = vld [vmem:[%s19062_s3 + $0x190] ss:$8 sps:$4 sm:$0xff]  }
 0x481   :  { %v7365_v9 = vmax.f32 %v11744_v47, 0.0  ;;  %8798 = vmatmul.mubr.bf16.gmra.mrb[248].mxu0 %v15559_v57  ;;  %6386 = vmatprep.mubr.bf16.mxu1 %v13868_v11  ;;  %v17163_v46 = vpack.c.bf16 %v7379_v0, %v7371_v54  ;;  %v13559_v47 = vld [vmem:[%s19062_s3 + $0x1a4] ss:$8 sps:$4 sm:$0xff]   ;;  %v13562_v11 = vld [vmem:[%s19062_s3 + $0x1b4] ss:$8 sps:$4 sm:$0xff]  }
 0x482   :  { %v7366_v34 = vmax.f32 %v11745_v33, 0.0  ;;  %8807 = vmatprep.mubr.bf16.mxu0 %v15603_v10  ;;  %9063 = vmatpush1.bf16.msra.mxu0 %v13551_v12  ;;  %v5124_v57 = vpop.f32.mrb[148].mxu1  ;;  %v17174_v41 = vpack.c.bf16 %v7380_v62, %v7372_v16  ;;  %v13557_v16 = vld [vmem:[%s19062_s3 + $0x1a0] ss:$8 sps:$4 sm:$0xff]  }
 0x483   :  { %v17169_v60 = vpack.c.bf16 %v7365_v9, %v7357_v14  ;;  %9064 = vmatprep.subr.bf16.mxu0 %v13556_v15  ;;  %6635 = vmatprep.subr.bf16.mxu1 %v11030_v23  ;;  %v11636_v10 = vadd.f32 %v5124_v57, %v16805_v53  ;;  %v5126_v19 = vpop.f32.mrb[149].mxu1 }
 0x484   :  { %v17176_v54 = vpack.c.bf16 %v7366_v34, %v7358_v18  ;;  %v6077_v12 = vpop.f32.mrb[144].mxu0  ;;  %6636 = vmatpush1.bf16.msra.mxu1 %v11029_v7  ;;  %v11637_v4 = vadd.f32 %v5126_v19, %v16807_v36  ;;  %v5128_v15 = vpop.f32.mrb[150].mxu1 }
 0x485   :  { %19191 = vst [vmem:[#allocation51_spill] sm:$0xff] %v17169_v60  ;;  %v11746_v55 = vadd.f32 %v6077_v12, %v16821_v61  ;;  %v6079_v35 = vpop.f32.mrb[145].mxu0  ;;  %v11638_v0 = vadd.f32 %v5128_v15, %v16805_v53  ;;  %v5130_v51 = vpop.f32.mrb[151].mxu1  ;;  %v7387_v23 = vmax.f32 %v11636_v10, 0.0 }
 0x486   :  { %19192 = vst [vmem:[#allocation52_spill] sm:$0xff] %v17176_v54  ;;  %v11747_v14 = vadd.f32 %v6079_v35, %v16826_v6  ;;  %v6081_v33 = vpop.f32.mrb[146].mxu0  ;;  %9065 = vmatpush1.bf16.msra.mxu0 %v13554_v37  ;;  %v11639_v7 = vadd.f32 %v5130_v51, %v16807_v36  ;;  %v13869_v37 = vld [vmem:[%s19060_s0 + $0x120] ss:$24 sps:$4 sm:$0xff]   ;;  %v7388_v12 = vmax.f32 %v11637_v4, 0.0 }
 0x487   :  { %v11748_v9 = vadd.f32 %v6081_v33, %v16821_v61  ;;  %v6083_v62 = vpop.f32.mrb[147].mxu0  ;;  %9066 = vmatprep.subr.bf16.mxu0 %v13559_v47  ;;  %v7395_v18 = vmax.f32 %v11638_v0, 0.0  ;;  %v7373_v57 = vmax.f32 %v11746_v55, 0.0  ;;  %v13870_v47 = vld [vmem:[%s19060_s0 + $0x154] ss:$24 sps:$4 sm:$0xff]  }
 0x488   :  { %v11749_v34 = vadd.f32 %v6083_v62, %v16826_v6  ;;  %6387 = vmatmul.mubr.bf16.gmra.mrb[0].mxu1 %v13869_v37  ;;  %v7396_v35 = vmax.f32 %v11639_v7, 0.0  ;;  %v7374_v10 = vmax.f32 %v11747_v14, 0.0  ;;  %v13560_v55 = vld [vmem:[%s19062_s3 + $0x1b0] ss:$8 sps:$4 sm:$0xff]  }
 0x489   :  { %v7381_v19 = vmax.f32 %v11748_v9, 0.0  ;;  %8808 = vmatmul.mubr.bf16.gmra.mrb[252].mxu0 %v15595_v21  ;;  %6396 = vmatprep.mubr.bf16.mxu1 %v13870_v47  ;;  %v17199_v15 = vpack.c.bf16 %v7395_v18, %v7387_v23 }
 0x48a   :  { %v7382_v0 = vmax.f32 %v11749_v34, 0.0  ;;  %8817 = vmatprep.mubr.bf16.mxu0 %v15639_v63  ;;  %9067 = vmatpush1.bf16.msra.mxu0 %v13557_v16  ;;  %v5134_v33 = vpop.f32.mrb[152].mxu1  ;;  %v17207_v21 = vpack.c.bf16 %v7396_v35, %v7388_v12  ;;  %v417_v63 = vld [vmem:[%s19059_s1 + $0x6d8] sm:$0xff] }
 0x48b   :  { %v17205_v4 = vpack.c.bf16 %v7381_v19, %v7373_v57  ;;  %9068 = vmatprep.subr.bf16.mxu0 %v13562_v11  ;;  %v11640_v14 = vadd.f32 %v5134_v33, %v16805_v53  ;;  %v5136_v7 = vpop.f32.mrb[153].mxu1  ;;  %v421_v16 = vld [vmem:[%s19059_s1 + $0x6f8] sm:$0xff] }
 0x48c   :  { %v17209_v51 = vpack.c.bf16 %v7382_v0, %v7374_v10  ;;  %v6087_v9 = vpop.f32.mrb[148].mxu0  ;;  %v11641_v11 = vadd.f32 %v5136_v7, %v16807_v36  ;;  %v5138_v18 = vpop.f32.mrb[154].mxu1  ;;  %v11038_v34 = vcombine.high %v417_v63, %v421_v16  ;;  %v11037_v35 = vcombine.low %v417_v63, %v421_v16  ;;  %v13872_v63 = vld [vmem:[%s19060_s0 + $0x184] ss:$24 sps:$4 sm:$0xff]  }
 0x48d   :  { %19193 = vst [vmem:[#allocation53_spill] sm:$0xff] %v17205_v4  ;;  %v11750_v62 = vadd.f32 %v6087_v9, %v16821_v61  ;;  %v6089_v23 = vpop.f32.mrb[149].mxu0  ;;  %v11642_v57 = vadd.f32 %v5138_v18, %v16805_v53  ;;  %v5140_v19 = vpop.f32.mrb[155].mxu1  ;;  %v7403_v33 = vmax.f32 %v11640_v14, 0.0 }
 0x48e   :  { %19194 = vst [vmem:[#allocation54_spill] sm:$0xff] %v17209_v51  ;;  %v11751_v37 = vadd.f32 %v6089_v23, %v16826_v6  ;;  %v6091_v12 = vpop.f32.mrb[150].mxu0  ;;  %9069 = vmatpush1.bf16.msra.mxu0 %v13560_v55  ;;  %v11643_v10 = vadd.f32 %v5140_v19, %v16807_v36  ;;  %6637 = vmatprep.subr.bf16.mxu1 %v11038_v34  ;;  %v13871_v23 = vld [vmem:[%s19060_s0 + $0x150] ss:$24 sps:$4 sm:$0xff]   ;;  %v7404_v4 = vmax.f32 %v11641_v11, 0.0 }
 0x48f   :  { %v11752_v47 = vadd.f32 %v6091_v12, %v16821_v61  ;;  %v6093_v0 = vpop.f32.mrb[151].mxu0  ;;  %v7411_v9 = vmax.f32 %v11642_v57, 0.0  ;;  %v7389_v18 = vmax.f32 %v11750_v62, 0.0  ;;  %6638 = vmatpush1.bf16.msra.mxu1 %v11037_v35 }
 0x490   :  { %v11753_v7 = vadd.f32 %v6093_v0, %v16826_v6  ;;  %6397 = vmatmul.mubr.bf16.gmra.mrb[4].mxu1 %v13871_v23  ;;  %v7412_v55 = vmax.f32 %v11643_v10, 0.0  ;;  %v7390_v14 = vmax.f32 %v11751_v37, 0.0  ;;  %v13563_v37 = vld [vmem:[%s19062_s3 + $0x1c0] ss:$8 sps:$4 sm:$0xff]  }
 0x491   :  { %v7397_v51 = vmax.f32 %v11752_v47, 0.0  ;;  %8818 = vmatmul.mubr.bf16.gmra.mrb[0].mxu0 %v15631_v58  ;;  %6406 = vmatprep.mubr.bf16.mxu1 %v13872_v63  ;;  %v17232_v16 = vpack.c.bf16 %v7411_v9, %v7403_v33 }
 0x492   :  { %v7398_v34 = vmax.f32 %v11753_v7, 0.0  ;;  %8827 = vmatprep.mubr.bf16.mxu0 %v15663_v27  ;;  %v5144_v62 = vpop.f32.mrb[156].mxu1  ;;  %v17237_v11 = vpack.c.bf16 %v7412_v55, %v7404_v4  ;;  %v13565_v27 = vld [vmem:[%s19062_s3 + $0x1c4] ss:$8 sps:$4 sm:$0xff]  }
 0x493   :  { %v17235_v57 = vpack.c.bf16 %v7397_v51, %v7389_v18  ;;  %v11644_v58 = vadd.f32 %v5144_v62, %v16805_v53  ;;  %v5146_v47 = vpop.f32.mrb[157].mxu1  ;;  %9070 = vmatprep.subr.bf16.mxu0 %v13565_v27  ;;  %v13873_v62 = vld [vmem:[%s19060_s0 + $0x180] ss:$24 sps:$4 sm:$0xff]   ;;  %v13874_v27 = vld [vmem:[%s19060_s0 + $0x1b4] ss:$24 sps:$4 sm:$0xff]  }
 0x494   :  { %v17239_v12 = vpack.c.bf16 %v7398_v34, %v7390_v14  ;;  %v6097_v19 = vpop.f32.mrb[152].mxu0  ;;  %v11645_v35 = vadd.f32 %v5146_v47, %v16807_v36  ;;  %v5148_v10 = vpop.f32.mrb[158].mxu1  ;;  %9071 = vmatpush1.bf16.msra.mxu0 %v13563_v37 }
 0x495   :  { %19195 = vst [vmem:[#allocation55_spill] sm:$0xff] %v17235_v57  ;;  %v11754_v51 = vadd.f32 %v6097_v19, %v16821_v61  ;;  %v6099_v4 = vpop.f32.mrb[153].mxu0  ;;  %v11646_v33 = vadd.f32 %v5148_v10, %v16805_v53  ;;  %v5150_v7 = vpop.f32.mrb[159].mxu1  ;;  %v7419_v63 = vmax.f32 %v11644_v58, 0.0 }
 0x496   :  { %19196 = vst [vmem:[#allocation56_spill] sm:$0xff] %v17239_v12  ;;  %v11755_v0 = vadd.f32 %v6099_v4, %v16826_v6  ;;  %v6101_v9 = vpop.f32.mrb[154].mxu0  ;;  %v11647_v18 = vadd.f32 %v5150_v7, %v16807_v36  ;;  %v7420_v47 = vmax.f32 %v11645_v35, 0.0 }
 0x497   :  { %v11756_v23 = vadd.f32 %v6101_v9, %v16821_v61  ;;  %v6103_v55 = vpop.f32.mrb[155].mxu0  ;;  %v7427_v14 = vmax.f32 %v11646_v33, 0.0  ;;  %v7405_v19 = vmax.f32 %v11754_v51, 0.0 }
 0x498   :  { %v11757_v34 = vadd.f32 %v6103_v55, %v16826_v6  ;;  %6407 = vmatmul.mubr.bf16.gmra.mrb[8].mxu1 %v13873_v62  ;;  %v7428_v10 = vmax.f32 %v11647_v18, 0.0  ;;  %v7406_v58 = vmax.f32 %v11755_v0, 0.0  ;;  %v425_v0 = vld [vmem:[%s19059_s1 + $0x718] sm:$0xff] }
 0x499   :  { %v7413_v4 = vmax.f32 %v11756_v23, 0.0  ;;  %8828 = vmatmul.mubr.bf16.gmra.mrb[4].mxu0 %v15655_v8  ;;  %6416 = vmatprep.mubr.bf16.mxu1 %v13874_v27  ;;  %v17262_v37 = vpack.c.bf16 %v7427_v14, %v7419_v63  ;;  %v429_v55 = vld [vmem:[%s19059_s1 + $0x738] sm:$0xff] }
 0x49a   :  { %v7414_v33 = vmax.f32 %v11757_v34, 0.0  ;;  %8837 = vmatprep.mubr.bf16.mxu0 %v15687_v32  ;;  %v5154_v7 = vpop.f32.mrb[160].mxu1  ;;  %v17267_v51 = vpack.c.bf16 %v7428_v10, %v7420_v47  ;;  %v11046_v62 = vcombine.high %v425_v0, %v429_v55  ;;  %v11045_v27 = vcombine.low %v425_v0, %v429_v55  ;;  %v13876_v0 = vld [vmem:[%s19060_s0 + $0x1e4] ss:$24 sps:$4 sm:$0xff]  }
 0x49b   :  { %v17265_v9 = vpack.c.bf16 %v7413_v4, %v7405_v19  ;;  %v11648_v8 = vadd.f32 %v5154_v7, %v16805_v53  ;;  %v5156_v18 = vpop.f32.mrb[161].mxu1 }
 0x49c   :  { %v17269_v35 = vpack.c.bf16 %v7414_v33, %v7406_v58  ;;  %v6107_v23 = vpop.f32.mrb[156].mxu0  ;;  %v11649_v63 = vadd.f32 %v5156_v18, %v16807_v36  ;;  %v5158_v34 = vpop.f32.mrb[162].mxu1  ;;  %6639 = vmatprep.subr.bf16.mxu1 %v11046_v62 }
 0x49d   :  { %19197 = vst [vmem:[#allocation57_spill] sm:$0xff] %v17265_v9  ;;  %v11758_v32 = vadd.f32 %v6107_v23, %v16821_v61  ;;  %v6109_v14 = vpop.f32.mrb[157].mxu0  ;;  %v11650_v47 = vadd.f32 %v5158_v34, %v16805_v53  ;;  %v5160_v10 = vpop.f32.mrb[163].mxu1  ;;  %v7435_v9 = vmax.f32 %v11648_v8, 0.0  ;;  %6640 = vmatpush1.bf16.msra.mxu1 %v11045_v27 }
 0x49e   :  { %19198 = vst [vmem:[#allocation58_spill] sm:$0xff] %v17269_v35  ;;  %v11759_v19 = vadd.f32 %v6109_v14, %v16826_v6  ;;  %v6111_v4 = vpop.f32.mrb[158].mxu0  ;;  %v11651_v33 = vadd.f32 %v5160_v10, %v16807_v36  ;;  %v13875_v35 = vld [vmem:[%s19060_s0 + $0x1b0] ss:$24 sps:$4 sm:$0xff]   ;;  %v7436_v34 = vmax.f32 %v11649_v63, 0.0 }
 0x49f   :  { %v11760_v58 = vadd.f32 %v6111_v4, %v16821_v61  ;;  %v6113_v7 = vpop.f32.mrb[159].mxu0  ;;  %v7443_v23 = vmax.f32 %v11650_v47, 0.0  ;;  %v7421_v14 = vmax.f32 %v11758_v32, 0.0  ;;  %v13566_v32 = vld [vmem:[%s19062_s3 + $0x1d0] ss:$8 sps:$4 sm:$0xff]  }
 0x4a0   :  { %v11761_v18 = vadd.f32 %v6113_v7, %v16826_v6  ;;  %6417 = vmatmul.mubr.bf16.gmra.mrb[12].mxu1 %v13875_v35  ;;  %v7444_v12 = vmax.f32 %v11651_v33, 0.0  ;;  %v7422_v8 = vmax.f32 %v11759_v19, 0.0 }
 0x4a1   :  { %v7429_v57 = vmax.f32 %v11760_v58, 0.0  ;;  %8838 = vmatmul.mubr.bf16.gmra.mrb[8].mxu0 %v15679_v22  ;;  %6426 = vmatprep.mubr.bf16.mxu1 %v13876_v0  ;;  %v17292_v55 = vpack.c.bf16 %v7443_v23, %v7435_v9  ;;  %v13568_v22 = vld [vmem:[%s19062_s3 + $0x1d4] ss:$8 sps:$4 sm:$0xff]  }
 0x4a2   :  { %v7430_v62 = vmax.f32 %v11761_v18, 0.0  ;;  %8847 = vmatprep.mubr.bf16.mxu0 %v15711_v25  ;;  %v5164_v35 = vpop.f32.mrb[164].mxu1  ;;  %v17303_v63 = vpack.c.bf16 %v7444_v12, %v7436_v34  ;;  %9072 = vmatprep.subr.bf16.mxu0 %v13568_v22 }
 0x4a3   :  { %v17295_v47 = vpack.c.bf16 %v7429_v57, %v7421_v14  ;;  %v11652_v9 = vadd.f32 %v5164_v35, %v16805_v53  ;;  %v5166_v25 = vpop.f32.mrb[165].mxu1  ;;  %9073 = vmatpush1.bf16.msra.mxu0 %v13566_v32  ;;  %v13877_v35 = vld [vmem:[%s19060_s0 + $0x1e0] ss:$24 sps:$4 sm:$0xff]   ;;  %v13878_v32 = vld [vmem:[%s19060_s0 + $0x214] ss:$24 sps:$4 sm:$0xff]  }
 0x4a4   :  { %v17305_v19 = vpack.c.bf16 %v7430_v62, %v7422_v8  ;;  %v6117_v4 = vpop.f32.mrb[160].mxu0  ;;  %v11653_v10 = vadd.f32 %v5166_v25, %v16807_v36  ;;  %v5168_v58 = vpop.f32.mrb[166].mxu1 }
 0x4a5   :  { %19199 = vst [vmem:[#allocation59_spill] sm:$0xff] %v17295_v47  ;;  %v11762_v57 = vadd.f32 %v6117_v4, %v16821_v61  ;;  %v6119_v27 = vpop.f32.mrb[161].mxu0  ;;  %v11654_v7 = vadd.f32 %v5168_v58, %v16805_v53  ;;  %v5170_v12 = vpop.f32.mrb[167].mxu1  ;;  %v7451_v0 = vmax.f32 %v11652_v9, 0.0 }
 0x4a6   :  { %19200 = vst [vmem:[#allocation60_spill] sm:$0xff] %v17305_v19  ;;  %v11763_v33 = vadd.f32 %v6119_v27, %v16826_v6  ;;  %v6121_v23 = vpop.f32.mrb[162].mxu0  ;;  %v11655_v14 = vadd.f32 %v5170_v12, %v16807_v36  ;;  %v7452_v4 = vmax.f32 %v11653_v10, 0.0 }
 0x4a7   :  { %v11764_v18 = vadd.f32 %v6121_v23, %v16821_v61  ;;  %v6123_v34 = vpop.f32.mrb[163].mxu0  ;;  %v7459_v8 = vmax.f32 %v11654_v7, 0.0  ;;  %v7437_v22 = vmax.f32 %v11762_v57, 0.0 }
 0x4a8   :  { %v11765_v62 = vadd.f32 %v6123_v34, %v16826_v6  ;;  %6427 = vmatmul.mubr.bf16.gmra.mrb[16].mxu1 %v13877_v35  ;;  %v7460_v27 = vmax.f32 %v11655_v14, 0.0  ;;  %v7438_v9 = vmax.f32 %v11763_v33, 0.0  ;;  %v433_v33 = vld [vmem:[%s19059_s1 + $0x758] sm:$0xff] }
 0x4a9   :  { %v7445_v25 = vmax.f32 %v11764_v18, 0.0  ;;  %8848 = vmatmul.mubr.bf16.gmra.mrb[12].mxu0 %v15703_v52  ;;  %6436 = vmatprep.mubr.bf16.mxu1 %v13878_v32  ;;  %v17322_v58 = vpack.c.bf16 %v7459_v8, %v7451_v0  ;;  %v437_v34 = vld [vmem:[%s19059_s1 + $0x778] sm:$0xff] }
 0x4aa   :  { %v7446_v7 = vmax.f32 %v11765_v62, 0.0  ;;  %8857 = vmatprep.mubr.bf16.mxu0 %v15735_v28  ;;  %v5174_v12 = vpop.f32.mrb[168].mxu1  ;;  %v17327_v57 = vpack.c.bf16 %v7460_v27, %v7452_v4  ;;  %v11054_v35 = vcombine.high %v433_v33, %v437_v34  ;;  %v11053_v32 = vcombine.low %v433_v33, %v437_v34  ;;  %v13569_v33 = vld [vmem:[%s19062_s3 + $0x1e0] ss:$8 sps:$4 sm:$0xff]  }
 0x4ab   :  { %v17325_v23 = vpack.c.bf16 %v7445_v25, %v7437_v22  ;;  %v11656_v52 = vadd.f32 %v5174_v12, %v16805_v53  ;;  %v5176_v14 = vpop.f32.mrb[169].mxu1 }
 0x4ac   :  { %v17329_v10 = vpack.c.bf16 %v7446_v7, %v7438_v9  ;;  %v6127_v18 = vpop.f32.mrb[164].mxu0  ;;  %v11657_v0 = vadd.f32 %v5176_v14, %v16807_v36  ;;  %v5178_v62 = vpop.f32.mrb[170].mxu1  ;;  %6641 = vmatprep.subr.bf16.mxu1 %v11054_v35  ;;  %v445_v35 = vld [vmem:[%s19059_s1 + $0x7b8] sm:$0xff] }
 0x4ad   :  { %19201 = vst [vmem:[#allocation61_spill] sm:$0xff] %v17325_v23  ;;  %v11766_v28 = vadd.f32 %v6127_v18, %v16821_v61  ;;  %v6129_v8 = vpop.f32.mrb[165].mxu0  ;;  %v11658_v4 = vadd.f32 %v5178_v62, %v16805_v53  ;;  %v5180_v27 = vpop.f32.mrb[171].mxu1  ;;  %v7467_v9 = vmax.f32 %v11656_v52, 0.0  ;;  %v13880_v52 = vld [vmem:[%s19060_s0 + $0x244] ss:$24 sps:$4 sm:$0xff]   ;;  %6642 = vmatpush1.bf16.msra.mxu1 %v11053_v32 }
 0x4ae   :  { %19202 = vst [vmem:[#allocation62_spill] sm:$0xff] %v17329_v10  ;;  %v11767_v22 = vadd.f32 %v6129_v8, %v16826_v6  ;;  %v6131_v25 = vpop.f32.mrb[166].mxu0  ;;  %v11659_v12 = vadd.f32 %v5180_v27, %v16807_v36  ;;  %v7468_v10 = vmax.f32 %v11657_v0, 0.0  ;;  %v13879_v8 = vld [vmem:[%s19060_s0 + $0x210] ss:$24 sps:$4 sm:$0xff]  }
 0x4af   :  { %v11768_v7 = vadd.f32 %v6131_v25, %v16821_v61  ;;  %v6133_v23 = vpop.f32.mrb[167].mxu0  ;;  %v7453_v18 = vmax.f32 %v11766_v28, 0.0  ;;  %v7475_v14 = vmax.f32 %v11658_v4, 0.0 }
 0x4b0   :  { %v11769_v47 = vadd.f32 %v6133_v23, %v16826_v6  ;;  %6437 = vmatmul.mubr.bf16.gmra.mrb[20].mxu1 %v13879_v8  ;;  %v7476_v19 = vmax.f32 %v11659_v12, 0.0  ;;  %v13571_v23 = vld [vmem:[%s19062_s3 + $0x1e4] ss:$8 sps:$4 sm:$0xff]   ;;  %v7454_v34 = vmax.f32 %v11767_v22, 0.0 }
 0x4b1   :  { %v7461_v62 = vmax.f32 %v11768_v7, 0.0  ;;  %8858 = vmatmul.mubr.bf16.gmra.mrb[16].mxu0 %v15727_v26  ;;  %6446 = vmatprep.mubr.bf16.mxu1 %v13880_v52  ;;  %v17358_v28 = vpack.c.bf16 %v7475_v14, %v7467_v9  ;;  %v441_v26 = vld [vmem:[%s19059_s1 + $0x798] sm:$0xff] }
 0x4b2   :  { %v7462_v0 = vmax.f32 %v11769_v47, 0.0  ;;  %8867 = vmatprep.mubr.bf16.mxu0 %v15759_v17  ;;  %v5184_v25 = vpop.f32.mrb[172].mxu1  ;;  %9074 = vmatprep.subr.bf16.mxu0 %v13571_v23  ;;  %v11061_v27 = vcombine.low %v441_v26, %v445_v35  ;;  %v11062_v22 = vcombine.high %v441_v26, %v445_v35  ;;  %v17369_v9 = vpack.c.bf16 %v7476_v19, %v7468_v10 }
 0x4b3   :  { %v17367_v4 = vpack.c.bf16 %v7461_v62, %v7453_v18  ;;  %v11660_v17 = vadd.f32 %v5184_v25, %v16805_v53  ;;  %v5186_v7 = vpop.f32.mrb[173].mxu1  ;;  %9075 = vmatpush1.bf16.msra.mxu0 %v13569_v33 }
 0x4b4   :  { %v17371_v47 = vpack.c.bf16 %v7462_v0, %v7454_v34  ;;  %v6137_v32 = vpop.f32.mrb[168].mxu0  ;;  %v11661_v14 = vadd.f32 %v5186_v7, %v16807_v36  ;;  %v5188_v18 = vpop.f32.mrb[174].mxu1  ;;  %6643 = vmatprep.subr.bf16.mxu1 %v11062_v22  ;;  %v13881_v22 = vld [vmem:[%s19060_s0 + $0x240] ss:$24 sps:$4 sm:$0xff]  }
 0x4b5   :  { %19203 = vst [vmem:[#allocation63_spill] sm:$0xff] %v17367_v4  ;;  %v11770_v12 = vadd.f32 %v6137_v32, %v16821_v61  ;;  %v6139_v8 = vpop.f32.mrb[169].mxu0  ;;  %v11662_v52 = vadd.f32 %v5188_v18, %v16805_v53  ;;  %v5190_v10 = vpop.f32.mrb[175].mxu1  ;;  %6644 = vmatpush1.bf16.msra.mxu1 %v11061_v27  ;;  %v7483_v33 = vmax.f32 %v11660_v17, 0.0  ;;  %v13882_v27 = vld [vmem:[%s19060_s0 + $0x274] ss:$24 sps:$4 sm:$0xff]  }
 0x4b6   :  { %19204 = vst [vmem:[#allocation64_spill] sm:$0xff] %v17371_v47  ;;  %v11771_v62 = vadd.f32 %v6139_v8, %v16826_v6  ;;  %v6141_v19 = vpop.f32.mrb[170].mxu0  ;;  %v11663_v34 = vadd.f32 %v5190_v10, %v16807_v36  ;;  %v7484_v32 = vmax.f32 %v11661_v14, 0.0  ;;  %v13574_v14 = vld [vmem:[%s19062_s3 + $0x1f4] ss:$8 sps:$4 sm:$0xff]  }
 0x4b7   :  { %v11772_v23 = vadd.f32 %v6141_v19, %v16821_v61  ;;  %v6143_v0 = vpop.f32.mrb[171].mxu0  ;;  %v7469_v26 = vmax.f32 %v11770_v12, 0.0  ;;  %v7491_v35 = vmax.f32 %v11662_v52, 0.0  ;;  %v13572_v52 = vld [vmem:[%s19062_s3 + $0x1f0] ss:$8 sps:$4 sm:$0xff]   ;;  %9076 = vmatprep.subr.bf16.mxu0 %v13574_v14 }
 0x4b8   :  { %v11773_v25 = vadd.f32 %v6143_v0, %v16826_v6  ;;  %6447 = vmatmul.mubr.bf16.gmra.mrb[24].mxu1 %v13881_v22  ;;  %v7470_v7 = vmax.f32 %v11771_v62, 0.0  ;;  %v7492_v18 = vmax.f32 %v11663_v34, 0.0  ;;  %v453_v10 = vld [vmem:[%s19059_s1 + $0x7f8] sm:$0xff]  ;;  %9077 = vmatpush1.bf16.msra.mxu0 %v13572_v52  ;;  %v13883_v52 = vld [vmem:[%s19060_s0 + $0x270] ss:$24 sps:$4 sm:$0xff]  }
 0x4b9   :  { %v7477_v8 = vmax.f32 %v11772_v23, 0.0  ;;  %8868 = vmatmul.mubr.bf16.gmra.mrb[20].mxu0 %v15751_v39  ;;  %6456 = vmatprep.mubr.bf16.mxu1 %v13882_v27  ;;  %v17388_v17 = vpack.c.bf16 %v7491_v35, %v7483_v33  ;;  %v449_v39 = vld [vmem:[%s19059_s1 + $0x7d8] sm:$0xff] }
 0x4ba   :  { %v7478_v12 = vmax.f32 %v11773_v25, 0.0  ;;  %8877 = vmatprep.mubr.bf16.mxu0 %v15789_v56  ;;  %v5194_v19 = vpop.f32.mrb[176].mxu1  ;;  %v17405_v56 = vpack.c.bf16 %v7492_v18, %v7484_v32  ;;  %v11069_v35 = vcombine.low %v449_v39, %v453_v10  ;;  %v11070_v25 = vcombine.high %v449_v39, %v453_v10 }
 0x4bb   :  { %v17400_v62 = vpack.c.bf16 %v7477_v8, %v7469_v26  ;;  %v11664_v34 = vadd.f32 %v5194_v19, %v16805_v53  ;;  %v5196_v33 = vpop.f32.mrb[177].mxu1 }
 0x4bc   :  { %v17407_v23 = vpack.c.bf16 %v7478_v12, %v7470_v7  ;;  %v6147_v0 = vpop.f32.mrb[172].mxu0  ;;  %v11665_v26 = vadd.f32 %v5196_v33, %v16807_v36  ;;  %v5198_v27 = vpop.f32.mrb[178].mxu1  ;;  %6645 = vmatprep.subr.bf16.mxu1 %v11070_v25  ;;  %v13884_v25 = vld [vmem:[%s19060_s0 + $0x2a4] ss:$24 sps:$4 sm:$0xff]  }
 0x4bd   :  { %19205 = vst [vmem:[#allocation65_spill] sm:$0xff] %v17400_v62  ;;  %v11774_v22 = vadd.f32 %v6147_v0, %v16821_v61  ;;  %v6149_v8 = vpop.f32.mrb[173].mxu0  ;;  %v11666_v32 = vadd.f32 %v5198_v27, %v16805_v53  ;;  %v5200_v18 = vpop.f32.mrb[179].mxu1  ;;  %6646 = vmatpush1.bf16.msra.mxu1 %v11069_v35  ;;  %v7499_v39 = vmax.f32 %v11664_v34, 0.0 }
 0x4be   :  { %19206 = vst [vmem:[#allocation66_spill] sm:$0xff] %v17407_v23  ;;  %v11775_v62 = vadd.f32 %v6149_v8, %v16826_v6  ;;  %v6151_v7 = vpop.f32.mrb[174].mxu0  ;;  %v11667_v14 = vadd.f32 %v5200_v18, %v16807_v36  ;;  %v7500_v8 = vmax.f32 %v11665_v26, 0.0 }
 0x4bf   :  { %v11776_v12 = vadd.f32 %v6151_v7, %v16821_v61  ;;  %v6153_v19 = vpop.f32.mrb[175].mxu0  ;;  %v7507_v10 = vmax.f32 %v11666_v32, 0.0  ;;  %v7485_v33 = vmax.f32 %v11774_v22, 0.0 }
 0x4c0   :  { %v11777_v0 = vadd.f32 %v6153_v19, %v16826_v6  ;;  %6457 = vmatmul.mubr.bf16.gmra.mrb[28].mxu1 %v13883_v52  ;;  %v7508_v23 = vmax.f32 %v11667_v14, 0.0  ;;  %v7486_v34 = vmax.f32 %v11775_v62, 0.0 }
 0x4c1   :  { %v7493_v27 = vmax.f32 %v11776_v12, 0.0  ;;  %8878 = vmatmul.mubr.bf16.gmra.mrb[24].mxu0 %v15787_v24  ;;  %6466 = vmatprep.mubr.bf16.mxu1 %v13884_v25  ;;  %v17424_v35 = vpack.c.bf16 %v7507_v10, %v7499_v39 }
 0x4c2   :  { %v7494_v32 = vmax.f32 %v11777_v0, 0.0  ;;  %8887 = vmatprep.mubr.bf16.mxu0 %v15819_v5  ;;  %v5204_v18 = vpop.f32.mrb[180].mxu1  ;;  %v17429_v22 = vpack.c.bf16 %v7508_v23, %v7500_v8 }
 0x4c3   :  { %v17427_v7 = vpack.c.bf16 %v7493_v27, %v7485_v33  ;;  %v11668_v24 = vadd.f32 %v5204_v18, %v16805_v53  ;;  %v5206_v14 = vpop.f32.mrb[181].mxu1  ;;  %v13885_v18 = vld [vmem:[%s19060_s0 + $0x2a0] ss:$24 sps:$4 sm:$0xff]  }
 0x4c4   :  { %v17431_v26 = vpack.c.bf16 %v7494_v32, %v7486_v34  ;;  %v6157_v12 = vpop.f32.mrb[176].mxu0  ;;  %v11669_v62 = vadd.f32 %v5206_v14, %v16807_v36  ;;  %v5208_v10 = vpop.f32.mrb[182].mxu1 }
 0x4c5   :  { %19207 = vst [vmem:[#allocation67_spill] sm:$0xff] %v17427_v7  ;;  %v11778_v19 = vadd.f32 %v6157_v12, %v16821_v61  ;;  %v6159_v39 = vpop.f32.mrb[177].mxu0  ;;  %v11670_v5 = vadd.f32 %v5208_v10, %v16805_v53  ;;  %v5210_v33 = vpop.f32.mrb[183].mxu1  ;;  %v7515_v25 = vmax.f32 %v11668_v24, 0.0  ;;  %v13577_v24 = vld [vmem:[%s19062_s3 + $0x204] ss:$8 sps:$4 sm:$0xff]  }
 0x4c6   :  { %19208 = vst [vmem:[#allocation68_spill] sm:$0xff] %v17431_v26  ;;  %v11779_v0 = vadd.f32 %v6159_v39, %v16826_v6  ;;  %v6161_v52 = vpop.f32.mrb[178].mxu0  ;;  %v11671_v8 = vadd.f32 %v5210_v33, %v16807_v36  ;;  %v7516_v14 = vmax.f32 %v11669_v62, 0.0  ;;  %9367 = vmatprep.subr.bf16.mxu0 %v13577_v24 }
 0x4c7   :  { %v11780_v23 = vadd.f32 %v6161_v52, %v16821_v61  ;;  %v6163_v27 = vpop.f32.mrb[179].mxu0  ;;  %v7523_v34 = vmax.f32 %v11670_v5, 0.0  ;;  %v7501_v12 = vmax.f32 %v11778_v19, 0.0  ;;  %v13886_v52 = vld [vmem:[%s19060_s0 + $0x2d4] ss:$24 sps:$4 sm:$0xff]  }
 0x4c8   :  { %v11781_v32 = vadd.f32 %v6163_v27, %v16826_v6  ;;  %6467 = vmatmul.mubr.bf16.gmra.mrb[32].mxu1 %v13885_v18  ;;  %v7524_v10 = vmax.f32 %v11671_v8, 0.0  ;;  %v7502_v5 = vmax.f32 %v11779_v0, 0.0 }
 0x4c9   :  { %v7509_v39 = vmax.f32 %v11780_v23, 0.0  ;;  %8888 = vmatmul.mubr.bf16.gmra.mrb[28].mxu0 %v15817_v50  ;;  %6476 = vmatprep.mubr.bf16.mxu1 %v13886_v52  ;;  %v17451_v33 = vpack.c.bf16 %v7523_v34, %v7515_v25 }
 0x4ca   :  { %v7510_v27 = vmax.f32 %v11781_v32, 0.0  ;;  %8897 = vmatprep.mubr.bf16.mxu0 %v15836_v1  ;;  %v5214_v62 = vpop.f32.mrb[184].mxu1  ;;  %v17456_v50 = vpack.c.bf16 %v7524_v10, %v7516_v14 }
 0x4cb   :  { %v17454_v19 = vpack.c.bf16 %v7509_v39, %v7501_v12  ;;  %v11672_v8 = vadd.f32 %v5214_v62, %v16805_v53  ;;  %v5216_v52 = vpop.f32.mrb[185].mxu1 }
 0x4cc   :  { %v17458_v23 = vpack.c.bf16 %v7510_v27, %v7502_v5  ;;  %v6167_v18 = vpop.f32.mrb[180].mxu0  ;;  %v11673_v0 = vadd.f32 %v5216_v52, %v16807_v36  ;;  %v5218_v34 = vpop.f32.mrb[186].mxu1 }
 0x4cd   :  { %19209 = vst [vmem:[#allocation69_spill] sm:$0xff] %v17454_v19  ;;  %v11782_v7 = vadd.f32 %v6167_v18, %v16821_v61  ;;  %v6169_v25 = vpop.f32.mrb[181].mxu0  ;;  %v11674_v32 = vadd.f32 %v5218_v34, %v16805_v53  ;;  %v5220_v39 = vpop.f32.mrb[187].mxu1  ;;  %v7531_v5 = vmax.f32 %v11672_v8, 0.0  ;;  %v13887_v18 = vld [vmem:[%s19060_s0 + $0x2d0] ss:$24 sps:$4 sm:$0xff]  }
 0x4ce   :  { %19210 = vst [vmem:[#allocation70_spill] sm:$0xff] %v17458_v23  ;;  %v11783_v1 = vadd.f32 %v6169_v25, %v16826_v6  ;;  %v6171_v12 = vpop.f32.mrb[182].mxu0  ;;  %v11675_v10 = vadd.f32 %v5220_v39, %v16807_v36  ;;  %v7532_v25 = vmax.f32 %v11673_v0, 0.0 }
 0x4cf   :  { %v11784_v14 = vadd.f32 %v6171_v12, %v16821_v61  ;;  %v6173_v24 = vpop.f32.mrb[183].mxu0  ;;  %v7539_v27 = vmax.f32 %v11674_v32, 0.0  ;;  %v7517_v52 = vmax.f32 %v11782_v7, 0.0  ;;  %v13888_v12 = vld [vmem:[%s19060_s0 + $0x304] ss:$24 sps:$4 sm:$0xff]  }
 0x4d0   :  { %v11785_v62 = vadd.f32 %v6173_v24, %v16826_v6  ;;  %6477 = vmatmul.mubr.bf16.gmra.mrb[36].mxu1 %v13887_v18  ;;  %v7540_v34 = vmax.f32 %v11675_v10, 0.0  ;;  %v7518_v8 = vmax.f32 %v11783_v1, 0.0  ;;  %v17481_v7 = vld [vmem:[%s19059_s1 + $0x818] sm:$0xff] }
 0x4d1   :  { %v7525_v19 = vmax.f32 %v11784_v14, 0.0  ;;  %8898 = vmatmul.mubr.bf16.gmra.mrb[32].mxu0 %v15834_v49  ;;  %6486 = vmatprep.mubr.bf16.mxu1 %v13888_v12  ;;  %v17475_v32 = vpack.c.bf16 %v7539_v27, %v7531_v5  ;;  %v17486_v49 = vld [vmem:[%s19059_s1 + $0x838] sm:$0xff] }
 0x4d2   :  { %v7526_v39 = vmax.f32 %v11785_v62, 0.0  ;;  %8907 = vmatprep.mubr.bf16.mxu0 %v15864_v43  ;;  %v5224_v14 = vpop.f32.mrb[188].mxu1  ;;  %v11078_v10 = vcombine.high %v17481_v7, %v17486_v49  ;;  %v17494_v43 = vpack.c.bf16 %v7540_v34, %v7532_v25 }
 0x4d3   :  { %v17488_v0 = vpack.c.bf16 %v7525_v19, %v7517_v52  ;;  %v11676_v5 = vadd.f32 %v5224_v14, %v16805_v53  ;;  %v5226_v62 = vpop.f32.mrb[189].mxu1 }
 0x4d4   :  { %v17496_v24 = vpack.c.bf16 %v7526_v39, %v7518_v8  ;;  %v6177_v27 = vpop.f32.mrb[184].mxu0  ;;  %v11677_v19 = vadd.f32 %v5226_v62, %v16807_v36  ;;  %v5228_v12 = vpop.f32.mrb[190].mxu1  ;;  %6936 = vmatprep.subr.bf16.mxu1 %v11078_v10  ;;  %v13889_v62 = vld [vmem:[%s19060_s0 + $0x300] ss:$24 sps:$4 sm:$0xff]  }
 0x4d5   :  { %19211 = vst [vmem:[#allocation71_spill] sm:$0xff] %v17488_v0  ;;  %v11786_v18 = vadd.f32 %v6177_v27, %v16821_v61  ;;  %v6179_v52 = vpop.f32.mrb[185].mxu0  ;;  %v11678_v0 = vadd.f32 %v5228_v12, %v16805_v53  ;;  %v5230_v25 = vpop.f32.mrb[191].mxu1  ;;  %v7547_v14 = vmax.f32 %v11676_v5, 0.0 }
 0x4d6   :  { %19212 = vst [vmem:[#allocation72_spill] sm:$0xff] %v17496_v24  ;;  %v11787_v1 = vadd.f32 %v6179_v52, %v16826_v6  ;;  %v6181_v23 = vpop.f32.mrb[186].mxu0  ;;  %v11679_v8 = vadd.f32 %v5230_v25, %v16807_v36  ;;  %v7548_v52 = vmax.f32 %v11677_v19, 0.0 }
 0x4d7   :  { %v11788_v34 = vadd.f32 %v6181_v23, %v16821_v61  ;;  %v6183_v39 = vpop.f32.mrb[187].mxu0  ;;  %v7555_v24 = vmax.f32 %v11678_v0, 0.0  ;;  %v7533_v10 = vmax.f32 %v11786_v18, 0.0  ;;  %v13890_v23 = vld [vmem:[%s19060_s0 + $0x334] ss:$24 sps:$4 sm:$0xff]  }
 0x4d8   :  { %v11789_v27 = vadd.f32 %v6183_v39, %v16826_v6  ;;  %6487 = vmatmul.mubr.bf16.gmra.mrb[40].mxu1 %v13889_v62  ;;  %v7556_v12 = vmax.f32 %v11679_v8, 0.0  ;;  %v7534_v5 = vmax.f32 %v11787_v1, 0.0 }
 0x4d9   :  { %v7541_v26 = vmax.f32 %v11788_v34, 0.0  ;;  %8908 = vmatmul.mubr.bf16.gmra.mrb[36].mxu0 %v15862_v20  ;;  %6496 = vmatprep.mubr.bf16.mxu1 %v13890_v23  ;;  %v17513_v0 = vpack.c.bf16 %v7555_v24, %v7547_v14 }
 0x4da   :  { %v7542_v25 = vmax.f32 %v11789_v27, 0.0  ;;  %8917 = vmatprep.mubr.bf16.mxu0 %v15892_v31  ;;  %v5234_v62 = vpop.f32.mrb[192].mxu1  ;;  %v17518_v18 = vpack.c.bf16 %v7556_v12, %v7548_v52 }
 0x4db   :  { %v17516_v39 = vpack.c.bf16 %v7541_v26, %v7533_v10  ;;  %v11680_v20 = vadd.f32 %v5234_v62, %v16805_v53  ;;  %v5236_v8 = vpop.f32.mrb[193].mxu1 }
 0x4dc   :  { %v17520_v19 = vpack.c.bf16 %v7542_v25, %v7534_v5  ;;  %v6187_v34 = vpop.f32.mrb[188].mxu0  ;;  %v11681_v1 = vadd.f32 %v5236_v8, %v16807_v36  ;;  %v5238_v14 = vpop.f32.mrb[194].mxu1 }
 0x4dd   :  { %19213 = vst [vmem:[#allocation73_spill] sm:$0xff] %v17516_v39  ;;  %v11790_v4 = vadd.f32 %v6187_v34, %v16821_v61  ;;  %v6189_v24 = vpop.f32.mrb[189].mxu0  ;;  %v11682_v31 = vadd.f32 %v5238_v14, %v16805_v53  ;;  %v5240_v10 = vpop.f32.mrb[195].mxu1  ;;  %v7563_v5 = vmax.f32 %v11680_v20, 0.0  ;;  %v13891_v34 = vld [vmem:[%s19060_s0 + $0x330] ss:$24 sps:$4 sm:$0xff]  }
 0x4de   :  { %19214 = vst [vmem:[#allocation74_spill] sm:$0xff] %v17520_v19  ;;  %v11791_v27 = vadd.f32 %v6189_v24, %v16826_v6  ;;  %v6191_v26 = vpop.f32.mrb[190].mxu0  ;;  %v11683_v12 = vadd.f32 %v5240_v10, %v16807_v36  ;;  %v7564_v24 = vmax.f32 %v11681_v1, 0.0 }
 0x4df   :  { %v11792_v52 = vadd.f32 %v6191_v26, %v16821_v61  ;;  %v6193_v23 = vpop.f32.mrb[191].mxu0  ;;  %v7571_v25 = vmax.f32 %v11682_v31, 0.0  ;;  %v7549_v8 = vmax.f32 %v11790_v4, 0.0  ;;  %v13892_v26 = vld [vmem:[%s19060_s0 + $0x364] ss:$24 sps:$4 sm:$0xff]  }
 0x4e0   :  { %v11793_v62 = vadd.f32 %v6193_v23, %v16826_v6  ;;  %6497 = vmatmul.mubr.bf16.gmra.mrb[44].mxu1 %v13891_v34  ;;  %v7572_v14 = vmax.f32 %v11683_v12, 0.0  ;;  %v7550_v20 = vmax.f32 %v11791_v27, 0.0 }
 0x4e1   :  { %v7557_v39 = vmax.f32 %v11792_v52, 0.0  ;;  %8918 = vmatmul.mubr.bf16.gmra.mrb[40].mxu0 %v15890_v40  ;;  %6506 = vmatprep.mubr.bf16.mxu1 %v13892_v26  ;;  %v17537_v31 = vpack.c.bf16 %v7571_v25, %v7563_v5 }
 0x4e2   :  { %v7558_v10 = vmax.f32 %v11793_v62, 0.0  ;;  %8927 = vmatprep.mubr.bf16.mxu0 %v15906_v48  ;;  %v5244_v34 = vpop.f32.mrb[196].mxu1  ;;  %v17542_v4 = vpack.c.bf16 %v7572_v14, %v7564_v24 }
 0x4e3   :  { %v17540_v23 = vpack.c.bf16 %v7557_v39, %v7549_v8  ;;  %v11684_v40 = vadd.f32 %v5244_v34, %v16805_v53  ;;  %v5246_v12 = vpop.f32.mrb[197].mxu1 }
 0x4e4   :  { %v17544_v1 = vpack.c.bf16 %v7558_v10, %v7550_v20  ;;  %v6197_v52 = vpop.f32.mrb[192].mxu0  ;;  %v11685_v27 = vadd.f32 %v5246_v12, %v16807_v36  ;;  %v5248_v25 = vpop.f32.mrb[198].mxu1 }
 0x4e5   :  { %19215 = vst [vmem:[#allocation75_spill] sm:$0xff] %v17540_v23  ;;  %v11794_v19 = vadd.f32 %v6197_v52, %v16821_v61  ;;  %v6199_v5 = vpop.f32.mrb[193].mxu0  ;;  %v11686_v48 = vadd.f32 %v5248_v25, %v16805_v53  ;;  %v5250_v8 = vpop.f32.mrb[199].mxu1  ;;  %v7579_v20 = vmax.f32 %v11684_v40, 0.0  ;;  %v13893_v52 = vld [vmem:[%s19060_s0 + $0x360] ss:$24 sps:$4 sm:$0xff]  }
 0x4e6   :  { %19216 = vst [vmem:[#allocation76_spill] sm:$0xff] %v17544_v1  ;;  %v11795_v62 = vadd.f32 %v6199_v5, %v16826_v6  ;;  %v6201_v39 = vpop.f32.mrb[194].mxu0  ;;  %v11687_v14 = vadd.f32 %v5250_v8, %v16807_v36  ;;  %v7580_v5 = vmax.f32 %v11685_v27, 0.0  ;;  %v19217_v1 = vld [vmem:[#allocation4_spill] sm:$0xff] }
 0x4e7   :  { %v11796_v24 = vadd.f32 %v6201_v39, %v16821_v61  ;;  %v6203_v26 = vpop.f32.mrb[195].mxu0  ;;  %v7587_v10 = vmax.f32 %v11686_v48, 0.0  ;;  %v7565_v12 = vmax.f32 %v11794_v19, 0.0  ;;  %v13894_v39 = vld [vmem:[%s19060_s0 + $0x394] ss:$24 sps:$4 sm:$0xff]  }
 0x4e8   :  { %v11797_v34 = vadd.f32 %v6203_v26, %v16826_v6  ;;  %6507 = vmatmul.mubr.bf16.gmra.mrb[48].mxu1 %v13893_v52  ;;  %v7588_v25 = vmax.f32 %v11687_v14, 0.0  ;;  %v7566_v40 = vmax.f32 %v11795_v62, 0.0  ;;  %v19218_v26 = vld [vmem:[#allocation6_spill] sm:$0xff] }
 0x4e9   :  { %v7573_v23 = vmax.f32 %v11796_v24, 0.0  ;;  %8928 = vmatmul.mubr.bf16.gmra.mrb[44].mxu0 %v19217_v1  ;;  %6516 = vmatprep.mubr.bf16.mxu1 %v13894_v39  ;;  %v17561_v48 = vpack.c.bf16 %v7587_v10, %v7579_v20 }
 0x4ea   :  { %v7574_v8 = vmax.f32 %v11797_v34, 0.0  ;;  %8937 = vmatprep.mubr.bf16.mxu0 %v19218_v26  ;;  %v5254_v52 = vpop.f32.mrb[200].mxu1  ;;  %v17566_v19 = vpack.c.bf16 %v7588_v25, %v7580_v5 }
 0x4eb   :  { %v17564_v47 = vpack.c.bf16 %v7573_v23, %v7565_v12  ;;  %v11688_v1 = vadd.f32 %v5254_v52, %v16805_v53  ;;  %v5256_v14 = vpop.f32.mrb[201].mxu1 }
 0x4ec   :  { %v17568_v27 = vpack.c.bf16 %v7574_v8, %v7566_v40  ;;  %v6207_v24 = vpop.f32.mrb[196].mxu0  ;;  %v11689_v62 = vadd.f32 %v5256_v14, %v16807_v36  ;;  %v5258_v10 = vpop.f32.mrb[202].mxu1 }
 0x4ed   :  { %19219 = vst [vmem:[#allocation4_spill] sm:$0xff] %v17564_v47  ;;  %v11798_v60 = vadd.f32 %v6207_v24, %v16821_v61  ;;  %v6209_v20 = vpop.f32.mrb[197].mxu0  ;;  %v11690_v23 = vadd.f32 %v5258_v10, %v16805_v53  ;;  %v5260_v39 = vpop.f32.mrb[203].mxu1  ;;  %v7595_v8 = vmax.f32 %v11688_v1, 0.0  ;;  %v13895_v24 = vld [vmem:[%s19060_s0 + $0x390] ss:$24 sps:$4 sm:$0xff]  }
 0x4ee   :  { %19220 = vst [vmem:[#allocation6_spill] sm:$0xff] %v17568_v27  ;;  %v11799_v34 = vadd.f32 %v6209_v20, %v16826_v6  ;;  %v6211_v12 = vpop.f32.mrb[198].mxu0  ;;  %v11691_v25 = vadd.f32 %v5260_v39, %v16807_v36  ;;  %v7596_v20 = vmax.f32 %v11689_v62, 0.0  ;;  %v19221_v27 = vld [vmem:[#allocation5_spill] sm:$0xff] }
 0x4ef   :  { %v11800_v5 = vadd.f32 %v6211_v12, %v16821_v61  ;;  %v6213_v40 = vpop.f32.mrb[199].mxu0  ;;  %v7603_v26 = vmax.f32 %v11690_v23, 0.0  ;;  %v7581_v14 = vmax.f32 %v11798_v60, 0.0  ;;  %v13896_v12 = vld [vmem:[%s19060_s0 + $0x3c4] ss:$24 sps:$4 sm:$0xff]  }
 0x4f0   :  { %v11801_v52 = vadd.f32 %v6213_v40, %v16826_v6  ;;  %6517 = vmatmul.mubr.bf16.gmra.mrb[52].mxu1 %v13895_v24  ;;  %v7604_v10 = vmax.f32 %v11691_v25, 0.0  ;;  %v7582_v1 = vmax.f32 %v11799_v34, 0.0  ;;  %v19223_v40 = vld [vmem:[#allocation8_spill] sm:$0xff] }
 0x4f1   :  { %v7589_v47 = vmax.f32 %v11800_v5, 0.0  ;;  %8938 = vmatmul.mubr.bf16.gmra.mrb[48].mxu0 %v19221_v27  ;;  %6526 = vmatprep.mubr.bf16.mxu1 %v13896_v12  ;;  %v17585_v23 = vpack.c.bf16 %v7603_v26, %v7595_v8 }
 0x4f2   :  { %v7590_v39 = vmax.f32 %v11801_v52, 0.0  ;;  %8947 = vmatprep.mubr.bf16.mxu0 %v19223_v40  ;;  %v5264_v24 = vpop.f32.mrb[204].mxu1  ;;  %v17590_v60 = vpack.c.bf16 %v7604_v10, %v7596_v20 }
 0x4f3   :  { %19222 = vst [vmem:[#allocation5_spill] sm:$0xff] %v17585_v23  ;;  %v17588_v54 = vpack.c.bf16 %v7589_v47, %v7581_v14  ;;  %v11692_v27 = vadd.f32 %v5264_v24, %v16805_v53  ;;  %v5266_v25 = vpop.f32.mrb[205].mxu1 }
 0x4f4   :  { %v17592_v62 = vpack.c.bf16 %v7590_v39, %v7582_v1  ;;  %v6217_v5 = vpop.f32.mrb[200].mxu0  ;;  %v11693_v34 = vadd.f32 %v5266_v25, %v16807_v36  ;;  %v5268_v26 = vpop.f32.mrb[206].mxu1 }
 0x4f5   :  { %19224 = vst [vmem:[#allocation8_spill] sm:$0xff] %v17588_v54  ;;  %v11802_v44 = vadd.f32 %v6217_v5, %v16821_v61  ;;  %v6219_v8 = vpop.f32.mrb[201].mxu0  ;;  %v11694_v47 = vadd.f32 %v5268_v26, %v16805_v53  ;;  %v5270_v12 = vpop.f32.mrb[207].mxu1  ;;  %v7611_v39 = vmax.f32 %v11692_v27, 0.0  ;;  %v13897_v5 = vld [vmem:[%s19060_s0 + $0x3c0] ss:$24 sps:$4 sm:$0xff]  }
 0x4f6   :  { %19225 = vst [vmem:[#allocation77_spill] sm:$0xff] %v17592_v62  ;;  %v11803_v52 = vadd.f32 %v6219_v8, %v16826_v6  ;;  %v6221_v14 = vpop.f32.mrb[202].mxu0  ;;  %v11695_v10 = vadd.f32 %v5270_v12, %v16807_v36  ;;  %v7612_v8 = vmax.f32 %v11693_v34, 0.0  ;;  %v19226_v62 = vld [vmem:[#allocation7_spill] sm:$0xff] }
 0x4f7   :  { %v11804_v20 = vadd.f32 %v6221_v14, %v16821_v61  ;;  %v6223_v1 = vpop.f32.mrb[203].mxu0  ;;  %v7619_v40 = vmax.f32 %v11694_v47, 0.0  ;;  %v7597_v25 = vmax.f32 %v11802_v44, 0.0  ;;  %v13898_v14 = vld [vmem:[%s19060_s0 + $0x3f4] ss:$24 sps:$4 sm:$0xff]  }
 0x4f8   :  { %v11805_v24 = vadd.f32 %v6223_v1, %v16826_v6  ;;  %6527 = vmatmul.mubr.bf16.gmra.mrb[56].mxu1 %v13897_v5  ;;  %v7620_v26 = vmax.f32 %v11695_v10, 0.0  ;;  %v7598_v27 = vmax.f32 %v11803_v52, 0.0  ;;  %v19228_v1 = vld [vmem:[#allocation10_spill] sm:$0xff] }
 0x4f9   :  { %v7605_v54 = vmax.f32 %v11804_v20, 0.0  ;;  %8948 = vmatmul.mubr.bf16.gmra.mrb[52].mxu0 %v19226_v62  ;;  %6536 = vmatprep.mubr.bf16.mxu1 %v13898_v14  ;;  %v17609_v47 = vpack.c.bf16 %v7619_v40, %v7611_v39 }
 0x4fa   :  { %v7606_v12 = vmax.f32 %v11805_v24, 0.0  ;;  %8957 = vmatprep.mubr.bf16.mxu0 %v19228_v1  ;;  %v5274_v5 = vpop.f32.mrb[208].mxu1  ;;  %v17614_v44 = vpack.c.bf16 %v7620_v26, %v7612_v8 }
 0x4fb   :  { %19227 = vst [vmem:[#allocation7_spill] sm:$0xff] %v17609_v47  ;;  %v17612_v29 = vpack.c.bf16 %v7605_v54, %v7597_v25  ;;  %v11696_v62 = vadd.f32 %v5274_v5, %v16805_v53  ;;  %v5276_v10 = vpop.f32.mrb[209].mxu1 }
 0x4fc   :  { %19230 = vst [vmem:[#allocation78_spill] sm:$0xff] %v17614_v44  ;;  %v17616_v34 = vpack.c.bf16 %v7606_v12, %v7598_v27  ;;  %v6227_v20 = vpop.f32.mrb[204].mxu0  ;;  %v11697_v52 = vadd.f32 %v5276_v10, %v16807_v36  ;;  %v5278_v40 = vpop.f32.mrb[210].mxu1 }
 0x4fd   :  { %19229 = vst [vmem:[#allocation10_spill] sm:$0xff] %v17612_v29  ;;  %v11806_v23 = vadd.f32 %v6227_v20, %v16821_v61  ;;  %v6229_v39 = vpop.f32.mrb[205].mxu0  ;;  %v11698_v54 = vadd.f32 %v5278_v40, %v16805_v53  ;;  %v5280_v14 = vpop.f32.mrb[211].mxu1  ;;  %v7627_v12 = vmax.f32 %v11696_v62, 0.0  ;;  %v13899_v20 = vld [vmem:[%s19060_s0 + $0x3f0] ss:$24 sps:$4 sm:$0xff]  }
 0x4fe   :  { %19231 = vst [vmem:[#allocation79_spill] sm:$0xff] %v17616_v34  ;;  %v11807_v24 = vadd.f32 %v6229_v39, %v16826_v6  ;;  %v6231_v25 = vpop.f32.mrb[206].mxu0  ;;  %v11699_v26 = vadd.f32 %v5280_v14, %v16807_v36  ;;  %v7628_v39 = vmax.f32 %v11697_v52, 0.0  ;;  %v19232_v34 = vld [vmem:[#allocation9_spill] sm:$0xff] }
 0x4ff   :  { %v11808_v8 = vadd.f32 %v6231_v25, %v16821_v61  ;;  %v6233_v27 = vpop.f32.mrb[207].mxu0  ;;  %v7635_v1 = vmax.f32 %v11698_v54, 0.0  ;;  %v7613_v10 = vmax.f32 %v11806_v23, 0.0  ;;  %v13900_v25 = vld [vmem:[%s19060_s0 + $0x424] ss:$24 sps:$4 sm:$0xff]  }
 0x500   :  { %v11809_v5 = vadd.f32 %v6233_v27, %v16826_v6  ;;  %6537 = vmatmul.mubr.bf16.gmra.mrb[60].mxu1 %v13899_v20  ;;  %v7636_v40 = vmax.f32 %v11699_v26, 0.0  ;;  %v7614_v62 = vmax.f32 %v11807_v24, 0.0  ;;  %v19234_v27 = vld [vmem:[#allocation12_spill] sm:$0xff] }
 0x501   :  { %v7621_v29 = vmax.f32 %v11808_v8, 0.0  ;;  %8958 = vmatmul.mubr.bf16.gmra.mrb[56].mxu0 %v19232_v34  ;;  %6546 = vmatprep.mubr.bf16.mxu1 %v13900_v25  ;;  %v17633_v54 = vpack.c.bf16 %v7635_v1, %v7627_v12 }
 0x502   :  { %v7622_v14 = vmax.f32 %v11809_v5, 0.0  ;;  %8967 = vmatprep.mubr.bf16.mxu0 %v19234_v27  ;;  %v17638_v20 = vpack.c.bf16 %v7636_v40, %v7628_v39  ;;  %v5284_v23 = vpop.f32.mrb[212].mxu1 }
 0x503   :  { %19233 = vst [vmem:[#allocation9_spill] sm:$0xff] %v17633_v54  ;;  %v17636_v47 = vpack.c.bf16 %v7621_v29, %v7613_v10  ;;  %v11700_v34 = vadd.f32 %v5284_v23, %v16805_v53  ;;  %v5286_v26 = vpop.f32.mrb[213].mxu1 }
 0x504   :  { %19236 = vst [vmem:[#allocation80_spill] sm:$0xff] %v17638_v20  ;;  %v17640_v52 = vpack.c.bf16 %v7622_v14, %v7614_v62  ;;  %v6237_v8 = vpop.f32.mrb[208].mxu0  ;;  %v11701_v24 = vadd.f32 %v5286_v26, %v16807_v36  ;;  %v5288_v1 = vpop.f32.mrb[214].mxu1 }
 0x505   :  { %19235 = vst [vmem:[#allocation12_spill] sm:$0xff] %v17636_v47  ;;  %v11810_v44 = vadd.f32 %v6237_v8, %v16821_v61  ;;  %v6239_v12 = vpop.f32.mrb[209].mxu0  ;;  %v11702_v29 = vadd.f32 %v5288_v1, %v16805_v53  ;;  %v5290_v39 = vpop.f32.mrb[215].mxu1  ;;  %v7643_v14 = vmax.f32 %v11700_v34, 0.0  ;;  %v13901_v8 = vld [vmem:[%s19060_s0 + $0x420] ss:$24 sps:$4 sm:$0xff]  }
 0x506   :  { %19237 = vst [vmem:[#allocation81_spill] sm:$0xff] %v17640_v52  ;;  %v11811_v5 = vadd.f32 %v6239_v12, %v16826_v6  ;;  %v6241_v10 = vpop.f32.mrb[210].mxu0  ;;  %v11703_v25 = vadd.f32 %v5290_v39, %v16807_v36  ;;  %v7644_v12 = vmax.f32 %v11701_v24, 0.0  ;;  %v19238_v52 = vld [vmem:[#allocation11_spill] sm:$0xff] }
 0x507   :  { %v11812_v40 = vadd.f32 %v6241_v10, %v16821_v61  ;;  %v6243_v62 = vpop.f32.mrb[211].mxu0  ;;  %v7651_v27 = vmax.f32 %v11702_v29, 0.0  ;;  %v7629_v26 = vmax.f32 %v11810_v44, 0.0  ;;  %v13902_v10 = vld [vmem:[%s19060_s0 + $0x454] ss:$24 sps:$4 sm:$0xff]  }
 0x508   :  { %v11813_v23 = vadd.f32 %v6243_v62, %v16826_v6  ;;  %6547 = vmatmul.mubr.bf16.gmra.mrb[64].mxu1 %v13901_v8  ;;  %v7652_v1 = vmax.f32 %v11703_v25, 0.0  ;;  %v7630_v34 = vmax.f32 %v11811_v5, 0.0  ;;  %v19240_v62 = vld [vmem:[#allocation14_spill] sm:$0xff] }
 0x509   :  { %v7637_v47 = vmax.f32 %v11812_v40, 0.0  ;;  %8968 = vmatmul.mubr.bf16.gmra.mrb[60].mxu0 %v19238_v52  ;;  %6556 = vmatprep.mubr.bf16.mxu1 %v13902_v10  ;;  %v17657_v29 = vpack.c.bf16 %v7651_v27, %v7643_v14 }
 0x50a   :  { %v7638_v39 = vmax.f32 %v11813_v23, 0.0  ;;  %8977 = vmatprep.mubr.bf16.mxu0 %v19240_v62  ;;  %v17662_v8 = vpack.c.bf16 %v7652_v1, %v7644_v12  ;;  %v5294_v44 = vpop.f32.mrb[216].mxu1 }
 0x50b   :  { %19239 = vst [vmem:[#allocation11_spill] sm:$0xff] %v17657_v29  ;;  %v17660_v54 = vpack.c.bf16 %v7637_v47, %v7629_v26  ;;  %v11704_v52 = vadd.f32 %v5294_v44, %v16805_v53  ;;  %v5296_v25 = vpop.f32.mrb[217].mxu1 }
 0x50c   :  { %19242 = vst [vmem:[#allocation82_spill] sm:$0xff] %v17662_v8  ;;  %v17664_v24 = vpack.c.bf16 %v7638_v39, %v7630_v34  ;;  %v6247_v40 = vpop.f32.mrb[212].mxu0  ;;  %v11705_v5 = vadd.f32 %v5296_v25, %v16807_v36  ;;  %v5298_v27 = vpop.f32.mrb[218].mxu1 }
 0x50d   :  { %19241 = vst [vmem:[#allocation14_spill] sm:$0xff] %v17660_v54  ;;  %v11814_v20 = vadd.f32 %v6247_v40, %v16821_v61  ;;  %v6249_v14 = vpop.f32.mrb[213].mxu0  ;;  %v11706_v47 = vadd.f32 %v5298_v27, %v16805_v53  ;;  %v5300_v12 = vpop.f32.mrb[219].mxu1  ;;  %v7659_v39 = vmax.f32 %v11704_v52, 0.0  ;;  %v13903_v40 = vld [vmem:[%s19060_s0 + $0x450] ss:$24 sps:$4 sm:$0xff]  }
 0x50e   :  { %19243 = vst [vmem:[#allocation83_spill] sm:$0xff] %v17664_v24  ;;  %v11815_v23 = vadd.f32 %v6249_v14, %v16826_v6  ;;  %v6251_v26 = vpop.f32.mrb[214].mxu0  ;;  %v11707_v10 = vadd.f32 %v5300_v12, %v16807_v36  ;;  %v7660_v14 = vmax.f32 %v11705_v5, 0.0  ;;  %v19244_v24 = vld [vmem:[#allocation13_spill] sm:$0xff] }
 0x50f   :  { %v11816_v1 = vadd.f32 %v6251_v26, %v16821_v61  ;;  %v6253_v34 = vpop.f32.mrb[215].mxu0  ;;  %v7667_v62 = vmax.f32 %v11706_v47, 0.0  ;;  %v7645_v25 = vmax.f32 %v11814_v20, 0.0  ;;  %v13904_v26 = vld [vmem:[%s19060_s0 + $0x484] ss:$24 sps:$4 sm:$0xff]  }
 0x510   :  { %v11817_v44 = vadd.f32 %v6253_v34, %v16826_v6  ;;  %6557 = vmatmul.mubr.bf16.gmra.mrb[68].mxu1 %v13903_v40  ;;  %v7668_v27 = vmax.f32 %v11707_v10, 0.0  ;;  %v7646_v52 = vmax.f32 %v11815_v23, 0.0  ;;  %v19246_v34 = vld [vmem:[#allocation16_spill] sm:$0xff] }
 0x511   :  { %v7653_v54 = vmax.f32 %v11816_v1, 0.0  ;;  %8978 = vmatmul.mubr.bf16.gmra.mrb[64].mxu0 %v19244_v24  ;;  %6566 = vmatprep.mubr.bf16.mxu1 %v13904_v26  ;;  %v17681_v47 = vpack.c.bf16 %v7667_v62, %v7659_v39 }
 0x512   :  { %v7654_v12 = vmax.f32 %v11817_v44, 0.0  ;;  %8987 = vmatprep.mubr.bf16.mxu0 %v19246_v34  ;;  %v17686_v40 = vpack.c.bf16 %v7668_v27, %v7660_v14  ;;  %v5304_v20 = vpop.f32.mrb[220].mxu1 }
 0x513   :  { %19245 = vst [vmem:[#allocation13_spill] sm:$0xff] %v17681_v47  ;;  %v17684_v29 = vpack.c.bf16 %v7653_v54, %v7645_v25  ;;  %v11708_v24 = vadd.f32 %v5304_v20, %v16805_v53  ;;  %v5306_v10 = vpop.f32.mrb[221].mxu1 }
 0x514   :  { %19248 = vst [vmem:[#allocation84_spill] sm:$0xff] %v17686_v40  ;;  %v17688_v5 = vpack.c.bf16 %v7654_v12, %v7646_v52  ;;  %v6257_v1 = vpop.f32.mrb[216].mxu0  ;;  %v11709_v23 = vadd.f32 %v5306_v10, %v16807_v36  ;;  %v5308_v62 = vpop.f32.mrb[222].mxu1 }
 0x515   :  { %19247 = vst [vmem:[#allocation16_spill] sm:$0xff] %v17684_v29  ;;  %v11818_v8 = vadd.f32 %v6257_v1, %v16821_v61  ;;  %v6259_v39 = vpop.f32.mrb[217].mxu0  ;;  %v11710_v54 = vadd.f32 %v5308_v62, %v16805_v53  ;;  %v5310_v14 = vpop.f32.mrb[223].mxu1  ;;  %v7675_v12 = vmax.f32 %v11708_v24, 0.0  ;;  %v13905_v1 = vld [vmem:[%s19060_s0 + $0x480] ss:$24 sps:$4 sm:$0xff]  }
 0x516   :  { %19249 = vst [vmem:[#allocation85_spill] sm:$0xff] %v17688_v5  ;;  %v11819_v44 = vadd.f32 %v6259_v39, %v16826_v6  ;;  %v6261_v25 = vpop.f32.mrb[218].mxu0  ;;  %v11711_v26 = vadd.f32 %v5310_v14, %v16807_v36  ;;  %v7676_v39 = vmax.f32 %v11709_v23, 0.0  ;;  %v19250_v5 = vld [vmem:[#allocation15_spill] sm:$0xff] }
 0x517   :  { %v11820_v27 = vadd.f32 %v6261_v25, %v16821_v61  ;;  %v6263_v52 = vpop.f32.mrb[219].mxu0  ;;  %v7683_v34 = vmax.f32 %v11710_v54, 0.0  ;;  %v7661_v10 = vmax.f32 %v11818_v8, 0.0  ;;  %v13906_v25 = vld [vmem:[%s19060_s0 + $0x4b4] ss:$24 sps:$4 sm:$0xff]  }
 0x518   :  { %v11821_v20 = vadd.f32 %v6263_v52, %v16826_v6  ;;  %6567 = vmatmul.mubr.bf16.gmra.mrb[72].mxu1 %v13905_v1  ;;  %v7684_v62 = vmax.f32 %v11711_v26, 0.0  ;;  %v7662_v24 = vmax.f32 %v11819_v44, 0.0  ;;  %v19251_v52 = vld [vmem:[#allocation18_spill] sm:$0xff] }
 0x519   :  { %v7669_v29 = vmax.f32 %v11820_v27, 0.0  ;;  %8988 = vmatmul.mubr.bf16.gmra.mrb[68].mxu0 %v19250_v5  ;;  %6576 = vmatprep.mubr.bf16.mxu1 %v13906_v25  ;;  %v17705_v54 = vpack.c.bf16 %v7683_v34, %v7675_v12 }
 0x51a   :  { %v7670_v14 = vmax.f32 %v11821_v20, 0.0  ;;  %8997 = vmatprep.mubr.bf16.mxu0 %v19251_v52  ;;  %v17710_v1 = vpack.c.bf16 %v7684_v62, %v7676_v39  ;;  %v5314_v8 = vpop.f32.mrb[224].mxu1 }
 0x51b   :  { %v17708_v47 = vpack.c.bf16 %v7669_v29, %v7661_v10  ;;  %v11712_v5 = vadd.f32 %v5314_v8, %v16805_v53  ;;  %v5316_v26 = vpop.f32.mrb[225].mxu1 }
 0x51c   :  { %v17712_v23 = vpack.c.bf16 %v7670_v14, %v7662_v24  ;;  %v6267_v27 = vpop.f32.mrb[220].mxu0  ;;  %v11713_v44 = vadd.f32 %v5316_v26, %v16807_v36  ;;  %v5318_v34 = vpop.f32.mrb[226].mxu1 }
 0x51d   :  { %19252 = vst [vmem:[#allocation15_spill] sm:$0xff] %v17708_v47  ;;  %v11822_v40 = vadd.f32 %v6267_v27, %v16821_v61  ;;  %v6269_v12 = vpop.f32.mrb[221].mxu0  ;;  %v11714_v29 = vadd.f32 %v5318_v34, %v16805_v53  ;;  %v5320_v39 = vpop.f32.mrb[227].mxu1  ;;  %v7691_v14 = vmax.f32 %v11712_v5, 0.0  ;;  %v13907_v27 = vld [vmem:[%s19060_s0 + $0x4b0] ss:$24 sps:$4 sm:$0xff]  }
 0x51e   :  { %19253 = vst [vmem:[#allocation18_spill] sm:$0xff] %v17712_v23  ;;  %v11823_v20 = vadd.f32 %v6269_v12, %v16826_v6  ;;  %v6271_v10 = vpop.f32.mrb[222].mxu0  ;;  %v11715_v25 = vadd.f32 %v5320_v39, %v16807_v36  ;;  %v7692_v12 = vmax.f32 %v11713_v44, 0.0  ;;  %v19254_v23 = vld [vmem:[#allocation17_spill] sm:$0xff] }
 0x51f   :  { %v11824_v62 = vadd.f32 %v6271_v10, %v16821_v61  ;;  %v6273_v24 = vpop.f32.mrb[223].mxu0  ;;  %v7699_v52 = vmax.f32 %v11714_v29, 0.0  ;;  %v7677_v26 = vmax.f32 %v11822_v40, 0.0  ;;  %v13908_v10 = vld [vmem:[%s19060_s0 + $0x4e4] ss:$24 sps:$4 sm:$0xff]  }
 0x520   :  { %v11825_v8 = vadd.f32 %v6273_v24, %v16826_v6  ;;  %6577 = vmatmul.mubr.bf16.gmra.mrb[76].mxu1 %v13907_v27  ;;  %v7700_v34 = vmax.f32 %v11715_v25, 0.0  ;;  %v7678_v5 = vmax.f32 %v11823_v20, 0.0  ;;  %v19255_v24 = vld [vmem:[#allocation21_spill] sm:$0xff] }
 0x521   :  { %v7685_v47 = vmax.f32 %v11824_v62, 0.0  ;;  %8998 = vmatmul.mubr.bf16.gmra.mrb[72].mxu0 %v19254_v23  ;;  %6586 = vmatprep.mubr.bf16.mxu1 %v13908_v10  ;;  %v17729_v29 = vpack.c.bf16 %v7699_v52, %v7691_v14 }
 0x522   :  { %v7686_v39 = vmax.f32 %v11825_v8, 0.0  ;;  %9007 = vmatprep.mubr.bf16.mxu0 %v19255_v24  ;;  %v17734_v27 = vpack.c.bf16 %v7700_v34, %v7692_v12  ;;  %v17736_v40 = vpop.f32.mrb[228].mxu1  ;;  %v13909_v34 = vld [vmem:[%s19060_s0 + $0x4e0] ss:$24 sps:$4 sm:$0xff]   ;;  %v19256_v24 = vld [vmem:[#allocation20_spill] sm:$0xff] }
 0x523   :  { %v17732_v53 = vpack.c.bf16 %v7685_v47, %v7677_v26  ;;  %v17740_v62 = vpop.f32.mrb[229].mxu1 }
 0x524   :  { %v17738_v44 = vpack.c.bf16 %v7686_v39, %v7678_v5  ;;  %v6277_v23 = vpop.f32.mrb[224].mxu0  ;;  %v5328_v20 = vpop.f32.mrb[230].mxu1 }
 0x525   :  { %v11826_v25 = vadd.f32 %v6277_v23, %v16821_v61  ;;  %v6279_v10 = vpop.f32.mrb[225].mxu0  ;;  %v5329_v8 = vpop.f32.mrb[231].mxu1  ;;  %v13910_v23 = vld [vmem:[%s19060_s0 + $0x514] ss:$24 sps:$4 sm:$0xff]  }
 0x526   :  { %v11827_v14 = vadd.f32 %v6279_v10, %v16826_v6  ;;  %v6281_v52 = vpop.f32.mrb[226].mxu0 }
 0x527   :  { %v11828_v47 = vadd.f32 %v6281_v52, %v16821_v61  ;;  %v6283_v26 = vpop.f32.mrb[227].mxu0  ;;  %v7693_v5 = vmax.f32 %v11826_v25, 0.0 }
 0x528   :  { %v11829_v12 = vadd.f32 %v6283_v26, %v16826_v6  ;;  %6587 = vmatmul.mubr.bf16.gmra.mrb[80].mxu1 %v13909_v34  ;;  %v7694_v10 = vmax.f32 %v11827_v14, 0.0 }
 0x529   :  { %v7701_v39 = vmax.f32 %v11828_v47, 0.0  ;;  %9008 = vmatmul.mubr.bf16.gmra.mrb[76].mxu0 %v19256_v24  ;;  %6596 = vmatprep.mubr.bf16.mxu1 %v13910_v23  ;;  %v13911_v24 = vld [vmem:[%s19060_s0 + $0x510] ss:$24 sps:$4 sm:$0xff]  }
 0x52a   :  { %v7702_v20 = vmax.f32 %v11829_v12, 0.0  ;;  %9017 = vmatprep.mubr.bf16.mxu0 %v16032_v13  ;;  %v19257_v23 = vld [vmem:[#allocation23_spill] sm:$0xff]  ;;  %v19258_v13 = vld [vmem:[#allocation33_spill] sm:$0xff] }
 0x52b   :  { %v17754_v52 = vpack.c.bf16 %v7701_v39, %v7693_v5  ;;  %v7706_v14 = vmax.f32 %v19258_v13, 0.0  ;;  %v19259_v5 = vld [vmem:[#allocation3_spill] sm:$0xff]  ;;  %v19260_v39 = vld [vmem:[#allocation24_spill] sm:$0xff]  ;;  %v473_v13 = vld [vmem:[%s19059_s1 + $0x898] sm:$0xff] }
 0x52c   :  { %v17756_v8 = vpack.c.bf16 %v7702_v20, %v7694_v10  ;;  %v17758_v26 = vpop.f32.mrb[228].mxu0  ;;  %v13912_v10 = vld [vmem:[%s19060_s0 + $0xc] ss:$24 sps:$4 sm:$0xff]   ;;  %v19261_v20 = vld [vmem:[#allocation32_spill] sm:$0xff] }
 0x52d   :  { %v17760_v34 = vpop.f32.mrb[229].mxu0  ;;  %v7938_v12 = vpack.c.bf16 %v7706_v14, %v7706_v14  ;;  %v477_v14 = vld [vmem:[%s19059_s1 + $0x8b8] sm:$0xff] }
 0x52e   :  { %v6291_v25 = vpop.f32.mrb[230].mxu0 }
 0x52f   :  { %v6292_v47 = vpop.f32.mrb[231].mxu0  ;;  %v7705_v25 = vmax.f32 %v19261_v20, 0.0  ;;  %v11094_v20 = vcombine.high %v473_v13, %v477_v14 }
 0x530   :  { %6597 = vmatmul.mubr.bf16.gmra.mrb[84].mxu1 %v13911_v24 }
 0x531   :  { %9018 = vmatmul.mubr.bf16.gmra.mrb[80].mxu0 %v19257_v23  ;;  %6606 = vmatprep.mubr.bf16.mxu1 %v19157_v45  ;;  %v465_v45 = vld [vmem:[%s19059_s1 + $0x858] sm:$0xff]  ;;  %v7937_v47 = vpack.c.bf16 %v7705_v25, %v7705_v25  ;;  %v13913_v23 = vld [vmem:[%s19060_s0 + $0x8] ss:$24 sps:$4 sm:$0xff]  }
 0x532   :  { %9027 = vmatprep.mubr.bf16.mxu0 %v16046_v3  ;;  %v469_v3 = vld [vmem:[%s19059_s1 + $0x878] sm:$0xff] }
 0x533   :  { %v11086_v24 = vcombine.high %v465_v45, %v469_v3  ;;  %v481_v25 = vld [vmem:[%s19059_s1 + $0x8d8] sm:$0xff] }
 0x538   :  { %6607 = vmatmul.mubr.bf16.gmra.mrb[88].mxu1 %v19259_v5  ;;  %v19262_v5 = vld [vmem:[#allocation35_spill] sm:$0xff] }
 0x539   :  { %9028 = vmatmul.mubr.bf16.gmra.mrb[84].mxu0 %v19260_v39  ;;  %6647 = vmatprep.mubr.bf16.mxu1 %v13912_v10  ;;  %v19263_v39 = vcombine.low %v17481_v7, %v17486_v49  ;;  %v11085_v10 = vcombine.low %v465_v45, %v469_v3  ;;  %v13580_v7 = vld [vmem:[%s19062_s3 + $0x214] ss:$8 sps:$4 sm:$0xff]   ;;  %v11093_v49 = vcombine.low %v473_v13, %v477_v14  ;;  %v13915_v45 = vld [vmem:[%s19060_s0 + $0x38] ss:$24 sps:$4 sm:$0xff]   ;;  %v19265_v14 = vld [vmem:[#allocation38_spill] sm:$0xff] }
 0x53a   :  { %9037 = vmatprep.mubr.bf16.mxu0 %v7938_v12  ;;  %v13914_v12 = vld [vmem:[%s19060_s0 + $0x3c] ss:$24 sps:$4 sm:$0xff]  }
 0x53b   :  { %v493_v13 = vld [vmem:[%s19059_s1 + $0x938] sm:$0xff] }
 0x540   :  { %6648 = vmatmul.mubr.bf16.vlgmr.msra.gmra.mrb[232].mxu1 %v13913_v23  ;;  %v13575_v23 = vld [vmem:[%s19062_s3 + $0x200] ss:$8 sps:$4 sm:$0xff]  }
 0x541   :  { %9038 = vmatmul.mubr.bf16.gmra.mrb[88].mxu0 %v7937_v47  ;;  %6657 = vmatprep.mubr.bf16.mxu1 %v13914_v12  ;;  %v485_v47 = vld [vmem:[%s19059_s1 + $0x8f8] sm:$0xff]  ;;  %v13916_v12 = vld [vmem:[%s19060_s0 + $0x6c] ss:$24 sps:$4 sm:$0xff]  }
 0x542   :  { %9078 = vmatprep.mubr.bf16.mxu0 %v19262_v5  ;;  %6937 = vmatpush1.bf16.msra.mxu1 %v19263_v39  ;;  %v11102_v3 = vcombine.high %v481_v25, %v485_v47  ;;  %v489_v5 = vld [vmem:[%s19059_s1 + $0x918] sm:$0xff] }
 0x543   :  { %6938 = vmatprep.subr.bf16.mxu1 %v11086_v24  ;;  %v19264_v24 = vld [vmem:[#allocation34_spill] sm:$0xff]  ;;  %v13578_v39 = vld [vmem:[%s19062_s3 + $0x210] ss:$8 sps:$4 sm:$0xff]  }
 0x546   :  { %6939 = vmatpush1.bf16.msra.mxu1 %v11085_v10  ;;  %v13583_v10 = vld [vmem:[%s19062_s3 + $0x224] ss:$8 sps:$4 sm:$0xff]  }
 0x547   :  { %6940 = vmatprep.subr.bf16.mxu1 %v11094_v20  ;;  %v11101_v20 = vcombine.low %v481_v25, %v485_v47  ;;  %v13586_v25 = vld [vmem:[%s19062_s3 + $0x234] ss:$8 sps:$4 sm:$0xff]   ;;  %v11109_v47 = vcombine.low %v489_v5, %v493_v13 }
 0x548   :  { %6658 = vmatmul.mubr.bf16.gmra.mrb[236].mxu1 %v13915_v45  ;;  %v11110_v45 = vcombine.high %v489_v5, %v493_v13  ;;  %v509_v5 = vld [vmem:[%s19059_s1 + $0x9b8] sm:$0xff] }
 0x549   :  { %9079 = vmatmul.mubr.bf16.vlgmr.msra.gmra.mrb[232].mxu0 %v19264_v24  ;;  %6667 = vmatprep.mubr.bf16.mxu1 %v13916_v12  ;;  %v497_v24 = vld [vmem:[%s19059_s1 + $0x958] sm:$0xff]  ;;  %v19266_v12 = vld [vmem:[#allocation36_spill] sm:$0xff] }
 0x54a   :  { %9088 = vmatprep.mubr.bf16.mxu0 %v19265_v14  ;;  %9368 = vmatpush1.bf16.msra.mxu0 %v13575_v23  ;;  %v501_v23 = vld [vmem:[%s19059_s1 + $0x978] sm:$0xff] }
 0x54b   :  { %9369 = vmatprep.subr.bf16.mxu0 %v13580_v7  ;;  %6941 = vmatpush1.bf16.msra.mxu1 %v11093_v49  ;;  %v13581_v7 = vld [vmem:[%s19062_s3 + $0x220] ss:$8 sps:$4 sm:$0xff]   ;;  %v13918_v14 = vld [vmem:[%s19060_s0 + $0x9c] ss:$24 sps:$4 sm:$0xff]  }
 0x54c   :  { %6942 = vmatprep.subr.bf16.mxu1 %v11102_v3  ;;  %v13917_v49 = vld [vmem:[%s19060_s0 + $0x68] ss:$24 sps:$4 sm:$0xff]   ;;  %v11118_v3 = vcombine.high %v497_v24, %v501_v23  ;;  %v19267_v13 = vld [vmem:[#allocation41_spill] sm:$0xff] }
 0x54e   :  { %9370 = vmatpush1.bf16.msra.mxu0 %v13578_v39  ;;  %v505_v39 = vld [vmem:[%s19059_s1 + $0x998] sm:$0xff] }
 0x54f   :  { %9371 = vmatprep.subr.bf16.mxu0 %v13583_v10  ;;  %6943 = vmatpush1.bf16.msra.mxu1 %v11101_v20  ;;  %v13584_v10 = vld [vmem:[%s19062_s3 + $0x230] ss:$8 sps:$4 sm:$0xff]   ;;  %v13589_v20 = vld [vmem:[%s19062_s3 + $0x244] ss:$8 sps:$4 sm:$0xff]  }
 0x550   :  { %6668 = vmatmul.mubr.bf16.gmra.mrb[240].mxu1 %v13917_v49  ;;  %6944 = vmatprep.subr.bf16.mxu1 %v11110_v45  ;;  %v11117_v45 = vcombine.low %v497_v24, %v501_v23  ;;  %v11126_v49 = vcombine.high %v505_v39, %v509_v5  ;;  %v13592_v24 = vld [vmem:[%s19062_s3 + $0x254] ss:$8 sps:$4 sm:$0xff]   ;;  %v11125_v23 = vcombine.low %v505_v39, %v509_v5  ;;  %v19269_v5 = vld [vmem:[#allocation43_spill] sm:$0xff] }
 0x551   :  { %9089 = vmatmul.mubr.bf16.gmra.mrb[236].mxu0 %v19266_v12  ;;  %6677 = vmatprep.mubr.bf16.mxu1 %v13918_v14  ;;  %v513_v12 = vld [vmem:[%s19059_s1 + $0x9d8] sm:$0xff]  ;;  %v19268_v14 = vld [vmem:[#allocation28_spill] sm:$0xff] }
 0x552   :  { %9098 = vmatprep.mubr.bf16.mxu0 %v19267_v13  ;;  %9372 = vmatpush1.bf16.msra.mxu0 %v13581_v7  ;;  %v517_v7 = vld [vmem:[%s19059_s1 + $0x9f8] sm:$0xff]  ;;  %v13920_v13 = vld [vmem:[%s19060_s0 + $0xcc] ss:$24 sps:$4 sm:$0xff]  }
 0x553   :  { %9373 = vmatprep.subr.bf16.mxu0 %v13586_v25  ;;  %6945 = vmatpush1.bf16.msra.mxu1 %v11109_v47  ;;  %v13587_v25 = vld [vmem:[%s19062_s3 + $0x240] ss:$8 sps:$4 sm:$0xff]   ;;  %v13919_v47 = vld [vmem:[%s19060_s0 + $0x98] ss:$24 sps:$4 sm:$0xff]  }
 0x554   :  { %6946 = vmatprep.subr.bf16.mxu1 %v11118_v3  ;;  %v11134_v3 = vcombine.high %v513_v12, %v517_v7  ;;  %v525_v39 = vld [vmem:[%s19059_s1 + $0xa38] sm:$0xff] }
 0x556   :  { %9374 = vmatpush1.bf16.msra.mxu0 %v13584_v10  ;;  %v521_v10 = vld [vmem:[%s19059_s1 + $0xa18] sm:$0xff] }
 0x557   :  { %9375 = vmatprep.subr.bf16.mxu0 %v13589_v20  ;;  %6947 = vmatpush1.bf16.msra.mxu1 %v11117_v45  ;;  %v13590_v20 = vld [vmem:[%s19062_s3 + $0x250] ss:$8 sps:$4 sm:$0xff]   ;;  %v13595_v45 = vld [vmem:[%s19062_s3 + $0x264] ss:$8 sps:$4 sm:$0xff]  }
 0x558   :  { %6678 = vmatmul.mubr.bf16.gmra.mrb[244].mxu1 %v13919_v47  ;;  %6948 = vmatprep.subr.bf16.mxu1 %v11126_v49  ;;  %v11133_v49 = vcombine.low %v513_v12, %v517_v7  ;;  %v11142_v47 = vcombine.high %v521_v10, %v525_v39  ;;  %v13598_v12 = vld [vmem:[%s19062_s3 + $0x274] ss:$8 sps:$4 sm:$0xff]   ;;  %v11141_v7 = vcombine.low %v521_v10, %v525_v39  ;;  %v13596_v10 = vld [vmem:[%s19062_s3 + $0x270] ss:$8 sps:$4 sm:$0xff]  }
 0x559   :  { %9099 = vmatmul.mubr.bf16.gmra.mrb[240].mxu0 %v19268_v14  ;;  %6687 = vmatprep.mubr.bf16.mxu1 %v13920_v13  ;;  %v529_v14 = vld [vmem:[%s19059_s1 + $0xa58] sm:$0xff]  ;;  %v19270_v13 = vld [vmem:[#allocation27_spill] sm:$0xff] }
 0x55a   :  { %9108 = vmatprep.mubr.bf16.mxu0 %v19269_v5  ;;  %9376 = vmatpush1.bf16.msra.mxu0 %v13587_v25  ;;  %v533_v25 = vld [vmem:[%s19059_s1 + $0xa78] sm:$0xff] }
 0x55b   :  { %9377 = vmatprep.subr.bf16.mxu0 %v13592_v24  ;;  %6949 = vmatpush1.bf16.msra.mxu1 %v11125_v23  ;;  %v13593_v24 = vld [vmem:[%s19062_s3 + $0x260] ss:$8 sps:$4 sm:$0xff]   ;;  %v13922_v5 = vld [vmem:[%s19060_s0 + $0xfc] ss:$24 sps:$4 sm:$0xff]  }
 0x55c   :  { %6950 = vmatprep.subr.bf16.mxu1 %v11134_v3  ;;  %v13921_v23 = vld [vmem:[%s19060_s0 + $0xc8] ss:$24 sps:$4 sm:$0xff]   ;;  %v11150_v3 = vcombine.high %v529_v14, %v533_v25  ;;  %v537_v39 = vld [vmem:[%s19059_s1 + $0xa98] sm:$0xff] }
 0x55e   :  { %9378 = vmatpush1.bf16.msra.mxu0 %v13590_v20  ;;  %v541_v20 = vld [vmem:[%s19059_s1 + $0xab8] sm:$0xff] }
 0x55f   :  { %9379 = vmatprep.subr.bf16.mxu0 %v13595_v45  ;;  %6951 = vmatpush1.bf16.msra.mxu1 %v11133_v49  ;;  %v13601_v45 = vld [vmem:[%s19062_s3 + $0x284] ss:$8 sps:$4 sm:$0xff]   ;;  %v11158_v49 = vcombine.high %v537_v39, %v541_v20 }
 0x560   :  { %6688 = vmatmul.mubr.bf16.gmra.mrb[248].mxu1 %v13921_v23  ;;  %6952 = vmatprep.subr.bf16.mxu1 %v11142_v47  ;;  %v13599_v47 = vld [vmem:[%s19062_s3 + $0x280] ss:$8 sps:$4 sm:$0xff]   ;;  %v13923_v23 = vld [vmem:[%s19060_s0 + $0xf8] ss:$24 sps:$4 sm:$0xff]  }
 0x561   :  { %9109 = vmatmul.mubr.bf16.gmra.mrb[244].mxu0 %v19270_v13  ;;  %6697 = vmatprep.mubr.bf16.mxu1 %v13922_v5  ;;  %v19271_v13 = vld [vmem:[#allocation46_spill] sm:$0xff]  ;;  %v13926_v5 = vld [vmem:[%s19060_s0 + $0x15c] ss:$24 sps:$4 sm:$0xff]  }
 0x562   :  { %9118 = vmatprep.mubr.bf16.mxu0 %v17018_v30  ;;  %9380 = vmatpush1.bf16.msra.mxu0 %v13593_v24  ;;  %v11149_v30 = vcombine.low %v529_v14, %v533_v25  ;;  %v13604_v24 = vld [vmem:[%s19062_s3 + $0x294] ss:$8 sps:$4 sm:$0xff]   ;;  %v13924_v14 = vld [vmem:[%s19060_s0 + $0x12c] ss:$24 sps:$4 sm:$0xff]   ;;  %v13602_v25 = vld [vmem:[%s19062_s3 + $0x290] ss:$8 sps:$4 sm:$0xff]  }
 0x563   :  { %9381 = vmatprep.subr.bf16.mxu0 %v13598_v12  ;;  %6953 = vmatpush1.bf16.msra.mxu1 %v11141_v7  ;;  %v11157_v12 = vcombine.low %v537_v39, %v541_v20  ;;  %v13607_v7 = vld [vmem:[%s19062_s3 + $0x2a4] ss:$8 sps:$4 sm:$0xff]   ;;  %v545_v39 = vld [vmem:[%s19059_s1 + $0xad8] sm:$0xff] }
 0x564   :  { %6954 = vmatprep.subr.bf16.mxu1 %v11150_v3  ;;  %v13925_v3 = vld [vmem:[%s19060_s0 + $0x128] ss:$24 sps:$4 sm:$0xff]   ;;  %v549_v20 = vld [vmem:[%s19059_s1 + $0xaf8] sm:$0xff] }
 0x566   :  { %9382 = vmatpush1.bf16.msra.mxu0 %v13596_v10  ;;  %v13608_v10 = vld [vmem:[%s19062_s3 + $0x2b0] ss:$8 sps:$4 sm:$0xff]  }
 0x567   :  { %9383 = vmatprep.subr.bf16.mxu0 %v13601_v45  ;;  %6955 = vmatpush1.bf16.msra.mxu1 %v11149_v30  ;;  %v11165_v45 = vcombine.low %v545_v39, %v549_v20  ;;  %v11166_v30 = vcombine.high %v545_v39, %v549_v20  ;;  %v13619_v39 = vld [vmem:[%s19062_s3 + $0x2e4] ss:$8 sps:$4 sm:$0xff]   ;;  %v569_v20 = vld [vmem:[%s19059_s1 + $0xb98] sm:$0xff] }
 0x568   :  { %6698 = vmatmul.mubr.bf16.gmra.mrb[252].mxu1 %v13923_v23  ;;  %6956 = vmatprep.subr.bf16.mxu1 %v11158_v49  ;;  %v13611_v49 = vld [vmem:[%s19062_s3 + $0x2c0] ss:$8 sps:$4 sm:$0xff]   ;;  %v553_v23 = vld [vmem:[%s19059_s1 + $0xb18] sm:$0xff] }
 0x569   :  { %9119 = vmatmul.mubr.bf16.gmra.mrb[248].mxu0 %v17009_v2  ;;  %6707 = vmatprep.mubr.bf16.mxu1 %v13924_v14  ;;  %v13605_v2 = vld [vmem:[%s19062_s3 + $0x2a0] ss:$8 sps:$4 sm:$0xff]  }
 0x56a   :  { %9128 = vmatprep.mubr.bf16.mxu0 %v17082_v59  ;;  %9384 = vmatpush1.bf16.msra.mxu0 %v13599_v47  ;;  %v13610_v59 = vld [vmem:[%s19062_s3 + $0x2b4] ss:$8 sps:$4 sm:$0xff]   ;;  %v13927_v47 = vld [vmem:[%s19060_s0 + $0x158] ss:$24 sps:$4 sm:$0xff]  }
 0x56b   :  { %9385 = vmatprep.subr.bf16.mxu0 %v13604_v24  ;;  %6957 = vmatpush1.bf16.msra.mxu1 %v11157_v12  ;;  %v13928_v24 = vld [vmem:[%s19060_s0 + $0x18c] ss:$24 sps:$4 sm:$0xff]   ;;  %v13929_v12 = vld [vmem:[%s19060_s0 + $0x188] ss:$24 sps:$4 sm:$0xff]  }
 0x56c   :  { %6958 = vmatprep.subr.bf16.mxu1 %v11166_v30 }
 0x56e   :  { %9386 = vmatpush1.bf16.msra.mxu0 %v13602_v25 }
 0x56f   :  { %9387 = vmatprep.subr.bf16.mxu0 %v13607_v7  ;;  %6959 = vmatpush1.bf16.msra.mxu1 %v11165_v45  ;;  %v13614_v7 = vld [vmem:[%s19062_s3 + $0x2d0] ss:$8 sps:$4 sm:$0xff]  }
 0x570   :  { %6708 = vmatmul.mubr.bf16.gmra.mrb[0].mxu1 %v13925_v3  ;;  %v565_v3 = vld [vmem:[%s19059_s1 + $0xb78] sm:$0xff] }
 0x571   :  { %9129 = vmatmul.mubr.bf16.gmra.mrb[252].mxu0 %v19271_v13  ;;  %6717 = vmatprep.mubr.bf16.mxu1 %v13926_v5  ;;  %v573_v45 = vld [vmem:[%s19059_s1 + $0xbb8] sm:$0xff] }
 0x572   :  { %9138 = vmatprep.mubr.bf16.mxu0 %v17132_v42  ;;  %9388 = vmatpush1.bf16.msra.mxu0 %v13605_v2  ;;  %v13613_v42 = vld [vmem:[%s19062_s3 + $0x2c4] ss:$8 sps:$4 sm:$0xff]   ;;  %v13616_v2 = vld [vmem:[%s19062_s3 + $0x2d4] ss:$8 sps:$4 sm:$0xff]   ;;  %v11189_v30 = vcombine.low %v569_v20, %v573_v45 }
 0x573   :  { %9389 = vmatprep.subr.bf16.mxu0 %v13610_v59  ;;  %v561_v59 = vld [vmem:[%s19059_s1 + $0xb58] sm:$0xff] }
 0x574   :  { %v11181_v13 = vcombine.low %v561_v59, %v565_v3  ;;  %v11182_v5 = vcombine.high %v561_v59, %v565_v3  ;;  %v13961_v59 = vld [vmem:[%s19060_s0 + $0x488] ss:$24 sps:$4 sm:$0xff]   ;;  %v19276_v3 = vld [vmem:[#allocation9_spill] sm:$0xff] }
 0x576   :  { %9390 = vmatpush1.bf16.msra.mxu0 %v13608_v10  ;;  %v13617_v10 = vld [vmem:[%s19062_s3 + $0x2e0] ss:$8 sps:$4 sm:$0xff]  }
 0x577   :  { %9391 = vmatprep.subr.bf16.mxu0 %v13613_v42  ;;  %v11190_v42 = vcombine.high %v569_v20, %v573_v45  ;;  %v13966_v20 = vld [vmem:[%s19060_s0 + $0x51c] ss:$24 sps:$4 sm:$0xff]   ;;  %v11717_v45 = vadd.f32 %v17740_v62, %v16807_v36 }
 0x578   :  { %6718 = vmatmul.mubr.bf16.gmra.mrb[4].mxu1 %v13927_v47  ;;  %v13622_v47 = vld [vmem:[%s19062_s3 + $0x2f4] ss:$8 sps:$4 sm:$0xff]  }
 0x579   :  { %9139 = vmatmul.mubr.bf16.gmra.mrb[0].mxu0 %v17120_v38  ;;  %6727 = vmatprep.mubr.bf16.mxu1 %v13928_v24  ;;  %v557_v38 = vld [vmem:[%s19059_s1 + $0xb38] sm:$0xff]  ;;  %v13968_v36 = vld [vmem:[%s19060_s0 + $0x14] ss:$24 sps:$4 sm:$0xff]  }
 0x57a   :  { %9148 = vmatprep.mubr.bf16.mxu0 %v17174_v41  ;;  %9392 = vmatpush1.bf16.msra.mxu0 %v13611_v49  ;;  %v13930_v41 = vld [vmem:[%s19060_s0 + $0x1bc] ss:$24 sps:$4 sm:$0xff]   ;;  %v11173_v14 = vcombine.low %v553_v23, %v557_v38  ;;  %v11174_v25 = vcombine.high %v553_v23, %v557_v38  ;;  %v13620_v49 = vld [vmem:[%s19062_s3 + $0x2f0] ss:$8 sps:$4 sm:$0xff]   ;;  %v13940_v38 = vld [vmem:[%s19060_s0 + $0x2ac] ss:$24 sps:$4 sm:$0xff]  }
 0x57b   :  { %9393 = vmatprep.subr.bf16.mxu0 %v13616_v2  ;;  %v577_v24 = vld [vmem:[%s19059_s1 + $0xbd8] sm:$0xff] }
 0x57c   :  { %6960 = vmatprep.subr.bf16.mxu1 %v11174_v25  ;;  %v13945_v25 = vld [vmem:[%s19060_s0 + $0x308] ss:$24 sps:$4 sm:$0xff]   ;;  %v13959_v2 = vld [vmem:[%s19060_s0 + $0x458] ss:$24 sps:$4 sm:$0xff]  }
 0x57d   :  { %6961 = vmatpush1.bf16.msra.mxu1 %v11173_v14  ;;  %v13942_v14 = vld [vmem:[%s19060_s0 + $0x2dc] ss:$24 sps:$4 sm:$0xff]  }
 0x57e   :  { %9394 = vmatpush1.bf16.msra.mxu0 %v13614_v7  ;;  %6962 = vmatprep.subr.bf16.mxu1 %v11182_v5  ;;  %v13958_v7 = vld [vmem:[%s19060_s0 + $0x45c] ss:$24 sps:$4 sm:$0xff]   ;;  %v19277_v5 = vld [vmem:[#allocation82_spill] sm:$0xff] }
 0x57f   :  { %9395 = vmatprep.subr.bf16.mxu0 %v13619_v39  ;;  %v19279_v39 = vld [vmem:[#allocation84_spill] sm:$0xff] }
 0x580   :  { %6728 = vmatmul.mubr.bf16.gmra.mrb[8].mxu1 %v13929_v12 }
 0x581   :  { %9149 = vmatmul.mubr.bf16.gmra.mrb[4].mxu0 %v17163_v46  ;;  %6737 = vmatprep.mubr.bf16.mxu1 %v13930_v41  ;;  %v13931_v46 = vld [vmem:[%s19060_s0 + $0x1b8] ss:$24 sps:$4 sm:$0xff]   ;;  %v13941_v41 = vld [vmem:[%s19060_s0 + $0x2a8] ss:$24 sps:$4 sm:$0xff]  }
 0x582   :  { %9158 = vmatprep.mubr.bf16.mxu0 %v17207_v21  ;;  %v13932_v21 = vld [vmem:[%s19060_s0 + $0x1ec] ss:$24 sps:$4 sm:$0xff]   ;;  %6963 = vmatpush1.bf16.msra.mxu1 %v11181_v13  ;;  %v13962_v13 = vld [vmem:[%s19060_s0 + $0x4bc] ss:$24 sps:$4 sm:$0xff]  }
 0x583   :  { %9396 = vmatpush1.bf16.msra.mxu0 %v13617_v10  ;;  %6964 = vmatprep.subr.bf16.mxu1 %v11190_v42  ;;  %v13964_v10 = vld [vmem:[%s19060_s0 + $0x4ec] ss:$24 sps:$4 sm:$0xff]  }
 0x584   :  { %9397 = vmatprep.subr.bf16.mxu0 %v13622_v47  ;;  %v19281_v42 = vld [vmem:[#allocation22_spill] sm:$0xff] }
 0x586   :  { %6965 = vmatpush1.bf16.msra.mxu1 %v11189_v30  ;;  %v13967_v30 = vld [vmem:[%s19060_s0 + $0x518] ss:$24 sps:$4 sm:$0xff]  }
 0x587   :  { %9398 = vmatpush1.bf16.msra.mxu0 %v13620_v49 }
 0x588   :  { %6738 = vmatmul.mubr.bf16.gmra.mrb[12].mxu1 %v13931_v46  ;;  %v13960_v46 = vld [vmem:[%s19060_s0 + $0x48c] ss:$24 sps:$4 sm:$0xff]  }
 0x589   :  { %9159 = vmatmul.mubr.bf16.gmra.mrb[8].mxu0 %v17199_v15  ;;  %6747 = vmatprep.mubr.bf16.mxu1 %v13932_v21  ;;  %v13933_v15 = vld [vmem:[%s19060_s0 + $0x1e8] ss:$24 sps:$4 sm:$0xff]   ;;  %v19275_v21 = vld [vmem:[#allocation80_spill] sm:$0xff] }
 0x58a   :  { %9168 = vmatprep.mubr.bf16.mxu0 %v17237_v11  ;;  %v13934_v11 = vld [vmem:[%s19060_s0 + $0x21c] ss:$24 sps:$4 sm:$0xff]  }
 0x590   :  { %6748 = vmatmul.mubr.bf16.gmra.mrb[16].mxu1 %v13933_v15  ;;  %v13963_v15 = vld [vmem:[%s19060_s0 + $0x4b8] ss:$24 sps:$4 sm:$0xff]  }
 0x591   :  { %9169 = vmatmul.mubr.bf16.gmra.mrb[12].mxu0 %v17232_v16  ;;  %6757 = vmatprep.mubr.bf16.mxu1 %v13934_v11  ;;  %v13935_v16 = vld [vmem:[%s19060_s0 + $0x218] ss:$24 sps:$4 sm:$0xff]   ;;  %v19278_v11 = vld [vmem:[#allocation11_spill] sm:$0xff] }
 0x592   :  { %9178 = vmatprep.mubr.bf16.mxu0 %v17267_v51  ;;  %v13936_v51 = vld [vmem:[%s19060_s0 + $0x24c] ss:$24 sps:$4 sm:$0xff]  }
 0x598   :  { %6758 = vmatmul.mubr.bf16.gmra.mrb[20].mxu1 %v13935_v16  ;;  %v13965_v16 = vld [vmem:[%s19060_s0 + $0x4e8] ss:$24 sps:$4 sm:$0xff]  }
 0x599   :  { %9179 = vmatmul.mubr.bf16.gmra.mrb[16].mxu0 %v17262_v37  ;;  %6767 = vmatprep.mubr.bf16.mxu1 %v13936_v51  ;;  %v13937_v37 = vld [vmem:[%s19060_s0 + $0x248] ss:$24 sps:$4 sm:$0xff]   ;;  %v19280_v51 = vld [vmem:[#allocation13_spill] sm:$0xff] }
 0x59a   :  { %9188 = vmatprep.mubr.bf16.mxu0 %v17303_v63  ;;  %v13938_v63 = vld [vmem:[%s19060_s0 + $0x27c] ss:$24 sps:$4 sm:$0xff]  }
 0x5a0   :  { %6768 = vmatmul.mubr.bf16.gmra.mrb[24].mxu1 %v13937_v37  ;;  %v7708_v37 = vmax.f32 %v11717_v45, 0.0  ;;  %v13981_v45 = vld [vmem:[%s19060_s0 + $0x130] ss:$24 sps:$4 sm:$0xff]  }
 0x5a1   :  { %9189 = vmatmul.mubr.bf16.gmra.mrb[20].mxu0 %v17292_v55  ;;  %6777 = vmatprep.mubr.bf16.mxu1 %v13938_v63  ;;  %v581_v55 = vld [vmem:[%s19059_s1 + $0xbf8] sm:$0xff]  ;;  %v19282_v63 = vld [vmem:[#allocation2_spill] sm:$0xff] }
 0x5a2   :  { %9198 = vmatprep.mubr.bf16.mxu0 %v17327_v57  ;;  %v11197_v12 = vcombine.low %v577_v24, %v581_v55  ;;  %v11198_v23 = vcombine.high %v577_v24, %v581_v55  ;;  %v13939_v57 = vld [vmem:[%s19060_s0 + $0x278] ss:$24 sps:$4 sm:$0xff]   ;;  %v11716_v49 = vadd.f32 %v17736_v40, %v19282_v63  ;;  %v7940_v47 = vpack.c.bf16 %v7708_v37, %v7708_v37  ;;  %v13970_v40 = vld [vmem:[%s19060_s0 + $0x44] ss:$24 sps:$4 sm:$0xff]   ;;  %v13623_v24 = vld [vmem:[%s19062_s3 + $0x300] ss:$8 sps:$4 sm:$0xff]  }
 0x5a3   :  { %v13628_v55 = vld [vmem:[%s19062_s3 + $0x314] ss:$8 sps:$4 sm:$0xff]   ;;  %v13656_v63 = vld [vmem:[%s19062_s3 + $0x3b0] ss:$8 sps:$4 sm:$0xff]  }
 0x5a4   :  { %6966 = vmatprep.subr.bf16.mxu1 %v11198_v23  ;;  %v19285_v23 = vld [vmem:[#allocation37_spill] sm:$0xff]  ;;  %v19296_v37 = vld [vmem:[#allocation52_spill] sm:$0xff] }
 0x5a5   :  { %6967 = vmatpush1.bf16.msra.mxu1 %v11197_v12  ;;  %v13971_v12 = vld [vmem:[%s19060_s0 + $0x40] ss:$24 sps:$4 sm:$0xff]  }
 0x5a8   :  { %6778 = vmatmul.mubr.bf16.gmra.mrb[28].mxu1 %v13939_v57  ;;  %v13972_v57 = vld [vmem:[%s19060_s0 + $0x74] ss:$24 sps:$4 sm:$0xff]  }
 0x5a9   :  { %9199 = vmatmul.mubr.bf16.gmra.mrb[24].mxu0 %v17322_v58  ;;  %6787 = vmatprep.mubr.bf16.mxu1 %v13940_v38  ;;  %v13625_v58 = vld [vmem:[%s19062_s3 + $0x304] ss:$8 sps:$4 sm:$0xff]  }
 0x5aa   :  { %9208 = vmatprep.mubr.bf16.mxu0 %v17369_v9  ;;  %9688 = vmatprep.subr.bf16.mxu0 %v13625_v58  ;;  %v13943_v9 = vld [vmem:[%s19060_s0 + $0x2d8] ss:$24 sps:$4 sm:$0xff]   ;;  %v19286_v38 = vld [vmem:[#allocation42_spill] sm:$0xff] }
 0x5ab   :  { %v13629_v58 = vld [vmem:[%s19062_s3 + $0x320] ss:$8 sps:$4 sm:$0xff]  }
 0x5b0   :  { %6788 = vmatmul.mubr.bf16.gmra.mrb[32].mxu1 %v13941_v41  ;;  %v13626_v41 = vld [vmem:[%s19062_s3 + $0x310] ss:$8 sps:$4 sm:$0xff]  }
 0x5b1   :  { %9209 = vmatmul.mubr.bf16.gmra.mrb[28].mxu0 %v17358_v28  ;;  %6797 = vmatprep.mubr.bf16.mxu1 %v13942_v14  ;;  %v13944_v28 = vld [vmem:[%s19060_s0 + $0x30c] ss:$24 sps:$4 sm:$0xff]  }
 0x5b2   :  { %9218 = vmatprep.mubr.bf16.mxu0 %v17405_v56  ;;  %v13946_v56 = vld [vmem:[%s19060_s0 + $0x33c] ss:$24 sps:$4 sm:$0xff]   ;;  %v13631_v14 = vld [vmem:[%s19062_s3 + $0x324] ss:$8 sps:$4 sm:$0xff]  }
 0x5b8   :  { %6798 = vmatmul.mubr.bf16.gmra.mrb[36].mxu1 %v13943_v9  ;;  %v13634_v9 = vld [vmem:[%s19062_s3 + $0x334] ss:$8 sps:$4 sm:$0xff]  }
 0x5b9   :  { %9219 = vmatmul.mubr.bf16.gmra.mrb[32].mxu0 %v17388_v17  ;;  %6807 = vmatprep.mubr.bf16.mxu1 %v13944_v28  ;;  %v13947_v17 = vld [vmem:[%s19060_s0 + $0x338] ss:$24 sps:$4 sm:$0xff]  }
 0x5ba   :  { %9228 = vmatprep.mubr.bf16.mxu0 %v17429_v22  ;;  %v13948_v22 = vld [vmem:[%s19060_s0 + $0x36c] ss:$24 sps:$4 sm:$0xff]   ;;  %v13973_v28 = vld [vmem:[%s19060_s0 + $0x70] ss:$24 sps:$4 sm:$0xff]  }
 0x5c0   :  { %6808 = vmatmul.mubr.bf16.gmra.mrb[40].mxu1 %v13945_v25  ;;  %v19287_v25 = vld [vmem:[#allocation40_spill] sm:$0xff] }
 0x5c1   :  { %9229 = vmatmul.mubr.bf16.gmra.mrb[36].mxu0 %v17424_v35  ;;  %6817 = vmatprep.mubr.bf16.mxu1 %v13946_v56  ;;  %v13949_v35 = vld [vmem:[%s19060_s0 + $0x368] ss:$24 sps:$4 sm:$0xff]   ;;  %v13974_v56 = vld [vmem:[%s19060_s0 + $0xa4] ss:$24 sps:$4 sm:$0xff]  }
 0x5c2   :  { %9238 = vmatprep.mubr.bf16.mxu0 %v17456_v50  ;;  %v13950_v50 = vld [vmem:[%s19060_s0 + $0x39c] ss:$24 sps:$4 sm:$0xff]  }
 0x5c8   :  { %6818 = vmatmul.mubr.bf16.gmra.mrb[44].mxu1 %v13947_v17  ;;  %v19288_v17 = vld [vmem:[#allocation44_spill] sm:$0xff] }
 0x5c9   :  { %9239 = vmatmul.mubr.bf16.gmra.mrb[40].mxu0 %v17451_v33  ;;  %6827 = vmatprep.mubr.bf16.mxu1 %v13948_v22  ;;  %v13951_v33 = vld [vmem:[%s19060_s0 + $0x398] ss:$24 sps:$4 sm:$0xff]  }
 0x5ca   :  { %9248 = vmatprep.mubr.bf16.mxu0 %v17494_v43  ;;  %v13952_v43 = vld [vmem:[%s19060_s0 + $0x3cc] ss:$24 sps:$4 sm:$0xff]   ;;  %v13632_v22 = vld [vmem:[%s19062_s3 + $0x330] ss:$8 sps:$4 sm:$0xff]  }
 0x5d0   :  { %6828 = vmatmul.mubr.bf16.gmra.mrb[48].mxu1 %v13949_v35  ;;  %v13637_v35 = vld [vmem:[%s19062_s3 + $0x344] ss:$8 sps:$4 sm:$0xff]  }
 0x5d1   :  { %9249 = vmatmul.mubr.bf16.gmra.mrb[44].mxu0 %v17475_v32  ;;  %6837 = vmatprep.mubr.bf16.mxu1 %v13950_v50  ;;  %v13953_v32 = vld [vmem:[%s19060_s0 + $0x3c8] ss:$24 sps:$4 sm:$0xff]  }
 0x5d2   :  { %9258 = vmatprep.mubr.bf16.mxu0 %v17518_v18  ;;  %v13954_v18 = vld [vmem:[%s19060_s0 + $0x3fc] ss:$24 sps:$4 sm:$0xff]   ;;  %v13635_v50 = vld [vmem:[%s19062_s3 + $0x340] ss:$8 sps:$4 sm:$0xff]  }
 0x5d8   :  { %6838 = vmatmul.mubr.bf16.gmra.mrb[52].mxu1 %v13951_v33  ;;  %v13640_v33 = vld [vmem:[%s19062_s3 + $0x354] ss:$8 sps:$4 sm:$0xff]  }
 0x5d9   :  { %9259 = vmatmul.mubr.bf16.gmra.mrb[48].mxu0 %v17513_v0  ;;  %6847 = vmatprep.mubr.bf16.mxu1 %v13952_v43  ;;  %v13955_v0 = vld [vmem:[%s19060_s0 + $0x3f8] ss:$24 sps:$4 sm:$0xff]  }
 0x5da   :  { %9268 = vmatprep.mubr.bf16.mxu0 %v17542_v4  ;;  %v13956_v4 = vld [vmem:[%s19060_s0 + $0x42c] ss:$24 sps:$4 sm:$0xff]   ;;  %v13975_v43 = vld [vmem:[%s19060_s0 + $0xa0] ss:$24 sps:$4 sm:$0xff]  }
 0x5e0   :  { %6848 = vmatmul.mubr.bf16.gmra.mrb[56].mxu1 %v13953_v32  ;;  %v19289_v32 = vld [vmem:[#allocation31_spill] sm:$0xff] }
 0x5e1   :  { %9269 = vmatmul.mubr.bf16.gmra.mrb[52].mxu0 %v17537_v31  ;;  %6857 = vmatprep.mubr.bf16.mxu1 %v13954_v18  ;;  %v13957_v31 = vld [vmem:[%s19060_s0 + $0x428] ss:$24 sps:$4 sm:$0xff]   ;;  %v13976_v18 = vld [vmem:[%s19060_s0 + $0xd4] ss:$24 sps:$4 sm:$0xff]  }
 0x5e2   :  { %9278 = vmatprep.mubr.bf16.mxu0 %v17566_v19  ;;  %v19272_v19 = vld [vmem:[#allocation5_spill] sm:$0xff] }
 0x5e8   :  { %6858 = vmatmul.mubr.bf16.gmra.mrb[60].mxu1 %v13955_v0  ;;  %v19290_v0 = vld [vmem:[#allocation45_spill] sm:$0xff] }
 0x5e9   :  { %9279 = vmatmul.mubr.bf16.gmra.mrb[56].mxu0 %v17561_v48  ;;  %6867 = vmatprep.mubr.bf16.mxu1 %v13956_v4  ;;  %v19273_v48 = vld [vmem:[#allocation78_spill] sm:$0xff]  ;;  %v13638_v4 = vld [vmem:[%s19062_s3 + $0x350] ss:$8 sps:$4 sm:$0xff]  }
 0x5ea   :  { %9288 = vmatprep.mubr.bf16.mxu0 %v17590_v60  ;;  %v19274_v60 = vld [vmem:[#allocation7_spill] sm:$0xff] }
 0x5f0   :  { %6868 = vmatmul.mubr.bf16.gmra.mrb[64].mxu1 %v13957_v31  ;;  %v13643_v31 = vld [vmem:[%s19062_s3 + $0x364] ss:$8 sps:$4 sm:$0xff]  }
 0x5f1   :  { %9289 = vmatmul.mubr.bf16.gmra.mrb[60].mxu0 %v19272_v19  ;;  %6877 = vmatprep.mubr.bf16.mxu1 %v13958_v7  ;;  %v13641_v19 = vld [vmem:[%s19062_s3 + $0x360] ss:$8 sps:$4 sm:$0xff]   ;;  %v13646_v7 = vld [vmem:[%s19062_s3 + $0x374] ss:$8 sps:$4 sm:$0xff]  }
 0x5f2   :  { %9298 = vmatprep.mubr.bf16.mxu0 %v19273_v48  ;;  %v13977_v48 = vld [vmem:[%s19060_s0 + $0xd0] ss:$24 sps:$4 sm:$0xff]  }
 0x5f8   :  { %6878 = vmatmul.mubr.bf16.gmra.mrb[68].mxu1 %v13959_v2  ;;  %v19291_v2 = vld [vmem:[#allocation30_spill] sm:$0xff] }
 0x5f9   :  { %9299 = vmatmul.mubr.bf16.gmra.mrb[64].mxu0 %v19274_v60  ;;  %6887 = vmatprep.mubr.bf16.mxu1 %v13960_v46  ;;  %v13978_v60 = vld [vmem:[%s19060_s0 + $0x104] ss:$24 sps:$4 sm:$0xff]   ;;  %v19292_v46 = vld [vmem:[#allocation48_spill] sm:$0xff] }
 0x5fa   :  { %9308 = vmatprep.mubr.bf16.mxu0 %v19275_v21  ;;  %v13644_v21 = vld [vmem:[%s19062_s3 + $0x370] ss:$8 sps:$4 sm:$0xff]  }
 0x600   :  { %6888 = vmatmul.mubr.bf16.gmra.mrb[72].mxu1 %v13961_v59  ;;  %v13649_v59 = vld [vmem:[%s19062_s3 + $0x384] ss:$8 sps:$4 sm:$0xff]  }
 0x601   :  { %9309 = vmatmul.mubr.bf16.gmra.mrb[68].mxu0 %v19276_v3  ;;  %6897 = vmatprep.mubr.bf16.mxu1 %v13962_v13  ;;  %v13647_v3 = vld [vmem:[%s19062_s3 + $0x380] ss:$8 sps:$4 sm:$0xff]   ;;  %v13652_v13 = vld [vmem:[%s19062_s3 + $0x394] ss:$8 sps:$4 sm:$0xff]  }
 0x602   :  { %9318 = vmatprep.mubr.bf16.mxu0 %v19277_v5  ;;  %v13979_v5 = vld [vmem:[%s19060_s0 + $0x100] ss:$24 sps:$4 sm:$0xff]  }
 0x608   :  { %6898 = vmatmul.mubr.bf16.gmra.mrb[76].mxu1 %v13963_v15  ;;  %v19293_v15 = vld [vmem:[#allocation47_spill] sm:$0xff] }
 0x609   :  { %9319 = vmatmul.mubr.bf16.gmra.mrb[72].mxu0 %v19278_v11  ;;  %6907 = vmatprep.mubr.bf16.mxu1 %v13964_v10  ;;  %v13980_v11 = vld [vmem:[%s19060_s0 + $0x134] ss:$24 sps:$4 sm:$0xff]   ;;  %v19294_v10 = vld [vmem:[#allocation50_spill] sm:$0xff] }
 0x60a   :  { %9328 = vmatprep.mubr.bf16.mxu0 %v19279_v39  ;;  %v13650_v39 = vld [vmem:[%s19062_s3 + $0x390] ss:$8 sps:$4 sm:$0xff]  }
 0x610   :  { %6908 = vmatmul.mubr.bf16.gmra.mrb[80].mxu1 %v13965_v16  ;;  %v13655_v16 = vld [vmem:[%s19062_s3 + $0x3a4] ss:$8 sps:$4 sm:$0xff]  }
 0x611   :  { %9329 = vmatmul.mubr.bf16.gmra.mrb[76].mxu0 %v19280_v51  ;;  %6917 = vmatprep.mubr.bf16.mxu1 %v13966_v20  ;;  %v13653_v51 = vld [vmem:[%s19062_s3 + $0x3a0] ss:$8 sps:$4 sm:$0xff]   ;;  %v13658_v20 = vld [vmem:[%s19062_s3 + $0x3b4] ss:$8 sps:$4 sm:$0xff]  }
 0x612   :  { %9338 = vmatprep.mubr.bf16.mxu0 %v17710_v1  ;;  %v19283_v1 = vld [vmem:[#allocation25_spill] sm:$0xff] }
 0x618   :  { %6918 = vmatmul.mubr.bf16.gmra.mrb[84].mxu1 %v13967_v30  ;;  %v19295_v30 = vld [vmem:[#allocation49_spill] sm:$0xff] }
 0x619   :  { %9339 = vmatmul.mubr.bf16.gmra.mrb[80].mxu0 %v17705_v54  ;;  %6927 = vmatprep.mubr.bf16.mxu1 %v19281_v42  ;;  %v7707_v54 = vmax.f32 %v11716_v49, 0.0  ;;  %v13982_v42 = vld [vmem:[%s19060_s0 + $0x164] ss:$24 sps:$4 sm:$0xff]  }
 0x61a   :  { %9348 = vmatprep.mubr.bf16.mxu0 %v17734_v27  ;;  %v13969_v27 = vld [vmem:[%s19060_s0 + $0x10] ss:$24 sps:$4 sm:$0xff]   ;;  %v13661_v49 = vld [vmem:[%s19062_s3 + $0x3c4] ss:$8 sps:$4 sm:$0xff]  }
 0x61b   :  { %v7939_v62 = vpack.c.bf16 %v7707_v54, %v7707_v54  ;;  %v13984_v54 = vld [vmem:[%s19060_s0 + $0x194] ss:$24 sps:$4 sm:$0xff]  }
 0x620   :  { %6928 = vmatmul.mubr.bf16.gmra.mrb[88].mxu1 %v19283_v1  ;;  %v13983_v1 = vld [vmem:[%s19060_s0 + $0x160] ss:$24 sps:$4 sm:$0xff]  }
 0x621   :  { %9349 = vmatmul.mubr.bf16.gmra.mrb[84].mxu0 %v17729_v29  ;;  %6968 = vmatprep.mubr.bf16.mxu1 %v13968_v36  ;;  %v19284_v29 = vld [vmem:[#allocation39_spill] sm:$0xff] }
 0x622   :  { %9358 = vmatprep.mubr.bf16.mxu0 %v7940_v47  ;;  %v13659_v47 = vld [vmem:[%s19062_s3 + $0x3c0] ss:$8 sps:$4 sm:$0xff]  }
 0x623   :  { %v19297_v36 = vld [vmem:[#allocation51_spill] sm:$0xff] }
 0x628   :  { %6969 = vmatmul.mubr.bf16.vlgmr.msra.gmra.mrb[232].mxu1 %v13969_v27  ;;  %v13985_v27 = vld [vmem:[%s19060_s0 + $0x190] ss:$24 sps:$4 sm:$0xff]  }
 0x629   :  { %9359 = vmatmul.mubr.bf16.gmra.mrb[88].mxu0 %v7939_v62  ;;  %6978 = vmatprep.mubr.bf16.mxu1 %v13970_v40  ;;  %v19298_v62 = vld [vmem:[#allocation54_spill] sm:$0xff]  ;;  %v19299_v40 = vld [vmem:[#allocation53_spill] sm:$0xff] }
 0x62a   :  { %9399 = vmatprep.mubr.bf16.mxu0 %v19284_v29  ;;  %v13986_v29 = vld [vmem:[%s19060_s0 + $0x1c4] ss:$24 sps:$4 sm:$0xff]  }
 0x630   :  { %6979 = vmatmul.mubr.bf16.gmra.mrb[236].mxu1 %v13971_v12  ;;  %v13664_v12 = vld [vmem:[%s19062_s3 + $0x3d4] ss:$8 sps:$4 sm:$0xff]  }
 0x631   :  { %9400 = vmatmul.mubr.bf16.vlgmr.msra.gmra.mrb[232].mxu0 %v19285_v23  ;;  %6988 = vmatprep.mubr.bf16.mxu1 %v13972_v57  ;;  %v13987_v23 = vld [vmem:[%s19060_s0 + $0x1c0] ss:$24 sps:$4 sm:$0xff]   ;;  %v19301_v57 = vld [vmem:[#allocation55_spill] sm:$0xff] }
 0x632   :  { %9409 = vmatprep.mubr.bf16.mxu0 %v19286_v38  ;;  %9689 = vmatpush1.bf16.msra.mxu0 %v13623_v24  ;;  %v19300_v24 = vld [vmem:[#allocation56_spill] sm:$0xff] }
 0x633   :  { %9690 = vmatprep.subr.bf16.mxu0 %v13628_v55  ;;  %v13662_v55 = vld [vmem:[%s19062_s3 + $0x3d0] ss:$8 sps:$4 sm:$0xff]   ;;  %v13988_v38 = vld [vmem:[%s19060_s0 + $0x1f4] ss:$24 sps:$4 sm:$0xff]  }
 0x636   :  { %9691 = vmatpush1.bf16.msra.mxu0 %v13626_v41  ;;  %v19302_v41 = vld [vmem:[#allocation58_spill] sm:$0xff] }
 0x637   :  { %9692 = vmatprep.subr.bf16.mxu0 %v13631_v14  ;;  %v13989_v14 = vld [vmem:[%s19060_s0 + $0x1f0] ss:$24 sps:$4 sm:$0xff]  }
 0x638   :  { %6989 = vmatmul.mubr.bf16.gmra.mrb[240].mxu1 %v13973_v28  ;;  %v19304_v28 = vld [vmem:[#allocation60_spill] sm:$0xff] }
 0x639   :  { %9410 = vmatmul.mubr.bf16.gmra.mrb[236].mxu0 %v19287_v25  ;;  %6998 = vmatprep.mubr.bf16.mxu1 %v13974_v56  ;;  %v13665_v25 = vld [vmem:[%s19062_s3 + $0x3e0] ss:$8 sps:$4 sm:$0xff]   ;;  %v13667_v56 = vld [vmem:[%s19062_s3 + $0x3e4] ss:$8 sps:$4 sm:$0xff]  }
 0x63a   :  { %9419 = vmatprep.mubr.bf16.mxu0 %v19288_v17  ;;  %9693 = vmatpush1.bf16.msra.mxu0 %v13629_v58  ;;  %v19303_v58 = vld [vmem:[#allocation57_spill] sm:$0xff] }
 0x63b   :  { %9694 = vmatprep.subr.bf16.mxu0 %v13634_v9  ;;  %v13990_v9 = vld [vmem:[%s19060_s0 + $0x224] ss:$24 sps:$4 sm:$0xff]   ;;  %v13991_v17 = vld [vmem:[%s19060_s0 + $0x220] ss:$24 sps:$4 sm:$0xff]  }
 0x63e   :  { %9695 = vmatpush1.bf16.msra.mxu0 %v13632_v22  ;;  %v19305_v22 = vld [vmem:[#allocation59_spill] sm:$0xff] }
 0x63f   :  { %9696 = vmatprep.subr.bf16.mxu0 %v13637_v35  ;;  %v13992_v35 = vld [vmem:[%s19060_s0 + $0x254] ss:$24 sps:$4 sm:$0xff]  }
 0x640   :  { %6999 = vmatmul.mubr.bf16.gmra.mrb[244].mxu1 %v13975_v43  ;;  %v19307_v43 = vld [vmem:[#allocation61_spill] sm:$0xff] }
 0x641   :  { %9420 = vmatmul.mubr.bf16.gmra.mrb[240].mxu0 %v19289_v32  ;;  %7008 = vmatprep.mubr.bf16.mxu1 %v13976_v18  ;;  %v13994_v32 = vld [vmem:[%s19060_s0 + $0x284] ss:$24 sps:$4 sm:$0xff]   ;;  %v19308_v18 = vld [vmem:[#allocation64_spill] sm:$0xff] }
 0x642   :  { %9429 = vmatprep.mubr.bf16.mxu0 %v19290_v0  ;;  %9697 = vmatpush1.bf16.msra.mxu0 %v13635_v50  ;;  %v19306_v50 = vld [vmem:[#allocation62_spill] sm:$0xff]  ;;  %v13668_v0 = vld [vmem:[%s19062_s3 + $0x3f0] ss:$8 sps:$4 sm:$0xff]  }
 0x643   :  { %9698 = vmatprep.subr.bf16.mxu0 %v13640_v33  ;;  %v13993_v33 = vld [vmem:[%s19060_s0 + $0x250] ss:$24 sps:$4 sm:$0xff]  }
 0x646   :  { %9699 = vmatpush1.bf16.msra.mxu0 %v13638_v4  ;;  %v13670_v4 = vld [vmem:[%s19062_s3 + $0x3f4] ss:$8 sps:$4 sm:$0xff]  }
 0x647   :  { %9700 = vmatprep.subr.bf16.mxu0 %v13643_v31  ;;  %v13995_v31 = vld [vmem:[%s19060_s0 + $0x280] ss:$24 sps:$4 sm:$0xff]  }
 0x648   :  { %7009 = vmatmul.mubr.bf16.gmra.mrb[248].mxu1 %v13977_v48  ;;  %v19310_v48 = vld [vmem:[#allocation66_spill] sm:$0xff] }
 0x649   :  { %9430 = vmatmul.mubr.bf16.gmra.mrb[244].mxu0 %v19291_v2  ;;  %7018 = vmatprep.mubr.bf16.mxu1 %v13978_v60  ;;  %v14025_v2 = vmov 0   ;;  %v13671_v60 = vld [vmem:[%s19063_s5] sm:$0xff]  }
 0x64a   :  { %9439 = vmatprep.mubr.bf16.mxu0 %v19292_v46  ;;  %9701 = vmatpush1.bf16.msra.mxu0 %v13641_v19  ;;  %v19309_v19 = vld [vmem:[#allocation63_spill] sm:$0xff] }
 0x64b   :  { %9702 = vmatprep.subr.bf16.mxu0 %v13646_v7  ;;  %v13996_v7 = vld [vmem:[%s19060_s0 + $0x2b4] ss:$24 sps:$4 sm:$0xff]   ;;  %10316 = vmatprep.subr.bf16.mxu1 %v14025_v2  ;;  %v13997_v46 = vld [vmem:[%s19060_s0 + $0x2b0] ss:$24 sps:$4 sm:$0xff]  }
 0x64c   :  { %10317 = vmatpush1.bf16.msra.mxu1 %v13671_v60  ;;  %v19335_v60 = vld [vmem:[#allocation19_spill] sm:$0xff] }
 0x64d   :  { %10318 = vmatprep.subr.bf16.mxu1 %v14025_v2 }
 0x64e   :  { %9703 = vmatpush1.bf16.msra.mxu0 %v13644_v21  ;;  %v19311_v21 = vld [vmem:[#allocation65_spill] sm:$0xff] }
 0x64f   :  { %9704 = vmatprep.subr.bf16.mxu0 %v13649_v59  ;;  %v13998_v59 = vld [vmem:[%s19060_s0 + $0x2e4] ss:$24 sps:$4 sm:$0xff]  }
 0x650   :  { %7019 = vmatmul.mubr.bf16.gmra.mrb[252].mxu1 %v13979_v5  ;;  %v19313_v5 = vld [vmem:[#allocation67_spill] sm:$0xff] }
 0x651   :  { %9440 = vmatmul.mubr.bf16.gmra.mrb[248].mxu0 %v19293_v15  ;;  %7028 = vmatprep.mubr.bf16.mxu1 %v13980_v11  ;;  %v14000_v15 = vld [vmem:[%s19060_s0 + $0x314] ss:$24 sps:$4 sm:$0xff]   ;;  %v19314_v11 = vld [vmem:[#allocation70_spill] sm:$0xff] }
 0x652   :  { %9449 = vmatprep.mubr.bf16.mxu0 %v19294_v10  ;;  %9705 = vmatpush1.bf16.msra.mxu0 %v13647_v3  ;;  %v19312_v3 = vld [vmem:[#allocation68_spill] sm:$0xff]  ;;  %v13672_v10 = vld [vmem:[%s19063_s5 + $0x8] sm:$0xff]  }
 0x653   :  { %9706 = vmatprep.subr.bf16.mxu0 %v13652_v13  ;;  %v13999_v13 = vld [vmem:[%s19060_s0 + $0x2e0] ss:$24 sps:$4 sm:$0xff]   ;;  %10319 = vmatpush1.bf16.msra.mxu1 %v13672_v10 }
 0x654   :  { %10320 = vmatprep.subr.bf16.mxu1 %v14025_v2  ;;  %v13678_v10 = vld [vmem:[%s19063_s5 + $0x38] sm:$0xff]  }
 0x656   :  { %9707 = vmatpush1.bf16.msra.mxu0 %v13650_v39  ;;  %v14001_v39 = vld [vmem:[%s19060_s0 + $0x310] ss:$24 sps:$4 sm:$0xff]  }
 0x657   :  { %9708 = vmatprep.subr.bf16.mxu0 %v13655_v16  ;;  %v19315_v16 = vld [vmem:[#allocation69_spill] sm:$0xff] }
 0x658   :  { %7029 = vmatmul.mubr.bf16.gmra.mrb[0].mxu1 %v13981_v45  ;;  %v13673_v45 = vld [vmem:[%s19063_s5 + $0x10] sm:$0xff]  }
 0x659   :  { %9450 = vmatmul.mubr.bf16.gmra.mrb[252].mxu0 %v19295_v30  ;;  %7038 = vmatprep.mubr.bf16.mxu1 %v13982_v42  ;;  %v14003_v30 = vld [vmem:[%s19060_s0 + $0x340] ss:$24 sps:$4 sm:$0xff]   ;;  %v19317_v42 = vld [vmem:[#allocation71_spill] sm:$0xff] }
 0x65a   :  { %9459 = vmatprep.mubr.bf16.mxu0 %v19296_v37  ;;  %9709 = vmatpush1.bf16.msra.mxu0 %v13653_v51  ;;  %v14002_v51 = vld [vmem:[%s19060_s0 + $0x344] ss:$24 sps:$4 sm:$0xff]   ;;  %v14004_v37 = vld [vmem:[%s19060_s0 + $0x374] ss:$24 sps:$4 sm:$0xff]  }
 0x65b   :  { %9710 = vmatprep.subr.bf16.mxu0 %v13658_v20  ;;  %v19316_v20 = vld [vmem:[#allocation72_spill] sm:$0xff]  ;;  %10321 = vmatpush1.bf16.msra.mxu1 %v13673_v45 }
 0x65c   :  { %10322 = vmatprep.subr.bf16.mxu1 %v14025_v2 }
 0x65e   :  { %9711 = vmatpush1.bf16.msra.mxu0 %v13656_v63  ;;  %v19318_v63 = vld [vmem:[#allocation74_spill] sm:$0xff] }
 0x65f   :  { %9712 = vmatprep.subr.bf16.mxu0 %v13661_v49  ;;  %v14005_v49 = vld [vmem:[%s19060_s0 + $0x370] ss:$24 sps:$4 sm:$0xff]  }
 0x660   :  { %7039 = vmatmul.mubr.bf16.gmra.mrb[4].mxu1 %v13983_v1  ;;  %v14006_v1 = vld [vmem:[%s19060_s0 + $0x3a4] ss:$24 sps:$4 sm:$0xff]  }
 0x661   :  { %9460 = vmatmul.mubr.bf16.gmra.mrb[0].mxu0 %v19297_v36  ;;  %7048 = vmatprep.mubr.bf16.mxu1 %v13984_v54  ;;  %v19320_v36 = vld [vmem:[#allocation76_spill] sm:$0xff]  ;;  %v13674_v54 = vld [vmem:[%s19063_s5 + $0x18] sm:$0xff]  }
 0x662   :  { %9469 = vmatprep.mubr.bf16.mxu0 %v19298_v62  ;;  %9713 = vmatpush1.bf16.msra.mxu0 %v13659_v47  ;;  %v19319_v47 = vld [vmem:[#allocation73_spill] sm:$0xff] }
 0x663   :  { %9714 = vmatprep.subr.bf16.mxu0 %v13664_v12  ;;  %v14007_v62 = vld [vmem:[%s19060_s0 + $0x3a0] ss:$24 sps:$4 sm:$0xff]   ;;  %10323 = vmatpush1.bf16.msra.mxu1 %v13674_v54  ;;  %v14010_v12 = vld [vmem:[%s19060_s0 + $0x404] ss:$24 sps:$4 sm:$0xff]  }
 0x664   :  { %10324 = vmatprep.subr.bf16.mxu1 %v14025_v2  ;;  %v19337_v54 = vld [vmem:[#allocation26_spill] sm:$0xff] }
 0x666   :  { %9715 = vmatpush1.bf16.msra.mxu0 %v13662_v55  ;;  %v19323_v55 = vld [vmem:[#allocation4_spill] sm:$0xff] }
 0x667   :  { %9716 = vmatprep.subr.bf16.mxu0 %v13667_v56  ;;  %v19328_v56 = vld [vmem:[#allocation81_spill] sm:$0xff] }
 0x668   :  { %7049 = vmatmul.mubr.bf16.gmra.mrb[8].mxu1 %v13985_v27  ;;  %v19321_v27 = vld [vmem:[#allocation75_spill] sm:$0xff] }
 0x669   :  { %9470 = vmatmul.mubr.bf16.gmra.mrb[4].mxu0 %v19299_v40  ;;  %7058 = vmatprep.mubr.bf16.mxu1 %v13986_v29  ;;  %v14008_v40 = vld [vmem:[%s19060_s0 + $0x3d4] ss:$24 sps:$4 sm:$0xff]   ;;  %v19322_v29 = vld [vmem:[#allocation6_spill] sm:$0xff] }
 0x66a   :  { %9479 = vmatprep.mubr.bf16.mxu0 %v19300_v24  ;;  %9717 = vmatpush1.bf16.msra.mxu0 %v13665_v25  ;;  %v14009_v24 = vld [vmem:[%s19060_s0 + $0x3d0] ss:$24 sps:$4 sm:$0xff]   ;;  %v14014_v25 = vld [vmem:[%s19060_s0 + $0x464] ss:$24 sps:$4 sm:$0xff]  }
 0x66b   :  { %9718 = vmatprep.subr.bf16.mxu0 %v13670_v4  ;;  %v13677_v4 = vld [vmem:[%s19063_s5 + $0x30] sm:$0xff]  }
 0x66e   :  { %9719 = vmatpush1.bf16.msra.mxu0 %v13668_v0  ;;  %v19332_v0 = vld [vmem:[#allocation85_spill] sm:$0xff] }
 0x670   :  { %7059 = vmatmul.mubr.bf16.gmra.mrb[12].mxu1 %v13987_v23  ;;  %v19324_v23 = vld [vmem:[#allocation77_spill] sm:$0xff] }
 0x671   :  { %9480 = vmatmul.mubr.bf16.gmra.mrb[8].mxu0 %v19301_v57  ;;  %7068 = vmatprep.mubr.bf16.mxu1 %v13988_v38  ;;  %v13675_v57 = vld [vmem:[%s19063_s5 + $0x20] sm:$0xff]  }
 0x672   :  { %9489 = vmatprep.mubr.bf16.mxu0 %v19302_v41  ;;  %10325 = vmatpush1.bf16.msra.mxu1 %v13675_v57  ;;  %v14011_v38 = vld [vmem:[%s19060_s0 + $0x400] ss:$24 sps:$4 sm:$0xff]   ;;  %v19325_v41 = vld [vmem:[#allocation8_spill] sm:$0xff]  ;;  %v11830_v57 = vadd.f32 %v17758_v26, %v16821_v61 }
 0x673   :  { %10326 = vmatprep.subr.bf16.mxu1 %v14025_v2 }
 0x678   :  { %7069 = vmatmul.mubr.bf16.gmra.mrb[16].mxu1 %v13989_v14  ;;  %v14012_v14 = vld [vmem:[%s19060_s0 + $0x434] ss:$24 sps:$4 sm:$0xff]  }
 0x679   :  { %9490 = vmatmul.mubr.bf16.gmra.mrb[12].mxu0 %v19303_v58  ;;  %7078 = vmatprep.mubr.bf16.mxu1 %v13990_v9  ;;  %v19326_v58 = vld [vmem:[#allocation79_spill] sm:$0xff] }
 0x67a   :  { %9499 = vmatprep.mubr.bf16.mxu0 %v19304_v28  ;;  %v14013_v9 = vld [vmem:[%s19060_s0 + $0x430] ss:$24 sps:$4 sm:$0xff]   ;;  %v19327_v28 = vld [vmem:[#allocation10_spill] sm:$0xff] }
 0x680   :  { %7079 = vmatmul.mubr.bf16.gmra.mrb[20].mxu1 %v13991_v17  ;;  %v13676_v17 = vld [vmem:[%s19063_s5 + $0x28] sm:$0xff]  }
 0x681   :  { %9500 = vmatmul.mubr.bf16.gmra.mrb[16].mxu0 %v19305_v22  ;;  %7088 = vmatprep.mubr.bf16.mxu1 %v13992_v35  ;;  %v14015_v22 = vld [vmem:[%s19060_s0 + $0x460] ss:$24 sps:$4 sm:$0xff]   ;;  %v19329_v35 = vld [vmem:[#allocation12_spill] sm:$0xff] }
 0x682   :  { %9509 = vmatprep.mubr.bf16.mxu0 %v19306_v50  ;;  %10327 = vmatpush1.bf16.msra.mxu1 %v13676_v17  ;;  %v14016_v50 = vld [vmem:[%s19060_s0 + $0x494] ss:$24 sps:$4 sm:$0xff]  }
 0x683   :  { %10328 = vmatprep.subr.bf16.mxu1 %v14025_v2 }
 0x686   :  { %10329 = vmatpush1.bf16.msra.mxu1 %v13677_v4 }
 0x687   :  { %10330 = vmatprep.subr.bf16.mxu1 %v14025_v2 }
 0x688   :  { %7089 = vmatmul.mubr.bf16.gmra.mrb[24].mxu1 %v13993_v33  ;;  %v19330_v33 = vld [vmem:[#allocation83_spill] sm:$0xff] }
 0x689   :  { %9510 = vmatmul.mubr.bf16.gmra.mrb[20].mxu0 %v19307_v43  ;;  %7098 = vmatprep.mubr.bf16.mxu1 %v13994_v32  ;;  %v14017_v43 = vld [vmem:[%s19060_s0 + $0x490] ss:$24 sps:$4 sm:$0xff]   ;;  %v19331_v32 = vld [vmem:[#allocation14_spill] sm:$0xff] }
 0x68a   :  { %9519 = vmatprep.mubr.bf16.mxu0 %v19308_v18  ;;  %v14018_v18 = vld [vmem:[%s19060_s0 + $0x4c4] ss:$24 sps:$4 sm:$0xff]   ;;  %10331 = vmatpush1.bf16.msra.mxu1 %v13678_v10 }
 0x68b   :  { %10332 = vmatprep.subr.bf16.mxu1 %v14025_v2 }
 0x690   :  { %7099 = vmatmul.mubr.bf16.gmra.mrb[28].mxu1 %v13995_v31  ;;  %v14019_v31 = vld [vmem:[%s19060_s0 + $0x4c0] ss:$24 sps:$4 sm:$0xff]  }
 0x691   :  { %9520 = vmatmul.mubr.bf16.gmra.mrb[24].mxu0 %v19309_v19  ;;  %7108 = vmatprep.mubr.bf16.mxu1 %v13996_v7  ;;  %v19333_v19 = vld [vmem:[#allocation16_spill] sm:$0xff] }
 0x692   :  { %9529 = vmatprep.mubr.bf16.mxu0 %v19310_v48  ;;  %v14020_v7 = vld [vmem:[%s19060_s0 + $0x4f4] ss:$24 sps:$4 sm:$0xff]   ;;  %v19334_v48 = vld [vmem:[#allocation18_spill] sm:$0xff] }
 0x698   :  { %7109 = vmatmul.mubr.bf16.gmra.mrb[32].mxu1 %v13997_v46  ;;  %v610_v46 = vsub.s32 6, %v19335_v60 }
 0x699   :  { %9530 = vmatmul.mubr.bf16.gmra.mrb[28].mxu0 %v19311_v21  ;;  %7118 = vmatprep.mubr.bf16.mxu1 %v13998_v59  ;;  %v614_v21 = vsub.s32 7, %v19335_v60  ;;  %v14021_v59 = vld [vmem:[%s19060_s0 + $0x4f0] ss:$24 sps:$4 sm:$0xff]  }
 0x69a   :  { %9539 = vmatprep.mubr.bf16.mxu0 %v19312_v3  ;;  %v14022_v3 = vld [vmem:[%s19061_s2] sm:$0xff] }
 0x6a0   :  { %7119 = vmatmul.mubr.bf16.gmra.mrb[36].mxu1 %v13999_v13  ;;  %v18531_v13 = vrot.slane %v14022_v3, %v610_v46  ;;  %v13680_v46 = vld [vmem:[%s19063_s5 + $0x48] sm:$0xff]  }
 0x6a1   :  { %9540 = vmatmul.mubr.bf16.gmra.mrb[32].mxu0 %v19313_v5  ;;  %7128 = vmatprep.mubr.bf16.mxu1 %v14000_v15  ;;  %v19336_v5 = vld [vmem:[#allocation15_spill] sm:$0xff]  ;;  %v18534_v15 = vrot.slane %v14022_v3, %v614_v21 }
 0x6a2   :  { %9549 = vmatprep.mubr.bf16.mxu0 %v19314_v11  ;;  %v14023_v11 = vld [vmem:[%s19060_s0 + $0x524] ss:$24 sps:$4 sm:$0xff]  }
 0x6a8   :  { %7129 = vmatmul.mubr.bf16.gmra.mrb[40].mxu1 %v14001_v39 }
 0x6a9   :  { %9550 = vmatmul.mubr.bf16.gmra.mrb[36].mxu0 %v19315_v16  ;;  %7138 = vmatprep.mubr.bf16.mxu1 %v14002_v51 }
 0x6aa   :  { %9559 = vmatprep.mubr.bf16.mxu0 %v19316_v20 }
 0x6b0   :  { %7139 = vmatmul.mubr.bf16.gmra.mrb[44].mxu1 %v14003_v30 }
 0x6b1   :  { %9560 = vmatmul.mubr.bf16.gmra.mrb[40].mxu0 %v19317_v42  ;;  %7148 = vmatprep.mubr.bf16.mxu1 %v14004_v37 }
 0x6b2   :  { %9569 = vmatprep.mubr.bf16.mxu0 %v19318_v63 }
 0x6b8   :  { %7149 = vmatmul.mubr.bf16.gmra.mrb[48].mxu1 %v14005_v49 }
 0x6b9   :  { %9570 = vmatmul.mubr.bf16.gmra.mrb[44].mxu0 %v19319_v47  ;;  %7158 = vmatprep.mubr.bf16.mxu1 %v14006_v1  ;;  %v14024_v47 = vld [vmem:[%s19060_s0 + $0x520] ss:$24 sps:$4 sm:$0xff]  }
 0x6ba   :  { %9579 = vmatprep.mubr.bf16.mxu0 %v19320_v36 }
 0x6c0   :  { %7159 = vmatmul.mubr.bf16.gmra.mrb[52].mxu1 %v14007_v62 }
 0x6c1   :  { %9580 = vmatmul.mubr.bf16.gmra.mrb[48].mxu0 %v19321_v27  ;;  %7168 = vmatprep.mubr.bf16.mxu1 %v14008_v40 }
 0x6c2   :  { %9589 = vmatprep.mubr.bf16.mxu0 %v19322_v29 }
 0x6c8   :  { %7169 = vmatmul.mubr.bf16.gmra.mrb[56].mxu1 %v14009_v24 }
 0x6c9   :  { %9590 = vmatmul.mubr.bf16.gmra.mrb[52].mxu0 %v19323_v55  ;;  %7178 = vmatprep.mubr.bf16.mxu1 %v14010_v12 }
 0x6ca   :  { %9599 = vmatprep.mubr.bf16.mxu0 %v19324_v23 }
 0x6d0   :  { %7179 = vmatmul.mubr.bf16.gmra.mrb[60].mxu1 %v14011_v38 }
 0x6d1   :  { %9600 = vmatmul.mubr.bf16.gmra.mrb[56].mxu0 %v19325_v41  ;;  %7188 = vmatprep.mubr.bf16.mxu1 %v14012_v14 }
 0x6d2   :  { %9609 = vmatprep.mubr.bf16.mxu0 %v19326_v58  ;;  %v19338_v58 = vld [vmem:[#allocation29_spill] sm:$0xff] }
 0x6d8   :  { %7189 = vmatmul.mubr.bf16.gmra.mrb[64].mxu1 %v14013_v9 }
 0x6d9   :  { %9610 = vmatmul.mubr.bf16.gmra.mrb[60].mxu0 %v19327_v28  ;;  %7198 = vmatprep.mubr.bf16.mxu1 %v14014_v25 }
 0x6da   :  { %9619 = vmatprep.mubr.bf16.mxu0 %v19328_v56  ;;  %v7709_v56 = vmax.f32 %v11830_v57, 0.0 }
 0x6e0   :  { %7199 = vmatmul.mubr.bf16.gmra.mrb[68].mxu1 %v14015_v22 }
 0x6e1   :  { %9620 = vmatmul.mubr.bf16.gmra.mrb[64].mxu0 %v19329_v35  ;;  %7208 = vmatprep.mubr.bf16.mxu1 %v14016_v50 }
 0x6e2   :  { %9629 = vmatprep.mubr.bf16.mxu0 %v19330_v33 }
 0x6e8   :  { %7209 = vmatmul.mubr.bf16.gmra.mrb[72].mxu1 %v14017_v43 }
 0x6e9   :  { %9630 = vmatmul.mubr.bf16.gmra.mrb[68].mxu0 %v19331_v32  ;;  %7218 = vmatprep.mubr.bf16.mxu1 %v14018_v18  ;;  %v7941_v32 = vpack.c.bf16 %v7709_v56, %v7709_v56 }
 0x6ea   :  { %9639 = vmatprep.mubr.bf16.mxu0 %v19332_v0 }
 0x6f0   :  { %7219 = vmatmul.mubr.bf16.gmra.mrb[76].mxu1 %v14019_v31 }
 0x6f1   :  { %9640 = vmatmul.mubr.bf16.gmra.mrb[72].mxu0 %v19333_v19  ;;  %7228 = vmatprep.mubr.bf16.mxu1 %v14020_v7 }
 0x6f2   :  { %9649 = vmatprep.mubr.bf16.mxu0 %v19334_v48 }
 0x6f8   :  { %7229 = vmatmul.mubr.bf16.gmra.mrb[80].mxu1 %v14021_v59 }
 0x6f9   :  { %9650 = vmatmul.mubr.bf16.gmra.mrb[76].mxu0 %v19336_v5  ;;  %7238 = vmatprep.mubr.bf16.mxu1 %v14023_v11 }
 0x6fa   :  { %9659 = vmatprep.mubr.bf16.mxu0 %v17738_v44  ;;  %v11831_v44 = vadd.f32 %v17760_v34, %v16826_v6 }
 0x6fb   :  { %v6970_v39 = vpop.f32.mrb[232].mxu1 }
 0x6fc   :  { %v11832_v16 = vadd.f32 %v6970_v39, %v18531_v13  ;;  %v6972_v51 = vpop.f32.mrb[233].mxu1  ;;  %v7710_v29 = vmax.f32 %v11831_v44, 0.0 }
 0x6fd   :  { %v11833_v20 = vadd.f32 %v6972_v51, %v18534_v15  ;;  %v6974_v45 = vpop.f32.mrb[234].mxu1 }
 0x6fe   :  { %v11834_v30 = vadd.f32 %v6974_v45, %v18531_v13  ;;  %v6976_v42 = vpop.f32.mrb[235].mxu1  ;;  %v7263_v63 = vmax.f32 %v11832_v16, 0.0  ;;  %v7942_v38 = vpack.c.bf16 %v7710_v29, %v7710_v29 }
 0x6ff   :  { %v11835_v37 = vadd.f32 %v6976_v42, %v18534_v15  ;;  %v7264_v1 = vmax.f32 %v11833_v20, 0.0 }
 0x700   :  { %v7271_v49 = vmax.f32 %v11834_v30, 0.0  ;;  %7239 = vmatmul.mubr.bf16.gmra.mrb[84].mxu1 %v14024_v47 }
 0x701   :  { %v7272_v36 = vmax.f32 %v11835_v37, 0.0  ;;  %9660 = vmatmul.mubr.bf16.gmra.mrb[80].mxu0 %v17732_v53  ;;  %7248 = vmatprep.mubr.bf16.mxu1 %v19337_v54  ;;  %v13679_v53 = vld [vmem:[%s19063_s5 + $0x40] sm:$0xff]  }
 0x702   :  { %v7719_v62 = vpack.c.bf16 %v7271_v49, %v7263_v63  ;;  %9669 = vmatprep.mubr.bf16.mxu0 %v17756_v8  ;;  %10333 = vmatpush1.bf16.msra.mxu1 %v13679_v53 }
 0x703   :  { %v7720_v27 = vpack.c.bf16 %v7272_v36, %v7264_v1  ;;  %v6980_v40 = vpop.f32.mrb[236].mxu1  ;;  %10334 = vmatprep.subr.bf16.mxu1 %v14025_v2 }
 0x704   :  { %v11836_v6 = vadd.f32 %v6980_v40, %v18531_v13  ;;  %v6982_v34 = vpop.f32.mrb[237].mxu1 }
 0x705   :  { %v11837_v24 = vadd.f32 %v6982_v34, %v18534_v15  ;;  %v6984_v55 = vpop.f32.mrb[238].mxu1 }
 0x706   :  { %v11838_v12 = vadd.f32 %v6984_v55, %v18531_v13  ;;  %v6986_v23 = vpop.f32.mrb[239].mxu1  ;;  %v7279_v41 = vmax.f32 %v11836_v6, 0.0  ;;  %10335 = vmatpush1.bf16.msra.mxu1 %v13680_v46  ;;  %v13681_v55 = vld [vmem:[%s19063_s5 + $0x50] sm:$0xff]  }
 0x707   :  { %v11839_v8 = vadd.f32 %v6986_v23, %v18534_v15  ;;  %v7280_v9 = vmax.f32 %v11837_v24, 0.0  ;;  %10336 = vmatprep.subr.bf16.mxu1 %v14025_v2 }
 0x708   :  { %v7287_v14 = vmax.f32 %v11838_v12, 0.0  ;;  %7249 = vmatmul.mubr.bf16.gmra.mrb[88].mxu1 %v19338_v58 }
 0x709   :  { %v7288_v28 = vmax.f32 %v11839_v8, 0.0  ;;  %9670 = vmatmul.mubr.bf16.gmra.mrb[84].mxu0 %v17754_v52 }
 0x70a   :  { %v7727_v25 = vpack.c.bf16 %v7287_v14, %v7279_v41  ;;  %9679 = vmatprep.mubr.bf16.mxu0 %v7942_v38  ;;  %10337 = vmatpush1.bf16.msra.mxu1 %v13681_v55 }
 0x70b   :  { %v7728_v17 = vpack.c.bf16 %v7288_v28, %v7280_v9  ;;  %v6990_v22 = vpop.f32.mrb[240].mxu1  ;;  %10338 = vmatprep.subr.bf16.mxu1 %v14025_v2 }
 0x70c   :  { %v11840_v61 = vadd.f32 %v6990_v22, %v18531_v13  ;;  %v6992_v26 = vpop.f32.mrb[241].mxu1 }
 0x70d   :  { %v11841_v35 = vadd.f32 %v6992_v26, %v18534_v15  ;;  %v6994_v50 = vpop.f32.mrb[242].mxu1 }
 0x70e   :  { %v11842_v33 = vadd.f32 %v6994_v50, %v18531_v13  ;;  %v6996_v43 = vpop.f32.mrb[243].mxu1  ;;  %v7295_v18 = vmax.f32 %v11840_v61, 0.0 }
 0x70f   :  { %v11843_v52 = vadd.f32 %v6996_v43, %v18534_v15  ;;  %v7296_v4 = vmax.f32 %v11841_v35, 0.0 }
 0x710   :  { %v7303_v0 = vmax.f32 %v11842_v33, 0.0 }
 0x711   :  { %v7304_v31 = vmax.f32 %v11843_v52, 0.0  ;;  %9680 = vmatmul.mubr.bf16.gmra.mrb[88].mxu0 %v7941_v32 }
 0x712   :  { %v7735_v19 = vpack.c.bf16 %v7303_v0, %v7295_v18  ;;  %9720 = vmatprep.mubr.bf16.mxu0 %v7720_v27 }
 0x713   :  { %v7736_v7 = vpack.c.bf16 %v7304_v31, %v7296_v4  ;;  %v7000_v48 = vpop.f32.mrb[244].mxu1 }
 0x714   :  { %v11844_v21 = vadd.f32 %v7000_v48, %v18531_v13  ;;  %v7002_v59 = vpop.f32.mrb[245].mxu1 }
 0x715   :  { %v11845_v3 = vadd.f32 %v7002_v59, %v18534_v15  ;;  %v7004_v5 = vpop.f32.mrb[246].mxu1 }
 0x716   :  { %v11846_v11 = vadd.f32 %v7004_v5, %v18531_v13  ;;  %v7006_v10 = vpop.f32.mrb[247].mxu1  ;;  %v7311_v16 = vmax.f32 %v11844_v21, 0.0 }
 0x717   :  { %v11847_v39 = vadd.f32 %v7006_v10, %v18534_v15  ;;  %v7312_v20 = vmax.f32 %v11845_v3, 0.0 }
 0x718   :  { %v7319_v51 = vmax.f32 %v11846_v11, 0.0 }
 0x719   :  { %v7320_v45 = vmax.f32 %v11847_v39, 0.0  ;;  %9721 = vmatmul.mubr.bf16.vlgmr.msra.gmra.mrb[232].mxu0 %v7719_v62 }
 0x71a   :  { %v7743_v30 = vpack.c.bf16 %v7319_v51, %v7311_v16  ;;  %9730 = vmatprep.mubr.bf16.mxu0 %v7728_v17 }
 0x71b   :  { %v7744_v42 = vpack.c.bf16 %v7320_v45, %v7312_v20  ;;  %v7010_v37 = vpop.f32.mrb[248].mxu1 }
 0x71c   :  { %v11848_v44 = vadd.f32 %v7010_v37, %v18531_v13  ;;  %v7012_v63 = vpop.f32.mrb[249].mxu1 }
 0x71d   :  { %v11849_v49 = vadd.f32 %v7012_v63, %v18534_v15  ;;  %v7014_v47 = vpop.f32.mrb[250].mxu1 }
 0x71e   :  { %v11850_v1 = vadd.f32 %v7014_v47, %v18531_v13  ;;  %v7016_v36 = vpop.f32.mrb[251].mxu1  ;;  %v7327_v27 = vmax.f32 %v11848_v44, 0.0 }
 0x71f   :  { %v11851_v54 = vadd.f32 %v7016_v36, %v18534_v15  ;;  %v7328_v29 = vmax.f32 %v11849_v49, 0.0 }
 0x720   :  { %v7335_v40 = vmax.f32 %v11850_v1, 0.0 }
 0x721   :  { %v7336_v6 = vmax.f32 %v11851_v54, 0.0  ;;  %9731 = vmatmul.mubr.bf16.gmra.mrb[236].mxu0 %v7727_v25 }
 0x722   :  { %v7751_v62 = vpack.c.bf16 %v7335_v40, %v7327_v27  ;;  %9740 = vmatprep.mubr.bf16.mxu0 %v7736_v7  ;;  %v13682_v7 = vld [vmem:[%s19063_s5 + $0x58] sm:$0xff]  }
 0x723   :  { %v7752_v34 = vpack.c.bf16 %v7336_v6, %v7328_v29  ;;  %v7020_v24 = vpop.f32.mrb[252].mxu1  ;;  %10339 = vmatpush1.bf16.msra.mxu1 %v13682_v7  ;;  %v13683_v6 = vld [vmem:[%s19063_s5 + $0x60] sm:$0xff]  }
 0x724   :  { %v11852_v12 = vadd.f32 %v7020_v24, %v18531_v13  ;;  %v7022_v23 = vpop.f32.mrb[253].mxu1  ;;  %10340 = vmatprep.subr.bf16.mxu1 %v14025_v2 }
 0x725   :  { %v11853_v53 = vadd.f32 %v7022_v23, %v18534_v15  ;;  %v7024_v57 = vpop.f32.mrb[254].mxu1 }
 0x726   :  { %v11854_v8 = vadd.f32 %v7024_v57, %v18531_v13  ;;  %v7026_v38 = vpop.f32.mrb[255].mxu1  ;;  %v7343_v14 = vmax.f32 %v11852_v12, 0.0 }
 0x727   :  { %v11855_v41 = vadd.f32 %v7026_v38, %v18534_v15  ;;  %v7344_v9 = vmax.f32 %v11853_v53, 0.0  ;;  %10341 = vmatpush1.bf16.msra.mxu1 %v13683_v6 }
 0x728   :  { %v7351_v58 = vmax.f32 %v11854_v8, 0.0  ;;  %10342 = vmatprep.subr.bf16.mxu1 %v14025_v2 }
 0x729   :  { %v7352_v28 = vmax.f32 %v11855_v41, 0.0  ;;  %9741 = vmatmul.mubr.bf16.gmra.mrb[240].mxu0 %v7735_v19 }
 0x72a   :  { %v7759_v25 = vpack.c.bf16 %v7351_v58, %v7343_v14  ;;  %9750 = vmatprep.mubr.bf16.mxu0 %v7744_v42 }
 0x72b   :  { %v7760_v56 = vpack.c.bf16 %v7352_v28, %v7344_v9  ;;  %v7030_v17 = vpop.f32.mrb[0].mxu1 }
 0x72c   :  { %v11856_v22 = vadd.f32 %v7030_v17, %v18531_v13  ;;  %v7032_v61 = vpop.f32.mrb[1].mxu1 }
 0x72d   :  { %v11857_v26 = vadd.f32 %v7032_v61, %v18534_v15  ;;  %v7034_v35 = vpop.f32.mrb[2].mxu1 }
 0x72e   :  { %v11858_v50 = vadd.f32 %v7034_v35, %v18531_v13  ;;  %v7036_v33 = vpop.f32.mrb[3].mxu1  ;;  %v7359_v32 = vmax.f32 %v11856_v22, 0.0 }
 0x72f   :  { %v11859_v43 = vadd.f32 %v7036_v33, %v18534_v15  ;;  %v7360_v18 = vmax.f32 %v11857_v26, 0.0  ;;  %v13684_v33 = vld [vmem:[%s19063_s5 + $0x68] sm:$0xff]  }
 0x730   :  { %v7367_v52 = vmax.f32 %v11858_v50, 0.0  ;;  %10343 = vmatpush1.bf16.msra.mxu1 %v13684_v33 }
 0x731   :  { %v7368_v0 = vmax.f32 %v11859_v43, 0.0  ;;  %9751 = vmatmul.mubr.bf16.gmra.mrb[244].mxu0 %v7743_v30  ;;  %10344 = vmatprep.subr.bf16.mxu1 %v14025_v2 }
 0x732   :  { %v7767_v4 = vpack.c.bf16 %v7367_v52, %v7359_v32  ;;  %9760 = vmatprep.mubr.bf16.mxu0 %v7752_v34 }
 0x733   :  { %v7768_v31 = vpack.c.bf16 %v7368_v0, %v7360_v18  ;;  %v7040_v19 = vpop.f32.mrb[4].mxu1 }
 0x734   :  { %v11860_v48 = vadd.f32 %v7040_v19, %v18531_v13  ;;  %v7042_v46 = vpop.f32.mrb[5].mxu1 }
 0x735   :  { %v11861_v21 = vadd.f32 %v7042_v46, %v18534_v15  ;;  %v7044_v59 = vpop.f32.mrb[6].mxu1 }
 0x736   :  { %v11862_v3 = vadd.f32 %v7044_v59, %v18531_v13  ;;  %v7046_v5 = vpop.f32.mrb[7].mxu1  ;;  %v7375_v10 = vmax.f32 %v11860_v48, 0.0 }
 0x737   :  { %v11863_v11 = vadd.f32 %v7046_v5, %v18534_v15  ;;  %v7376_v16 = vmax.f32 %v11861_v21, 0.0 }
 0x738   :  { %v7383_v39 = vmax.f32 %v11862_v3, 0.0 }
 0x739   :  { %v7384_v51 = vmax.f32 %v11863_v11, 0.0  ;;  %9761 = vmatmul.mubr.bf16.gmra.mrb[248].mxu0 %v7751_v62 }
 0x73a   :  { %v7775_v20 = vpack.c.bf16 %v7383_v39, %v7375_v10  ;;  %9770 = vmatprep.mubr.bf16.mxu0 %v7760_v56 }
 0x73b   :  { %v7776_v45 = vpack.c.bf16 %v7384_v51, %v7376_v16  ;;  %v7050_v30 = vpop.f32.mrb[8].mxu1 }
 0x73c   :  { %v11864_v42 = vadd.f32 %v7050_v30, %v18531_v13  ;;  %v7052_v37 = vpop.f32.mrb[9].mxu1 }
 0x73d   :  { %v11865_v44 = vadd.f32 %v7052_v37, %v18534_v15  ;;  %v7054_v63 = vpop.f32.mrb[10].mxu1 }
 0x73e   :  { %v11866_v49 = vadd.f32 %v7054_v63, %v18531_v13  ;;  %v7056_v47 = vpop.f32.mrb[11].mxu1  ;;  %v7391_v36 = vmax.f32 %v11864_v42, 0.0 }
 0x73f   :  { %v11867_v1 = vadd.f32 %v7056_v47, %v18534_v15  ;;  %v7392_v27 = vmax.f32 %v11865_v44, 0.0 }
 0x740   :  { %v7399_v54 = vmax.f32 %v11866_v49, 0.0 }
 0x741   :  { %v7400_v40 = vmax.f32 %v11867_v1, 0.0  ;;  %9771 = vmatmul.mubr.bf16.gmra.mrb[252].mxu0 %v7759_v25 }
 0x742   :  { %v7783_v29 = vpack.c.bf16 %v7399_v54, %v7391_v36  ;;  %9780 = vmatprep.mubr.bf16.mxu0 %v7768_v31 }
 0x743   :  { %v7784_v62 = vpack.c.bf16 %v7400_v40, %v7392_v27  ;;  %v7060_v34 = vpop.f32.mrb[12].mxu1 }
 0x744   :  { %v11868_v24 = vadd.f32 %v7060_v34, %v18531_v13  ;;  %v7062_v55 = vpop.f32.mrb[13].mxu1 }
 0x745   :  { %v11869_v12 = vadd.f32 %v7062_v55, %v18534_v15  ;;  %v7064_v23 = vpop.f32.mrb[14].mxu1 }
 0x746   :  { %v11870_v53 = vadd.f32 %v7064_v23, %v18531_v13  ;;  %v7066_v57 = vpop.f32.mrb[15].mxu1  ;;  %v7407_v38 = vmax.f32 %v11868_v24, 0.0 }
 0x747   :  { %v11871_v8 = vadd.f32 %v7066_v57, %v18534_v15  ;;  %v7408_v14 = vmax.f32 %v11869_v12, 0.0 }
 0x748   :  { %v7415_v41 = vmax.f32 %v11870_v53, 0.0 }
 0x749   :  { %v7416_v58 = vmax.f32 %v11871_v8, 0.0  ;;  %9781 = vmatmul.mubr.bf16.gmra.mrb[0].mxu0 %v7767_v4 }
 0x74a   :  { %v7791_v9 = vpack.c.bf16 %v7415_v41, %v7407_v38  ;;  %9790 = vmatprep.mubr.bf16.mxu0 %v7776_v45  ;;  %v13685_v45 = vld [vmem:[%s19063_s5 + $0x70] sm:$0xff]  }
 0x74b   :  { %v7792_v28 = vpack.c.bf16 %v7416_v58, %v7408_v14  ;;  %v7070_v25 = vpop.f32.mrb[16].mxu1  ;;  %10345 = vmatpush1.bf16.msra.mxu1 %v13685_v45  ;;  %v13686_v14 = vld [vmem:[%s19063_s5 + $0x78] sm:$0xff]  }
 0x74c   :  { %v11872_v56 = vadd.f32 %v7070_v25, %v18531_v13  ;;  %v7072_v17 = vpop.f32.mrb[17].mxu1  ;;  %10346 = vmatprep.subr.bf16.mxu1 %v14025_v2 }
 0x74d   :  { %v11873_v22 = vadd.f32 %v7072_v17, %v18534_v15  ;;  %v7074_v61 = vpop.f32.mrb[18].mxu1 }
 0x74e   :  { %v11874_v26 = vadd.f32 %v7074_v61, %v18531_v13  ;;  %v7076_v35 = vpop.f32.mrb[19].mxu1  ;;  %v7423_v43 = vmax.f32 %v11872_v56, 0.0 }
 0x74f   :  { %v11875_v50 = vadd.f32 %v7076_v35, %v18534_v15  ;;  %v7424_v52 = vmax.f32 %v11873_v22, 0.0  ;;  %10347 = vmatpush1.bf16.msra.mxu1 %v13686_v14 }
 0x750   :  { %v7431_v32 = vmax.f32 %v11874_v26, 0.0 }
 0x751   :  { %v7432_v18 = vmax.f32 %v11875_v50, 0.0  ;;  %9791 = vmatmul.mubr.bf16.gmra.mrb[4].mxu0 %v7775_v20 }
 0x752   :  { %v7799_v0 = vpack.c.bf16 %v7431_v32, %v7423_v43  ;;  %9800 = vmatprep.mubr.bf16.mxu0 %v7784_v62 }
 0x753   :  { %v7800_v4 = vpack.c.bf16 %v7432_v18, %v7424_v52  ;;  %v7080_v31 = vpop.f32.mrb[20].mxu1 }
 0x754   :  { %v11876_v19 = vadd.f32 %v7080_v31, %v18531_v13  ;;  %v7082_v7 = vpop.f32.mrb[21].mxu1 }
 0x755   :  { %v11877_v48 = vadd.f32 %v7082_v7, %v18534_v15  ;;  %v7084_v46 = vpop.f32.mrb[22].mxu1 }
 0x756   :  { %v11878_v21 = vadd.f32 %v7084_v46, %v18531_v13  ;;  %v7086_v59 = vpop.f32.mrb[23].mxu1  ;;  %v7439_v5 = vmax.f32 %v11876_v19, 0.0 }
 0x757   :  { %v11879_v3 = vadd.f32 %v7086_v59, %v18534_v15  ;;  %v7440_v10 = vmax.f32 %v11877_v48, 0.0 }
 0x758   :  { %v7447_v11 = vmax.f32 %v11878_v21, 0.0 }
 0x759   :  { %v7448_v39 = vmax.f32 %v11879_v3, 0.0  ;;  %9801 = vmatmul.mubr.bf16.gmra.mrb[8].mxu0 %v7783_v29 }
 0x75a   :  { %v7807_v16 = vpack.c.bf16 %v7447_v11, %v7439_v5  ;;  %9810 = vmatprep.mubr.bf16.mxu0 %v7792_v28 }
 0x75b   :  { %v7808_v51 = vpack.c.bf16 %v7448_v39, %v7440_v10  ;;  %v7090_v20 = vpop.f32.mrb[24].mxu1 }
 0x75c   :  { %v11880_v30 = vadd.f32 %v7090_v20, %v18531_v13  ;;  %v7092_v42 = vpop.f32.mrb[25].mxu1 }
 0x75d   :  { %v11881_v37 = vadd.f32 %v7092_v42, %v18534_v15  ;;  %v7094_v44 = vpop.f32.mrb[26].mxu1 }
 0x75e   :  { %v11882_v63 = vadd.f32 %v7094_v44, %v18531_v13  ;;  %v7096_v49 = vpop.f32.mrb[27].mxu1  ;;  %v7455_v1 = vmax.f32 %v11880_v30, 0.0 }
 0x75f   :  { %v11883_v47 = vadd.f32 %v7096_v49, %v18534_v15  ;;  %v7456_v54 = vmax.f32 %v11881_v37, 0.0 }
 0x760   :  { %v7463_v36 = vmax.f32 %v11882_v63, 0.0 }
 0x761   :  { %v7464_v27 = vmax.f32 %v11883_v47, 0.0  ;;  %9811 = vmatmul.mubr.bf16.gmra.mrb[12].mxu0 %v7791_v9 }
 0x762   :  { %v7815_v40 = vpack.c.bf16 %v7463_v36, %v7455_v1  ;;  %9820 = vmatprep.mubr.bf16.mxu0 %v7800_v4 }
 0x763   :  { %v7816_v29 = vpack.c.bf16 %v7464_v27, %v7456_v54  ;;  %v7100_v6 = vpop.f32.mrb[28].mxu1 }
 0x764   :  { %v11884_v62 = vadd.f32 %v7100_v6, %v18531_v13  ;;  %v7102_v34 = vpop.f32.mrb[29].mxu1 }
 0x765   :  { %v11885_v24 = vadd.f32 %v7102_v34, %v18534_v15  ;;  %v7104_v55 = vpop.f32.mrb[30].mxu1 }
 0x766   :  { %v11886_v12 = vadd.f32 %v7104_v55, %v18531_v13  ;;  %v7106_v2 = vpop.f32.mrb[31].mxu1  ;;  %v7471_v53 = vmax.f32 %v11884_v62, 0.0 }
 0x767   :  { %v11887_v23 = vadd.f32 %v7106_v2, %v18534_v15  ;;  %v7472_v8 = vmax.f32 %v11885_v24, 0.0 }
 0x768   :  { %v7479_v57 = vmax.f32 %v11886_v12, 0.0 }
 0x769   :  { %v7480_v38 = vmax.f32 %v11887_v23, 0.0  ;;  %9821 = vmatmul.mubr.bf16.gmra.mrb[16].mxu0 %v7799_v0 }
 0x76a   :  { %v7823_v41 = vpack.c.bf16 %v7479_v57, %v7471_v53  ;;  %9830 = vmatprep.mubr.bf16.mxu0 %v7808_v51 }
 0x76b   :  { %v7824_v58 = vpack.c.bf16 %v7480_v38, %v7472_v8  ;;  %v7110_v9 = vpop.f32.mrb[32].mxu1 }
 0x76c   :  { %v11888_v28 = vadd.f32 %v7110_v9, %v18531_v13  ;;  %v7112_v25 = vpop.f32.mrb[33].mxu1 }
 0x76d   :  { %v11889_v56 = vadd.f32 %v7112_v25, %v18534_v15  ;;  %v7114_v17 = vpop.f32.mrb[34].mxu1 }
 0x76e   :  { %v11890_v22 = vadd.f32 %v7114_v17, %v18531_v13  ;;  %v7116_v61 = vpop.f32.mrb[35].mxu1  ;;  %v7487_v35 = vmax.f32 %v11888_v28, 0.0 }
 0x76f   :  { %v11891_v26 = vadd.f32 %v7116_v61, %v18534_v15  ;;  %v7488_v33 = vmax.f32 %v11889_v56, 0.0 }
 0x770   :  { %v7495_v50 = vmax.f32 %v11890_v22, 0.0 }
 0x771   :  { %v7496_v43 = vmax.f32 %v11891_v26, 0.0  ;;  %9831 = vmatmul.mubr.bf16.gmra.mrb[20].mxu0 %v7807_v16 }
 0x772   :  { %v7831_v32 = vpack.c.bf16 %v7495_v50, %v7487_v35  ;;  %9840 = vmatprep.mubr.bf16.mxu0 %v7816_v29 }
 0x773   :  { %v7832_v52 = vpack.c.bf16 %v7496_v43, %v7488_v33  ;;  %v7120_v18 = vpop.f32.mrb[36].mxu1 }
 0x774   :  { %v11892_v0 = vadd.f32 %v7120_v18, %v18531_v13  ;;  %v7122_v4 = vpop.f32.mrb[37].mxu1 }
 0x775   :  { %v11893_v31 = vadd.f32 %v7122_v4, %v18534_v15  ;;  %v7124_v19 = vpop.f32.mrb[38].mxu1 }
 0x776   :  { %v11894_v7 = vadd.f32 %v7124_v19, %v18531_v13  ;;  %v7126_v48 = vpop.f32.mrb[39].mxu1  ;;  %v7503_v21 = vmax.f32 %v11892_v0, 0.0 }
 0x777   :  { %v11895_v46 = vadd.f32 %v7126_v48, %v18534_v15  ;;  %v7504_v3 = vmax.f32 %v11893_v31, 0.0 }
 0x778   :  { %v7511_v59 = vmax.f32 %v11894_v7, 0.0 }
 0x779   :  { %v7512_v5 = vmax.f32 %v11895_v46, 0.0  ;;  %9841 = vmatmul.mubr.bf16.gmra.mrb[24].mxu0 %v7815_v40 }
 0x77a   :  { %v7839_v11 = vpack.c.bf16 %v7511_v59, %v7503_v21  ;;  %9850 = vmatprep.mubr.bf16.mxu0 %v7824_v58 }
 0x77b   :  { %v7840_v10 = vpack.c.bf16 %v7512_v5, %v7504_v3  ;;  %v7130_v39 = vpop.f32.mrb[40].mxu1 }
 0x77c   :  { %v11896_v16 = vadd.f32 %v7130_v39, %v18531_v13  ;;  %v7132_v51 = vpop.f32.mrb[41].mxu1 }
 0x77d   :  { %v11897_v20 = vadd.f32 %v7132_v51, %v18534_v15  ;;  %v7134_v45 = vpop.f32.mrb[42].mxu1 }
 0x77e   :  { %v11898_v30 = vadd.f32 %v7134_v45, %v18531_v13  ;;  %v7136_v42 = vpop.f32.mrb[43].mxu1  ;;  %v7519_v44 = vmax.f32 %v11896_v16, 0.0 }
 0x77f   :  { %v11899_v37 = vadd.f32 %v7136_v42, %v18534_v15  ;;  %v7520_v49 = vmax.f32 %v11897_v20, 0.0 }
 0x780   :  { %v7527_v63 = vmax.f32 %v11898_v30, 0.0 }
 0x781   :  { %v7528_v47 = vmax.f32 %v11899_v37, 0.0  ;;  %9851 = vmatmul.mubr.bf16.gmra.mrb[28].mxu0 %v7823_v41 }
 0x782   :  { %v7847_v1 = vpack.c.bf16 %v7527_v63, %v7519_v44  ;;  %9860 = vmatprep.mubr.bf16.mxu0 %v7832_v52 }
 0x783   :  { %v7848_v36 = vpack.c.bf16 %v7528_v47, %v7520_v49  ;;  %v7140_v54 = vpop.f32.mrb[44].mxu1 }
 0x784   :  { %v11900_v27 = vadd.f32 %v7140_v54, %v18531_v13  ;;  %v7142_v40 = vpop.f32.mrb[45].mxu1 }
 0x785   :  { %v11901_v29 = vadd.f32 %v7142_v40, %v18534_v15  ;;  %v7144_v6 = vpop.f32.mrb[46].mxu1 }
 0x786   :  { %v11902_v62 = vadd.f32 %v7144_v6, %v18531_v13  ;;  %v7146_v34 = vpop.f32.mrb[47].mxu1  ;;  %v7535_v55 = vmax.f32 %v11900_v27, 0.0 }
 0x787   :  { %v11903_v24 = vadd.f32 %v7146_v34, %v18534_v15  ;;  %v7536_v2 = vmax.f32 %v11901_v29, 0.0 }
 0x788   :  { %v7543_v12 = vmax.f32 %v11902_v62, 0.0 }
 0x789   :  { %v7544_v23 = vmax.f32 %v11903_v24, 0.0  ;;  %9861 = vmatmul.mubr.bf16.gmra.mrb[32].mxu0 %v7831_v32 }
 0x78a   :  { %v7855_v53 = vpack.c.bf16 %v7543_v12, %v7535_v55  ;;  %9870 = vmatprep.mubr.bf16.mxu0 %v7840_v10 }
 0x78b   :  { %v7856_v57 = vpack.c.bf16 %v7544_v23, %v7536_v2  ;;  %v7150_v8 = vpop.f32.mrb[48].mxu1 }
 0x78c   :  { %v11904_v38 = vadd.f32 %v7150_v8, %v18531_v13  ;;  %v7152_v41 = vpop.f32.mrb[49].mxu1 }
 0x78d   :  { %v11905_v14 = vadd.f32 %v7152_v41, %v18534_v15  ;;  %v7154_v58 = vpop.f32.mrb[50].mxu1 }
 0x78e   :  { %v11906_v9 = vadd.f32 %v7154_v58, %v18531_v13  ;;  %v7156_v28 = vpop.f32.mrb[51].mxu1  ;;  %v7551_v56 = vmax.f32 %v11904_v38, 0.0 }
 0x78f   :  { %v11907_v25 = vadd.f32 %v7156_v28, %v18534_v15  ;;  %v7552_v22 = vmax.f32 %v11905_v14, 0.0 }
 0x790   :  { %v7559_v17 = vmax.f32 %v11906_v9, 0.0 }
 0x791   :  { %v7560_v61 = vmax.f32 %v11907_v25, 0.0  ;;  %9871 = vmatmul.mubr.bf16.gmra.mrb[36].mxu0 %v7839_v11 }
 0x792   :  { %v7863_v26 = vpack.c.bf16 %v7559_v17, %v7551_v56  ;;  %9880 = vmatprep.mubr.bf16.mxu0 %v7848_v36 }
 0x793   :  { %v7864_v35 = vpack.c.bf16 %v7560_v61, %v7552_v22  ;;  %v7160_v50 = vpop.f32.mrb[52].mxu1 }
 0x794   :  { %v11908_v33 = vadd.f32 %v7160_v50, %v18531_v13  ;;  %v7162_v43 = vpop.f32.mrb[53].mxu1 }
 0x795   :  { %v11909_v32 = vadd.f32 %v7162_v43, %v18534_v15  ;;  %v7164_v52 = vpop.f32.mrb[54].mxu1 }
 0x796   :  { %v11910_v18 = vadd.f32 %v7164_v52, %v18531_v13  ;;  %v7166_v0 = vpop.f32.mrb[55].mxu1  ;;  %v7567_v31 = vmax.f32 %v11908_v33, 0.0 }
 0x797   :  { %v11911_v4 = vadd.f32 %v7166_v0, %v18534_v15  ;;  %v7568_v7 = vmax.f32 %v11909_v32, 0.0 }
 0x798   :  { %v7575_v19 = vmax.f32 %v11910_v18, 0.0 }
 0x799   :  { %v7576_v48 = vmax.f32 %v11911_v4, 0.0  ;;  %9881 = vmatmul.mubr.bf16.gmra.mrb[40].mxu0 %v7847_v1 }
 0x79a   :  { %v7871_v46 = vpack.c.bf16 %v7575_v19, %v7567_v31  ;;  %9890 = vmatprep.mubr.bf16.mxu0 %v7856_v57 }
 0x79b   :  { %v7872_v21 = vpack.c.bf16 %v7576_v48, %v7568_v7  ;;  %v7170_v59 = vpop.f32.mrb[56].mxu1 }
 0x79c   :  { %v11912_v3 = vadd.f32 %v7170_v59, %v18531_v13  ;;  %v7172_v5 = vpop.f32.mrb[57].mxu1 }
 0x79d   :  { %v11913_v11 = vadd.f32 %v7172_v5, %v18534_v15  ;;  %v7174_v10 = vpop.f32.mrb[58].mxu1 }
 0x79e   :  { %v11914_v39 = vadd.f32 %v7174_v10, %v18531_v13  ;;  %v7176_v16 = vpop.f32.mrb[59].mxu1  ;;  %v7583_v20 = vmax.f32 %v11912_v3, 0.0 }
 0x79f   :  { %v11915_v51 = vadd.f32 %v7176_v16, %v18534_v15  ;;  %v7584_v30 = vmax.f32 %v11913_v11, 0.0 }
 0x7a0   :  { %v7591_v45 = vmax.f32 %v11914_v39, 0.0 }
 0x7a1   :  { %v7592_v42 = vmax.f32 %v11915_v51, 0.0  ;;  %9891 = vmatmul.mubr.bf16.gmra.mrb[44].mxu0 %v7855_v53 }
 0x7a2   :  { %v7879_v37 = vpack.c.bf16 %v7591_v45, %v7583_v20  ;;  %9900 = vmatprep.mubr.bf16.mxu0 %v7864_v35 }
 0x7a3   :  { %v7880_v44 = vpack.c.bf16 %v7592_v42, %v7584_v30  ;;  %v7180_v63 = vpop.f32.mrb[60].mxu1 }
 0x7a4   :  { %v11916_v49 = vadd.f32 %v7180_v63, %v18531_v13  ;;  %v7182_v47 = vpop.f32.mrb[61].mxu1 }
 0x7a5   :  { %v11917_v1 = vadd.f32 %v7182_v47, %v18534_v15  ;;  %v7184_v36 = vpop.f32.mrb[62].mxu1 }
 0x7a6   :  { %v11918_v54 = vadd.f32 %v7184_v36, %v18531_v13  ;;  %v7186_v27 = vpop.f32.mrb[63].mxu1  ;;  %v7599_v29 = vmax.f32 %v11916_v49, 0.0 }
 0x7a7   :  { %v11919_v40 = vadd.f32 %v7186_v27, %v18534_v15  ;;  %v7600_v62 = vmax.f32 %v11917_v1, 0.0 }
 0x7a8   :  { %v7607_v6 = vmax.f32 %v11918_v54, 0.0 }
 0x7a9   :  { %v7608_v34 = vmax.f32 %v11919_v40, 0.0  ;;  %9901 = vmatmul.mubr.bf16.gmra.mrb[48].mxu0 %v7863_v26 }
 0x7aa   :  { %v7887_v24 = vpack.c.bf16 %v7607_v6, %v7599_v29  ;;  %9910 = vmatprep.mubr.bf16.mxu0 %v7872_v21 }
 0x7ab   :  { %v7888_v55 = vpack.c.bf16 %v7608_v34, %v7600_v62  ;;  %v7190_v12 = vpop.f32.mrb[64].mxu1 }
 0x7ac   :  { %v11920_v2 = vadd.f32 %v7190_v12, %v18531_v13  ;;  %v7192_v23 = vpop.f32.mrb[65].mxu1 }
 0x7ad   :  { %v11921_v53 = vadd.f32 %v7192_v23, %v18534_v15  ;;  %v7194_v57 = vpop.f32.mrb[66].mxu1 }
 0x7ae   :  { %v11922_v8 = vadd.f32 %v7194_v57, %v18531_v13  ;;  %v7196_v38 = vpop.f32.mrb[67].mxu1  ;;  %v7615_v14 = vmax.f32 %v11920_v2, 0.0 }
 0x7af   :  { %v11923_v41 = vadd.f32 %v7196_v38, %v18534_v15  ;;  %v7616_v9 = vmax.f32 %v11921_v53, 0.0 }
 0x7b0   :  { %v7623_v58 = vmax.f32 %v11922_v8, 0.0 }
 0x7b1   :  { %v7624_v28 = vmax.f32 %v11923_v41, 0.0  ;;  %9911 = vmatmul.mubr.bf16.gmra.mrb[52].mxu0 %v7871_v46 }
 0x7b2   :  { %v7895_v25 = vpack.c.bf16 %v7623_v58, %v7615_v14  ;;  %9920 = vmatprep.mubr.bf16.mxu0 %v7880_v44 }
 0x7b3   :  { %v7896_v56 = vpack.c.bf16 %v7624_v28, %v7616_v9  ;;  %v7200_v17 = vpop.f32.mrb[68].mxu1 }
 0x7b4   :  { %v11924_v22 = vadd.f32 %v7200_v17, %v18531_v13  ;;  %v7202_v61 = vpop.f32.mrb[69].mxu1 }
 0x7b5   :  { %v11925_v26 = vadd.f32 %v7202_v61, %v18534_v15  ;;  %v7204_v35 = vpop.f32.mrb[70].mxu1 }
 0x7b6   :  { %v11926_v50 = vadd.f32 %v7204_v35, %v18531_v13  ;;  %v7206_v33 = vpop.f32.mrb[71].mxu1  ;;  %v7631_v32 = vmax.f32 %v11924_v22, 0.0 }
 0x7b7   :  { %v11927_v43 = vadd.f32 %v7206_v33, %v18534_v15  ;;  %v7632_v18 = vmax.f32 %v11925_v26, 0.0 }
 0x7b8   :  { %v7639_v52 = vmax.f32 %v11926_v50, 0.0 }
 0x7b9   :  { %v7640_v0 = vmax.f32 %v11927_v43, 0.0  ;;  %9921 = vmatmul.mubr.bf16.gmra.mrb[56].mxu0 %v7879_v37 }
 0x7ba   :  { %v7903_v4 = vpack.c.bf16 %v7639_v52, %v7631_v32  ;;  %9930 = vmatprep.mubr.bf16.mxu0 %v7888_v55 }
 0x7bb   :  { %v7904_v31 = vpack.c.bf16 %v7640_v0, %v7632_v18  ;;  %v7210_v19 = vpop.f32.mrb[72].mxu1 }
 0x7bc   :  { %v11928_v7 = vadd.f32 %v7210_v19, %v18531_v13  ;;  %v7212_v48 = vpop.f32.mrb[73].mxu1 }
 0x7bd   :  { %v11929_v46 = vadd.f32 %v7212_v48, %v18534_v15  ;;  %v7214_v21 = vpop.f32.mrb[74].mxu1 }
 0x7be   :  { %v11930_v59 = vadd.f32 %v7214_v21, %v18531_v13  ;;  %v7216_v3 = vpop.f32.mrb[75].mxu1  ;;  %v7647_v11 = vmax.f32 %v11928_v7, 0.0  ;;  %v19339_v7 = vsub.s32 0, %v19335_v60 }
 0x7bf   :  { %v11931_v5 = vadd.f32 %v7216_v3, %v18534_v15  ;;  %v7648_v39 = vmax.f32 %v11929_v46, 0.0  ;;  %v19340_v46 = vsub.s32 1, %v19335_v60 }
 0x7c0   :  { %v7655_v10 = vmax.f32 %v11930_v59, 0.0 }
 0x7c1   :  { %v7656_v16 = vmax.f32 %v11931_v5, 0.0  ;;  %9931 = vmatmul.mubr.bf16.gmra.mrb[60].mxu0 %v7887_v24 }
 0x7c2   :  { %v7911_v51 = vpack.c.bf16 %v7655_v10, %v7647_v11  ;;  %9940 = vmatprep.mubr.bf16.mxu0 %v7896_v56 }
 0x7c3   :  { %v7912_v20 = vpack.c.bf16 %v7656_v16, %v7648_v39  ;;  %v7220_v45 = vpop.f32.mrb[76].mxu1 }
 0x7c4   :  { %v11932_v30 = vadd.f32 %v7220_v45, %v18531_v13  ;;  %v7222_v42 = vpop.f32.mrb[77].mxu1 }
 0x7c5   :  { %v11933_v37 = vadd.f32 %v7222_v42, %v18534_v15  ;;  %v7224_v44 = vpop.f32.mrb[78].mxu1 }
 0x7c6   :  { %v11934_v63 = vadd.f32 %v7224_v44, %v18531_v13  ;;  %v7226_v49 = vpop.f32.mrb[79].mxu1  ;;  %v7663_v1 = vmax.f32 %v11932_v30, 0.0 }
 0x7c7   :  { %v11935_v47 = vadd.f32 %v7226_v49, %v18534_v15  ;;  %v7664_v54 = vmax.f32 %v11933_v37, 0.0 }
 0x7c8   :  { %v7671_v36 = vmax.f32 %v11934_v63, 0.0 }
 0x7c9   :  { %v7672_v27 = vmax.f32 %v11935_v47, 0.0  ;;  %9941 = vmatmul.mubr.bf16.gmra.mrb[64].mxu0 %v7895_v25 }
 0x7ca   :  { %v7919_v40 = vpack.c.bf16 %v7671_v36, %v7663_v1  ;;  %9950 = vmatprep.mubr.bf16.mxu0 %v7904_v31  ;;  %v8073_v31 = vld [vmem:[%s19064_s4] sm:$0x3] }
 0x7cb   :  { %v7920_v29 = vpack.c.bf16 %v7672_v27, %v7664_v54  ;;  %v7230_v6 = vpop.f32.mrb[80].mxu1  ;;  %v18705_v48 = vrot.slane %v8073_v31, %v19339_v7  ;;  %v18709_v21 = vrot.slane %v8073_v31, %v19340_v46 }
 0x7cc   :  { %v11936_v62 = vadd.f32 %v7230_v6, %v18531_v13  ;;  %v7232_v34 = vpop.f32.mrb[81].mxu1 }
 0x7cd   :  { %v11937_v24 = vadd.f32 %v7232_v34, %v18534_v15  ;;  %v7234_v55 = vpop.f32.mrb[82].mxu1 }
 0x7ce   :  { %v11938_v12 = vadd.f32 %v7234_v55, %v18531_v13  ;;  %v7236_v2 = vpop.f32.mrb[83].mxu1  ;;  %v7679_v53 = vmax.f32 %v11936_v62, 0.0 }
 0x7cf   :  { %v11939_v23 = vadd.f32 %v7236_v2, %v18534_v15  ;;  %v7680_v8 = vmax.f32 %v11937_v24, 0.0 }
 0x7d0   :  { %v7687_v57 = vmax.f32 %v11938_v12, 0.0 }
 0x7d1   :  { %v7688_v38 = vmax.f32 %v11939_v23, 0.0  ;;  %9951 = vmatmul.mubr.bf16.gmra.mrb[68].mxu0 %v7903_v4 }
 0x7d2   :  { %v7927_v41 = vpack.c.bf16 %v7687_v57, %v7679_v53  ;;  %9960 = vmatprep.mubr.bf16.mxu0 %v7912_v20 }
 0x7d3   :  { %v7928_v14 = vpack.c.bf16 %v7688_v38, %v7680_v8  ;;  %v7240_v58 = vpop.f32.mrb[84].mxu1 }
 0x7d4   :  { %v11940_v9 = vadd.f32 %v7240_v58, %v18531_v13  ;;  %v7242_v28 = vpop.f32.mrb[85].mxu1 }
 0x7d5   :  { %v11941_v25 = vadd.f32 %v7242_v28, %v18534_v15  ;;  %v7244_v56 = vpop.f32.mrb[86].mxu1 }
 0x7d6   :  { %v11942_v17 = vadd.f32 %v7244_v56, %v18531_v13  ;;  %v7246_v22 = vpop.f32.mrb[87].mxu1  ;;  %v7695_v26 = vmax.f32 %v11940_v9, 0.0 }
 0x7d7   :  { %v11943_v61 = vadd.f32 %v7246_v22, %v18534_v15  ;;  %v7696_v50 = vmax.f32 %v11941_v25, 0.0 }
 0x7d8   :  { %v7703_v35 = vmax.f32 %v11942_v17, 0.0 }
 0x7d9   :  { %v7704_v33 = vmax.f32 %v11943_v61, 0.0  ;;  %9961 = vmatmul.mubr.bf16.gmra.mrb[72].mxu0 %v7911_v51 }
 0x7da   :  { %v7935_v43 = vpack.c.bf16 %v7703_v35, %v7695_v26  ;;  %9970 = vmatprep.mubr.bf16.mxu0 %v7920_v29 }
 0x7db   :  { %v7936_v32 = vpack.c.bf16 %v7704_v33, %v7696_v50  ;;  %v7250_v52 = vpop.f32.mrb[88].mxu1 }
 0x7dc   :  { %v7252_v18 = vpop.f32.mrb[89].mxu1 }
 0x7dd   :  { %v7254_v0 = vpop.f32.mrb[90].mxu1  ;;  %v11945_v19 = vadd.f32 %v7252_v18, %v18534_v15  ;;  %v11944_v15 = vadd.f32 %v7250_v52, %v18531_v13 }
 0x7de   :  { %v7255_v4 = vpop.f32.mrb[91].mxu1 }
 0x7df   :  { %v7712_v59 = vmax.f32 %v11945_v19, 0.0  ;;  %v7711_v44 = vmax.f32 %v11944_v15, 0.0 }
 0x7e1   :  { %9971 = vmatmul.mubr.bf16.gmra.mrb[76].mxu0 %v7919_v40  ;;  %v7944_v20 = vpack.c.bf16 %v7712_v59, %v7712_v59  ;;  %v7943_v27 = vpack.c.bf16 %v7711_v44, %v7711_v44 }
 0x7e2   :  { %9980 = vmatprep.mubr.bf16.mxu0 %v7928_v14 }
 0x7e9   :  { %9981 = vmatmul.mubr.bf16.gmra.mrb[80].mxu0 %v7927_v41 }
 0x7ea   :  { %9990 = vmatprep.mubr.bf16.mxu0 %v7936_v32 }
 0x7ec   :  { %v9722_v3 = vpop.f32.mrb[232].mxu0 }
 0x7ed   :  { %v11946_v5 = vadd.f32 %v9722_v3, %v18705_v48  ;;  %v9724_v11 = vpop.f32.mrb[233].mxu0 }
 0x7ee   :  { %v11947_v10 = vadd.f32 %v9724_v11, %v18709_v21  ;;  %v9726_v39 = vpop.f32.mrb[234].mxu0 }
 0x7ef   :  { %v11948_v16 = vadd.f32 %v9726_v39, %v18705_v48  ;;  %v9728_v51 = vpop.f32.mrb[235].mxu0  ;;  %v10009_v30 = vmax.f32 %v11946_v5, 0.0 }
 0x7f0   :  { %v11949_v45 = vadd.f32 %v9728_v51, %v18709_v21  ;;  %v10010_v42 = vmax.f32 %v11947_v10, 0.0 }
 0x7f1   :  { %v10011_v60 = vmax.f32 %v11948_v16, 0.0  ;;  %9991 = vmatmul.mubr.bf16.gmra.mrb[84].mxu0 %v7935_v43 }
 0x7f2   :  { %v10012_v37 = vmax.f32 %v11949_v45, 0.0  ;;  %10000 = vmatprep.mubr.bf16.mxu0 %v7944_v20 }
 0x7f3   :  { %v10123_v63 = vpack.c.bf16 %v10011_v60, %v10009_v30 }
 0x7f4   :  { %v10124_v49 = vpack.c.bf16 %v10012_v37, %v10010_v42  ;;  %v9732_v47 = vpop.f32.mrb[236].mxu0 }
 0x7f5   :  { %v11950_v1 = vadd.f32 %v9732_v47, %v18705_v48  ;;  %v9734_v36 = vpop.f32.mrb[237].mxu0 }
 0x7f6   :  { %v11951_v13 = vadd.f32 %v9734_v36, %v18709_v21  ;;  %v9736_v54 = vpop.f32.mrb[238].mxu0  ;;  %10348 = vmatprep.mubr.bf16.mxu1 %v10124_v49 }
 0x7f7   :  { %v11952_v40 = vadd.f32 %v9736_v54, %v18705_v48  ;;  %v9738_v29 = vpop.f32.mrb[239].mxu0  ;;  %10349 = vmatmul.mubr.bf16.vlgmr.msra.gmra.mrb[92].mxu1 %v10123_v63  ;;  %v10013_v62 = vmax.f32 %v11950_v1, 0.0 }
 0x7f8   :  { %v11953_v6 = vadd.f32 %v9738_v29, %v18709_v21  ;;  %v10014_v24 = vmax.f32 %v11951_v13, 0.0 }
 0x7f9   :  { %v10015_v34 = vmax.f32 %v11952_v40, 0.0  ;;  %10001 = vmatmul.mubr.bf16.gmra.mrb[88].mxu0 %v7943_v27 }
 0x7fa   :  { %v10016_v55 = vmax.f32 %v11953_v6, 0.0 }
 0x7fb   :  { %v10125_v12 = vpack.c.bf16 %v10015_v34, %v10013_v62 }
 0x7fc   :  { %v10126_v2 = vpack.c.bf16 %v10016_v55, %v10014_v24  ;;  %v9742_v23 = vpop.f32.mrb[240].mxu0 }
 0x7fd   :  { %v11954_v53 = vadd.f32 %v9742_v23, %v18705_v48  ;;  %v9744_v57 = vpop.f32.mrb[241].mxu0 }
 0x7fe   :  { %v11955_v8 = vadd.f32 %v9744_v57, %v18709_v21  ;;  %v9746_v38 = vpop.f32.mrb[242].mxu0  ;;  %10356 = vmatprep.mubr.bf16.mxu1 %v10126_v2 }
 0x7ff   :  { %v11956_v41 = vadd.f32 %v9746_v38, %v18705_v48  ;;  %v9748_v14 = vpop.f32.mrb[243].mxu0  ;;  %10357 = vmatmul.mubr.bf16.gmra.mrb[96].mxu1 %v10125_v12  ;;  %v10017_v9 = vmax.f32 %v11954_v53, 0.0 }
 0x800   :  { %v11957_v58 = vadd.f32 %v9748_v14, %v18709_v21  ;;  %v10018_v25 = vmax.f32 %v11955_v8, 0.0 }
 0x801   :  { %v10019_v28 = vmax.f32 %v11956_v41, 0.0 }
 0x802   :  { %v10020_v56 = vmax.f32 %v11957_v58, 0.0 }
 0x803   :  { %v10127_v17 = vpack.c.bf16 %v10019_v28, %v10017_v9 }
 0x804   :  { %v10128_v22 = vpack.c.bf16 %v10020_v56, %v10018_v25  ;;  %v9752_v61 = vpop.f32.mrb[244].mxu0 }
 0x805   :  { %v11958_v26 = vadd.f32 %v9752_v61, %v18705_v48  ;;  %v9754_v35 = vpop.f32.mrb[245].mxu0 }
 0x806   :  { %v11959_v50 = vadd.f32 %v9754_v35, %v18709_v21  ;;  %v9756_v33 = vpop.f32.mrb[246].mxu0  ;;  %10364 = vmatprep.mubr.bf16.mxu1 %v10128_v22 }
 0x807   :  { %v11960_v43 = vadd.f32 %v9756_v33, %v18705_v48  ;;  %v9758_v32 = vpop.f32.mrb[247].mxu0  ;;  %10365 = vmatmul.mubr.bf16.gmra.mrb[100].mxu1 %v10127_v17  ;;  %v10021_v18 = vmax.f32 %v11958_v26, 0.0 }
 0x808   :  { %v11961_v52 = vadd.f32 %v9758_v32, %v18709_v21  ;;  %v10022_v4 = vmax.f32 %v11959_v50, 0.0 }
 0x809   :  { %v10023_v0 = vmax.f32 %v11960_v43, 0.0 }
 0x80a   :  { %v10024_v31 = vmax.f32 %v11961_v52, 0.0 }
 0x80b   :  { %v10129_v19 = vpack.c.bf16 %v10023_v0, %v10021_v18 }
 0x80c   :  { %v10130_v7 = vpack.c.bf16 %v10024_v31, %v10022_v4  ;;  %v9762_v46 = vpop.f32.mrb[248].mxu0 }
 0x80d   :  { %v11962_v59 = vadd.f32 %v9762_v46, %v18705_v48  ;;  %v9764_v3 = vpop.f32.mrb[249].mxu0 }
 0x80e   :  { %v11963_v5 = vadd.f32 %v9764_v3, %v18709_v21  ;;  %v9766_v11 = vpop.f32.mrb[250].mxu0  ;;  %10372 = vmatprep.mubr.bf16.mxu1 %v10130_v7 }
 0x80f   :  { %v11964_v10 = vadd.f32 %v9766_v11, %v18705_v48  ;;  %v9768_v39 = vpop.f32.mrb[251].mxu0  ;;  %10373 = vmatmul.mubr.bf16.gmra.mrb[104].mxu1 %v10129_v19  ;;  %v10025_v16 = vmax.f32 %v11962_v59, 0.0 }
 0x810   :  { %v11965_v15 = vadd.f32 %v9768_v39, %v18709_v21  ;;  %v10026_v20 = vmax.f32 %v11963_v5, 0.0 }
 0x811   :  { %v10027_v51 = vmax.f32 %v11964_v10, 0.0 }
 0x812   :  { %v10028_v45 = vmax.f32 %v11965_v15, 0.0 }
 0x813   :  { %v10131_v30 = vpack.c.bf16 %v10027_v51, %v10025_v16 }
 0x814   :  { %v10132_v60 = vpack.c.bf16 %v10028_v45, %v10026_v20  ;;  %v9772_v42 = vpop.f32.mrb[252].mxu0 }
 0x815   :  { %v11966_v37 = vadd.f32 %v9772_v42, %v18705_v48  ;;  %v9774_v44 = vpop.f32.mrb[253].mxu0 }
 0x816   :  { %v11967_v63 = vadd.f32 %v9774_v44, %v18709_v21  ;;  %v9776_v49 = vpop.f32.mrb[254].mxu0  ;;  %10380 = vmatprep.mubr.bf16.mxu1 %v10132_v60 }
 0x817   :  { %v11968_v47 = vadd.f32 %v9776_v49, %v18705_v48  ;;  %v9778_v1 = vpop.f32.mrb[255].mxu0  ;;  %10381 = vmatmul.mubr.bf16.gmra.mrb[108].mxu1 %v10131_v30  ;;  %v10029_v13 = vmax.f32 %v11966_v37, 0.0 }
 0x818   :  { %v11969_v36 = vadd.f32 %v9778_v1, %v18709_v21  ;;  %v10030_v27 = vmax.f32 %v11967_v63, 0.0 }
 0x819   :  { %v10031_v54 = vmax.f32 %v11968_v47, 0.0 }
 0x81a   :  { %v10032_v40 = vmax.f32 %v11969_v36, 0.0 }
 0x81b   :  { %v10133_v29 = vpack.c.bf16 %v10031_v54, %v10029_v13 }
 0x81c   :  { %v10134_v6 = vpack.c.bf16 %v10032_v40, %v10030_v27  ;;  %v9782_v62 = vpop.f32.mrb[0].mxu0 }
 0x81d   :  { %v11970_v34 = vadd.f32 %v9782_v62, %v18705_v48  ;;  %v9784_v24 = vpop.f32.mrb[1].mxu0 }
 0x81e   :  { %v11971_v55 = vadd.f32 %v9784_v24, %v18709_v21  ;;  %v9786_v12 = vpop.f32.mrb[2].mxu0  ;;  %10388 = vmatprep.mubr.bf16.mxu1 %v10134_v6 }
 0x81f   :  { %v11972_v2 = vadd.f32 %v9786_v12, %v18705_v48  ;;  %v9788_v23 = vpop.f32.mrb[3].mxu0  ;;  %10389 = vmatmul.mubr.bf16.gmra.mrb[112].mxu1 %v10133_v29  ;;  %v10033_v57 = vmax.f32 %v11970_v34, 0.0 }
 0x820   :  { %v11973_v53 = vadd.f32 %v9788_v23, %v18709_v21  ;;  %v10034_v38 = vmax.f32 %v11971_v55, 0.0 }
 0x821   :  { %v10035_v8 = vmax.f32 %v11972_v2, 0.0 }
 0x822   :  { %v10036_v41 = vmax.f32 %v11973_v53, 0.0 }
 0x823   :  { %v10135_v14 = vpack.c.bf16 %v10035_v8, %v10033_v57 }
 0x824   :  { %v10136_v58 = vpack.c.bf16 %v10036_v41, %v10034_v38  ;;  %v9792_v9 = vpop.f32.mrb[4].mxu0 }
 0x825   :  { %v11974_v28 = vadd.f32 %v9792_v9, %v18705_v48  ;;  %v9794_v25 = vpop.f32.mrb[5].mxu0 }
 0x826   :  { %v11975_v56 = vadd.f32 %v9794_v25, %v18709_v21  ;;  %v9796_v17 = vpop.f32.mrb[6].mxu0  ;;  %10396 = vmatprep.mubr.bf16.mxu1 %v10136_v58 }
 0x827   :  { %v11976_v22 = vadd.f32 %v9796_v17, %v18705_v48  ;;  %v9798_v61 = vpop.f32.mrb[7].mxu0  ;;  %10397 = vmatmul.mubr.bf16.gmra.mrb[116].mxu1 %v10135_v14  ;;  %v10037_v35 = vmax.f32 %v11974_v28, 0.0 }
 0x828   :  { %v11977_v26 = vadd.f32 %v9798_v61, %v18709_v21  ;;  %v10038_v33 = vmax.f32 %v11975_v56, 0.0 }
 0x829   :  { %v10039_v50 = vmax.f32 %v11976_v22, 0.0 }
 0x82a   :  { %v10040_v43 = vmax.f32 %v11977_v26, 0.0 }
 0x82b   :  { %v10137_v32 = vpack.c.bf16 %v10039_v50, %v10037_v35 }
 0x82c   :  { %v10138_v52 = vpack.c.bf16 %v10040_v43, %v10038_v33  ;;  %v9802_v18 = vpop.f32.mrb[8].mxu0 }
 0x82d   :  { %v11978_v0 = vadd.f32 %v9802_v18, %v18705_v48  ;;  %v9804_v4 = vpop.f32.mrb[9].mxu0 }
 0x82e   :  { %v11979_v31 = vadd.f32 %v9804_v4, %v18709_v21  ;;  %v9806_v19 = vpop.f32.mrb[10].mxu0  ;;  %10404 = vmatprep.mubr.bf16.mxu1 %v10138_v52 }
 0x82f   :  { %v11980_v7 = vadd.f32 %v9806_v19, %v18705_v48  ;;  %v9808_v46 = vpop.f32.mrb[11].mxu0  ;;  %10405 = vmatmul.mubr.bf16.gmra.mrb[120].mxu1 %v10137_v32  ;;  %v10041_v3 = vmax.f32 %v11978_v0, 0.0 }
 0x830   :  { %v11981_v59 = vadd.f32 %v9808_v46, %v18709_v21  ;;  %v10042_v11 = vmax.f32 %v11979_v31, 0.0 }
 0x831   :  { %v10043_v5 = vmax.f32 %v11980_v7, 0.0 }
 0x832   :  { %v10044_v10 = vmax.f32 %v11981_v59, 0.0 }
 0x833   :  { %v10139_v39 = vpack.c.bf16 %v10043_v5, %v10041_v3 }
 0x834   :  { %v10140_v15 = vpack.c.bf16 %v10044_v10, %v10042_v11  ;;  %v9812_v16 = vpop.f32.mrb[12].mxu0 }
 0x835   :  { %v11982_v51 = vadd.f32 %v9812_v16, %v18705_v48  ;;  %v9814_v20 = vpop.f32.mrb[13].mxu0 }
 0x836   :  { %v11983_v45 = vadd.f32 %v9814_v20, %v18709_v21  ;;  %v9816_v30 = vpop.f32.mrb[14].mxu0  ;;  %10412 = vmatprep.mubr.bf16.mxu1 %v10140_v15 }
 0x837   :  { %v11984_v60 = vadd.f32 %v9816_v30, %v18705_v48  ;;  %v9818_v42 = vpop.f32.mrb[15].mxu0  ;;  %10413 = vmatmul.mubr.bf16.gmra.mrb[124].mxu1 %v10139_v39  ;;  %v10045_v44 = vmax.f32 %v11982_v51, 0.0 }
 0x838   :  { %v11985_v37 = vadd.f32 %v9818_v42, %v18709_v21  ;;  %v10046_v49 = vmax.f32 %v11983_v45, 0.0 }
 0x839   :  { %v10047_v63 = vmax.f32 %v11984_v60, 0.0 }
 0x83a   :  { %v10048_v47 = vmax.f32 %v11985_v37, 0.0 }
 0x83b   :  { %v10141_v1 = vpack.c.bf16 %v10047_v63, %v10045_v44 }
 0x83c   :  { %v10142_v36 = vpack.c.bf16 %v10048_v47, %v10046_v49  ;;  %v9822_v13 = vpop.f32.mrb[16].mxu0 }
 0x83d   :  { %v11986_v54 = vadd.f32 %v9822_v13, %v18705_v48  ;;  %v9824_v27 = vpop.f32.mrb[17].mxu0 }
 0x83e   :  { %v11987_v40 = vadd.f32 %v9824_v27, %v18709_v21  ;;  %v9826_v29 = vpop.f32.mrb[18].mxu0  ;;  %10420 = vmatprep.mubr.bf16.mxu1 %v10142_v36 }
 0x83f   :  { %v11988_v6 = vadd.f32 %v9826_v29, %v18705_v48  ;;  %v9828_v62 = vpop.f32.mrb[19].mxu0  ;;  %10421 = vmatmul.mubr.bf16.gmra.mrb[128].mxu1 %v10141_v1  ;;  %v10049_v24 = vmax.f32 %v11986_v54, 0.0 }
 0x840   :  { %v11989_v34 = vadd.f32 %v9828_v62, %v18709_v21  ;;  %v10050_v12 = vmax.f32 %v11987_v40, 0.0 }
 0x841   :  { %v10051_v55 = vmax.f32 %v11988_v6, 0.0 }
 0x842   :  { %v10052_v2 = vmax.f32 %v11989_v34, 0.0 }
 0x843   :  { %v10143_v23 = vpack.c.bf16 %v10051_v55, %v10049_v24 }
 0x844   :  { %v10144_v53 = vpack.c.bf16 %v10052_v2, %v10050_v12  ;;  %v9832_v57 = vpop.f32.mrb[20].mxu0 }
 0x845   :  { %v11990_v8 = vadd.f32 %v9832_v57, %v18705_v48  ;;  %v9834_v38 = vpop.f32.mrb[21].mxu0 }
 0x846   :  { %v11991_v41 = vadd.f32 %v9834_v38, %v18709_v21  ;;  %v9836_v14 = vpop.f32.mrb[22].mxu0  ;;  %10428 = vmatprep.mubr.bf16.mxu1 %v10144_v53 }
 0x847   :  { %v11992_v58 = vadd.f32 %v9836_v14, %v18705_v48  ;;  %v9838_v9 = vpop.f32.mrb[23].mxu0  ;;  %10429 = vmatmul.mubr.bf16.gmra.mrb[132].mxu1 %v10143_v23  ;;  %v10053_v25 = vmax.f32 %v11990_v8, 0.0 }
 0x848   :  { %v11993_v28 = vadd.f32 %v9838_v9, %v18709_v21  ;;  %v10054_v17 = vmax.f32 %v11991_v41, 0.0 }
 0x849   :  { %v10055_v56 = vmax.f32 %v11992_v58, 0.0 }
 0x84a   :  { %v10056_v22 = vmax.f32 %v11993_v28, 0.0 }
 0x84b   :  { %v10145_v61 = vpack.c.bf16 %v10055_v56, %v10053_v25 }
 0x84c   :  { %v10146_v26 = vpack.c.bf16 %v10056_v22, %v10054_v17  ;;  %v9842_v35 = vpop.f32.mrb[24].mxu0 }
 0x84d   :  { %v11994_v50 = vadd.f32 %v9842_v35, %v18705_v48  ;;  %v9844_v33 = vpop.f32.mrb[25].mxu0 }
 0x84e   :  { %v11995_v43 = vadd.f32 %v9844_v33, %v18709_v21  ;;  %v9846_v32 = vpop.f32.mrb[26].mxu0  ;;  %10436 = vmatprep.mubr.bf16.mxu1 %v10146_v26 }
 0x84f   :  { %v11996_v52 = vadd.f32 %v9846_v32, %v18705_v48  ;;  %v9848_v18 = vpop.f32.mrb[27].mxu0  ;;  %10437 = vmatmul.mubr.bf16.gmra.mrb[136].mxu1 %v10145_v61  ;;  %v10057_v4 = vmax.f32 %v11994_v50, 0.0 }
 0x850   :  { %v11997_v0 = vadd.f32 %v9848_v18, %v18709_v21  ;;  %v10058_v19 = vmax.f32 %v11995_v43, 0.0 }
 0x851   :  { %v10059_v31 = vmax.f32 %v11996_v52, 0.0 }
 0x852   :  { %v10060_v7 = vmax.f32 %v11997_v0, 0.0 }
 0x853   :  { %v10147_v46 = vpack.c.bf16 %v10059_v31, %v10057_v4 }
 0x854   :  { %v10148_v59 = vpack.c.bf16 %v10060_v7, %v10058_v19  ;;  %v9852_v3 = vpop.f32.mrb[28].mxu0 }
 0x855   :  { %v11998_v5 = vadd.f32 %v9852_v3, %v18705_v48  ;;  %v9854_v11 = vpop.f32.mrb[29].mxu0 }
 0x856   :  { %v11999_v10 = vadd.f32 %v9854_v11, %v18709_v21  ;;  %v9856_v39 = vpop.f32.mrb[30].mxu0  ;;  %10444 = vmatprep.mubr.bf16.mxu1 %v10148_v59 }
 0x857   :  { %v12000_v15 = vadd.f32 %v9856_v39, %v18705_v48  ;;  %v9858_v16 = vpop.f32.mrb[31].mxu0  ;;  %10445 = vmatmul.mubr.bf16.gmra.mrb[140].mxu1 %v10147_v46  ;;  %v10061_v20 = vmax.f32 %v11998_v5, 0.0 }
 0x858   :  { %v12001_v51 = vadd.f32 %v9858_v16, %v18709_v21  ;;  %v10062_v30 = vmax.f32 %v11999_v10, 0.0 }
 0x859   :  { %v10063_v45 = vmax.f32 %v12000_v15, 0.0 }
 0x85a   :  { %v10064_v60 = vmax.f32 %v12001_v51, 0.0 }
 0x85b   :  { %v10149_v42 = vpack.c.bf16 %v10063_v45, %v10061_v20 }
 0x85c   :  { %v10150_v37 = vpack.c.bf16 %v10064_v60, %v10062_v30  ;;  %v9862_v44 = vpop.f32.mrb[32].mxu0 }
 0x85d   :  { %v12002_v63 = vadd.f32 %v9862_v44, %v18705_v48  ;;  %v9864_v49 = vpop.f32.mrb[33].mxu0 }
 0x85e   :  { %v12003_v47 = vadd.f32 %v9864_v49, %v18709_v21  ;;  %v9866_v1 = vpop.f32.mrb[34].mxu0  ;;  %10452 = vmatprep.mubr.bf16.mxu1 %v10150_v37 }
 0x85f   :  { %v12004_v36 = vadd.f32 %v9866_v1, %v18705_v48  ;;  %v9868_v13 = vpop.f32.mrb[35].mxu0  ;;  %10453 = vmatmul.mubr.bf16.gmra.mrb[144].mxu1 %v10149_v42  ;;  %v10065_v27 = vmax.f32 %v12002_v63, 0.0 }
 0x860   :  { %v12005_v54 = vadd.f32 %v9868_v13, %v18709_v21  ;;  %v10066_v29 = vmax.f32 %v12003_v47, 0.0 }
 0x861   :  { %v10067_v40 = vmax.f32 %v12004_v36, 0.0 }
 0x862   :  { %v10068_v6 = vmax.f32 %v12005_v54, 0.0 }
 0x863   :  { %v10151_v62 = vpack.c.bf16 %v10067_v40, %v10065_v27 }
 0x864   :  { %v10152_v34 = vpack.c.bf16 %v10068_v6, %v10066_v29  ;;  %v9872_v24 = vpop.f32.mrb[36].mxu0 }
 0x865   :  { %v12006_v55 = vadd.f32 %v9872_v24, %v18705_v48  ;;  %v9874_v12 = vpop.f32.mrb[37].mxu0 }
 0x866   :  { %v12007_v2 = vadd.f32 %v9874_v12, %v18709_v21  ;;  %v9876_v23 = vpop.f32.mrb[38].mxu0  ;;  %10460 = vmatprep.mubr.bf16.mxu1 %v10152_v34 }
 0x867   :  { %v12008_v53 = vadd.f32 %v9876_v23, %v18705_v48  ;;  %v9878_v57 = vpop.f32.mrb[39].mxu0  ;;  %10461 = vmatmul.mubr.bf16.gmra.mrb[148].mxu1 %v10151_v62  ;;  %v10069_v38 = vmax.f32 %v12006_v55, 0.0 }
 0x868   :  { %v12009_v8 = vadd.f32 %v9878_v57, %v18709_v21  ;;  %v10070_v14 = vmax.f32 %v12007_v2, 0.0 }
 0x869   :  { %v10071_v41 = vmax.f32 %v12008_v53, 0.0 }
 0x86a   :  { %v10072_v58 = vmax.f32 %v12009_v8, 0.0 }
 0x86b   :  { %v10153_v9 = vpack.c.bf16 %v10071_v41, %v10069_v38 }
 0x86c   :  { %v10154_v28 = vpack.c.bf16 %v10072_v58, %v10070_v14  ;;  %v9882_v25 = vpop.f32.mrb[40].mxu0 }
 0x86d   :  { %v12010_v56 = vadd.f32 %v9882_v25, %v18705_v48  ;;  %v9884_v17 = vpop.f32.mrb[41].mxu0 }
 0x86e   :  { %v12011_v22 = vadd.f32 %v9884_v17, %v18709_v21  ;;  %v9886_v61 = vpop.f32.mrb[42].mxu0  ;;  %10468 = vmatprep.mubr.bf16.mxu1 %v10154_v28 }
 0x86f   :  { %v12012_v26 = vadd.f32 %v9886_v61, %v18705_v48  ;;  %v9888_v35 = vpop.f32.mrb[43].mxu0  ;;  %10469 = vmatmul.mubr.bf16.gmra.mrb[152].mxu1 %v10153_v9  ;;  %v10073_v33 = vmax.f32 %v12010_v56, 0.0 }
 0x870   :  { %v12013_v50 = vadd.f32 %v9888_v35, %v18709_v21  ;;  %v10074_v32 = vmax.f32 %v12011_v22, 0.0 }
 0x871   :  { %v10075_v43 = vmax.f32 %v12012_v26, 0.0 }
 0x872   :  { %v10076_v52 = vmax.f32 %v12013_v50, 0.0 }
 0x873   :  { %v10155_v18 = vpack.c.bf16 %v10075_v43, %v10073_v33 }
 0x874   :  { %v10156_v0 = vpack.c.bf16 %v10076_v52, %v10074_v32  ;;  %v9892_v4 = vpop.f32.mrb[44].mxu0 }
 0x875   :  { %v12014_v31 = vadd.f32 %v9892_v4, %v18705_v48  ;;  %v9894_v19 = vpop.f32.mrb[45].mxu0 }
 0x876   :  { %v12015_v7 = vadd.f32 %v9894_v19, %v18709_v21  ;;  %v9896_v46 = vpop.f32.mrb[46].mxu0  ;;  %10476 = vmatprep.mubr.bf16.mxu1 %v10156_v0 }
 0x877   :  { %v12016_v59 = vadd.f32 %v9896_v46, %v18705_v48  ;;  %v9898_v3 = vpop.f32.mrb[47].mxu0  ;;  %10477 = vmatmul.mubr.bf16.gmra.mrb[156].mxu1 %v10155_v18  ;;  %v10077_v11 = vmax.f32 %v12014_v31, 0.0 }
 0x878   :  { %v12017_v5 = vadd.f32 %v9898_v3, %v18709_v21  ;;  %v10078_v39 = vmax.f32 %v12015_v7, 0.0 }
 0x879   :  { %v10079_v10 = vmax.f32 %v12016_v59, 0.0 }
 0x87a   :  { %v10080_v15 = vmax.f32 %v12017_v5, 0.0 }
 0x87b   :  { %v10157_v16 = vpack.c.bf16 %v10079_v10, %v10077_v11 }
 0x87c   :  { %v10158_v51 = vpack.c.bf16 %v10080_v15, %v10078_v39  ;;  %v9902_v20 = vpop.f32.mrb[48].mxu0 }
 0x87d   :  { %v12018_v45 = vadd.f32 %v9902_v20, %v18705_v48  ;;  %v9904_v30 = vpop.f32.mrb[49].mxu0 }
 0x87e   :  { %v12019_v60 = vadd.f32 %v9904_v30, %v18709_v21  ;;  %v9906_v42 = vpop.f32.mrb[50].mxu0  ;;  %10484 = vmatprep.mubr.bf16.mxu1 %v10158_v51 }
 0x87f   :  { %v12020_v37 = vadd.f32 %v9906_v42, %v18705_v48  ;;  %v9908_v44 = vpop.f32.mrb[51].mxu0  ;;  %10485 = vmatmul.mubr.bf16.gmra.mrb[160].mxu1 %v10157_v16  ;;  %v10081_v49 = vmax.f32 %v12018_v45, 0.0 }
 0x880   :  { %v12021_v63 = vadd.f32 %v9908_v44, %v18709_v21  ;;  %v10082_v1 = vmax.f32 %v12019_v60, 0.0 }
 0x881   :  { %v10083_v47 = vmax.f32 %v12020_v37, 0.0 }
 0x882   :  { %v10084_v36 = vmax.f32 %v12021_v63, 0.0 }
 0x883   :  { %v10159_v13 = vpack.c.bf16 %v10083_v47, %v10081_v49 }
 0x884   :  { %v10160_v54 = vpack.c.bf16 %v10084_v36, %v10082_v1  ;;  %v9912_v27 = vpop.f32.mrb[52].mxu0 }
 0x885   :  { %v12022_v40 = vadd.f32 %v9912_v27, %v18705_v48  ;;  %v9914_v29 = vpop.f32.mrb[53].mxu0 }
 0x886   :  { %v12023_v6 = vadd.f32 %v9914_v29, %v18709_v21  ;;  %v9916_v62 = vpop.f32.mrb[54].mxu0  ;;  %10492 = vmatprep.mubr.bf16.mxu1 %v10160_v54 }
 0x887   :  { %v12024_v34 = vadd.f32 %v9916_v62, %v18705_v48  ;;  %v9918_v24 = vpop.f32.mrb[55].mxu0  ;;  %10493 = vmatmul.mubr.bf16.gmra.mrb[164].mxu1 %v10159_v13  ;;  %v10085_v12 = vmax.f32 %v12022_v40, 0.0 }
 0x888   :  { %v12025_v55 = vadd.f32 %v9918_v24, %v18709_v21  ;;  %v10086_v23 = vmax.f32 %v12023_v6, 0.0 }
 0x889   :  { %v10087_v2 = vmax.f32 %v12024_v34, 0.0 }
 0x88a   :  { %v10088_v53 = vmax.f32 %v12025_v55, 0.0 }
 0x88b   :  { %v10161_v57 = vpack.c.bf16 %v10087_v2, %v10085_v12 }
 0x88c   :  { %v10162_v8 = vpack.c.bf16 %v10088_v53, %v10086_v23  ;;  %v9922_v38 = vpop.f32.mrb[56].mxu0 }
 0x88d   :  { %v12026_v41 = vadd.f32 %v9922_v38, %v18705_v48  ;;  %v9924_v14 = vpop.f32.mrb[57].mxu0 }
 0x88e   :  { %v12027_v58 = vadd.f32 %v9924_v14, %v18709_v21  ;;  %v9926_v9 = vpop.f32.mrb[58].mxu0  ;;  %10500 = vmatprep.mubr.bf16.mxu1 %v10162_v8 }
 0x88f   :  { %v12028_v28 = vadd.f32 %v9926_v9, %v18705_v48  ;;  %v9928_v25 = vpop.f32.mrb[59].mxu0  ;;  %10501 = vmatmul.mubr.bf16.gmra.mrb[168].mxu1 %v10161_v57  ;;  %v10089_v17 = vmax.f32 %v12026_v41, 0.0 }
 0x890   :  { %v12029_v56 = vadd.f32 %v9928_v25, %v18709_v21  ;;  %v10090_v61 = vmax.f32 %v12027_v58, 0.0 }
 0x891   :  { %v10091_v22 = vmax.f32 %v12028_v28, 0.0 }
 0x892   :  { %v10092_v26 = vmax.f32 %v12029_v56, 0.0 }
 0x893   :  { %v10163_v35 = vpack.c.bf16 %v10091_v22, %v10089_v17 }
 0x894   :  { %v10164_v50 = vpack.c.bf16 %v10092_v26, %v10090_v61  ;;  %v9932_v33 = vpop.f32.mrb[60].mxu0 }
 0x895   :  { %v12030_v43 = vadd.f32 %v9932_v33, %v18705_v48  ;;  %v9934_v32 = vpop.f32.mrb[61].mxu0 }
 0x896   :  { %v12031_v52 = vadd.f32 %v9934_v32, %v18709_v21  ;;  %v9936_v18 = vpop.f32.mrb[62].mxu0  ;;  %10508 = vmatprep.mubr.bf16.mxu1 %v10164_v50 }
 0x897   :  { %v12032_v0 = vadd.f32 %v9936_v18, %v18705_v48  ;;  %v9938_v4 = vpop.f32.mrb[63].mxu0  ;;  %10509 = vmatmul.mubr.bf16.gmra.mrb[172].mxu1 %v10163_v35  ;;  %v10093_v19 = vmax.f32 %v12030_v43, 0.0 }
 0x898   :  { %v12033_v31 = vadd.f32 %v9938_v4, %v18709_v21  ;;  %v10094_v46 = vmax.f32 %v12031_v52, 0.0 }
 0x899   :  { %v10095_v7 = vmax.f32 %v12032_v0, 0.0 }
 0x89a   :  { %v10096_v59 = vmax.f32 %v12033_v31, 0.0 }
 0x89b   :  { %v10165_v3 = vpack.c.bf16 %v10095_v7, %v10093_v19 }
 0x89c   :  { %v10166_v5 = vpack.c.bf16 %v10096_v59, %v10094_v46  ;;  %v9942_v11 = vpop.f32.mrb[64].mxu0 }
 0x89d   :  { %v12034_v10 = vadd.f32 %v9942_v11, %v18705_v48  ;;  %v9944_v39 = vpop.f32.mrb[65].mxu0 }
 0x89e   :  { %v12035_v15 = vadd.f32 %v9944_v39, %v18709_v21  ;;  %v9946_v16 = vpop.f32.mrb[66].mxu0  ;;  %10516 = vmatprep.mubr.bf16.mxu1 %v10166_v5 }
 0x89f   :  { %v12036_v51 = vadd.f32 %v9946_v16, %v18705_v48  ;;  %v9948_v20 = vpop.f32.mrb[67].mxu0  ;;  %10517 = vmatmul.mubr.bf16.gmra.mrb[176].mxu1 %v10165_v3  ;;  %v10097_v30 = vmax.f32 %v12034_v10, 0.0 }
 0x8a0   :  { %v12037_v45 = vadd.f32 %v9948_v20, %v18709_v21  ;;  %v10098_v42 = vmax.f32 %v12035_v15, 0.0 }
 0x8a1   :  { %v10099_v60 = vmax.f32 %v12036_v51, 0.0 }
 0x8a2   :  { %v10100_v37 = vmax.f32 %v12037_v45, 0.0 }
 0x8a3   :  { %v10167_v44 = vpack.c.bf16 %v10099_v60, %v10097_v30 }
 0x8a4   :  { %v10168_v63 = vpack.c.bf16 %v10100_v37, %v10098_v42  ;;  %v9952_v49 = vpop.f32.mrb[68].mxu0 }
 0x8a5   :  { %v12038_v47 = vadd.f32 %v9952_v49, %v18705_v48  ;;  %v9954_v1 = vpop.f32.mrb[69].mxu0 }
 0x8a6   :  { %v12039_v36 = vadd.f32 %v9954_v1, %v18709_v21  ;;  %v9956_v13 = vpop.f32.mrb[70].mxu0  ;;  %10524 = vmatprep.mubr.bf16.mxu1 %v10168_v63  ;;  %v18827_v1 = vld [vmem:[%s19065_s6] ss:$0 sm:$0xff] }
 0x8a7   :  { %v12040_v54 = vadd.f32 %v9956_v13, %v18705_v48  ;;  %v9958_v27 = vpop.f32.mrb[71].mxu0  ;;  %10525 = vmatmul.mubr.bf16.gmra.mrb[180].mxu1 %v10167_v44  ;;  %v10101_v29 = vmax.f32 %v12038_v47, 0.0 }
 0x8a8   :  { %v12041_v40 = vadd.f32 %v9958_v27, %v18709_v21  ;;  %v10102_v62 = vmax.f32 %v12039_v36, 0.0 }
 0x8a9   :  { %v10103_v6 = vmax.f32 %v12040_v54, 0.0 }
 0x8aa   :  { %v10104_v34 = vmax.f32 %v12041_v40, 0.0 }
 0x8ab   :  { %v10169_v24 = vpack.c.bf16 %v10103_v6, %v10101_v29 }
 0x8ac   :  { %v10170_v55 = vpack.c.bf16 %v10104_v34, %v10102_v62  ;;  %v9962_v12 = vpop.f32.mrb[72].mxu0 }
 0x8ad   :  { %v12042_v2 = vadd.f32 %v9962_v12, %v18705_v48  ;;  %v9964_v23 = vpop.f32.mrb[73].mxu0 }
 0x8ae   :  { %v12043_v53 = vadd.f32 %v9964_v23, %v18709_v21  ;;  %v9966_v57 = vpop.f32.mrb[74].mxu0  ;;  %10532 = vmatprep.mubr.bf16.mxu1 %v10170_v55 }
 0x8af   :  { %v12044_v8 = vadd.f32 %v9966_v57, %v18705_v48  ;;  %v9968_v38 = vpop.f32.mrb[75].mxu0  ;;  %10533 = vmatmul.mubr.bf16.gmra.mrb[184].mxu1 %v10169_v24  ;;  %v10105_v14 = vmax.f32 %v12042_v2, 0.0 }
 0x8b0   :  { %v12045_v41 = vadd.f32 %v9968_v38, %v18709_v21  ;;  %v10106_v9 = vmax.f32 %v12043_v53, 0.0 }
 0x8b1   :  { %v10107_v58 = vmax.f32 %v12044_v8, 0.0 }
 0x8b2   :  { %v10108_v28 = vmax.f32 %v12045_v41, 0.0 }
 0x8b3   :  { %v10171_v25 = vpack.c.bf16 %v10107_v58, %v10105_v14 }
 0x8b4   :  { %v10172_v56 = vpack.c.bf16 %v10108_v28, %v10106_v9  ;;  %v9972_v17 = vpop.f32.mrb[76].mxu0 }
 0x8b5   :  { %v12046_v22 = vadd.f32 %v9972_v17, %v18705_v48  ;;  %v9974_v61 = vpop.f32.mrb[77].mxu0 }
 0x8b6   :  { %v12047_v26 = vadd.f32 %v9974_v61, %v18709_v21  ;;  %v9976_v35 = vpop.f32.mrb[78].mxu0  ;;  %10540 = vmatprep.mubr.bf16.mxu1 %v10172_v56 }
 0x8b7   :  { %v12048_v50 = vadd.f32 %v9976_v35, %v18705_v48  ;;  %v9978_v33 = vpop.f32.mrb[79].mxu0  ;;  %10541 = vmatmul.mubr.bf16.gmra.mrb[188].mxu1 %v10171_v25  ;;  %v10109_v32 = vmax.f32 %v12046_v22, 0.0 }
 0x8b8   :  { %v12049_v43 = vadd.f32 %v9978_v33, %v18709_v21  ;;  %v10110_v18 = vmax.f32 %v12047_v26, 0.0 }
 0x8b9   :  { %v10111_v52 = vmax.f32 %v12048_v50, 0.0 }
 0x8ba   :  { %v10112_v0 = vmax.f32 %v12049_v43, 0.0 }
 0x8bb   :  { %v10173_v4 = vpack.c.bf16 %v10111_v52, %v10109_v32 }
 0x8bc   :  { %v10174_v31 = vpack.c.bf16 %v10112_v0, %v10110_v18  ;;  %v9982_v19 = vpop.f32.mrb[80].mxu0 }
 0x8bd   :  { %v12050_v7 = vadd.f32 %v9982_v19, %v18705_v48  ;;  %v9984_v46 = vpop.f32.mrb[81].mxu0 }
 0x8be   :  { %v12051_v59 = vadd.f32 %v9984_v46, %v18709_v21  ;;  %v9986_v3 = vpop.f32.mrb[82].mxu0  ;;  %10548 = vmatprep.mubr.bf16.mxu1 %v10174_v31 }
 0x8bf   :  { %v12052_v5 = vadd.f32 %v9986_v3, %v18705_v48  ;;  %v9988_v11 = vpop.f32.mrb[83].mxu0  ;;  %10549 = vmatmul.mubr.bf16.gmra.mrb[192].mxu1 %v10173_v4  ;;  %v10113_v39 = vmax.f32 %v12050_v7, 0.0 }
 0x8c0   :  { %v12053_v10 = vadd.f32 %v9988_v11, %v18709_v21  ;;  %v10114_v16 = vmax.f32 %v12051_v59, 0.0 }
 0x8c1   :  { %v10115_v15 = vmax.f32 %v12052_v5, 0.0 }
 0x8c2   :  { %v10116_v51 = vmax.f32 %v12053_v10, 0.0 }
 0x8c3   :  { %v10175_v20 = vpack.c.bf16 %v10115_v15, %v10113_v39 }
 0x8c4   :  { %v10176_v45 = vpack.c.bf16 %v10116_v51, %v10114_v16  ;;  %v9992_v30 = vpop.f32.mrb[84].mxu0 }
 0x8c5   :  { %v12054_v60 = vadd.f32 %v9992_v30, %v18705_v48  ;;  %v9994_v42 = vpop.f32.mrb[85].mxu0 }
 0x8c6   :  { %v12055_v37 = vadd.f32 %v9994_v42, %v18709_v21  ;;  %v9996_v44 = vpop.f32.mrb[86].mxu0  ;;  %10556 = vmatprep.mubr.bf16.mxu1 %v10176_v45 }
 0x8c7   :  { %v12056_v63 = vadd.f32 %v9996_v44, %v18705_v48  ;;  %v9998_v49 = vpop.f32.mrb[87].mxu0  ;;  %10557 = vmatmul.mubr.bf16.gmra.mrb[196].mxu1 %v10175_v20  ;;  %v10117_v36 = vmax.f32 %v12054_v60, 0.0 }
 0x8c8   :  { %v12057_v47 = vadd.f32 %v9998_v49, %v18709_v21  ;;  %v10118_v54 = vmax.f32 %v12055_v37, 0.0 }
 0x8c9   :  { %v10119_v13 = vmax.f32 %v12056_v63, 0.0 }
 0x8ca   :  { %v10120_v27 = vmax.f32 %v12057_v47, 0.0  ;;  %v10350_v40 = vpop.f32.mrb[92].mxu1 }
 0x8cb   :  { %v10177_v29 = vpack.c.bf16 %v10119_v13, %v10117_v36  ;;  %v10351_v6 = vadd.f32 %v18827_v1, %v10350_v40  ;;  %v10352_v62 = vpop.f32.mrb[93].mxu1 }
 0x8cc   :  { %v10178_v34 = vpack.c.bf16 %v10120_v27, %v10118_v54  ;;  %v10002_v24 = vpop.f32.mrb[88].mxu0  ;;  %v10353_v55 = vpop.f32.mrb[94].mxu1 }
 0x8cd   :  { %10580 = vst [vmem:[%s19066_s7] sm:$0xff] %v10351_v6  ;;  %v12058_v12 = vadd.f32 %v10002_v24, %v18705_v48  ;;  %v10354_v2 = vadd.f32 %v18827_v1, %v10353_v55  ;;  %v10004_v23 = vpop.f32.mrb[89].mxu0  ;;  %v10355_v53 = vpop.f32.mrb[95].mxu1 }
 0x8ce   :  { %v12059_v57 = vadd.f32 %v10004_v23, %v18709_v21  ;;  %v10006_v8 = vpop.f32.mrb[90].mxu0  ;;  %10564 = vmatprep.mubr.bf16.mxu1 %v10178_v34 }
 0x8cf   :  { %10581 = vst [vmem:[%s19066_s7 + $0x8] sm:$0xff] %v10354_v2  ;;  %v10007_v38 = vpop.f32.mrb[91].mxu0  ;;  %10565 = vmatmul.mubr.bf16.gmra.mrb[200].mxu1 %v10177_v29  ;;  %v10121_v14 = vmax.f32 %v12058_v12, 0.0 }
 0x8d0   :  { %v10122_v41 = vmax.f32 %v12059_v57, 0.0 }
 0x8d1   :  { %v10179_v56 = vpack.c.bf16 %v10121_v14, %v10121_v14 }
 0x8d2   :  { %v10180_v58 = vpack.c.bf16 %v10122_v41, %v10122_v41  ;;  %v10358_v9 = vpop.f32.mrb[96].mxu1 }
 0x8d3   :  { %v10359_v48 = vadd.f32 %v18827_v1, %v10358_v9  ;;  %v10360_v28 = vpop.f32.mrb[97].mxu1 }
 0x8d4   :  { %v10361_v25 = vpop.f32.mrb[98].mxu1  ;;  %10572 = vmatprep.mubr.bf16.mxu1 %v10180_v58 }
 0x8d5   :  { %10582 = vst [vmem:[%s19066_s7 + $0x10] sm:$0xff] %v10359_v48  ;;  %v10362_v21 = vadd.f32 %v18827_v1, %v10361_v25  ;;  %v10363_v17 = vpop.f32.mrb[99].mxu1 }
 0x8d7   :  { %10583 = vst [vmem:[%s19066_s7 + $0x18] sm:$0xff] %v10362_v21  ;;  %10573 = vmatmul.mubr.bf16.gmra.mrb[204].mxu1 %v10179_v56 }
 0x8da   :  { %v10366_v22 = vpop.f32.mrb[100].mxu1 }
 0x8db   :  { %v10367_v61 = vadd.f32 %v18827_v1, %v10366_v22  ;;  %v10368_v26 = vpop.f32.mrb[101].mxu1 }
 0x8dc   :  { %v10369_v35 = vpop.f32.mrb[102].mxu1 }
 0x8dd   :  { %10584 = vst [vmem:[%s19066_s7 + $0x20] sm:$0xff] %v10367_v61  ;;  %v10370_v50 = vadd.f32 %v18827_v1, %v10369_v35  ;;  %v10371_v33 = vpop.f32.mrb[103].mxu1 }
 0x8df   :  { %10585 = vst [vmem:[%s19066_s7 + $0x28] sm:$0xff] %v10370_v50 }
 0x8e2   :  { %v10374_v43 = vpop.f32.mrb[104].mxu1 }
 0x8e3   :  { %v10375_v32 = vadd.f32 %v18827_v1, %v10374_v43  ;;  %v10376_v52 = vpop.f32.mrb[105].mxu1 }
 0x8e4   :  { %v10377_v18 = vpop.f32.mrb[106].mxu1 }
 0x8e5   :  { %10586 = vst [vmem:[%s19066_s7 + $0x30] sm:$0xff] %v10375_v32  ;;  %v10378_v0 = vadd.f32 %v18827_v1, %v10377_v18  ;;  %v10379_v4 = vpop.f32.mrb[107].mxu1 }
 0x8e7   :  { %10587 = vst [vmem:[%s19066_s7 + $0x38] sm:$0xff] %v10378_v0 }
 0x8ea   :  { %v10382_v31 = vpop.f32.mrb[108].mxu1 }
 0x8eb   :  { %v10383_v19 = vadd.f32 %v18827_v1, %v10382_v31  ;;  %v10384_v7 = vpop.f32.mrb[109].mxu1 }
 0x8ec   :  { %v10385_v46 = vpop.f32.mrb[110].mxu1 }
 0x8ed   :  { %10588 = vst [vmem:[%s19066_s7 + $0x40] sm:$0xff] %v10383_v19  ;;  %v10386_v59 = vadd.f32 %v18827_v1, %v10385_v46  ;;  %v10387_v3 = vpop.f32.mrb[111].mxu1 }
 0x8ef   :  { %10589 = vst [vmem:[%s19066_s7 + $0x48] sm:$0xff] %v10386_v59 }
 0x8f2   :  { %v10390_v5 = vpop.f32.mrb[112].mxu1 }
 0x8f3   :  { %v10391_v11 = vadd.f32 %v18827_v1, %v10390_v5  ;;  %v10392_v10 = vpop.f32.mrb[113].mxu1 }
 0x8f4   :  { %v10393_v39 = vpop.f32.mrb[114].mxu1 }
 0x8f5   :  { %10590 = vst [vmem:[%s19066_s7 + $0x50] sm:$0xff] %v10391_v11  ;;  %v10394_v15 = vadd.f32 %v18827_v1, %v10393_v39  ;;  %v10395_v16 = vpop.f32.mrb[115].mxu1 }
 0x8f7   :  { %10591 = vst [vmem:[%s19066_s7 + $0x58] sm:$0xff] %v10394_v15 }
 0x8fa   :  { %v10398_v51 = vpop.f32.mrb[116].mxu1 }
 0x8fb   :  { %v10399_v20 = vadd.f32 %v18827_v1, %v10398_v51  ;;  %v10400_v45 = vpop.f32.mrb[117].mxu1 }
 0x8fc   :  { %v10401_v30 = vpop.f32.mrb[118].mxu1 }
 0x8fd   :  { %10592 = vst [vmem:[%s19066_s7 + $0x60] sm:$0xff] %v10399_v20  ;;  %v10402_v60 = vadd.f32 %v18827_v1, %v10401_v30  ;;  %v10403_v42 = vpop.f32.mrb[119].mxu1 }
 0x8ff   :  { %10593 = vst [vmem:[%s19066_s7 + $0x68] sm:$0xff] %v10402_v60 }
 0x902   :  { %v10406_v37 = vpop.f32.mrb[120].mxu1 }
 0x903   :  { %v10407_v44 = vadd.f32 %v18827_v1, %v10406_v37  ;;  %v10408_v63 = vpop.f32.mrb[121].mxu1 }
 0x904   :  { %v10409_v49 = vpop.f32.mrb[122].mxu1 }
 0x905   :  { %10594 = vst [vmem:[%s19066_s7 + $0x70] sm:$0xff] %v10407_v44  ;;  %v10410_v47 = vadd.f32 %v18827_v1, %v10409_v49  ;;  %v10411_v36 = vpop.f32.mrb[123].mxu1 }
 0x907   :  { %10595 = vst [vmem:[%s19066_s7 + $0x78] sm:$0xff] %v10410_v47 }
 0x90a   :  { %v10414_v13 = vpop.f32.mrb[124].mxu1 }
 0x90b   :  { %v10415_v54 = vadd.f32 %v18827_v1, %v10414_v13  ;;  %v10416_v27 = vpop.f32.mrb[125].mxu1 }
 0x90c   :  { %v10417_v40 = vpop.f32.mrb[126].mxu1 }
 0x90d   :  { %10596 = vst [vmem:[%s19066_s7 + $0x80] sm:$0xff] %v10415_v54  ;;  %v10418_v29 = vadd.f32 %v18827_v1, %v10417_v40  ;;  %v10419_v6 = vpop.f32.mrb[127].mxu1 }
 0x90f   :  { %10597 = vst [vmem:[%s19066_s7 + $0x88] sm:$0xff] %v10418_v29 }
 0x912   :  { %v10422_v62 = vpop.f32.mrb[128].mxu1 }
 0x913   :  { %v10423_v34 = vadd.f32 %v18827_v1, %v10422_v62  ;;  %v10424_v24 = vpop.f32.mrb[129].mxu1 }
 0x914   :  { %v10425_v55 = vpop.f32.mrb[130].mxu1 }
 0x915   :  { %10598 = vst [vmem:[%s19066_s7 + $0x90] sm:$0xff] %v10423_v34  ;;  %v10426_v12 = vadd.f32 %v18827_v1, %v10425_v55  ;;  %v10427_v2 = vpop.f32.mrb[131].mxu1 }
 0x917   :  { %10599 = vst [vmem:[%s19066_s7 + $0x98] sm:$0xff] %v10426_v12 }
 0x91a   :  { %v10430_v23 = vpop.f32.mrb[132].mxu1 }
 0x91b   :  { %v10431_v53 = vadd.f32 %v18827_v1, %v10430_v23  ;;  %v10432_v57 = vpop.f32.mrb[133].mxu1 }
 0x91c   :  { %v10433_v8 = vpop.f32.mrb[134].mxu1 }
 0x91d   :  { %10600 = vst [vmem:[%s19066_s7 + $0xa0] sm:$0xff] %v10431_v53  ;;  %v10434_v38 = vadd.f32 %v18827_v1, %v10433_v8  ;;  %v10435_v41 = vpop.f32.mrb[135].mxu1 }
 0x91f   :  { %10601 = vst [vmem:[%s19066_s7 + $0xa8] sm:$0xff] %v10434_v38 }
 0x922   :  { %v10438_v14 = vpop.f32.mrb[136].mxu1 }
 0x923   :  { %v10439_v58 = vadd.f32 %v18827_v1, %v10438_v14  ;;  %v10440_v9 = vpop.f32.mrb[137].mxu1 }
 0x924   :  { %v10441_v48 = vpop.f32.mrb[138].mxu1 }
 0x925   :  { %10602 = vst [vmem:[%s19066_s7 + $0xb0] sm:$0xff] %v10439_v58  ;;  %v10442_v28 = vadd.f32 %v18827_v1, %v10441_v48  ;;  %v10443_v25 = vpop.f32.mrb[139].mxu1 }
 0x927   :  { %10603 = vst [vmem:[%s19066_s7 + $0xb8] sm:$0xff] %v10442_v28 }
 0x92a   :  { %v10446_v56 = vpop.f32.mrb[140].mxu1 }
 0x92b   :  { %v10447_v21 = vadd.f32 %v18827_v1, %v10446_v56  ;;  %v10448_v17 = vpop.f32.mrb[141].mxu1 }
 0x92c   :  { %v10449_v22 = vpop.f32.mrb[142].mxu1 }
 0x92d   :  { %10604 = vst [vmem:[%s19066_s7 + $0xc0] sm:$0xff] %v10447_v21  ;;  %v10450_v61 = vadd.f32 %v18827_v1, %v10449_v22  ;;  %v10451_v26 = vpop.f32.mrb[143].mxu1 }
 0x92f   :  { %10605 = vst [vmem:[%s19066_s7 + $0xc8] sm:$0xff] %v10450_v61 }
 0x932   :  { %v10454_v35 = vpop.f32.mrb[144].mxu1 }
 0x933   :  { %v10455_v50 = vadd.f32 %v18827_v1, %v10454_v35  ;;  %v10456_v33 = vpop.f32.mrb[145].mxu1 }
 0x934   :  { %v10457_v43 = vpop.f32.mrb[146].mxu1 }
 0x935   :  { %10606 = vst [vmem:[%s19066_s7 + $0xd0] sm:$0xff] %v10455_v50  ;;  %v10458_v32 = vadd.f32 %v18827_v1, %v10457_v43  ;;  %v10459_v52 = vpop.f32.mrb[147].mxu1 }
 0x937   :  { %10607 = vst [vmem:[%s19066_s7 + $0xd8] sm:$0xff] %v10458_v32 }
 0x93a   :  { %v10462_v18 = vpop.f32.mrb[148].mxu1 }
 0x93b   :  { %v10463_v0 = vadd.f32 %v18827_v1, %v10462_v18  ;;  %v10464_v4 = vpop.f32.mrb[149].mxu1 }
 0x93c   :  { %v10465_v31 = vpop.f32.mrb[150].mxu1 }
 0x93d   :  { %10608 = vst [vmem:[%s19066_s7 + $0xe0] sm:$0xff] %v10463_v0  ;;  %v10466_v19 = vadd.f32 %v18827_v1, %v10465_v31  ;;  %v10467_v7 = vpop.f32.mrb[151].mxu1 }
 0x93f   :  { %10609 = vst [vmem:[%s19066_s7 + $0xe8] sm:$0xff] %v10466_v19 }
 0x942   :  { %v10470_v46 = vpop.f32.mrb[152].mxu1 }
 0x943   :  { %v10471_v59 = vadd.f32 %v18827_v1, %v10470_v46  ;;  %v10472_v3 = vpop.f32.mrb[153].mxu1 }
 0x944   :  { %v10473_v5 = vpop.f32.mrb[154].mxu1 }
 0x945   :  { %10610 = vst [vmem:[%s19066_s7 + $0xf0] sm:$0xff] %v10471_v59  ;;  %v10474_v11 = vadd.f32 %v18827_v1, %v10473_v5  ;;  %v10475_v10 = vpop.f32.mrb[155].mxu1 }
 0x947   :  { %10611 = vst [vmem:[%s19066_s7 + $0xf8] sm:$0xff] %v10474_v11 }
 0x94a   :  { %v10478_v39 = vpop.f32.mrb[156].mxu1 }
 0x94b   :  { %v10479_v15 = vadd.f32 %v18827_v1, %v10478_v39  ;;  %v10480_v16 = vpop.f32.mrb[157].mxu1 }
 0x94c   :  { %v10481_v51 = vpop.f32.mrb[158].mxu1 }
 0x94d   :  { %10612 = vst [vmem:[%s19066_s7 + $0x100] sm:$0xff] %v10479_v15  ;;  %v10482_v20 = vadd.f32 %v18827_v1, %v10481_v51  ;;  %v10483_v45 = vpop.f32.mrb[159].mxu1 }
 0x94f   :  { %10613 = vst [vmem:[%s19066_s7 + $0x108] sm:$0xff] %v10482_v20 }
 0x952   :  { %v10486_v30 = vpop.f32.mrb[160].mxu1 }
 0x953   :  { %v10487_v60 = vadd.f32 %v18827_v1, %v10486_v30  ;;  %v10488_v42 = vpop.f32.mrb[161].mxu1 }
 0x954   :  { %v10489_v37 = vpop.f32.mrb[162].mxu1 }
 0x955   :  { %10614 = vst [vmem:[%s19066_s7 + $0x110] sm:$0xff] %v10487_v60  ;;  %v10490_v44 = vadd.f32 %v18827_v1, %v10489_v37  ;;  %v10491_v63 = vpop.f32.mrb[163].mxu1 }
 0x957   :  { %10615 = vst [vmem:[%s19066_s7 + $0x118] sm:$0xff] %v10490_v44 }
 0x95a   :  { %v10494_v49 = vpop.f32.mrb[164].mxu1 }
 0x95b   :  { %v10495_v47 = vadd.f32 %v18827_v1, %v10494_v49  ;;  %v10496_v36 = vpop.f32.mrb[165].mxu1 }
 0x95c   :  { %v10497_v13 = vpop.f32.mrb[166].mxu1 }
 0x95d   :  { %10616 = vst [vmem:[%s19066_s7 + $0x120] sm:$0xff] %v10495_v47  ;;  %v10498_v54 = vadd.f32 %v18827_v1, %v10497_v13  ;;  %v10499_v27 = vpop.f32.mrb[167].mxu1 }
 0x95f   :  { %10617 = vst [vmem:[%s19066_s7 + $0x128] sm:$0xff] %v10498_v54 }
 0x962   :  { %v10502_v40 = vpop.f32.mrb[168].mxu1 }
 0x963   :  { %v10503_v29 = vadd.f32 %v18827_v1, %v10502_v40  ;;  %v10504_v6 = vpop.f32.mrb[169].mxu1 }
 0x964   :  { %v10505_v62 = vpop.f32.mrb[170].mxu1 }
 0x965   :  { %10618 = vst [vmem:[%s19066_s7 + $0x130] sm:$0xff] %v10503_v29  ;;  %v10506_v34 = vadd.f32 %v18827_v1, %v10505_v62  ;;  %v10507_v24 = vpop.f32.mrb[171].mxu1 }
 0x967   :  { %10619 = vst [vmem:[%s19066_s7 + $0x138] sm:$0xff] %v10506_v34 }
 0x96a   :  { %v10510_v55 = vpop.f32.mrb[172].mxu1 }
 0x96b   :  { %v10511_v12 = vadd.f32 %v18827_v1, %v10510_v55  ;;  %v10512_v2 = vpop.f32.mrb[173].mxu1 }
 0x96c   :  { %v10513_v23 = vpop.f32.mrb[174].mxu1 }
 0x96d   :  { %10620 = vst [vmem:[%s19066_s7 + $0x140] sm:$0xff] %v10511_v12  ;;  %v10514_v53 = vadd.f32 %v18827_v1, %v10513_v23  ;;  %v10515_v57 = vpop.f32.mrb[175].mxu1 }
 0x96f   :  { %10621 = vst [vmem:[%s19066_s7 + $0x148] sm:$0xff] %v10514_v53 }
 0x972   :  { %v10518_v8 = vpop.f32.mrb[176].mxu1 }
 0x973   :  { %v10519_v38 = vadd.f32 %v18827_v1, %v10518_v8  ;;  %v10520_v41 = vpop.f32.mrb[177].mxu1 }
 0x974   :  { %v10521_v14 = vpop.f32.mrb[178].mxu1 }
 0x975   :  { %10622 = vst [vmem:[%s19066_s7 + $0x150] sm:$0xff] %v10519_v38  ;;  %v10522_v58 = vadd.f32 %v18827_v1, %v10521_v14  ;;  %v10523_v9 = vpop.f32.mrb[179].mxu1 }
 0x977   :  { %10623 = vst [vmem:[%s19066_s7 + $0x158] sm:$0xff] %v10522_v58 }
 0x97a   :  { %v10526_v48 = vpop.f32.mrb[180].mxu1 }
 0x97b   :  { %v10527_v28 = vadd.f32 %v18827_v1, %v10526_v48  ;;  %v10528_v25 = vpop.f32.mrb[181].mxu1 }
 0x97c   :  { %v10529_v56 = vpop.f32.mrb[182].mxu1 }
 0x97d   :  { %10624 = vst [vmem:[%s19066_s7 + $0x160] sm:$0xff] %v10527_v28  ;;  %v10530_v21 = vadd.f32 %v18827_v1, %v10529_v56  ;;  %v10531_v17 = vpop.f32.mrb[183].mxu1 }
 0x97f   :  { %10625 = vst [vmem:[%s19066_s7 + $0x168] sm:$0xff] %v10530_v21 }
 0x982   :  { %v10534_v22 = vpop.f32.mrb[184].mxu1 }
 0x983   :  { %v10535_v61 = vadd.f32 %v18827_v1, %v10534_v22  ;;  %v10536_v26 = vpop.f32.mrb[185].mxu1 }
 0x984   :  { %v10537_v35 = vpop.f32.mrb[186].mxu1 }
 0x985   :  { %10626 = vst [vmem:[%s19066_s7 + $0x170] sm:$0xff] %v10535_v61  ;;  %v10538_v50 = vadd.f32 %v18827_v1, %v10537_v35  ;;  %v10539_v33 = vpop.f32.mrb[187].mxu1 }
 0x987   :  { %10627 = vst [vmem:[%s19066_s7 + $0x178] sm:$0xff] %v10538_v50 }
 0x98a   :  { %v10542_v43 = vpop.f32.mrb[188].mxu1 }
 0x98b   :  { %v10543_v32 = vadd.f32 %v18827_v1, %v10542_v43  ;;  %v10544_v52 = vpop.f32.mrb[189].mxu1 }
 0x98c   :  { %v10545_v18 = vpop.f32.mrb[190].mxu1 }
 0x98d   :  { %10628 = vst [vmem:[%s19066_s7 + $0x180] sm:$0xff] %v10543_v32  ;;  %v10546_v0 = vadd.f32 %v18827_v1, %v10545_v18  ;;  %v10547_v4 = vpop.f32.mrb[191].mxu1 }
 0x98f   :  { %10629 = vst [vmem:[%s19066_s7 + $0x188] sm:$0xff] %v10546_v0 }
 0x992   :  { %v10550_v31 = vpop.f32.mrb[192].mxu1 }
 0x993   :  { %v10551_v19 = vadd.f32 %v18827_v1, %v10550_v31  ;;  %v10552_v7 = vpop.f32.mrb[193].mxu1 }
 0x994   :  { %v10553_v46 = vpop.f32.mrb[194].mxu1 }
 0x995   :  { %10630 = vst [vmem:[%s19066_s7 + $0x190] sm:$0xff] %v10551_v19  ;;  %v10554_v59 = vadd.f32 %v18827_v1, %v10553_v46  ;;  %v10555_v3 = vpop.f32.mrb[195].mxu1 }
 0x997   :  { %10631 = vst [vmem:[%s19066_s7 + $0x198] sm:$0xff] %v10554_v59 }
 0x99a   :  { %v10558_v5 = vpop.f32.mrb[196].mxu1 }
 0x99b   :  { %v10559_v11 = vadd.f32 %v18827_v1, %v10558_v5  ;;  %v10560_v10 = vpop.f32.mrb[197].mxu1 }
 0x99c   :  { %v10561_v39 = vpop.f32.mrb[198].mxu1 }
 0x99d   :  { %10632 = vst [vmem:[%s19066_s7 + $0x1a0] sm:$0xff] %v10559_v11  ;;  %v10562_v15 = vadd.f32 %v18827_v1, %v10561_v39  ;;  %v10563_v16 = vpop.f32.mrb[199].mxu1 }
 0x99f   :  { %10633 = vst [vmem:[%s19066_s7 + $0x1a8] sm:$0xff] %v10562_v15 }
 0x9a2   :  { %v10566_v51 = vpop.f32.mrb[200].mxu1 }
 0x9a3   :  { %v10567_v20 = vadd.f32 %v18827_v1, %v10566_v51  ;;  %v10568_v45 = vpop.f32.mrb[201].mxu1 }
 0x9a4   :  { %v10569_v30 = vpop.f32.mrb[202].mxu1 }
 0x9a5   :  { %10634 = vst [vmem:[%s19066_s7 + $0x1b0] sm:$0xff] %v10567_v20  ;;  %v10570_v60 = vadd.f32 %v18827_v1, %v10569_v30  ;;  %v10571_v42 = vpop.f32.mrb[203].mxu1 }
 0x9a7   :  { %10635 = vst [vmem:[%s19066_s7 + $0x1b8] sm:$0xff] %v10570_v60 }
 0x9aa   :  { %v10574_v37 = vpop.f32.mrb[204].mxu1 }
 0x9ab   :  { %v10575_v44 = vadd.f32 %v18827_v1, %v10574_v37  ;;  %v10576_v63 = vpop.f32.mrb[205].mxu1 }
 0x9ac   :  { %v10577_v49 = vpop.f32.mrb[206].mxu1 }
 0x9ad   :  { %10636 = vst [vmem:[%s19066_s7 + $0x1c0] sm:$0xff] %v10575_v44  ;;  %v10578_v47 = vpop.f32.mrb[207].mxu1 }

</bundles_post_ra>
